<compile_context>
chip_gen: v7x
topology: tpu7x:2x2x1
jax: 0.10.0
libtpu: 0.0.40
codegen_flags: <defaults>
</compile_context>

<pallas_src>
import jax
import jax.numpy as jnp
from jax.experimental import pallas as pl
from jax.experimental.pallas import tpu as pltpu


# ---------------------------------------------------------------------------
# In-kernel helpers
# ---------------------------------------------------------------------------
def _leaky_relu(x, slope=0.2):
    return jnp.where(x > 0, x, slope * x)


def _store_padded(pad_ref, interior_f32):
    """Write a (Hi, Wi, C) f32 activation into a (Hi+2, Wi+2, C) bf16 padded scratch ref,
    zero-filling the 1-pixel halo.  Every element is written exactly once and the interior
    rows are full-width dense stores (no full-buffer pre-zeroing, no masked column writes).
    """
    Hi, Wi, C = interior_f32.shape
    dt = pad_ref.dtype
    zc = jnp.zeros((Hi, 1, C), jnp.float32)
    rows = jnp.concatenate([zc, interior_f32, zc], axis=1).astype(dt)   # (Hi, Wi+2, C)
    pad_ref[pl.ds(1, Hi), :, :] = rows
    zr = jnp.zeros((1, Wi + 2, C), dt)
    pad_ref[pl.ds(0, 1), :, :] = zr
    pad_ref[pl.ds(Hi + 1, 1), :, :] = zr


def _conv3x3_im2col(xp, w_mat, b_row, Ho, Wo):
    """3x3 stride-1 conv over a zero-padded (Ho+2, Wo+2, Cin) bf16 value as ONE MXU matmul.

    xp    : (Ho+2, Wo+2, Cin) bf16 padded activation (already bf16 -> no per-tap casts)
    w_mat : (9*Cin, Cout) bf16 weights, rows ordered (kh, kw, cin) to match the patch
    b_row : (1, Cout) f32 bias
    Returns LeakyReLU(conv + bias), shape (Ho*Wo, Cout), f32.
    """
    Cin = xp.shape[-1]
    taps = [xp[kh:kh + Ho, kw:kw + Wo, :].reshape(Ho * Wo, Cin)
            for kh in range(3) for kw in range(3)]
    if Cin % 128 == 0:
        # 128-channel taps: every concat offset is already 128-lane aligned.
        patch = jnp.concatenate(taps, axis=-1)                       # (Npix, 9*Cin)
    else:
        # 64-channel taps: group in pairs so the outer concat offsets stay 128-aligned.
        pairs = [jnp.concatenate(taps[i:i + 2], axis=-1) for i in range(0, 8, 2)]
        pairs.append(taps[8])
        patch = jnp.concatenate(pairs, axis=-1)                      # (Npix, 9*Cin)
    acc = jnp.dot(patch, w_mat, preferred_element_type=jnp.float32)  # MXU-internal K-accum
    return _leaky_relu(acc + b_row)


# ---------------------------------------------------------------------------
# Fused FUBranch kernel (one batch element per grid step)
# ---------------------------------------------------------------------------
def fubranch_kernel(x_ref, aw1_ref, ab1_ref, aw2_ref, ab2_ref, up_ref,
                    w1_ref, b1_ref, w2_ref, b2_ref, w3_ref, b3_ref,
                    w4t_ref, b4_ref, o_ref,
                    pad1_ref, pad2_ref, pad3_ref, pad4_ref):
    _, H, W, C = x_ref.shape
    H2, W2 = 2 * H, 2 * W
    C2 = w2_ref.shape[-1]          # 64

    # ---- AFS: global avg pool -> 1x1 conv -> 1x1 conv -> sigmoid -> channel gate ----
    # (matches the PyTorch module: no nonlinearity between the two 1x1 convs; f32 math)
    x2 = x_ref[0].reshape(H * W, C)                                  # (HW, C) f32
    m = jnp.mean(x2, axis=0, keepdims=True)                          # (1, C)
    h = jnp.dot(m, aw1_ref[...], preferred_element_type=jnp.float32) + ab1_ref[...]
    g = jnp.dot(h, aw2_ref[...], preferred_element_type=jnp.float32) + ab2_ref[...]
    g = jax.nn.sigmoid(g)                                            # (1, C)
    gated = x2 * g                                                   # (HW, C) f32
    _store_padded(pad1_ref, gated.reshape(H, W, C))

    # ---- STconv1: 3x3, 128 -> 128, LeakyReLU(0.2) ----
    act1 = _conv3x3_im2col(pad1_ref[...], w1_ref[...], b1_ref[...], H, W)   # (HW, 128) f32

    # ---- bilinear 2x upsample (align_corners=True) as one MXU matmul ----
    up = jnp.dot(up_ref[...], act1.astype(jnp.bfloat16),
                 preferred_element_type=jnp.float32)                 # (4HW, 128) f32
    _store_padded(pad2_ref, up.reshape(H2, W2, C))

    # ---- STconv2: 3x3, 128 -> 64 ----
    act2 = _conv3x3_im2col(pad2_ref[...], w2_ref[...], b2_ref[...], H2, W2)  # (4HW, 64)
    _store_padded(pad3_ref, act2.reshape(H2, W2, C2))

    # ---- STconv3: 3x3, 64 -> 64 ----
    act3 = _conv3x3_im2col(pad3_ref[...], w3_ref[...], b3_ref[...], H2, W2)  # (4HW, 64)
    _store_padded(pad4_ref, act3.reshape(H2, W2, C2))

    # ---- STconv4: 3x3, 64 -> 3; tiny weight block transposed in-kernel ----
    w4 = jnp.transpose(w4t_ref[...]).astype(jnp.bfloat16)            # (576, 3)
    act4 = _conv3x3_im2col(pad4_ref[...], w4, b4_ref[...], H2, W2)   # (4HW, 3)
    o_ref[0] = jnp.transpose(act4).astype(o_ref.dtype)               # (3, 4HW) lane-dense


# ---------------------------------------------------------------------------
# Exact align_corners=True bilinear 2x upsample as a (4HW, HW) matrix
# ---------------------------------------------------------------------------
def _interp_matrix(n_in, n_out):
    i = jnp.arange(n_out, dtype=jnp.float32)
    src = i * (n_in - 1) / (n_out - 1)
    i0 = jnp.clip(jnp.floor(src).astype(jnp.int32), 0, n_in - 2)
    f = src - i0.astype(jnp.float32)
    A = jnp.zeros((n_out, n_in), jnp.float32)
    A = A.at[jnp.arange(n_out), i0].add(1.0 - f)
    A = A.at[jnp.arange(n_out), i0 + 1].add(f)
    return A


def _upsample2x_matrix(H, W):
    # out_flat[h'*2W + w'] = sum_{h,w} AH[h',h] * AW[w',w] * in_flat[h*W + w]
    # Kron form kept only because H*W is small here; use separable AH/AW for large H,W.
    return jnp.kron(_interp_matrix(H, 2 * H), _interp_matrix(W, 2 * W))


# ---------------------------------------------------------------------------
# Wrapper
# ---------------------------------------------------------------------------
def fubranch_forward(x_nchw, params):
    N, C, H, W = x_nchw.shape
    H2, W2 = 2 * H, 2 * W
    x = jnp.transpose(x_nchw, (0, 2, 3, 1))                          # NCHW -> NHWC (input only)
    up_mat = _upsample2x_matrix(H, W).astype(jnp.bfloat16)           # (4HW, HW)

    # im2col-ready weights: (kh, kw, Cin, Cout) -> (9*Cin, Cout); conv4 lane-dense (3, 576).
    w1m = params["w1"].reshape(9 * 128, 128)                         # bf16
    w2m = params["w2"].reshape(9 * 128, 64)                          # bf16
    w3m = params["w3"].reshape(9 * 64, 64)                           # bf16
    w4t = jnp.transpose(params["w4"].reshape(9 * 64, 3))             # (3, 576) f32

    out = pl.pallas_call(
        fubranch_kernel,
        out_shape=jax.ShapeDtypeStruct((N, 3, H2 * W2), jnp.float32),
        grid=(N,),
        in_specs=[
            pl.BlockSpec((1, H, W, C), lambda n: (n, 0, 0, 0)),
            pl.BlockSpec((C, C), lambda n: (0, 0)),
            pl.BlockSpec((1, C), lambda n: (0, 0)),
            pl.BlockSpec((C, C), lambda n: (0, 0)),
            pl.BlockSpec((1, C), lambda n: (0, 0)),
            pl.BlockSpec((H2 * W2, H * W), lambda n: (0, 0)),
            pl.BlockSpec((9 * 128, 128), lambda n: (0, 0)),
            pl.BlockSpec((1, 128), lambda n: (0, 0)),
            pl.BlockSpec((9 * 128, 64), lambda n: (0, 0)),
            pl.BlockSpec((1, 64), lambda n: (0, 0)),
            pl.BlockSpec((9 * 64, 64), lambda n: (0, 0)),
            pl.BlockSpec((1, 64), lambda n: (0, 0)),
            pl.BlockSpec((3, 9 * 64), lambda n: (0, 0)),
            pl.BlockSpec((1, 3), lambda n: (0, 0)),
        ],
        out_specs=pl.BlockSpec((1, 3, H2 * W2), lambda n: (n, 0, 0)),
        scratch_shapes=[
            # bf16 padded activations (interiors + zero halo written every grid step)
            pltpu.VMEM((H + 2, W + 2, 128), jnp.bfloat16),    # padded gated input
            pltpu.VMEM((H2 + 2, W2 + 2, 128), jnp.bfloat16),  # padded upsampled act1
            pltpu.VMEM((H2 + 2, W2 + 2, 64), jnp.bfloat16),   # padded act2
            pltpu.VMEM((H2 + 2, W2 + 2, 64), jnp.bfloat16),   # padded act3
        ],
        compiler_params=pltpu.CompilerParams(
            # N should stay a multiple of 2 on v7x (2 TensorCores).
            dimension_semantics=("parallel",),
            # Explicit scoped-VMEM limit; re-derive if H,W grow beyond ~16.
            vmem_limit_bytes=32 * 1024 * 1024,
        ),
    )(x, params["afs_w1t"], params["afs_b1"], params["afs_w2t"], params["afs_b2"],
      up_mat, w1m, params["b1"], w2m, params["b2"], w3m, params["b3"],
      w4t, params["b4"])

    return out.reshape(N, 3, H2, W2)                                 # free reshape, already NCHW


def init_params(key):
    ks = jax.random.split(key, 12)
    s = 0.05
    bf = jnp.bfloat16
    return {
        # AFS 1x1 convs, stored transposed to (Cin, Cout); kept f32 (tiny, gate accuracy)
        "afs_w1t": s * jax.random.normal(ks[0], (128, 128), jnp.float32),
        "afs_b1":  s * jax.random.normal(ks[1], (1, 128), jnp.float32),
        "afs_w2t": s * jax.random.normal(ks[2], (128, 128), jnp.float32),
        "afs_b2":  s * jax.random.normal(ks[3], (1, 128), jnp.float32),
        # 3x3 convs as (kh, kw, Cin, Cout); bf16 MXU operands, f32 bias/accumulation
        "w1": (s * jax.random.normal(ks[4], (3, 3, 128, 128), jnp.float32)).astype(bf),
        "b1": s * jax.random.normal(ks[5], (1, 128), jnp.float32),
        "w2": (s * jax.random.normal(ks[6], (3, 3, 128, 64), jnp.float32)).astype(bf),
        "b2": s * jax.random.normal(ks[7], (1, 64), jnp.float32),
        "w3": (s * jax.random.normal(ks[8], (3, 3, 64, 64), jnp.float32)).astype(bf),
        "b3": s * jax.random.normal(ks[9], (1, 64), jnp.float32),
        # conv4 kept f32 (tiny); cast to bf16 in-kernel after the (3,576)->(576,3) transpose
        "w4": s * jax.random.normal(ks[10], (3, 3, 64, 3), jnp.float32),
        "b4": s * jax.random.normal(ks[11], (1, 3), jnp.float32),
    }


if __name__ == "__main__":
    key = jax.random.PRNGKey(0)
    k_x, k_p = jax.random.split(key)
    # FUBranch requires 128 input channels; keep spatial small. N=2 keeps both v7x TCs busy.
    x = jax.random.normal(k_x, (2, 128, 8, 8), jnp.float32)          # NCHW
    params = init_params(k_p)

    out = jax.jit(fubranch_forward)(x, params)
    jax.block_until_ready(out)
    assert out.shape == (2, 3, 16, 16), out.shape
    print("KERNEL_OK")
</pallas_src>

<mosaic_0001>
module attributes {stable_mosaic.version = 11 : i64} {
  func.func private @main(%arg0: i32) attributes {dimension_semantics = [#tpu.dimension_semantics<core_parallel>], iteration_bounds = array<i64: 2>, tpu.core_type = #tpu.core_type<sc_scalar_subcore>, window_params = []} {
    return
  }
}

module attributes {stable_mosaic.version = 11 : i64} {
  func.func private @main(%arg0: i32) attributes {dimension_semantics = [#tpu.dimension_semantics<core_parallel>], iteration_bounds = array<i64: 2>, tpu.core_type = #tpu.core_type<sc_scalar_subcore>, window_params = []} {
    return
  }
}

module attributes {stable_mosaic.version = 11 : i64} {
  func.func @fubranch_kernel(%arg0: i32, %arg1: memref<1x8x8x128xf32, #tpu.memory_space<vmem>>, %arg2: memref<128x128xf32, #tpu.memory_space<vmem>>, %arg3: memref<1x128xf32, #tpu.memory_space<vmem>>, %arg4: memref<128x128xf32, #tpu.memory_space<vmem>>, %arg5: memref<1x128xf32, #tpu.memory_space<vmem>>, %arg6: memref<256x64xbf16, #tpu.memory_space<vmem>>, %arg7: memref<1152x128xbf16, #tpu.memory_space<vmem>>, %arg8: memref<1x128xf32, #tpu.memory_space<vmem>>, %arg9: memref<1152x64xbf16, #tpu.memory_space<vmem>>, %arg10: memref<1x64xf32, #tpu.memory_space<vmem>>, %arg11: memref<576x64xbf16, #tpu.memory_space<vmem>>, %arg12: memref<1x64xf32, #tpu.memory_space<vmem>>, %arg13: memref<3x576xf32, #tpu.memory_space<vmem>>, %arg14: memref<1x3xf32, #tpu.memory_space<vmem>>, %arg15: memref<1x3x256xf32, #tpu.memory_space<vmem>>, %arg16: memref<10x10x128xbf16, #tpu.memory_space<vmem>>, %arg17: memref<18x18x128xbf16, #tpu.memory_space<vmem>>, %arg18: memref<18x18x64xbf16, #tpu.memory_space<vmem>>, %arg19: memref<18x18x64xbf16, #tpu.memory_space<vmem>>) attributes {dimension_semantics = [#tpu.dimension_semantics<parallel>], iteration_bounds = array<i64: 2>, scalar_prefetch = 0 : i64, scratch_operands = 4 : i64, tpu.core_type = #tpu.core_type<tc>, window_params = [{transform_indices = @transform_0, window_bounds = array<i64: 1, 8, 8, 128>}, {pipeline_mode = #tpu.pipeline_mode<synchronous>, transform_indices = @transform_1, window_bounds = array<i64: 128, 128>}, {pipeline_mode = #tpu.pipeline_mode<synchronous>, transform_indices = @transform_2, window_bounds = array<i64: 1, 128>}, {pipeline_mode = #tpu.pipeline_mode<synchronous>, transform_indices = @transform_3, window_bounds = array<i64: 128, 128>}, {pipeline_mode = #tpu.pipeline_mode<synchronous>, transform_indices = @transform_4, window_bounds = array<i64: 1, 128>}, {pipeline_mode = #tpu.pipeline_mode<synchronous>, transform_indices = @transform_5, window_bounds = array<i64: 256, 64>}, {pipeline_mode = #tpu.pipeline_mode<synchronous>, transform_indices = @transform_6, window_bounds = array<i64: 1152, 128>}, {pipeline_mode = #tpu.pipeline_mode<synchronous>, transform_indices = @transform_7, window_bounds = array<i64: 1, 128>}, {pipeline_mode = #tpu.pipeline_mode<synchronous>, transform_indices = @transform_8, window_bounds = array<i64: 1152, 64>}, {pipeline_mode = #tpu.pipeline_mode<synchronous>, transform_indices = @transform_9, window_bounds = array<i64: 1, 64>}, {pipeline_mode = #tpu.pipeline_mode<synchronous>, transform_indices = @transform_10, window_bounds = array<i64: 576, 64>}, {pipeline_mode = #tpu.pipeline_mode<synchronous>, transform_indices = @transform_11, window_bounds = array<i64: 1, 64>}, {pipeline_mode = #tpu.pipeline_mode<synchronous>, transform_indices = @transform_12, window_bounds = array<i64: 3, 576>}, {pipeline_mode = #tpu.pipeline_mode<synchronous>, transform_indices = @transform_13, window_bounds = array<i64: 1, 3>}, {transform_indices = @transform_14, window_bounds = array<i64: 1, 3, 256>}]} {
    %c0 = arith.constant 0 : index
    %c0_0 = arith.constant 0 : index
    %c0_1 = arith.constant 0 : index
    %c0_2 = arith.constant 0 : index
    %0 = vector.load %arg1[%c0, %c0_0, %c0_1, %c0_2] : memref<1x8x8x128xf32, #tpu.memory_space<vmem>>, vector<1x8x8x128xf32>
    %1 = vector.shape_cast %0 : vector<1x8x8x128xf32> to vector<8x8x128xf32>
    %2 = vector.shape_cast %1 : vector<8x8x128xf32> to vector<64x128xf32>
    %cst = arith.constant dense<0.000000e+00> : vector<128xf32>
    %3 = vector.multi_reduction <add>, %2, %cst [0] : vector<64x128xf32> to vector<128xf32>
    %4 = vector.shape_cast %3 : vector<128xf32> to vector<1x128xf32>
    %cst_3 = arith.constant 6.400000e+01 : f32
    %5 = vector.broadcast %cst_3 : f32 to vector<1x128xf32>
    %6 = arith.divf %4, %5 : vector<1x128xf32>
    %c0_4 = arith.constant 0 : index
    %c0_5 = arith.constant 0 : index
    %7 = vector.load %arg2[%c0_4, %c0_5] : memref<128x128xf32, #tpu.memory_space<vmem>>, vector<128x128xf32>
    %cst_6 = arith.constant dense<0.000000e+00> : vector<1x128xf32>
    %8 = tpu.matmul %6, %7, %cst_6 {dimension_numbers = #tpu.dot_dimension_numbers<[1], [0], [0], [1], [0, 0, 1, 1], [], []>} : vector<1x128xf32>, vector<128x128xf32>, vector<1x128xf32> -> vector<1x128xf32>
    %c0_7 = arith.constant 0 : index
    %c0_8 = arith.constant 0 : index
    %9 = vector.load %arg3[%c0_7, %c0_8] : memref<1x128xf32, #tpu.memory_space<vmem>>, vector<1x128xf32>
    %10 = arith.addf %8, %9 : vector<1x128xf32>
    %c0_9 = arith.constant 0 : index
    %c0_10 = arith.constant 0 : index
    %11 = vector.load %arg4[%c0_9, %c0_10] : memref<128x128xf32, #tpu.memory_space<vmem>>, vector<128x128xf32>
    %cst_11 = arith.constant dense<0.000000e+00> : vector<1x128xf32>
    %12 = tpu.matmul %10, %11, %cst_11 {dimension_numbers = #tpu.dot_dimension_numbers<[1], [0], [0], [1], [0, 0, 1, 1], [], []>} : vector<1x128xf32>, vector<128x128xf32>, vector<1x128xf32> -> vector<1x128xf32>
    %c0_12 = arith.constant 0 : index
    %c0_13 = arith.constant 0 : index
    %13 = vector.load %arg5[%c0_12, %c0_13] : memref<1x128xf32, #tpu.memory_space<vmem>>, vector<1x128xf32>
    %14 = arith.addf %12, %13 : vector<1x128xf32>
    %15 = arith.negf %14 : vector<1x128xf32>
    %16 = math.exp %15 : vector<1x128xf32>
    %cst_14 = arith.constant 1.000000e+00 : f32
    %17 = vector.broadcast %cst_14 : f32 to vector<1x128xf32>
    %18 = arith.addf %17, %16 : vector<1x128xf32>
    %19 = arith.divf %17, %18 : vector<1x128xf32>
    %20 = vector.broadcast %19 : vector<1x128xf32> to vector<64x128xf32>
    %21 = arith.mulf %2, %20 : vector<64x128xf32>
    %22 = vector.shape_cast %21 : vector<64x128xf32> to vector<8x8x128xf32>
    %cst_15 = arith.constant 0.000000e+00 : f32
    %23 = vector.broadcast %cst_15 : f32 to vector<8x1x128xf32>
    %24 = tpu.concatenate %23, %22, %23 in 1 : vector<8x1x128xf32>, vector<8x8x128xf32>, vector<8x1x128xf32> -> vector<8x10x128xf32>
    %25 = arith.truncf %24 : vector<8x10x128xf32> to vector<8x10x128xbf16>
    %c1 = arith.constant 1 : index
    %c0_16 = arith.constant 0 : index
    %c0_17 = arith.constant 0 : index
    %26 = vector.load %arg16[%c1, %c0_16, %c0_17] : memref<10x10x128xbf16, #tpu.memory_space<vmem>>, vector<8x10x128xbf16>
    tpu.vector_store %arg16[%c1, %c0_16, %c0_17], %25 {strides = array<i32>} : memref<10x10x128xbf16, #tpu.memory_space<vmem>>, vector<8x10x128xbf16>,
    %cst_18 = arith.constant 0.000000e+00 : bf16
    %27 = vector.broadcast %cst_18 : bf16 to vector<1x10x128xbf16>
    %c0_19 = arith.constant 0 : index
    %c0_20 = arith.constant 0 : index
    %c0_21 = arith.constant 0 : index
    %28 = vector.load %arg16[%c0_19, %c0_20, %c0_21] : memref<10x10x128xbf16, #tpu.memory_space<vmem>>, vector<1x10x128xbf16>
    tpu.vector_store %arg16[%c0_19, %c0_20, %c0_21], %27 {strides = array<i32>} : memref<10x10x128xbf16, #tpu.memory_space<vmem>>, vector<1x10x128xbf16>,
    %c9 = arith.constant 9 : index
    %c0_22 = arith.constant 0 : index
    %c0_23 = arith.constant 0 : index
    %29 = vector.load %arg16[%c9, %c0_22, %c0_23] : memref<10x10x128xbf16, #tpu.memory_space<vmem>>, vector<1x10x128xbf16>
    tpu.vector_store %arg16[%c9, %c0_22, %c0_23], %27 {strides = array<i32>} : memref<10x10x128xbf16, #tpu.memory_space<vmem>>, vector<1x10x128xbf16>,
    %c0_24 = arith.constant 0 : index
    %c0_25 = arith.constant 0 : index
    %c0_26 = arith.constant 0 : index
    %30 = vector.load %arg16[%c0_24, %c0_25, %c0_26] : memref<10x10x128xbf16, #tpu.memory_space<vmem>>, vector<10x10x128xbf16>
    %c0_27 = arith.constant 0 : index
    %c0_28 = arith.constant 0 : index
    %31 = vector.load %arg7[%c0_27, %c0_28] : memref<1152x128xbf16, #tpu.memory_space<vmem>>, vector<1152x128xbf16>
    %c0_29 = arith.constant 0 : index
    %c0_30 = arith.constant 0 : index
    %32 = vector.load %arg8[%c0_29, %c0_30] : memref<1x128xf32, #tpu.memory_space<vmem>>, vector<1x128xf32>
    %33 = vector.extract_strided_slice %30 {offsets = [0, 0, 0], sizes = [8, 8, 128], strides = [1, 1, 1]} : vector<10x10x128xbf16> to vector<8x8x128xbf16>
    %34 = vector.shape_cast %33 : vector<8x8x128xbf16> to vector<64x128xbf16>
    %35 = vector.extract_strided_slice %30 {offsets = [0, 1, 0], sizes = [8, 8, 128], strides = [1, 1, 1]} : vector<10x10x128xbf16> to vector<8x8x128xbf16>
    %36 = vector.shape_cast %35 : vector<8x8x128xbf16> to vector<64x128xbf16>
    %37 = vector.extract_strided_slice %30 {offsets = [0, 2, 0], sizes = [8, 8, 128], strides = [1, 1, 1]} : vector<10x10x128xbf16> to vector<8x8x128xbf16>
    %38 = vector.shape_cast %37 : vector<8x8x128xbf16> to vector<64x128xbf16>
    %39 = vector.extract_strided_slice %30 {offsets = [1, 0, 0], sizes = [8, 8, 128], strides = [1, 1, 1]} : vector<10x10x128xbf16> to vector<8x8x128xbf16>
    %40 = vector.shape_cast %39 : vector<8x8x128xbf16> to vector<64x128xbf16>
    %41 = vector.extract_strided_slice %30 {offsets = [1, 1, 0], sizes = [8, 8, 128], strides = [1, 1, 1]} : vector<10x10x128xbf16> to vector<8x8x128xbf16>
    %42 = vector.shape_cast %41 : vector<8x8x128xbf16> to vector<64x128xbf16>
    %43 = vector.extract_strided_slice %30 {offsets = [1, 2, 0], sizes = [8, 8, 128], strides = [1, 1, 1]} : vector<10x10x128xbf16> to vector<8x8x128xbf16>
    %44 = vector.shape_cast %43 : vector<8x8x128xbf16> to vector<64x128xbf16>
    %45 = vector.extract_strided_slice %30 {offsets = [2, 0, 0], sizes = [8, 8, 128], strides = [1, 1, 1]} : vector<10x10x128xbf16> to vector<8x8x128xbf16>
    %46 = vector.shape_cast %45 : vector<8x8x128xbf16> to vector<64x128xbf16>
    %47 = vector.extract_strided_slice %30 {offsets = [2, 1, 0], sizes = [8, 8, 128], strides = [1, 1, 1]} : vector<10x10x128xbf16> to vector<8x8x128xbf16>
    %48 = vector.shape_cast %47 : vector<8x8x128xbf16> to vector<64x128xbf16>
    %49 = vector.extract_strided_slice %30 {offsets = [2, 2, 0], sizes = [8, 8, 128], strides = [1, 1, 1]} : vector<10x10x128xbf16> to vector<8x8x128xbf16>
    %50 = vector.shape_cast %49 : vector<8x8x128xbf16> to vector<64x128xbf16>
    %51 = tpu.concatenate %34, %36, %38, %40, %42, %44, %46, %48, %50 in 1 : vector<64x128xbf16>, vector<64x128xbf16>, vector<64x128xbf16>, vector<64x128xbf16>, vector<64x128xbf16>, vector<64x128xbf16>, vector<64x128xbf16>, vector<64x128xbf16>, vector<64x128xbf16> -> vector<64x1152xbf16>
    %cst_31 = arith.constant dense<0.000000e+00> : vector<64x128xf32>
    %52 = tpu.matmul %51, %31, %cst_31 {dimension_numbers = #tpu.dot_dimension_numbers<[1], [0], [0], [1], [0, 0, 1, 1], [], []>} : vector<64x1152xbf16>, vector<1152x128xbf16>, vector<64x128xf32> -> vector<64x128xf32>
    %53 = vector.broadcast %32 : vector<1x128xf32> to vector<64x128xf32>
    %54 = arith.addf %52, %53 : vector<64x128xf32>
    %cst_32 = arith.constant 0.000000e+00 : f32
    %55 = vector.broadcast %cst_32 : f32 to vector<64x128xf32>
    %56 = arith.cmpf ogt, %54, %55 : vector<64x128xf32>
    %cst_33 = arith.constant 2.000000e-01 : f32
    %57 = vector.broadcast %cst_33 : f32 to vector<64x128xf32>
    %58 = arith.mulf %57, %54 : vector<64x128xf32>
    %59 = arith.select %56, %54, %58 : vector<64x128xi1>, vector<64x128xf32>
    %c0_34 = arith.constant 0 : index
    %c0_35 = arith.constant 0 : index
    %60 = vector.load %arg6[%c0_34, %c0_35] : memref<256x64xbf16, #tpu.memory_space<vmem>>, vector<256x64xbf16>
    %61 = arith.truncf %59 : vector<64x128xf32> to vector<64x128xbf16>
    %cst_36 = arith.constant dense<0.000000e+00> : vector<256x128xf32>
    %62 = tpu.matmul %60, %61, %cst_36 {dimension_numbers = #tpu.dot_dimension_numbers<[1], [0], [0], [1], [0, 0, 1, 1], [], []>} : vector<256x64xbf16>, vector<64x128xbf16>, vector<256x128xf32> -> vector<256x128xf32>
    %63 = vector.shape_cast %62 : vector<256x128xf32> to vector<16x16x128xf32>
    %cst_37 = arith.constant 0.000000e+00 : f32
    %64 = vector.broadcast %cst_37 : f32 to vector<16x1x128xf32>
    %65 = tpu.concatenate %64, %63, %64 in 1 : vector<16x1x128xf32>, vector<16x16x128xf32>, vector<16x1x128xf32> -> vector<16x18x128xf32>
    %66 = arith.truncf %65 : vector<16x18x128xf32> to vector<16x18x128xbf16>
    %c1_38 = arith.constant 1 : index
    %c0_39 = arith.constant 0 : index
    %c0_40 = arith.constant 0 : index
    %67 = vector.load %arg17[%c1_38, %c0_39, %c0_40] : memref<18x18x128xbf16, #tpu.memory_space<vmem>>, vector<16x18x128xbf16>
    tpu.vector_store %arg17[%c1_38, %c0_39, %c0_40], %66 {strides = array<i32>} : memref<18x18x128xbf16, #tpu.memory_space<vmem>>, vector<16x18x128xbf16>,
    %cst_41 = arith.constant 0.000000e+00 : bf16
    %68 = vector.broadcast %cst_41 : bf16 to vector<1x18x128xbf16>
    %c0_42 = arith.constant 0 : index
    %c0_43 = arith.constant 0 : index
    %c0_44 = arith.constant 0 : index
    %69 = vector.load %arg17[%c0_42, %c0_43, %c0_44] : memref<18x18x128xbf16, #tpu.memory_space<vmem>>, vector<1x18x128xbf16>
    tpu.vector_store %arg17[%c0_42, %c0_43, %c0_44], %68 {strides = array<i32>} : memref<18x18x128xbf16, #tpu.memory_space<vmem>>, vector<1x18x128xbf16>,
    %c17 = arith.constant 17 : index
    %c0_45 = arith.constant 0 : index
    %c0_46 = arith.constant 0 : index
    %70 = vector.load %arg17[%c17, %c0_45, %c0_46] : memref<18x18x128xbf16, #tpu.memory_space<vmem>>, vector<1x18x128xbf16>
    tpu.vector_store %arg17[%c17, %c0_45, %c0_46], %68 {strides = array<i32>} : memref<18x18x128xbf16, #tpu.memory_space<vmem>>, vector<1x18x128xbf16>,
    %c0_47 = arith.constant 0 : index
    %c0_48 = arith.constant 0 : index
    %c0_49 = arith.constant 0 : index
    %71 = vector.load %arg17[%c0_47, %c0_48, %c0_49] : memref<18x18x128xbf16, #tpu.memory_space<vmem>>, vector<18x18x128xbf16>
    %c0_50 = arith.constant 0 : index
    %c0_51 = arith.constant 0 : index
    %72 = vector.load %arg9[%c0_50, %c0_51] : memref<1152x64xbf16, #tpu.memory_space<vmem>>, vector<1152x64xbf16>
    %c0_52 = arith.constant 0 : index
    %c0_53 = arith.constant 0 : index
    %73 = vector.load %arg10[%c0_52, %c0_53] : memref<1x64xf32, #tpu.memory_space<vmem>>, vector<1x64xf32>
    %74 = vector.extract_strided_slice %71 {offsets = [0, 0, 0], sizes = [16, 16, 128], strides = [1, 1, 1]} : vector<18x18x128xbf16> to vector<16x16x128xbf16>
    %75 = vector.shape_cast %74 : vector<16x16x128xbf16> to vector<256x128xbf16>
    %76 = vector.extract_strided_slice %71 {offsets = [0, 1, 0], sizes = [16, 16, 128], strides = [1, 1, 1]} : vector<18x18x128xbf16> to vector<16x16x128xbf16>
    %77 = vector.shape_cast %76 : vector<16x16x128xbf16> to vector<256x128xbf16>
    %78 = vector.extract_strided_slice %71 {offsets = [0, 2, 0], sizes = [16, 16, 128], strides = [1, 1, 1]} : vector<18x18x128xbf16> to vector<16x16x128xbf16>
    %79 = vector.shape_cast %78 : vector<16x16x128xbf16> to vector<256x128xbf16>
    %80 = vector.extract_strided_slice %71 {offsets = [1, 0, 0], sizes = [16, 16, 128], strides = [1, 1, 1]} : vector<18x18x128xbf16> to vector<16x16x128xbf16>
    %81 = vector.shape_cast %80 : vector<16x16x128xbf16> to vector<256x128xbf16>
    %82 = vector.extract_strided_slice %71 {offsets = [1, 1, 0], sizes = [16, 16, 128], strides = [1, 1, 1]} : vector<18x18x128xbf16> to vector<16x16x128xbf16>
    %83 = vector.shape_cast %82 : vector<16x16x128xbf16> to vector<256x128xbf16>
    %84 = vector.extract_strided_slice %71 {offsets = [1, 2, 0], sizes = [16, 16, 128], strides = [1, 1, 1]} : vector<18x18x128xbf16> to vector<16x16x128xbf16>
    %85 = vector.shape_cast %84 : vector<16x16x128xbf16> to vector<256x128xbf16>
    %86 = vector.extract_strided_slice %71 {offsets = [2, 0, 0], sizes = [16, 16, 128], strides = [1, 1, 1]} : vector<18x18x128xbf16> to vector<16x16x128xbf16>
    %87 = vector.shape_cast %86 : vector<16x16x128xbf16> to vector<256x128xbf16>
    %88 = vector.extract_strided_slice %71 {offsets = [2, 1, 0], sizes = [16, 16, 128], strides = [1, 1, 1]} : vector<18x18x128xbf16> to vector<16x16x128xbf16>
    %89 = vector.shape_cast %88 : vector<16x16x128xbf16> to vector<256x128xbf16>
    %90 = vector.extract_strided_slice %71 {offsets = [2, 2, 0], sizes = [16, 16, 128], strides = [1, 1, 1]} : vector<18x18x128xbf16> to vector<16x16x128xbf16>
    %91 = vector.shape_cast %90 : vector<16x16x128xbf16> to vector<256x128xbf16>
    %92 = tpu.concatenate %75, %77, %79, %81, %83, %85, %87, %89, %91 in 1 : vector<256x128xbf16>, vector<256x128xbf16>, vector<256x128xbf16>, vector<256x128xbf16>, vector<256x128xbf16>, vector<256x128xbf16>, vector<256x128xbf16>, vector<256x128xbf16>, vector<256x128xbf16> -> vector<256x1152xbf16>
    %cst_54 = arith.constant dense<0.000000e+00> : vector<256x64xf32>
    %93 = tpu.matmul %92, %72, %cst_54 {dimension_numbers = #tpu.dot_dimension_numbers<[1], [0], [0], [1], [0, 0, 1, 1], [], []>} : vector<256x1152xbf16>, vector<1152x64xbf16>, vector<256x64xf32> -> vector<256x64xf32>
    %94 = vector.broadcast %73 : vector<1x64xf32> to vector<256x64xf32>
    %95 = arith.addf %93, %94 : vector<256x64xf32>
    %cst_55 = arith.constant 0.000000e+00 : f32
    %96 = vector.broadcast %cst_55 : f32 to vector<256x64xf32>
    %97 = arith.cmpf ogt, %95, %96 : vector<256x64xf32>
    %cst_56 = arith.constant 2.000000e-01 : f32
    %98 = vector.broadcast %cst_56 : f32 to vector<256x64xf32>
    %99 = arith.mulf %98, %95 : vector<256x64xf32>
    %100 = arith.select %97, %95, %99 : vector<256x64xi1>, vector<256x64xf32>
    %101 = vector.shape_cast %100 : vector<256x64xf32> to vector<16x16x64xf32>
    %cst_57 = arith.constant 0.000000e+00 : f32
    %102 = vector.broadcast %cst_57 : f32 to vector<16x1x64xf32>
    %103 = tpu.concatenate %102, %101, %102 in 1 : vector<16x1x64xf32>, vector<16x16x64xf32>, vector<16x1x64xf32> -> vector<16x18x64xf32>
    %104 = arith.truncf %103 : vector<16x18x64xf32> to vector<16x18x64xbf16>
    %c1_58 = arith.constant 1 : index
    %c0_59 = arith.constant 0 : index
    %c0_60 = arith.constant 0 : index
    %105 = vector.load %arg18[%c1_58, %c0_59, %c0_60] : memref<18x18x64xbf16, #tpu.memory_space<vmem>>, vector<16x18x64xbf16>
    tpu.vector_store %arg18[%c1_58, %c0_59, %c0_60], %104 {strides = array<i32>} : memref<18x18x64xbf16, #tpu.memory_space<vmem>>, vector<16x18x64xbf16>,
    %cst_61 = arith.constant 0.000000e+00 : bf16
    %106 = vector.broadcast %cst_61 : bf16 to vector<1x18x64xbf16>
    %c0_62 = arith.constant 0 : index
    %c0_63 = arith.constant 0 : index
    %c0_64 = arith.constant 0 : index
    %107 = vector.load %arg18[%c0_62, %c0_63, %c0_64] : memref<18x18x64xbf16, #tpu.memory_space<vmem>>, vector<1x18x64xbf16>
    tpu.vector_store %arg18[%c0_62, %c0_63, %c0_64], %106 {strides = array<i32>} : memref<18x18x64xbf16, #tpu.memory_space<vmem>>, vector<1x18x64xbf16>,
    %c17_65 = arith.constant 17 : index
    %c0_66 = arith.constant 0 : index
    %c0_67 = arith.constant 0 : index
    %108 = vector.load %arg18[%c17_65, %c0_66, %c0_67] : memref<18x18x64xbf16, #tpu.memory_space<vmem>>, vector<1x18x64xbf16>
    tpu.vector_store %arg18[%c17_65, %c0_66, %c0_67], %106 {strides = array<i32>} : memref<18x18x64xbf16, #tpu.memory_space<vmem>>, vector<1x18x64xbf16>,
    %c0_68 = arith.constant 0 : index
    %c0_69 = arith.constant 0 : index
    %c0_70 = arith.constant 0 : index
    %109 = vector.load %arg18[%c0_68, %c0_69, %c0_70] : memref<18x18x64xbf16, #tpu.memory_space<vmem>>, vector<18x18x64xbf16>
    %c0_71 = arith.constant 0 : index
    %c0_72 = arith.constant 0 : index
    %110 = vector.load %arg11[%c0_71, %c0_72] : memref<576x64xbf16, #tpu.memory_space<vmem>>, vector<576x64xbf16>
    %c0_73 = arith.constant 0 : index
    %c0_74 = arith.constant 0 : index
    %111 = vector.load %arg12[%c0_73, %c0_74] : memref<1x64xf32, #tpu.memory_space<vmem>>, vector<1x64xf32>
    %112 = vector.extract_strided_slice %109 {offsets = [0, 0, 0], sizes = [16, 16, 64], strides = [1, 1, 1]} : vector<18x18x64xbf16> to vector<16x16x64xbf16>
    %113 = vector.shape_cast %112 : vector<16x16x64xbf16> to vector<256x64xbf16>
    %114 = vector.extract_strided_slice %109 {offsets = [0, 1, 0], sizes = [16, 16, 64], strides = [1, 1, 1]} : vector<18x18x64xbf16> to vector<16x16x64xbf16>
    %115 = vector.shape_cast %114 : vector<16x16x64xbf16> to vector<256x64xbf16>
    %116 = vector.extract_strided_slice %109 {offsets = [0, 2, 0], sizes = [16, 16, 64], strides = [1, 1, 1]} : vector<18x18x64xbf16> to vector<16x16x64xbf16>
    %117 = vector.shape_cast %116 : vector<16x16x64xbf16> to vector<256x64xbf16>
    %118 = vector.extract_strided_slice %109 {offsets = [1, 0, 0], sizes = [16, 16, 64], strides = [1, 1, 1]} : vector<18x18x64xbf16> to vector<16x16x64xbf16>
    %119 = vector.shape_cast %118 : vector<16x16x64xbf16> to vector<256x64xbf16>
    %120 = vector.extract_strided_slice %109 {offsets = [1, 1, 0], sizes = [16, 16, 64], strides = [1, 1, 1]} : vector<18x18x64xbf16> to vector<16x16x64xbf16>
    %121 = vector.shape_cast %120 : vector<16x16x64xbf16> to vector<256x64xbf16>
    %122 = vector.extract_strided_slice %109 {offsets = [1, 2, 0], sizes = [16, 16, 64], strides = [1, 1, 1]} : vector<18x18x64xbf16> to vector<16x16x64xbf16>
    %123 = vector.shape_cast %122 : vector<16x16x64xbf16> to vector<256x64xbf16>
    %124 = vector.extract_strided_slice %109 {offsets = [2, 0, 0], sizes = [16, 16, 64], strides = [1, 1, 1]} : vector<18x18x64xbf16> to vector<16x16x64xbf16>
    %125 = vector.shape_cast %124 : vector<16x16x64xbf16> to vector<256x64xbf16>
    %126 = vector.extract_strided_slice %109 {offsets = [2, 1, 0], sizes = [16, 16, 64], strides = [1, 1, 1]} : vector<18x18x64xbf16> to vector<16x16x64xbf16>
    %127 = vector.shape_cast %126 : vector<16x16x64xbf16> to vector<256x64xbf16>
    %128 = vector.extract_strided_slice %109 {offsets = [2, 2, 0], sizes = [16, 16, 64], strides = [1, 1, 1]} : vector<18x18x64xbf16> to vector<16x16x64xbf16>
    %129 = vector.shape_cast %128 : vector<16x16x64xbf16> to vector<256x64xbf16>
    %130 = tpu.concatenate %113, %115 in 1 : vector<256x64xbf16>, vector<256x64xbf16> -> vector<256x128xbf16>
    %131 = tpu.concatenate %117, %119 in 1 : vector<256x64xbf16>, vector<256x64xbf16> -> vector<256x128xbf16>
    %132 = tpu.concatenate %121, %123 in 1 : vector<256x64xbf16>, vector<256x64xbf16> -> vector<256x128xbf16>
    %133 = tpu.concatenate %125, %127 in 1 : vector<256x64xbf16>, vector<256x64xbf16> -> vector<256x128xbf16>
    %134 = tpu.concatenate %130, %131, %132, %133, %129 in 1 : vector<256x128xbf16>, vector<256x128xbf16>, vector<256x128xbf16>, vector<256x128xbf16>, vector<256x64xbf16> -> vector<256x576xbf16>
    %cst_75 = arith.constant dense<0.000000e+00> : vector<256x64xf32>
    %135 = tpu.matmul %134, %110, %cst_75 {dimension_numbers = #tpu.dot_dimension_numbers<[1], [0], [0], [1], [0, 0, 1, 1], [], []>} : vector<256x576xbf16>, vector<576x64xbf16>, vector<256x64xf32> -> vector<256x64xf32>
    %136 = vector.broadcast %111 : vector<1x64xf32> to vector<256x64xf32>
    %137 = arith.addf %135, %136 : vector<256x64xf32>
    %cst_76 = arith.constant 0.000000e+00 : f32
    %138 = vector.broadcast %cst_76 : f32 to vector<256x64xf32>
    %139 = arith.cmpf ogt, %137, %138 : vector<256x64xf32>
    %cst_77 = arith.constant 2.000000e-01 : f32
    %140 = vector.broadcast %cst_77 : f32 to vector<256x64xf32>
    %141 = arith.mulf %140, %137 : vector<256x64xf32>
    %142 = arith.select %139, %137, %141 : vector<256x64xi1>, vector<256x64xf32>
    %143 = vector.shape_cast %142 : vector<256x64xf32> to vector<16x16x64xf32>
    %cst_78 = arith.constant 0.000000e+00 : f32
    %144 = vector.broadcast %cst_78 : f32 to vector<16x1x64xf32>
    %145 = tpu.concatenate %144, %143, %144 in 1 : vector<16x1x64xf32>, vector<16x16x64xf32>, vector<16x1x64xf32> -> vector<16x18x64xf32>
    %146 = arith.truncf %145 : vector<16x18x64xf32> to vector<16x18x64xbf16>
    %c1_79 = arith.constant 1 : index
    %c0_80 = arith.constant 0 : index
    %c0_81 = arith.constant 0 : index
    %147 = vector.load %arg19[%c1_79, %c0_80, %c0_81] : memref<18x18x64xbf16, #tpu.memory_space<vmem>>, vector<16x18x64xbf16>
    tpu.vector_store %arg19[%c1_79, %c0_80, %c0_81], %146 {strides = array<i32>} : memref<18x18x64xbf16, #tpu.memory_space<vmem>>, vector<16x18x64xbf16>,
    %cst_82 = arith.constant 0.000000e+00 : bf16
    %148 = vector.broadcast %cst_82 : bf16 to vector<1x18x64xbf16>
    %c0_83 = arith.constant 0 : index
    %c0_84 = arith.constant 0 : index
    %c0_85 = arith.constant 0 : index
    %149 = vector.load %arg19[%c0_83, %c0_84, %c0_85] : memref<18x18x64xbf16, #tpu.memory_space<vmem>>, vector<1x18x64xbf16>
    tpu.vector_store %arg19[%c0_83, %c0_84, %c0_85], %148 {strides = array<i32>} : memref<18x18x64xbf16, #tpu.memory_space<vmem>>, vector<1x18x64xbf16>,
    %c17_86 = arith.constant 17 : index
    %c0_87 = arith.constant 0 : index
    %c0_88 = arith.constant 0 : index
    %150 = vector.load %arg19[%c17_86, %c0_87, %c0_88] : memref<18x18x64xbf16, #tpu.memory_space<vmem>>, vector<1x18x64xbf16>
    tpu.vector_store %arg19[%c17_86, %c0_87, %c0_88], %148 {strides = array<i32>} : memref<18x18x64xbf16, #tpu.memory_space<vmem>>, vector<1x18x64xbf16>,
    %c0_89 = arith.constant 0 : index
    %c0_90 = arith.constant 0 : index
    %151 = vector.load %arg13[%c0_89, %c0_90] : memref<3x576xf32, #tpu.memory_space<vmem>>, vector<3x576xf32>
    %152 = tpu.transpose %151, [1, 0] : vector<3x576xf32> -> vector<576x3xf32>
    %153 = arith.truncf %152 : vector<576x3xf32> to vector<576x3xbf16>
    %c0_91 = arith.constant 0 : index
    %c0_92 = arith.constant 0 : index
    %c0_93 = arith.constant 0 : index
    %154 = vector.load %arg19[%c0_91, %c0_92, %c0_93] : memref<18x18x64xbf16, #tpu.memory_space<vmem>>, vector<18x18x64xbf16>
    %c0_94 = arith.constant 0 : index
    %c0_95 = arith.constant 0 : index
    %155 = vector.load %arg14[%c0_94, %c0_95] : memref<1x3xf32, #tpu.memory_space<vmem>>, vector<1x3xf32>
    %156 = vector.extract_strided_slice %154 {offsets = [0, 0, 0], sizes = [16, 16, 64], strides = [1, 1, 1]} : vector<18x18x64xbf16> to vector<16x16x64xbf16>
    %157 = vector.shape_cast %156 : vector<16x16x64xbf16> to vector<256x64xbf16>
    %158 = vector.extract_strided_slice %154 {offsets = [0, 1, 0], sizes = [16, 16, 64], strides = [1, 1, 1]} : vector<18x18x64xbf16> to vector<16x16x64xbf16>
    %159 = vector.shape_cast %158 : vector<16x16x64xbf16> to vector<256x64xbf16>
    %160 = vector.extract_strided_slice %154 {offsets = [0, 2, 0], sizes = [16, 16, 64], strides = [1, 1, 1]} : vector<18x18x64xbf16> to vector<16x16x64xbf16>
    %161 = vector.shape_cast %160 : vector<16x16x64xbf16> to vector<256x64xbf16>
    %162 = vector.extract_strided_slice %154 {offsets = [1, 0, 0], sizes = [16, 16, 64], strides = [1, 1, 1]} : vector<18x18x64xbf16> to vector<16x16x64xbf16>
    %163 = vector.shape_cast %162 : vector<16x16x64xbf16> to vector<256x64xbf16>
    %164 = vector.extract_strided_slice %154 {offsets = [1, 1, 0], sizes = [16, 16, 64], strides = [1, 1, 1]} : vector<18x18x64xbf16> to vector<16x16x64xbf16>
    %165 = vector.shape_cast %164 : vector<16x16x64xbf16> to vector<256x64xbf16>
    %166 = vector.extract_strided_slice %154 {offsets = [1, 2, 0], sizes = [16, 16, 64], strides = [1, 1, 1]} : vector<18x18x64xbf16> to vector<16x16x64xbf16>
    %167 = vector.shape_cast %166 : vector<16x16x64xbf16> to vector<256x64xbf16>
    %168 = vector.extract_strided_slice %154 {offsets = [2, 0, 0], sizes = [16, 16, 64], strides = [1, 1, 1]} : vector<18x18x64xbf16> to vector<16x16x64xbf16>
    %169 = vector.shape_cast %168 : vector<16x16x64xbf16> to vector<256x64xbf16>
    %170 = vector.extract_strided_slice %154 {offsets = [2, 1, 0], sizes = [16, 16, 64], strides = [1, 1, 1]} : vector<18x18x64xbf16> to vector<16x16x64xbf16>
    %171 = vector.shape_cast %170 : vector<16x16x64xbf16> to vector<256x64xbf16>
    %172 = vector.extract_strided_slice %154 {offsets = [2, 2, 0], sizes = [16, 16, 64], strides = [1, 1, 1]} : vector<18x18x64xbf16> to vector<16x16x64xbf16>
    %173 = vector.shape_cast %172 : vector<16x16x64xbf16> to vector<256x64xbf16>
    %174 = tpu.concatenate %157, %159 in 1 : vector<256x64xbf16>, vector<256x64xbf16> -> vector<256x128xbf16>
    %175 = tpu.concatenate %161, %163 in 1 : vector<256x64xbf16>, vector<256x64xbf16> -> vector<256x128xbf16>
    %176 = tpu.concatenate %165, %167 in 1 : vector<256x64xbf16>, vector<256x64xbf16> -> vector<256x128xbf16>
    %177 = tpu.concatenate %169, %171 in 1 : vector<256x64xbf16>, vector<256x64xbf16> -> vector<256x128xbf16>
    %178 = tpu.concatenate %174, %175, %176, %177, %173 in 1 : vector<256x128xbf16>, vector<256x128xbf16>, vector<256x128xbf16>, vector<256x128xbf16>, vector<256x64xbf16> -> vector<256x576xbf16>
    %cst_96 = arith.constant dense<0.000000e+00> : vector<256x3xf32>
    %179 = tpu.matmul %178, %153, %cst_96 {dimension_numbers = #tpu.dot_dimension_numbers<[1], [0], [0], [1], [0, 0, 1, 1], [], []>} : vector<256x576xbf16>, vector<576x3xbf16>, vector<256x3xf32> -> vector<256x3xf32>
    %180 = vector.broadcast %155 : vector<1x3xf32> to vector<256x3xf32>
    %181 = arith.addf %179, %180 : vector<256x3xf32>
    %cst_97 = arith.constant 0.000000e+00 : f32
    %182 = vector.broadcast %cst_97 : f32 to vector<256x3xf32>
    %183 = arith.cmpf ogt, %181, %182 : vector<256x3xf32>
    %cst_98 = arith.constant 2.000000e-01 : f32
    %184 = vector.broadcast %cst_98 : f32 to vector<256x3xf32>
    %185 = arith.mulf %184, %181 : vector<256x3xf32>
    %186 = arith.select %183, %181, %185 : vector<256x3xi1>, vector<256x3xf32>
    %187 = tpu.transpose %186, [1, 0] : vector<256x3xf32> -> vector<3x256xf32>
    %c0_99 = arith.constant 0 : index
    %c0_100 = arith.constant 0 : index
    %c0_101 = arith.constant 0 : index
    %188 = vector.load %arg15[%c0_99, %c0_100, %c0_101] : memref<1x3x256xf32, #tpu.memory_space<vmem>>, vector<1x3x256xf32>
    %189 = vector.shape_cast %188 : vector<1x3x256xf32> to vector<3x256xf32>
    %190 = vector.shape_cast %187 : vector<3x256xf32> to vector<1x3x256xf32>
    tpu.vector_store %arg15[%c0_99, %c0_100, %c0_101], %190 {strides = array<i32>} : memref<1x3x256xf32, #tpu.memory_space<vmem>>, vector<1x3x256xf32>,
    return
  }
  func.func @transform_0(%arg0: i32) -> (i32, i32, i32, i32) {
    %c0_i32 = arith.constant 0 : i32
    %c0_i32_0 = arith.constant 0 : i32
    %c0_i32_1 = arith.constant 0 : i32
    %c0_i32_2 = arith.constant 0 : i32
    return %arg0, %c0_i32, %c0_i32_0, %c0_i32_1 : i32, i32, i32, i32
  }
  func.func @transform_1(%arg0: i32) -> (i32, i32) {
    %c0_i32 = arith.constant 0 : i32
    %c0_i32_0 = arith.constant 0 : i32
    %c0_i32_1 = arith.constant 0 : i32
    return %c0_i32, %c0_i32_0 : i32, i32
  }
  func.func @transform_2(%arg0: i32) -> (i32, i32) {
    %c0_i32 = arith.constant 0 : i32
    %c0_i32_0 = arith.constant 0 : i32
    %c0_i32_1 = arith.constant 0 : i32
    return %c0_i32, %c0_i32_0 : i32, i32
  }
  func.func @transform_3(%arg0: i32) -> (i32, i32) {
    %c0_i32 = arith.constant 0 : i32
    %c0_i32_0 = arith.constant 0 : i32
    %c0_i32_1 = arith.constant 0 : i32
    return %c0_i32, %c0_i32_0 : i32, i32
  }
  func.func @transform_4(%arg0: i32) -> (i32, i32) {
    %c0_i32 = arith.constant 0 : i32
    %c0_i32_0 = arith.constant 0 : i32
    %c0_i32_1 = arith.constant 0 : i32
    return %c0_i32, %c0_i32_0 : i32, i32
  }
  func.func @transform_5(%arg0: i32) -> (i32, i32) {
    %c0_i32 = arith.constant 0 : i32
    %c0_i32_0 = arith.constant 0 : i32
    %c0_i32_1 = arith.constant 0 : i32
    return %c0_i32, %c0_i32_0 : i32, i32
  }
  func.func @transform_6(%arg0: i32) -> (i32, i32) {
    %c0_i32 = arith.constant 0 : i32
    %c0_i32_0 = arith.constant 0 : i32
    %c0_i32_1 = arith.constant 0 : i32
    return %c0_i32, %c0_i32_0 : i32, i32
  }
  func.func @transform_7(%arg0: i32) -> (i32, i32) {
    %c0_i32 = arith.constant 0 : i32
    %c0_i32_0 = arith.constant 0 : i32
    %c0_i32_1 = arith.constant 0 : i32
    return %c0_i32, %c0_i32_0 : i32, i32
  }
  func.func @transform_8(%arg0: i32) -> (i32, i32) {
    %c0_i32 = arith.constant 0 : i32
    %c0_i32_0 = arith.constant 0 : i32
    %c0_i32_1 = arith.constant 0 : i32
    return %c0_i32, %c0_i32_0 : i32, i32
  }
  func.func @transform_9(%arg0: i32) -> (i32, i32) {
    %c0_i32 = arith.constant 0 : i32
    %c0_i32_0 = arith.constant 0 : i32
    %c0_i32_1 = arith.constant 0 : i32
    return %c0_i32, %c0_i32_0 : i32, i32
  }
  func.func @transform_10(%arg0: i32) -> (i32, i32) {
    %c0_i32 = arith.constant 0 : i32
    %c0_i32_0 = arith.constant 0 : i32
    %c0_i32_1 = arith.constant 0 : i32
    return %c0_i32, %c0_i32_0 : i32, i32
  }
  func.func @transform_11(%arg0: i32) -> (i32, i32) {
    %c0_i32 = arith.constant 0 : i32
    %c0_i32_0 = arith.constant 0 : i32
    %c0_i32_1 = arith.constant 0 : i32
    return %c0_i32, %c0_i32_0 : i32, i32
  }
  func.func @transform_12(%arg0: i32) -> (i32, i32) {
    %c0_i32 = arith.constant 0 : i32
    %c0_i32_0 = arith.constant 0 : i32
    %c0_i32_1 = arith.constant 0 : i32
    return %c0_i32, %c0_i32_0 : i32, i32
  }
  func.func @transform_13(%arg0: i32) -> (i32, i32) {
    %c0_i32 = arith.constant 0 : i32
    %c0_i32_0 = arith.constant 0 : i32
    %c0_i32_1 = arith.constant 0 : i32
    return %c0_i32, %c0_i32_0 : i32, i32
  }
  func.func @transform_14(%arg0: i32) -> (i32, i32, i32) {
    %c0_i32 = arith.constant 0 : i32
    %c0_i32_0 = arith.constant 0 : i32
    %c0_i32_1 = arith.constant 0 : i32
    return %arg0, %c0_i32, %c0_i32_0 : i32, i32, i32
  }
}

</mosaic_0001>

<bundles_post_ra>
// kernel: fubranch_forward.1
= control target key start
LH: loop header
LB: loop body
LE: loop exit
PB: predicated region body
PF: predicated region fallthrough
CT: control target
= control target key end

     0   :  { %s13067_s29 = smov 0   ;;  %s17631_s0 = inlined_call_operand.vmem [shape: f32[2,8,8,128], index: 0, kind: input, shape index: {}]   ;;  %s17632_s1 = inlined_call_operand.vmem [shape: f32[128,128], index: 1, kind: input, shape index: {}]   ;;  %s17633_s2 = inlined_call_operand.vmem [shape: f32[1,128], index: 2, kind: input, shape index: {}]   ;;  %s17634_s3 = inlined_call_operand.vmem [shape: f32[128,128], index: 3, kind: input, shape index: {}]   ;;  %s17635_s4 = inlined_call_operand.vmem [shape: f32[1,128], index: 4, kind: input, shape index: {}]   ;;  %s17636_s5 = inlined_call_operand.vmem [shape: bf16[256,64], index: 5, kind: input, shape index: {}]   ;;  %s17637_s6 = inlined_call_operand.vmem [shape: bf16[1152,128], index: 6, kind: input, shape index: {}]   ;;  %s17638_s7 = inlined_call_operand.vmem [shape: f32[1,128], index: 7, kind: input, shape index: {}]   ;;  %s17639_s8 = inlined_call_operand.vmem [shape: bf16[1152,64], index: 8, kind: input, shape index: {}]   ;;  %s17640_s9 = inlined_call_operand.vmem [shape: f32[1,64], index: 9, kind: input, shape index: {}]   ;;  %s17641_s10 = inlined_call_operand.vmem [shape: bf16[576,64], index: 10, kind: input, shape index: {}]   ;;  %s17642_s11 = inlined_call_operand.vmem [shape: f32[1,64], index: 11, kind: input, shape index: {}]   ;;  %s17643_s12 = inlined_call_operand.vmem [shape: f32[3,576], index: 12, kind: input, shape index: {}]   ;;  %s17644_s13 = inlined_call_operand.vmem [shape: f32[1,3], index: 13, kind: input, shape index: {}]   ;;  %s17645_s14 = inlined_call_operand.vmem [shape: f32[2,3,256], index: 14, kind: output, shape index: {}]  }
   0x1 LB: > { %s10132_s30 = sadd.s32 4294967295, %s12985_s29   ;;  %p10136_p0 = scmp.ge.s32.totalorder %s12985_s29, 1  ;;  %s12985_s29 = sphi %s13067_s29, %s24_s29  }
   0x2   : > { %p412_p1 = scmp.lt.s32.totalorder %s12985_s29, 3 }
   0x4   : > { %p413_p2 = pnand %p10136_p0, %p412_p1 }
   0x6   : > { %416 = sbr.rel (%p413_p2) target bundleno = 2910 (0xb5e), region = 76 }
   0xd   : > { %v492_v0 = vld [vmem:[%s17632_s1] sm:$0xff]  ;;  %v493_v1 = vld [vmem:[%s17632_s1 + $0x8] sm:$0xff]  ;;  %v494_v2 = vld [vmem:[%s17632_s1 + $0x10] sm:$0xff]  ;;  %v12987_v3 = vmov 0.0|0.0   ;;  %vm12988_vm0 = vmmov 0   ;;  %v12989_v6 = vmov 0.0  }
   0xe   : > { %12463 = vmatprep.subr.bf16.mxu0 %v12987_v3  ;;  %v12464_v4 = vpack.c.bf16 %v493_v1, %v492_v0  ;;  %v495_v5 = vld [vmem:[%s17632_s1 + $0x18] sm:$0xff]  ;;  %12233 = vmatprep.mubr.msk.f32.mxu0 %vm12988_vm0, %v12989_v6  ;;  %p458_p3 = scmp.lt.s32.totalorder %s10132_s30, 1  ;;  %v496_v8 = vld [vmem:[%s17632_s1 + $0x20] sm:$0xff]  ;;  %v497_v9 = vld [vmem:[%s17632_s1 + $0x28] sm:$0xff]  ;;  %vm708_vm1 = vcmask 1040384   ;;  %vm1107_vm2 = vcmask 1042432  }
   0xf   : > { %12487 = vmatprep.subr.bf16.mxu1 %v12987_v3  ;;  %12268 = vmatprep.mubr.msk.f32.mxu1 %vm12988_vm0, %v12989_v6  ;;  %v12467_v7 = vpack.c.bf16 %v495_v5, %v494_v2  ;;  %v579_v10 = vld [vmem:[%s17634_s3] sm:$0xff]  ;;  %v580_v11 = vld [vmem:[%s17634_s3 + $0x8] sm:$0xff]  ;;  %v581_v13 = vld [vmem:[%s17634_s3 + $0x10] sm:$0xff]  ;;  %v12470_v15 = vpack.c.bf16 %v497_v9, %v496_v8  ;;  %vm1108_vm3 = vcmask 1046532   ;;  %vm976_vm4 = vsmask.f32 3328 }
  0x10   : > { %12465 = vmatpush3.bf16.msra.mxu0 %v12464_v4  ;;  %s17876_s30 = smov (!%p458_p3, %s10132_s30), 1  ;;  %v12488_v12 = vpack.c.bf16 %v580_v11, %v579_v10  ;;  %v582_v14 = vld [vmem:[%s17634_s3 + $0x18] sm:$0xff]  ;;  %v498_v19 = vld [vmem:[%s17632_s1 + $0x30] sm:$0xff]  ;;  %v583_v24 = vld [vmem:[%s17634_s3 + $0x20] sm:$0xff]  ;;  %vm977_vm5 = vsmask.f32 7440 }
  0x11   : > { %12466 = vmatprep.subr.bf16.mxu0 %v12987_v3  ;;  %s10805_s27 = sshll.u32 %s17876_s30, 6  ;;  %v499_v20 = vld [vmem:[%s17632_s1 + $0x38] sm:$0xff]  ;;  %v12491_v22 = vpack.c.bf16 %v582_v14, %v581_v13  ;;  %v584_v25 = vld [vmem:[%s17634_s3 + $0x28] sm:$0xff]  ;;  %v500_v28 = vld [vmem:[%s17632_s1 + $0x40] sm:$0xff]  ;;  %vm2169_vm8 = vcmask 523264   ;;  %s10806_s19 = sshll.u32 %s17876_s30, 3 }
  0x12   : > { %s13108_s20 = scalar_lea.vmem %s17631_s0, %s10805_s27  ;;  %12489 = vmatpush3.bf16.msra.mxu1 %v12488_v12  ;;  %v12473_v27 = vpack.c.bf16 %v499_v20, %v498_v19  ;;  %v501_v29 = vld [vmem:[%s17632_s1 + $0x48] sm:$0xff]  ;;  %v12494_v33 = vpack.c.bf16 %v584_v25, %v583_v24  ;;  %v585_v34 = vld [vmem:[%s17634_s3 + $0x30] sm:$0xff]  ;;  %v586_v35 = vld [vmem:[%s17634_s3 + $0x38] sm:$0xff]  ;;  %s12991_s27 = smov 64  }
  0x13   : > { %v469_v16 = vld [vmem:[%s13108_s20] sm:$0xff]  ;;  %v470_v17 = vld [vmem:[%s13108_s20 + $0x8] sm:$0xff]  ;;  %v471_v18 = vld [vmem:[%s13108_s20 + $0x10] sm:$0xff]  ;;  %12490 = vmatprep.subr.bf16.mxu1 %v12987_v3  ;;  %v12476_v40 = vpack.c.bf16 %v501_v29, %v500_v28  ;;  %v12497_v45 = vpack.c.bf16 %v586_v35, %v585_v34  ;;  %v17646_v34 = vmov 0   ;;  %s467_s23 = scalar_lea.vmem %s17645_s14, %s10806_s19 }
  0x14   : > { %12468 = vmatpush3.bf16.msra.mxu0 %v12467_v7  ;;  %v477_v21 = vadd.f32 %v470_v17, %v469_v16  ;;  %v472_v23 = vld [vmem:[%s13108_s20 + $0x18] sm:$0xff]  ;;  %v473_v30 = vld [vmem:[%s13108_s20 + $0x20] sm:$0xff]  ;;  %v474_v31 = vld [vmem:[%s13108_s20 + $0x28] sm:$0xff]  ;;  %806 = vst [vmem:[#allocation2] sm:$0xf] %v17646_v34 }
  0x15   : > { %12469 = vmatprep.subr.bf16.mxu0 %v12987_v3  ;;  %v475_v36 = vld [vmem:[%s13108_s20 + $0x30] sm:$0xff]  ;;  %v503_v38 = vld [vmem:[%s17632_s1 + $0x58] sm:$0xff]  ;;  %v587_v42 = vld [vmem:[%s17634_s3 + $0x40] sm:$0xff]  ;;  %807 = vst [vmem:[#allocation2 + $0x4] sm:$0x1] %v17646_v34 }
  0x16   : > { %v478_v26 = vadd.f32 %v477_v21, %v471_v18  ;;  %12492 = vmatpush3.bf16.msra.mxu1 %v12491_v22  ;;  %v502_v37 = vld [vmem:[%s17632_s1 + $0x50] sm:$0xff]  ;;  %v476_v41 = vld [vmem:[%s13108_s20 + $0x38] sm:$0xff]  ;;  %v588_v43 = vld [vmem:[%s17634_s3 + $0x48] sm:$0xff]  ;;  %809 = vst [vmem:[#allocation2 + $0x48] sm:$0xf] %v17646_v34 }
  0x17   : > { %12493 = vmatprep.subr.bf16.mxu1 %v12987_v3  ;;  %v504_v46 = vld [vmem:[%s17632_s1 + $0x60] sm:$0xff]  ;;  %v505_v47 = vld [vmem:[%s17632_s1 + $0x68] sm:$0xff]  ;;  %v12479_v49 = vpack.c.bf16 %v503_v38, %v502_v37  ;;  %v589_v50 = vld [vmem:[%s17634_s3 + $0x50] sm:$0xff]  ;;  %v12500_v53 = vpack.c.bf16 %v588_v43, %v587_v42  ;;  %810 = vst [vmem:[#allocation2 + $0x4c] sm:$0x1] %v17646_v34 }
  0x18   : > { %12471 = vmatpush3.bf16.msra.mxu0 %v12470_v15  ;;  %v479_v32 = vadd.f32 %v478_v26, %v472_v23  ;;  %v590_v51 = vld [vmem:[%s17634_s3 + $0x58] sm:$0xff]  ;;  %v506_v54 = vld [vmem:[%s17632_s1 + $0x70] sm:$0xff]  ;;  %v12482_v57 = vpack.c.bf16 %v505_v47, %v504_v46  ;;  %v591_v58 = vld [vmem:[%s17634_s3 + $0x60] sm:$0xff]  ;;  %2796 = vst [vmem:[#allocation3] sm:$0xf] %v17646_v34 }
  0x19   : > { %12472 = vmatprep.subr.bf16.mxu0 %v12987_v3  ;;  %v507_v55 = vld [vmem:[%s17632_s1 + $0x78] sm:$0xff]  ;;  %v592_v59 = vld [vmem:[%s17634_s3 + $0x68] sm:$0xff]  ;;  %v12503_v61 = vpack.c.bf16 %v590_v51, %v589_v50  ;;  %v593_v6 = vld [vmem:[%s17634_s3 + $0x70] sm:$0xff]  ;;  %2797 = vst [vmem:[#allocation3 + $0x4] sm:$0xf] %v17646_v34 }
  0x1a   : > { %v480_v39 = vadd.f32 %v479_v32, %v473_v30  ;;  %12495 = vmatpush3.bf16.msra.mxu1 %v12494_v33  ;;  %v12485_v63 = vpack.c.bf16 %v507_v55, %v506_v54  ;;  %v12506_v1 = vpack.c.bf16 %v592_v59, %v591_v58  ;;  %v594_v7 = vld [vmem:[%s17634_s3 + $0x78] sm:$0xff]  ;;  %v508_v9 = vld [vmem:[%s17633_s2] sm:$0x1]  ;;  %v12690_v14 = vld [vmem:[%s17637_s6 + $0xc8] sm:$0xff]   ;;  %2798 = vst [vmem:[#allocation3 + $0x8] sm:$0x1] %v17646_v34  ;;  %v672_v54 = vlaneseq }
  0x1b   : > { %12496 = vmatprep.subr.bf16.mxu1 %v12987_v3  ;;  %v12509_v8 = vpack.c.bf16 %v594_v7, %v593_v6  ;;  %v12689_v13 = vld [vmem:[%s17637_s6 + $0x80] sm:$0xff]   ;;  %v12691_v15 = vld [vmem:[%s17637_s6 + $0x88] sm:$0xff]   ;;  %v12694_v18 = vld [vmem:[%s17637_s6 + $0xd0] sm:$0xff]   ;;  %2800 = vst [vmem:[#allocation3 + $0xcc] sm:$0xf] %v17646_v34 }
  0x1c   : > { %12474 = vmatpush3.bf16.msra.mxu0 %v12473_v27  ;;  %v481_v44 = vadd.f32 %v480_v39, %v474_v31  ;;  %v12692_v16 = vld [vmem:[%s17637_s6 + $0x40] sm:$0xff]   ;;  %v12695_v19 = vld [vmem:[%s17637_s6 + $0x90] sm:$0xff]   ;;  %v12696_v20 = vld [vmem:[%s17637_s6 + $0x48] sm:$0xff]   ;;  %2801 = vst [vmem:[#allocation3 + $0xd0] sm:$0xf] %v17646_v34 }
  0x1d   : > { %12475 = vmatprep.subr.bf16.mxu0 %v12987_v3  ;;  %v12693_v17 = vld [vmem:[%s17637_s6] sm:$0xff]   ;;  %v12697_v21 = vld [vmem:[%s17637_s6 + $0x8] sm:$0xff]   ;;  %v12698_v22 = vld [vmem:[%s17637_s6 + $0xd8] sm:$0xff]   ;;  %2802 = vst [vmem:[#allocation3 + $0xd4] sm:$0x1] %v17646_v34 }
  0x1e   : > { %v482_v48 = vadd.f32 %v481_v44, %v475_v36  ;;  %12498 = vmatpush3.bf16.msra.mxu1 %v12497_v45  ;;  %v12699_v23 = vld [vmem:[%s17637_s6 + $0x98] sm:$0xff]   ;;  %v12700_v24 = vld [vmem:[%s17637_s6 + $0x50] sm:$0xff]   ;;  %v12702_v25 = vld [vmem:[%s17637_s6 + $0xe0] sm:$0xff]  }
  0x1f   : > { %12499 = vmatprep.subr.bf16.mxu1 %v12987_v3  ;;  %v12701_v26 = vld [vmem:[%s17637_s6 + $0x10] sm:$0xff]   ;;  %v12703_v27 = vld [vmem:[%s17637_s6 + $0xa0] sm:$0xff]   ;;  %v12704_v28 = vld [vmem:[%s17637_s6 + $0x58] sm:$0xff]  }
  0x20   : > { %12477 = vmatpush3.bf16.msra.mxu0 %v12476_v40  ;;  %v483_v52 = vadd.f32 %v482_v48, %v476_v41  ;;  %v12706_v29 = vld [vmem:[%s17637_s6 + $0xe8] sm:$0xff]   ;;  %v12705_v30 = vld [vmem:[%s17637_s6 + $0x18] sm:$0xff]   ;;  %v12708_v32 = vld [vmem:[%s17637_s6 + $0x60] sm:$0xff]  }
  0x21   : > { %12478 = vmatprep.subr.bf16.mxu0 %v12987_v3  ;;  %v12707_v31 = vld [vmem:[%s17637_s6 + $0xa8] sm:$0xff]   ;;  %v12710_v33 = vld [vmem:[%s17637_s6 + $0xf0] sm:$0xff]   ;;  %v12709_v35 = vld [vmem:[%s17637_s6 + $0x20] sm:$0xff]  }
  0x22   : > { %v484_v56 = vrot.slane %v483_v52, 4  ;;  %12501 = vmatpush3.bf16.msra.mxu1 %v12500_v53  ;;  %v12711_v36 = vld [vmem:[%s17637_s6 + $0xb0] sm:$0xff]   ;;  %v12712_v37 = vld [vmem:[%s17637_s6 + $0x68] sm:$0xff]   ;;  %v12714_v38 = vld [vmem:[%s17637_s6 + $0xf8] sm:$0xff]  }
  0x23   : > { %12502 = vmatprep.subr.bf16.mxu1 %v12987_v3  ;;  %v12713_v39 = vld [vmem:[%s17637_s6 + $0x28] sm:$0xff]   ;;  %v12715_v40 = vld [vmem:[%s17637_s6 + $0xb8] sm:$0xff]   ;;  %v12717_v41 = vld [vmem:[%s17637_s6 + $0x70] sm:$0xff]  }
  0x24   : > { %12480 = vmatpush3.bf16.msra.mxu0 %v12479_v49  ;;  %v485_v60 = vadd.f32 %v484_v56, %v483_v52  ;;  %v12718_v42 = vld [vmem:[%s17637_s6 + $0x30] sm:$0xff]   ;;  %v12719_v43 = vld [vmem:[%s17637_s6 + $0x1c0] sm:$0xff]   ;;  %v12722_v44 = vld [vmem:[%s17637_s6 + $0x78] sm:$0xff]   ;;  %v673_v56 = vshrl.u32 %v672_v54, 7 }
  0x25   : > { %12481 = vmatprep.subr.bf16.mxu0 %v12987_v3  ;;  %v12723_v45 = vld [vmem:[%s17637_s6 + $0x38] sm:$0xff]   ;;  %v12726_v46 = vld [vmem:[%s17637_s6 + $0x140] sm:$0xff]   ;;  %v12947_v7 = vld [vmem:[%s13108_s20 + $0x8] sm:$0xff] }
  0x26   : > { %v486_v62 = vrot.slane %v485_v60, 2  ;;  %12504 = vmatpush3.bf16.msra.mxu1 %v12503_v61  ;;  %v595_v47 = vld [vmem:[%s17635_s4] sm:$0x1]  ;;  %v674_v59 = vsub.s32 0, %v673_v56  ;;  %vm13362_vm6 = vmor %vm1107_vm2, %vm1108_vm3  ;;  %vm5538_vm2 = vcmask 519168   ;;  %vm5541_vm3 = vcmask 516096  }
  0x27   : > { %12505 = vmatprep.subr.bf16.mxu1 %v12987_v3  ;;  %v13321_v55 = vld [vmem:[#allocation2] sm:$0xf]  ;;  %vm13377_vm7 = vmor %vm976_vm4, %vm977_vm5 }
  0x28   : > { %12483 = vmatpush3.bf16.msra.mxu0 %v12482_v57  ;;  %v487_v0 = vadd.f32 %v486_v62, %v485_v60  ;;  %v980_v57 = vshrl.u32 %v13321_v55, 16  ;;  %v983_v58 = vshll.u32 %v13321_v55, 16 }
  0x29   : > { %12484 = vmatprep.subr.bf16.mxu0 %v12987_v3 }
  0x2a   : > { %v488_v2 = vrot.slane %v487_v0, 1  ;;  %12507 = vmatpush3.bf16.msra.mxu1 %v12506_v1  ;;  %v13325_v60 = vrot.slane %v980_v57, 4  ;;  %v13327_v61 = vrot.slane %v983_v58, 5  ;;  %v10158_v1 = vrot.slane %v13321_v55, 9 }
  0x2b   : > { %12508 = vmatprep.subr.bf16.mxu1 %v12987_v3  ;;  %v12688_v3 = vld [vmem:[%s17637_s6 + $0xc0] sm:$0xff]  }
  0x2c   : > { %12486 = vmatpush3.bf16.msra.mxu0 %v12485_v63  ;;  %v489_v4 = vadd.f32 %v488_v2, %v487_v0  ;;  %v13329_v0 = vld [vmem:[#allocation2 + $0x4] sm:$0x1]  ;;  %v986_v2 = vor.u32 %v13327_v61, %v13325_v60 }
  0x2d   : > { %11049 = vmatprep.subr.bf16.mxu0 %v12692_v16  ;;  %v12952_v16 = vld [vmem:[%s13108_s20 + $0x30] sm:$0xff]  ;;  %v1112_v58 = vrot.slane %v13329_v0, 5 }
  0x2e   : > { %v491_v5 = vmul.f32 0.015625, %v489_v4  ;;  %12510 = vmatpush3.bf16.msra.mxu1 %v12509_v8  ;;  %v989_v4 = vshll.u32 %v13329_v0, 16 }
  0x2f   : > { %11089 = vmatprep.subr.bf16.mxu1 %v12688_v3  ;;  %v12950_v3 = vld [vmem:[%s13108_s20 + $0x20] sm:$0xff] }
  0x30   : > { %12234 = vmatmul.mubr.f32.vlgmr.msra.gmra.mrb[0].mxu0 %v491_v5  ;;  %v12946_v5 = vld [vmem:[%s13108_s20] sm:$0xff] }
  0x31   : > { %11050 = vmatpush3.bf16.msra.mxu0 %v12693_v17 }
  0x32   : > { %11051 = vmatprep.subr.bf16.mxu0 %v12696_v20 }
  0x35   : > { %11052 = vmatpush3.bf16.msra.mxu0 %v12697_v21 }
  0x36   : > { %11053 = vmatprep.subr.bf16.mxu0 %v12700_v24 }
  0x39   : > { %11054 = vmatpush3.bf16.msra.mxu0 %v12701_v26 }
  0x3a   : > { %11055 = vmatprep.subr.bf16.mxu0 %v12704_v28 }
  0x3d   : > { %11056 = vmatpush3.bf16.msra.mxu0 %v12705_v30 }
  0x3e   : > { %11057 = vmatprep.subr.bf16.mxu0 %v12708_v32 }
  0x41   : > { %11058 = vmatpush3.bf16.msra.mxu0 %v12709_v35 }
  0x42   : > { %11059 = vmatprep.subr.bf16.mxu0 %v12712_v37 }
  0x45   : > { %11060 = vmatpush3.bf16.msra.mxu0 %v12713_v39 }
  0x46   : > { %11061 = vmatprep.subr.bf16.mxu0 %v12717_v41 }
  0x49   : > { %11062 = vmatpush3.bf16.msra.mxu0 %v12718_v42 }
  0x4a   : > { %11063 = vmatprep.subr.bf16.mxu0 %v12722_v44 }
  0x4d   : > { %11064 = vmatpush3.bf16.msra.mxu0 %v12723_v45 }
  0x4e   : > { %11129 = vmatprep.subr.bf16.mxu0 %v12726_v46 }
 0x103   : > { %v575_v10 = vpop.f32.mrb[0].mxu0 }
 0x104   : > { %v576_v11 = vadd.f32 %v575_v10, %v508_v9  ;;  %v12235_v12 = vpop.f32.mrb[1].mxu0  ;;  %v12948_v9 = vld [vmem:[%s13108_s20 + $0x10] sm:$0xff] }
 0x106   : > { %12269 = vmatmul.mubr.f32.vlgmr.msra.gmra.mrb[0].mxu1 %v576_v11  ;;  %v12949_v11 = vld [vmem:[%s13108_s20 + $0x18] sm:$0xff] }
 0x107   : > { %11090 = vmatpush3.bf16.msra.mxu1 %v12689_v13 }
 0x108   : > { %11091 = vmatprep.subr.bf16.mxu1 %v12690_v14  ;;  %v12951_v14 = vld [vmem:[%s13108_s20 + $0x28] sm:$0xff] }
 0x10b   : > { %11092 = vmatpush3.bf16.msra.mxu1 %v12691_v15 }
 0x10c   : > { %11093 = vmatprep.subr.bf16.mxu1 %v12694_v18  ;;  %v12953_v18 = vld [vmem:[%s13108_s20 + $0x38] sm:$0xff] }
 0x10f   : > { %11094 = vmatpush3.bf16.msra.mxu1 %v12695_v19 }
 0x110   : > { %11095 = vmatprep.subr.bf16.mxu1 %v12698_v22 }
 0x113   : > { %11096 = vmatpush3.bf16.msra.mxu1 %v12699_v23 }
 0x114   : > { %11097 = vmatprep.subr.bf16.mxu1 %v12702_v25 }
 0x117   : > { %11098 = vmatpush3.bf16.msra.mxu1 %v12703_v27 }
 0x118   : > { %11099 = vmatprep.subr.bf16.mxu1 %v12706_v29 }
 0x11b   : > { %11100 = vmatpush3.bf16.msra.mxu1 %v12707_v31 }
 0x11c   : > { %11101 = vmatprep.subr.bf16.mxu1 %v12710_v33 }
 0x11f   : > { %11102 = vmatpush3.bf16.msra.mxu1 %v12711_v36 }
 0x120   : > { %11103 = vmatprep.subr.bf16.mxu1 %v12714_v38 }
 0x123   : > { %11104 = vmatpush3.bf16.msra.mxu1 %v12715_v40 }
 0x124   : > { %11169 = vmatprep.subr.bf16.mxu1 %v12719_v43 }
 0x1d9   : > { %v662_v48 = vpop.f32.mrb[0].mxu1 }
 0x1da   : > { %v663_v49 = vadd.f32 %v662_v48, %v595_v47  ;;  %v12270_v50 = vpop.f32.mrb[1].mxu1 }
 0x1dc   : > { %v10141_v51 = vmul.f32 -1.442695, %v663_v49 }
 0x1de   : > { %12942 = vpow2.f32 %v10141_v51 }
 0x1e8   : > { %v12943_v52 = vpop.eup %12942 }
 0x1e9   : > { %v669_v53 = vadd.f32 1.0, %v12943_v52 }
 0x1eb   : > { %12944 = vrcp.f32 %v669_v53 }
 0x1f5   : > { %v12945_v62 = vpop.eup %12944 }
 0x1f6   : > { %v675_v63 = vrot.slane %v12945_v62, %v674_v59 }
 0x1f8   : > { %v676_v6 = vmul.f32 %v12946_v5, %v675_v63  ;;  %v677_v8 = vmul.f32 %v12947_v7, %v675_v63  ;;  %v678_v10 = vmul.f32 %v12948_v9, %v675_v63  ;;  %v679_v12 = vmul.f32 %v12949_v11, %v675_v63 }
 0x1f9   : > { %v680_v13 = vmul.f32 %v12950_v3, %v675_v63  ;;  %v681_v15 = vmul.f32 %v12951_v14, %v675_v63  ;;  %v682_v17 = vmul.f32 %v12952_v16, %v675_v63  ;;  %v683_v19 = vmul.f32 %v12953_v18, %v675_v63 }
 0x1fa   : > { %v692_v20 = vrot.slane %v676_v6, 7  ;;  %v693_v21 = vrot.slane %v677_v8, 7  ;;  %v694_v22 = vrot.slane %v678_v10, 7  ;;  %v695_v23 = vrot.slane %v679_v12, 7 }
 0x1fb   : > { %v696_v24 = vrot.slane %v680_v13, 7  ;;  %v697_v25 = vrot.slane %v681_v15, 7  ;;  %v698_v26 = vrot.slane %v682_v17, 7  ;;  %v699_v27 = vrot.slane %v683_v19, 7  ;;  %v12721_v19 = vld [vmem:[%s17637_s6 + $0x180] sm:$0xff]  }
 0x1fc   : > { %v709_v28 = vsel %vm708_vm1, 0.0, %v692_v20  ;;  %v710_v29 = vsel %vm708_vm1, 0.0, %v693_v21  ;;  %v717_v30 = vsel %vm708_vm1, %v692_v20, 0.0  ;;  %v711_v31 = vsel %vm708_vm1, 0.0, %v694_v22 }
 0x1fd   : > { %v10807_v32 = vpack.c.bf16 %v709_v28, %v709_v28  ;;  %v10809_v33 = vpack.c.bf16 %v710_v29, %v710_v29  ;;  %v10808_v35 = vpack.c.bf16 %v717_v30, %v717_v30  ;;  %v712_v36 = vsel %vm708_vm1, 0.0, %v695_v23 }
 0x1fe   : > { %v10811_v37 = vpack.c.bf16 %v711_v31, %v711_v31  ;;  %v10813_v38 = vpack.c.bf16 %v712_v36, %v712_v36  ;;  %v718_v39 = vsel %vm708_vm1, %v693_v21, 0.0  ;;  %v719_v40 = vsel %vm708_vm1, %v694_v22, 0.0 }
 0x1ff   : > { %790 = vst [vmem:[#allocation2 + $0x8] sm:$0xf] %v10807_v32  ;;  %792 = vst [vmem:[#allocation2 + $0x10] sm:$0xf] %v10809_v33  ;;  %v10810_v41 = vpack.c.bf16 %v718_v39, %v718_v39  ;;  %v10812_v42 = vpack.c.bf16 %v719_v40, %v719_v40  ;;  %v713_v43 = vsel %vm708_vm1, 0.0, %v696_v24  ;;  %v714_v44 = vsel %vm708_vm1, 0.0, %v697_v25 }
 0x200   : > { %791 = vst [vmem:[#allocation2 + $0xc] sm:$0x1] %v10808_v35  ;;  %794 = vst [vmem:[#allocation2 + $0x18] sm:$0xf] %v10811_v37  ;;  %v10815_v45 = vpack.c.bf16 %v713_v43, %v713_v43  ;;  %v10817_v46 = vpack.c.bf16 %v714_v44, %v714_v44  ;;  %v720_v47 = vsel %vm708_vm1, %v695_v23, 0.0  ;;  %v721_v48 = vsel %vm708_vm1, %v696_v24, 0.0 }
 0x201   : > { %796 = vst [vmem:[#allocation2 + $0x20] sm:$0xf] %v10813_v38  ;;  %793 = vst [vmem:[#allocation2 + $0x14] sm:$0x1] %v10810_v41  ;;  %v10814_v49 = vpack.c.bf16 %v720_v47, %v720_v47  ;;  %v10816_v50 = vpack.c.bf16 %v721_v48, %v721_v48  ;;  %v715_v51 = vsel %vm708_vm1, 0.0, %v698_v26  ;;  %v716_v52 = vsel %vm708_vm1, 0.0, %v699_v27 }
 0x202   : > { %795 = vst [vmem:[#allocation2 + $0x1c] sm:$0x1] %v10812_v42  ;;  %798 = vst [vmem:[#allocation2 + $0x28] sm:$0xf] %v10815_v45  ;;  %v10819_v53 = vpack.c.bf16 %v715_v51, %v715_v51  ;;  %v10821_v54 = vpack.c.bf16 %v716_v52, %v716_v52  ;;  %v722_v56 = vsel %vm708_vm1, %v697_v25, 0.0  ;;  %v723_v57 = vsel %vm708_vm1, %v698_v26, 0.0 }
 0x203   : > { %800 = vst [vmem:[#allocation2 + $0x30] sm:$0xf] %v10817_v46  ;;  %797 = vst [vmem:[#allocation2 + $0x24] sm:$0x1] %v10814_v49  ;;  %v10818_v59 = vpack.c.bf16 %v722_v56, %v722_v56  ;;  %v10820_v62 = vpack.c.bf16 %v723_v57, %v723_v57  ;;  %v724_v63 = vsel %vm708_vm1, %v699_v27, 0.0  ;;  %v13369_v6 = vrot.slane %v986_v2, 4 }
 0x204   : > { %799 = vst [vmem:[#allocation2 + $0x2c] sm:$0x1] %v10816_v50  ;;  %v13373_v7 = vrot.slane %v989_v4, 5  ;;  %802 = vst [vmem:[#allocation2 + $0x38] sm:$0xf] %v10819_v53  ;;  %v10822_v8 = vpack.c.bf16 %v724_v63, %v724_v63  ;;  %v1113_v2 = vsel %vm13362_vm6, %v10158_v1, %v1112_v58  ;;  %v12724_v24 = vld [vmem:[%s17637_s6 + $0x1c8] sm:$0xff]  }
 0x205   : > { %804 = vst [vmem:[#allocation2 + $0x40] sm:$0xf] %v10821_v54  ;;  %801 = vst [vmem:[#allocation2 + $0x34] sm:$0x1] %v10818_v59  ;;  %v12725_v32 = vld [vmem:[%s17637_s6 + $0x188] sm:$0xff]   ;;  %v12728_v42 = vld [vmem:[%s17637_s6 + $0x1d0] sm:$0xff]  }
 0x206   : > { %803 = vst [vmem:[#allocation2 + $0x3c] sm:$0x1] %v10820_v62  ;;  %v13381_v10 = vld [vmem:[#allocation2 + $0x8] sm:$0xf]  ;;  %v13383_v60 = vld [vmem:[#allocation2 + $0x10] sm:$0xf]  ;;  %v992_v13 = vsel %vm13377_vm7, %v13369_v6, %v13373_v7 }
 0x207   : > { %v814_v61 = vld [vmem:[#allocation2 + $0xc] sm:$0x1]  ;;  %805 = vst [vmem:[#allocation2 + $0x44] sm:$0x1] %v10822_v8  ;;  %v10180_v0 = vcombine.low %v13381_v10, %v13383_v60  ;;  %v10159_v4 = vrot.slane %v13381_v10, 9  ;;  %v994_v14 = vshrl.u32 %v13381_v10, 16  ;;  %v10168_v16 = vcombine.low %v13321_v55, %v13381_v10 }
 0x208   : > { %v1116_v11 = vrot.slane %v814_v61, 5  ;;  %v13392_v12 = vld [vmem:[#allocation2 + $0x18] sm:$0xf]  ;;  %v13394_v3 = vld [vmem:[#allocation2 + $0x20] sm:$0xf]  ;;  %v997_v15 = vshll.u32 %v13381_v10, 16 }
 0x209   : > { %v816_v1 = vld [vmem:[#allocation2 + $0x14] sm:$0x1]  ;;  %1801 = vmatprep.mubr.bf16.mxu1 %v10180_v0  ;;  %v10181_v18 = vcombine.low %v13392_v12, %v13394_v3  ;;  %v818_v20 = vld [vmem:[#allocation2 + $0x1c] sm:$0x1]  ;;  %v1008_v21 = vshrl.u32 %v13383_v60, 16  ;;  %v1011_v22 = vshll.u32 %v13383_v60, 16 }
 0x20a   : > { %v13406_v17 = vsel %vm13362_vm6, %v10159_v4, %v1116_v11  ;;  %v996_v25 = vrot.slane %v994_v14, 4  ;;  %v999_v26 = vrot.slane %v997_v15, 5  ;;  %v1003_v27 = vshll.u32 %v814_v61, 16  ;;  %v13429_v43 = vld [vmem:[#allocation2 + $0x28] sm:$0xf]  ;;  %v12727_v6 = vld [vmem:[%s17637_s6 + $0x100] sm:$0xff]  }
 0x20b   : > { %v10176_v23 = vcombine.low %v1113_v2, %v13406_v17  ;;  %v1010_v28 = vrot.slane %v1008_v21, 4  ;;  %v1013_v29 = vrot.slane %v1011_v22, 5  ;;  %v1017_v30 = vshll.u32 %v816_v1, 16  ;;  %v13431_v48 = vld [vmem:[#allocation2 + $0x30] sm:$0xf]  ;;  %v12731_v4 = vld [vmem:[%s17637_s6 + $0x148] sm:$0xff]  }
 0x20c   : > { %v1022_v31 = vshrl.u32 %v13392_v12, 16  ;;  %v1000_v33 = vor.u32 %v999_v26, %v996_v25  ;;  %v1025_v35 = vshll.u32 %v13392_v12, 16  ;;  %v1031_v36 = vshll.u32 %v818_v20, 16  ;;  %v820_v53 = vld [vmem:[#allocation2 + $0x24] sm:$0x1]  ;;  %v12730_v2 = vld [vmem:[%s17637_s6 + $0x190] sm:$0xff]  }
 0x20d   : > { %1802 = vmatmul.mubr.bf16.vlgmr.msra.gmra.mrb[4].mxu1 %v10176_v23  ;;  %v10160_v37 = vrot.slane %v13383_v60, 9  ;;  %v1014_v38 = vor.u32 %v1013_v29, %v1010_v28  ;;  %v1120_v40 = vrot.slane %v816_v1, 5  ;;  %v10161_v41 = vrot.slane %v13392_v12, 9  ;;  %v822_v58 = vld [vmem:[#allocation2 + $0x2c] sm:$0x1]  ;;  %v12733_v14 = vld [vmem:[%s17637_s6 + $0x1d8] sm:$0xff]  }
 0x20e   : > { %1809 = vmatprep.mubr.bf16.mxu1 %v10181_v18  ;;  %11170 = vmatpush3.bf16.msra.mxu1 %v12721_v19  ;;  %v1024_v39 = vrot.slane %v1022_v31, 4  ;;  %v1001_v44 = vrot.slane %v1000_v33, 4  ;;  %v1005_v45 = vrot.slane %v1003_v27, 5  ;;  %v1027_v46 = vrot.slane %v1025_v35, 5  ;;  %v12732_v21 = vld [vmem:[%s17637_s6 + $0x108] sm:$0xff]   ;;  %v12734_v22 = vld [vmem:[%s17637_s6 + $0x198] sm:$0xff]  }
 0x20f   : > { %11171 = vmatprep.subr.bf16.mxu1 %v12724_v24  ;;  %v1124_v47 = vrot.slane %v818_v20, 5  ;;  %v1015_v49 = vrot.slane %v1014_v38, 4  ;;  %v1019_v50 = vrot.slane %v1017_v30, 5  ;;  %v1033_v51 = vrot.slane %v1031_v36, 5  ;;  %v13491_v26 = vld [vmem:[#allocation2 + $0x38] sm:$0xf] }
 0x210   : > { %v13435_v52 = vsel %vm13362_vm6, %v10160_v37, %v1120_v40  ;;  %v13439_v54 = vsel %vm13377_vm7, %v1001_v44, %v1005_v45  ;;  %v1028_v56 = vor.u32 %v1027_v46, %v1024_v39  ;;  %v1036_v59 = vshrl.u32 %v13394_v3, 16  ;;  %v13493_v27 = vld [vmem:[#allocation2 + $0x40] sm:$0xf]  ;;  %v12735_v29 = vld [vmem:[%s17637_s6 + $0x150] sm:$0xff]   ;;  %v826_v40 = vld [vmem:[#allocation2 + $0x3c] sm:$0x1] }
 0x211   : > { %v13443_v57 = vsel %vm13362_vm6, %v10161_v41, %v1124_v47  ;;  %v10172_v62 = vcombine.low %v992_v13, %v13439_v54  ;;  %v13449_v63 = vsel %vm13377_vm7, %v1015_v49, %v1019_v50  ;;  %v10182_v7 = vcombine.low %v13429_v43, %v13431_v48  ;;  %v824_v33 = vld [vmem:[#allocation2 + $0x34] sm:$0x1] }
 0x212   : > { %11172 = vmatpush3.bf16.msra.mxu1 %v12725_v32  ;;  %v1039_v8 = vshll.u32 %v13394_v3, 16  ;;  %v1029_v61 = vrot.slane %v1028_v56, 4  ;;  %v13459_v0 = vcombine.low %v13435_v52, %v13443_v57  ;;  %v1038_v11 = vrot.slane %v1036_v59, 4  ;;  %v12736_v46 = vld [vmem:[%s17637_s6 + $0x110] sm:$0xff]  }
 0x213   : > { %11173 = vmatprep.subr.bf16.mxu1 %v12728_v42  ;;  %v1045_v13 = vshll.u32 %v820_v53, 16  ;;  %1736 = vmatprep.mubr.bf16.mxu0 %v10172_v62  ;;  %v1050_v1 = vshrl.u32 %v13429_v43, 16  ;;  %v1053_v18 = vshll.u32 %v13429_v43, 16  ;;  %v1059_v19 = vshll.u32 %v822_v58, 16  ;;  %v12740_v62 = vld [vmem:[%s17637_s6 + $0x158] sm:$0xff]  }
 0x214   : > { %v1041_v15 = vrot.slane %v1039_v8, 5  ;;  %1737 = vmatmul.mubr.bf16.vlgmr.msra.gmra.mrb[4].mxu0 %v10168_v16  ;;  %v13477_v20 = vsel %vm13377_vm7, %v1029_v61, %v1033_v51  ;;  %v10162_v23 = vrot.slane %v13394_v3, 9  ;;  %v1128_v24 = vrot.slane %v820_v53, 5  ;;  %v12739_v51 = vld [vmem:[%s17637_s6 + $0x1a0] sm:$0xff]  }
 0x215   : > { %1810 = vmatmul.mubr.bf16.gmra.mrb[8].mxu1 %v13459_v0  ;;  %v13489_v55 = vcombine.low %v13449_v63, %v13477_v20  ;;  %11130 = vmatpush3.bf16.msra.mxu0 %v12727_v6  ;;  %v1052_v16 = vrot.slane %v1050_v1, 4  ;;  %v1055_v25 = vrot.slane %v1053_v18, 5  ;;  %v13497_v28 = vcombine.low %v13383_v60, %v13392_v12  ;;  %v12737_v60 = vld [vmem:[%s17637_s6 + $0x1e0] sm:$0xff]   ;;  %v12742_v6 = vld [vmem:[%s17637_s6 + $0x1e8] sm:$0xff]  }
 0x216   : > { %1817 = vmatprep.mubr.bf16.mxu1 %v10182_v7  ;;  %v1042_v10 = vor.u32 %v1041_v15, %v1038_v11  ;;  %11174 = vmatpush3.bf16.msra.mxu1 %v12730_v2  ;;  %v1047_v30 = vrot.slane %v1045_v13, 5  ;;  %v10163_v31 = vrot.slane %v13429_v43, 9  ;;  %v1132_v32 = vrot.slane %v822_v58, 5  ;;  %v12743_v18 = vld [vmem:[%s17637_s6 + $0x1a8] sm:$0xff]  }
 0x217   : > { %11131 = vmatprep.subr.bf16.mxu0 %v12731_v4  ;;  %1744 = vmatprep.mubr.bf16.mxu0 %v13489_v55  ;;  %v1056_v36 = vor.u32 %v1055_v25, %v1052_v16  ;;  %v1061_v37 = vrot.slane %v1059_v19, 5  ;;  %v13506_v38 = vsel %vm13362_vm6, %v10162_v23, %v1128_v24  ;;  %v10183_v39 = vcombine.low %v13491_v26, %v13493_v27  ;;  %v12744_v19 = vld [vmem:[%s17637_s6 + $0x160] sm:$0xff]   ;;  %v12746_v16 = vld [vmem:[%s17637_s6 + $0x1f0] sm:$0xff]  }
 0x218   : > { %11175 = vmatprep.subr.bf16.mxu1 %v12733_v14  ;;  %v1043_v35 = vrot.slane %v1042_v10, 4  ;;  %v13513_v12 = vsel %vm13362_vm6, %v10163_v31, %v1132_v32  ;;  %v1064_v41 = vshrl.u32 %v13431_v48, 16  ;;  %v1067_v42 = vshll.u32 %v13431_v48, 16  ;;  %v12741_v14 = vld [vmem:[%s17637_s6 + $0x118] sm:$0xff]   ;;  %v12745_v31 = vld [vmem:[%s17637_s6 + $0x120] sm:$0xff]  }
 0x219   : > { %11132 = vmatpush3.bf16.msra.mxu0 %v12732_v21  ;;  %v1057_v45 = vrot.slane %v1056_v36, 4  ;;  %v1073_v47 = vshll.u32 %v824_v33, 16  ;;  %v1078_v49 = vshrl.u32 %v13491_v26, 16  ;;  %v13529_v50 = vcombine.low %v13506_v38, %v13513_v12  ;;  %v12747_v36 = vld [vmem:[%s17637_s6 + $0x1b0] sm:$0xff]  }
 0x21a   : > { %v13521_v44 = vsel %vm13377_vm7, %v1043_v35, %v1047_v30  ;;  %11176 = vmatpush3.bf16.msra.mxu1 %v12734_v22  ;;  %11133 = vmatprep.subr.bf16.mxu0 %v12735_v29  ;;  %v1066_v53 = vrot.slane %v1064_v41, 4  ;;  %v1069_v56 = vrot.slane %v1067_v42, 5  ;;  %v1081_v58 = vshll.u32 %v13491_v26, 16  ;;  %v13613_v41 = vld [vmem:[#allocation2 + $0x48] sm:$0xf]  ;;  %v12754_v42 = vld [vmem:[%s17637_s6 + $0x200] sm:$0xff]  }
 0x21b   : > { %v13537_v59 = vsel %vm13377_vm7, %v1057_v45, %v1061_v37  ;;  %11177 = vmatprep.subr.bf16.mxu1 %v12737_v60  ;;  %v1080_v7 = vrot.slane %v1078_v49, 4  ;;  %v1087_v8 = vshll.u32 %v826_v40, 16  ;;  %v10164_v61 = vrot.slane %v13431_v48, 9  ;;  %v12749_v60 = vld [vmem:[%s17637_s6 + $0x128] sm:$0xff]  }
 0x21c   : > { %1745 = vmatmul.mubr.bf16.gmra.mrb[8].mxu0 %v13497_v28  ;;  %v13549_v2 = vcombine.low %v13521_v44, %v13537_v59  ;;  %v1070_v4 = vor.u32 %v1069_v56, %v1066_v53  ;;  %v1083_v11 = vrot.slane %v1081_v58, 5  ;;  %v1136_v13 = vrot.slane %v824_v33, 5 }
 0x21d   : > { %1818 = vmatmul.mubr.bf16.gmra.mrb[12].mxu1 %v13529_v50  ;;  %11134 = vmatpush3.bf16.msra.mxu0 %v12736_v46  ;;  %v10165_v15 = vrot.slane %v13491_v26, 9  ;;  %v1140_v1 = vrot.slane %v826_v40, 5  ;;  %v1075_v22 = vrot.slane %v1073_v47, 5  ;;  %v1089_v30 = vrot.slane %v1087_v8, 5  ;;  %v12752_v40 = vld [vmem:[%s17637_s6 + $0x170] sm:$0xff]   ;;  %v12755_v47 = vld [vmem:[%s17637_s6 + $0x178] sm:$0xff]  }
 0x21e   : > { %1825 = vmatprep.mubr.bf16.mxu1 %v10183_v39  ;;  %1752 = vmatprep.mubr.bf16.mxu0 %v13549_v2  ;;  %v1071_v21 = vrot.slane %v1070_v4, 4  ;;  %v1084_v23 = vor.u32 %v1083_v11, %v1080_v7  ;;  %v13565_v24 = vsel %vm13362_vm6, %v10164_v61, %v1136_v13  ;;  %v10170_v32 = vcombine.low %v13394_v3, %v13429_v43  ;;  %v12748_v3 = vld [vmem:[%s17637_s6 + $0x168] sm:$0xff]   ;;  %v12750_v43 = vld [vmem:[%s17637_s6 + $0x1f8] sm:$0xff]  }
 0x21f   : > { %11178 = vmatpush3.bf16.msra.mxu1 %v12739_v51  ;;  %11135 = vmatprep.subr.bf16.mxu0 %v12740_v62  ;;  %v13569_v10 = vsel %vm13362_vm6, %v10165_v15, %v1140_v1  ;;  %v12751_v39 = vld [vmem:[%s17637_s6 + $0x1b8] sm:$0xff]   ;;  %v1163_v45 = vshrl.u32 %v13613_v41, 16  ;;  %v10171_v46 = vcombine.low %v13431_v48, %v13491_v26  ;;  %v1143_v49 = vshrl.u32 %v13493_v27, 16  ;;  %v12757_v48 = vld [vmem:[%s17637_s6 + $0x208] sm:$0xff]  }
 0x220   : > { %11179 = vmatprep.subr.bf16.mxu1 %v12742_v6  ;;  %v13576_v25 = vsel %vm13377_vm7, %v1071_v21, %v1075_v22  ;;  %v1085_v29 = vrot.slane %v1084_v23, 4  ;;  %v13589_v35 = vcombine.low %v13565_v24, %v13569_v10  ;;  %v1146_v51 = vshll.u32 %v13493_v27, 16  ;;  %v12756_v26 = vld [vmem:[%s17637_s6 + $0x138] sm:$0xff]   ;;  %v830_v8 = vld [vmem:[#allocation2 + $0x4c] sm:$0x1] }
 0x221   : > { %11136 = vmatpush3.bf16.msra.mxu0 %v12741_v14  ;;  %v1166_v53 = vshll.u32 %v13613_v41, 16  ;;  %v10188_v56 = vcombine.low %v13406_v17, %v13435_v52  ;;  %v1145_v58 = vrot.slane %v1143_v49, 4  ;;  %v1165_v6 = vrot.slane %v1163_v45, 4  ;;  %v12758_v17 = vld [vmem:[%s17637_s6 + $0x210] sm:$0xff]   ;;  %v828_v52 = vld [vmem:[#allocation2 + $0x44] sm:$0x1] }
 0x222   : > { %11137 = vmatprep.subr.bf16.mxu0 %v12744_v19  ;;  %v13585_v33 = vsel %vm13377_vm7, %v1085_v29, %v1089_v30  ;;  %v1148_v62 = vrot.slane %v1146_v51, 5  ;;  %v10184_v61 = vcombine.low %v13439_v54, %v13449_v63  ;;  %v1172_v11 = vshll.u32 %v830_v8, 16  ;;  %v12760_v54 = vld [vmem:[%s17637_s6 + $0x220] sm:$0xff]   ;;  %v12761_v22 = vld [vmem:[%s17637_s6 + $0x228] sm:$0xff]  }
 0x223   : > { %11180 = vmatpush3.bf16.msra.mxu1 %v12743_v18  ;;  %v10175_v37 = vcombine.low %v13576_v25, %v13585_v33  ;;  %v1168_v7 = vrot.slane %v1166_v53, 5  ;;  %v10189_v13 = vcombine.low %v13443_v57, %v13506_v38  ;;  %v1152_v14 = vshll.u32 %v828_v52, 16 }
 0x224   : > { %11181 = vmatprep.subr.bf16.mxu1 %v12746_v16  ;;  %1753 = vmatmul.mubr.bf16.gmra.mrb[12].mxu0 %v10170_v32  ;;  %v1174_v18 = vrot.slane %v1172_v11, 5  ;;  %v10185_v63 = vcombine.low %v13477_v20, %v13521_v44  ;;  %v10190_v21 = vcombine.low %v13513_v12, %v13565_v24  ;;  %v10166_v23 = vrot.slane %v13493_v27, 9  ;;  %v12762_v12 = vld [vmem:[%s17637_s6 + $0x230] sm:$0xff]  }
 0x225   : > { %1826 = vmatmul.mubr.bf16.gmra.mrb[16].mxu1 %v13589_v35  ;;  %1760 = vmatprep.mubr.bf16.mxu0 %v10175_v37  ;;  %v1169_v4 = vor.u32 %v1168_v7, %v1165_v6  ;;  %v1154_v57 = vrot.slane %v1152_v14, 5  ;;  %v1160_v16 = vrot.slane %v828_v52, 5  ;;  %v10186_v24 = vcombine.low %v13537_v59, %v13576_v25 }
 0x226   : > { %11138 = vmatpush3.bf16.msra.mxu0 %v12745_v31  ;;  %1931 = vmatprep.mubr.bf16.mxu1 %v13489_v55  ;;  %v12753_v55 = vld [vmem:[%s17637_s6 + $0x130] sm:$0xff]   ;;  %v10192_v30 = vcombine.low %v13493_v27, %v13613_v41  ;;  %v12763_v31 = vld [vmem:[%s17637_s6 + $0x238] sm:$0xff]   ;;  %v1180_v25 = vrot.slane %v830_v8, 5 }
 0x227   : > { %11182 = vmatpush3.bf16.msra.mxu1 %v12747_v36  ;;  %11139 = vmatprep.subr.bf16.mxu0 %v12748_v3  ;;  %v1170_v1 = vrot.slane %v1169_v4, 4  ;;  %v1161_v44 = vsel %vm13362_vm6, %v10166_v23, %v1160_v16  ;;  %v12788_v16 = vld [vmem:[%s17639_s8 + $0x50] sm:$0xff]  }
 0x228   : > { %11183 = vmatprep.subr.bf16.mxu1 %v12750_v43  ;;  %v10191_v29 = vcombine.low %v13569_v10, %v1161_v44  ;;  %v10167_v10 = vrot.slane %v13613_v41, 9 }
 0x229   : > { %v1175_v19 = vsel %vm13377_vm7, %v1170_v1, %v1174_v18  ;;  %v12781_v1 = vld [vmem:[%s17639_s8] sm:$0xff]  }
 0x22a   : > { %11140 = vmatpush3.bf16.msra.mxu0 %v12749_v60  ;;  %v1181_v27 = vsel %vm13362_vm6, %v10167_v10, %v1180_v25  ;;  %v12789_v25 = vld [vmem:[%s17639_s8 + $0x10] sm:$0xff]  }
 0x22b   : > { %11184 = vmatpush3.bf16.msra.mxu1 %v12751_v39  ;;  %11141 = vmatprep.subr.bf16.mxu0 %v12752_v40  ;;  %v13692_v39 = vld [vmem:[%s17638_s7] ss:$0 sm:$0xff] }
 0x22c   : > { %12271 = vmatprep.subr.bf16.mxu1 %v12754_v42  ;;  %1761 = vmatmul.mubr.bf16.gmra.mrb[16].mxu0 %v10171_v46 }
 0x22d   : > { %1866 = vmatprep.mubr.bf16.mxu0 %v10188_v56 }
 0x22e   : > { %11142 = vmatpush3.bf16.msra.mxu0 %v12753_v55  ;;  %1932 = vmatmul.mubr.bf16.vlgmr.msra.gmra.mrb[20].mxu1 %v13497_v28  ;;  %v1149_v28 = vor.u32 %v1148_v62, %v1145_v58 }
 0x22f   : > { %11143 = vmatprep.subr.bf16.mxu0 %v12755_v47  ;;  %1939 = vmatprep.mubr.bf16.mxu1 %v13549_v2  ;;  %v12759_v2 = vld [vmem:[%s17637_s6 + $0x218] sm:$0xff]  }
 0x230   : > { %12272 = vmatpush3.bf16.msra.mxu1 %v12754_v42  ;;  %v1150_v15 = vrot.slane %v1149_v28, 4 }
 0x231   : > { %12273 = vmatprep.subr.bf16.mxu1 %v12757_v48 }
 0x232   : > { %11144 = vmatpush3.bf16.msra.mxu0 %v12756_v26  ;;  %v1155_v38 = vsel %vm13377_vm7, %v1150_v15, %v1154_v57  ;;  %v12780_v15 = vld [vmem:[%s17639_s8 + $0x40] sm:$0xff]   ;;  %v12784_v57 = vld [vmem:[%s17639_s8 + $0x48] sm:$0xff]  }
 0x233   : > { %v10193_v20 = vcombine.low %v1155_v38, %v1175_v19  ;;  %v10187_v59 = vcombine.low %v13585_v33, %v1155_v38  ;;  %11241 = vmatprep.subr.bf16.mxu0 %v12780_v15 }
 0x234   : > { %12274 = vmatpush3.bf16.msra.mxu1 %v12757_v48 }
 0x235   : > { %1867 = vmatmul.mubr.bf16.vlgmr.msra.gmra.mrb[20].mxu0 %v10184_v61  ;;  %12275 = vmatprep.subr.bf16.mxu1 %v12758_v17 }
 0x236   : > { %1874 = vmatprep.mubr.bf16.mxu0 %v10189_v13  ;;  %1940 = vmatmul.mubr.bf16.gmra.mrb[24].mxu1 %v10170_v32  ;;  %v10194_v32 = vcombine.low %v1161_v44, %v1181_v27  ;;  %v12792_v27 = vld [vmem:[%s17639_s8 + $0x58] sm:$0xff]  }
 0x237   : > { %1947 = vmatprep.mubr.bf16.mxu1 %v10175_v37  ;;  %11242 = vmatpush3.bf16.msra.mxu0 %v12781_v1 }
 0x238   : > { %12276 = vmatpush3.bf16.msra.mxu1 %v12758_v17  ;;  %11243 = vmatprep.subr.bf16.mxu0 %v12784_v57 }
 0x239   : > { %12277 = vmatprep.subr.bf16.mxu1 %v12759_v2 }
 0x23c   : > { %12278 = vmatpush3.bf16.msra.mxu1 %v12759_v2 }
 0x23d   : > { %1875 = vmatmul.mubr.bf16.gmra.mrb[24].mxu0 %v10185_v63  ;;  %12279 = vmatprep.subr.bf16.mxu1 %v12760_v54 }
 0x23e   : > { %1882 = vmatprep.mubr.bf16.mxu0 %v10190_v21  ;;  %1948 = vmatmul.mubr.bf16.gmra.mrb[28].mxu1 %v10171_v46  ;;  %v12785_v21 = vld [vmem:[%s17639_s8 + $0x8] sm:$0xff]  }
 0x23f   : > { %1955 = vmatprep.mubr.bf16.mxu1 %v10193_v20  ;;  %11244 = vmatpush3.bf16.msra.mxu0 %v12785_v21 }
 0x240   : > { %12280 = vmatpush3.bf16.msra.mxu1 %v12760_v54  ;;  %11245 = vmatprep.subr.bf16.mxu0 %v12788_v16 }
 0x241   : > { %12281 = vmatprep.subr.bf16.mxu1 %v12761_v22 }
 0x243   : > { %11246 = vmatpush3.bf16.msra.mxu0 %v12789_v25 }
 0x244   : > { %12282 = vmatpush3.bf16.msra.mxu1 %v12761_v22  ;;  %11247 = vmatprep.subr.bf16.mxu0 %v12792_v27 }
 0x245   : > { %1883 = vmatmul.mubr.bf16.gmra.mrb[28].mxu0 %v10186_v24  ;;  %12283 = vmatprep.subr.bf16.mxu1 %v12762_v12 }
 0x246   : > { %1890 = vmatprep.mubr.bf16.mxu0 %v10191_v29  ;;  %1956 = vmatmul.mubr.bf16.gmra.mrb[32].mxu1 %v10192_v30 }
 0x247   : > { %12287 = vmatprep.mubr.bf16.mxu1 %v13459_v0  ;;  %v12764_v0 = vld [vmem:[%s17636_s5] sm:$0xff]  }
 0x248   : > { %12284 = vmatpush3.bf16.msra.mxu1 %v12762_v12 }
 0x249   : > { %12285 = vmatprep.subr.bf16.mxu1 %v12763_v31 }
 0x24c   : > { %12286 = vmatpush3.bf16.msra.mxu1 %v12763_v31 }
 0x24d   : > { %1891 = vmatmul.mubr.bf16.gmra.mrb[32].mxu0 %v10187_v59 }
 0x24f   : > { %12288 = vmatmul.mubr.bf16.vlgmr.msra.gmra.mrb[36].mxu1 %v13529_v50 }
 0x250   : > { %12291 = vmatprep.mubr.bf16.mxu1 %v13589_v35 }
 0x257   : > { %12292 = vmatmul.mubr.bf16.gmra.mrb[40].mxu1 %v10194_v32 }
 0x258   : > { %12303 = vmatprep.mubr.msk.bf16.mxu1 %vm2169_vm8, %v12764_v0 }
 0x2e0   : > { %v11105_v33 = vpop.f32.mrb[4].mxu1 }
 0x2e1   : > { %v11106_v36 = vpop.f32.mrb[5].mxu1 }
 0x2e2   : > { %v11107_v37 = vadd.f32 %v11106_v36, %v11105_v33  ;;  %v11108_v3 = vpop.f32.mrb[6].mxu1 }
 0x2e3   : > { %v11109_v43 = vpop.f32.mrb[7].mxu1 }
 0x2e4   : > { %v11110_v50 = vadd.f32 %v11109_v43, %v11108_v3 }
 0x2e7   : > { %v11065_v60 = vpop.f32.mrb[4].mxu0 }
 0x2e8   : > { %v11111_v35 = vpop.f32.mrb[8].mxu1  ;;  %v11066_v40 = vpop.f32.mrb[5].mxu0 }
 0x2e9   : > { %v11112_v41 = vpop.f32.mrb[9].mxu1  ;;  %v11067_v42 = vadd.f32 %v11066_v40, %v11065_v60  ;;  %v11068_v55 = vpop.f32.mrb[6].mxu0 }
 0x2ea   : > { %v11113_v45 = vadd.f32 %v11112_v41, %v11111_v35  ;;  %v11114_v46 = vpop.f32.mrb[10].mxu1  ;;  %v11069_v47 = vpop.f32.mrb[7].mxu0 }
 0x2eb   : > { %v11115_v49 = vpop.f32.mrb[11].mxu1  ;;  %v1739_v51 = vadd.f32 %v11067_v42, %v13692_v39  ;;  %v11070_v53 = vadd.f32 %v11069_v47, %v11068_v55 }
 0x2ec   : > { %v11116_v56 = vadd.f32 %v11115_v49, %v11114_v46 }
 0x2ed   : > { %v1742_v48 = vadd.f32 %v11070_v53, %v13692_v39  ;;  %v13696_v26 = vadd.f32 %v11107_v37, %v1739_v51  ;;  %v12793_v37 = vld [vmem:[%s17639_s8 + $0x18] sm:$0xff]  }
 0x2ee   : > { %11248 = vmatpush3.bf16.msra.mxu0 %v12793_v37 }
 0x2ef   : > { %v11071_v58 = vpop.f32.mrb[8].mxu0  ;;  %v13698_v6 = vadd.f32 %v11110_v50, %v1742_v48 }
 0x2f0   : > { %v11117_v62 = vpop.f32.mrb[12].mxu1  ;;  %v11072_v7 = vpop.f32.mrb[9].mxu0 }
 0x2f1   : > { %v11118_v17 = vpop.f32.mrb[13].mxu1  ;;  %v11073_v52 = vadd.f32 %v11072_v7, %v11071_v58  ;;  %v11074_v8 = vpop.f32.mrb[10].mxu0 }
 0x2f2   : > { %v11119_v61 = vadd.f32 %v11118_v17, %v11117_v62  ;;  %v11120_v28 = vpop.f32.mrb[14].mxu1  ;;  %v11075_v4 = vpop.f32.mrb[11].mxu0 }
 0x2f3   : > { %v11121_v11 = vpop.f32.mrb[15].mxu1  ;;  %v1747_v13 = vadd.f32 %v11073_v52, %v13692_v39  ;;  %v11076_v2 = vadd.f32 %v11075_v4, %v11074_v8 }
 0x2f4   : > { %v11122_v14 = vadd.f32 %v11121_v11, %v11120_v28 }
 0x2f5   : > { %v1750_v18 = vadd.f32 %v11076_v2, %v13692_v39  ;;  %v13708_v54 = vadd.f32 %v11113_v45, %v1747_v13 }
 0x2f7   : > { %v11077_v63 = vpop.f32.mrb[12].mxu0  ;;  %v13713_v19 = vadd.f32 %v11116_v56, %v1750_v18 }
 0x2f8   : > { %v11123_v38 = vpop.f32.mrb[16].mxu1  ;;  %v11078_v22 = vpop.f32.mrb[13].mxu0 }
 0x2f9   : > { %v11124_v23 = vpop.f32.mrb[17].mxu1  ;;  %v11079_v20 = vadd.f32 %v11078_v22, %v11077_v63  ;;  %v11080_v44 = vpop.f32.mrb[14].mxu0 }
 0x2fa   : > { %v11125_v12 = vadd.f32 %v11124_v23, %v11123_v38  ;;  %v11126_v24 = vpop.f32.mrb[18].mxu1  ;;  %v11081_v29 = vpop.f32.mrb[15].mxu0 }
 0x2fb   : > { %v11127_v30 = vpop.f32.mrb[19].mxu1  ;;  %v1755_v31 = vadd.f32 %v11079_v20, %v13692_v39  ;;  %v11082_v59 = vadd.f32 %v11081_v29, %v11080_v44 }
 0x2fc   : > { %v11128_v10 = vadd.f32 %v11127_v30, %v11126_v24 }
 0x2fd   : > { %v1758_v32 = vadd.f32 %v11082_v59, %v13692_v39  ;;  %v1820_v0 = vadd.f32 %v11119_v61, %v1755_v31 }
 0x2ff   : > { %v11083_v33 = vpop.f32.mrb[16].mxu0  ;;  %v13729_v36 = vadd.f32 %v11122_v14, %v1758_v32 }
 0x300   : > { %v11084_v3 = vpop.f32.mrb[17].mxu0 }
 0x301   : > { %v11085_v43 = vadd.f32 %v11084_v3, %v11083_v33  ;;  %v11185_v50 = vpop.f32.mrb[20].mxu1  ;;  %v11086_v60 = vpop.f32.mrb[18].mxu0 }
 0x302   : > { %v11186_v35 = vpop.f32.mrb[21].mxu1  ;;  %v11087_v40 = vpop.f32.mrb[19].mxu0 }
 0x303   : > { %v1763_v41 = vadd.f32 %v11085_v43, %v13692_v39  ;;  %v11187_v42 = vadd.f32 %v11186_v35, %v11185_v50  ;;  %v11088_v55 = vadd.f32 %v11087_v40, %v11086_v60  ;;  %v11188_v45 = vpop.f32.mrb[22].mxu1 }
 0x304   : > { %v11189_v46 = vpop.f32.mrb[23].mxu1 }
 0x305   : > { %v1766_v47 = vadd.f32 %v11088_v55, %v13692_v39  ;;  %v11190_v49 = vadd.f32 %v11189_v46, %v11188_v45  ;;  %v1828_v51 = vadd.f32 %v11125_v12, %v1763_v41 }
 0x307   : > { %v13736_v56 = vadd.f32 %v11128_v10, %v1766_v47 }
 0x308   : > { %v11145_v53 = vpop.f32.mrb[20].mxu0 }
 0x309   : > { %v11146_v48 = vpop.f32.mrb[21].mxu0  ;;  %v11191_v62 = vpop.f32.mrb[24].mxu1 }
 0x30a   : > { %v11147_v58 = vadd.f32 %v11146_v48, %v11145_v53  ;;  %v11148_v7 = vpop.f32.mrb[22].mxu0  ;;  %v11192_v17 = vpop.f32.mrb[25].mxu1 }
 0x30b   : > { %v11149_v52 = vpop.f32.mrb[23].mxu0  ;;  %v11193_v61 = vadd.f32 %v11192_v17, %v11191_v62  ;;  %v11194_v4 = vpop.f32.mrb[26].mxu1 }
 0x30c   : > { %v1869_v8 = vadd.f32 %v11147_v58, %v13696_v26  ;;  %v11150_v28 = vadd.f32 %v11149_v52, %v11148_v7  ;;  %v11195_v11 = vpop.f32.mrb[27].mxu1 }
 0x30d   : > { %v11196_v39 = vadd.f32 %v11195_v11, %v11194_v4 }
 0x30e   : > { %v1872_v13 = vadd.f32 %v11150_v28, %v13698_v6  ;;  %v1934_v2 = vadd.f32 %v11187_v42, %v1869_v8 }
 0x310   : > { %v11151_v14 = vpop.f32.mrb[24].mxu0  ;;  %v1937_v15 = vadd.f32 %v11190_v49, %v1872_v13 }
 0x311   : > { %v11152_v1 = vpop.f32.mrb[25].mxu0  ;;  %v11197_v57 = vpop.f32.mrb[28].mxu1 }
 0x312   : > { %v11153_v18 = vadd.f32 %v11152_v1, %v11151_v14  ;;  %v11154_v63 = vpop.f32.mrb[26].mxu0  ;;  %v11198_v38 = vpop.f32.mrb[29].mxu1 }
 0x313   : > { %v11155_v21 = vpop.f32.mrb[27].mxu0  ;;  %v11199_v23 = vadd.f32 %v11198_v38, %v11197_v57  ;;  %v11200_v16 = vpop.f32.mrb[30].mxu1 }
 0x314   : > { %v1877_v22 = vadd.f32 %v11153_v18, %v13708_v54  ;;  %v11156_v26 = vadd.f32 %v11155_v21, %v11154_v63  ;;  %v11201_v20 = vpop.f32.mrb[31].mxu1 }
 0x315   : > { %v11202_v12 = vadd.f32 %v11201_v20, %v11200_v16 }
 0x316   : > { %v1880_v44 = vadd.f32 %v11156_v26, %v13713_v19  ;;  %v1942_v6 = vadd.f32 %v11193_v61, %v1877_v22 }
 0x318   : > { %v11157_v24 = vpop.f32.mrb[28].mxu0  ;;  %v1945_v29 = vadd.f32 %v11196_v39, %v1880_v44 }
 0x319   : > { %v11158_v30 = vpop.f32.mrb[29].mxu0  ;;  %v11203_v59 = vpop.f32.mrb[32].mxu1 }
 0x31a   : > { %v11159_v31 = vadd.f32 %v11158_v30, %v11157_v24  ;;  %v11160_v10 = vpop.f32.mrb[30].mxu0  ;;  %v11204_v25 = vpop.f32.mrb[33].mxu1  ;;  %v12782_v30 = vld [vmem:[%s17639_s8 + $0xc0] sm:$0xff]  }
 0x31b   : > { %v11161_v27 = vpop.f32.mrb[31].mxu0  ;;  %v11205_v33 = vadd.f32 %v11204_v25, %v11203_v59  ;;  %v11206_v54 = vpop.f32.mrb[34].mxu1  ;;  %v12766_v59 = vld [vmem:[%s17636_s5 + $0x10] sm:$0xff]   ;;  %v12786_v25 = vld [vmem:[%s17639_s8 + $0xc8] sm:$0xff]  }
 0x31c   : > { %v1885_v32 = vadd.f32 %v11159_v31, %v1820_v0  ;;  %v11162_v37 = vadd.f32 %v11161_v27, %v11160_v10  ;;  %v11207_v3 = vpop.f32.mrb[35].mxu1  ;;  %v12765_v31 = vld [vmem:[%s17636_s5 + $0x8] sm:$0xff]   ;;  %v12783_v10 = vld [vmem:[%s17639_s8 + $0x80] sm:$0xff]  }
 0x31d   : > { %v11208_v50 = vadd.f32 %v11207_v3, %v11206_v54  ;;  %v12787_v27 = vld [vmem:[%s17639_s8 + $0x88] sm:$0xff]   ;;  %v12791_v54 = vld [vmem:[%s17639_s8 + $0x90] sm:$0xff]  }
 0x31e   : > { %v1888_v43 = vadd.f32 %v11162_v37, %v13729_v36  ;;  %v1950_v60 = vadd.f32 %v11199_v23, %v1885_v32  ;;  %v12790_v32 = vld [vmem:[%s17639_s8 + $0xd0] sm:$0xff]   ;;  %v12768_v37 = vld [vmem:[%s17636_s5 + $0x20] sm:$0xff]   ;;  %v12769_v3 = vld [vmem:[%s17636_s5 + $0x28] sm:$0xff]  }
 0x320   : > { %v11163_v19 = vpop.f32.mrb[32].mxu0  ;;  %v1953_v35 = vadd.f32 %v11202_v12, %v1888_v43  ;;  %v12770_v43 = vld [vmem:[%s17636_s5 + $0x30] sm:$0xff]  }
 0x321   : > { %v11164_v40 = vpop.f32.mrb[33].mxu0 }
 0x322   : > { %v11165_v41 = vadd.f32 %v11164_v40, %v11163_v19  ;;  %v12289_v42 = vpop.f32.mrb[36].mxu1  ;;  %v11166_v55 = vpop.f32.mrb[34].mxu0  ;;  %v12773_v19 = vld [vmem:[%s17636_s5 + $0x48] sm:$0xff]   ;;  %v12775_v40 = vld [vmem:[%s17636_s5 + $0x58] sm:$0xff]  }
 0x323   : > { %v2007_v45 = vadd.f32 %v12289_v42, %v1942_v6  ;;  %v1998_v46 = vpop.f32.mrb[37].mxu1  ;;  %v11167_v47 = vpop.f32.mrb[35].mxu0  ;;  %v12777_v42 = vld [vmem:[%s17636_s5 + $0x68] sm:$0xff]  }
 0x324   : > { %v1893_v49 = vadd.f32 %v11165_v41, %v1828_v51  ;;  %v1999_v53 = vadd.f32 %v1998_v46, %v1934_v2  ;;  %v11168_v0 = vadd.f32 %v11167_v47, %v11166_v55  ;;  %v12290_v48 = vpop.f32.mrb[38].mxu1  ;;  %v12776_v41 = vld [vmem:[%s17636_s5 + $0x60] sm:$0xff]   ;;  %v12778_v55 = vld [vmem:[%s17636_s5 + $0x70] sm:$0xff]   ;;  %v12794_v46 = vld [vmem:[%s17639_s8 + $0xd8] sm:$0xff]  }
 0x325   : > { %v2039_v58 = vmul.f32 0.2, %v2007_v45  ;;  %v2010_v62 = vadd.f32 %v12290_v48, %v1945_v29  ;;  %v2001_v7 = vpop.f32.mrb[39].mxu1  ;;  %vm2031_vm9 = vcmp.gt.f32.partialorder %v2007_v45, 0.0  ;;  %v12795_v47 = vld [vmem:[%s17639_s8 + $0x98] sm:$0xff]   ;;  %v12799_v48 = vld [vmem:[%s17639_s8 + $0xa0] sm:$0xff]  }
 0x326   : > { %v2037_v36 = vmul.f32 0.2, %v1999_v53  ;;  %v1896_v17 = vadd.f32 %v11168_v0, %v13736_v56  ;;  %v2002_v52 = vadd.f32 %v2001_v7, %v1937_v15  ;;  %v1958_v8 = vadd.f32 %v11205_v33, %v1893_v49  ;;  %v12767_v33 = vld [vmem:[%s17636_s5 + $0x18] sm:$0xff]   ;;  %v12796_v49 = vld [vmem:[%s17639_s8 + $0x60] sm:$0xff]   ;;  %v12801_v7 = vld [vmem:[%s17639_s8 + $0x28] sm:$0xff]  }
 0x327   : > { %v2040_v61 = vmul.f32 0.2, %v2010_v62  ;;  %vm2029_vm10 = vcmp.gt.f32.partialorder %v1999_v53, 0.0  ;;  %vm2032_vm11 = vcmp.gt.f32.partialorder %v2010_v62, 0.0  ;;  %v2047_v11 = vsel %vm2031_vm9, %v2007_v45, %v2039_v58  ;;  %v12779_v45 = vld [vmem:[%s17636_s5 + $0x78] sm:$0xff]   ;;  %v12798_v0 = vld [vmem:[%s17639_s8 + $0xe0] sm:$0xff]   ;;  %11249 = vmatprep.subr.bf16.mxu0 %v12796_v49 }
 0x328   : > { %v2038_v28 = vmul.f32 0.2, %v2002_v52  ;;  %v1961_v4 = vadd.f32 %v11208_v50, %v1896_v17  ;;  %vm2030_vm12 = vcmp.gt.f32.partialorder %v2002_v52, 0.0  ;;  %v2045_v39 = vsel %vm2029_vm10, %v1999_v53, %v2037_v36  ;;  %v12771_v50 = vld [vmem:[%s17636_s5 + $0x38] sm:$0xff]   ;;  %v12797_v53 = vld [vmem:[%s17639_s8 + $0x20] sm:$0xff]   ;;  %v12800_v58 = vld [vmem:[%s17639_s8 + $0x68] sm:$0xff]  }
 0x329   : > { %v2048_v51 = vsel %vm2032_vm11, %v2010_v62, %v2040_v61  ;;  %v12802_v62 = vld [vmem:[%s17639_s8 + $0xe8] sm:$0xff]   ;;  %11250 = vmatpush3.bf16.msra.mxu0 %v12797_v53  ;;  %v12804_v17 = vld [vmem:[%s17639_s8 + $0x70] sm:$0xff]  }
 0x32a   : > { %v12293_v13 = vpop.f32.mrb[40].mxu1  ;;  %v2046_v2 = vsel %vm2030_vm12, %v2002_v52, %v2038_v28  ;;  %v2086_v14 = vpack.c.bf16 %v2048_v51, %v2047_v11  ;;  %11251 = vmatprep.subr.bf16.mxu0 %v12800_v58  ;;  %v12803_v36 = vld [vmem:[%s17639_s8 + $0xa8] sm:$0xff]   ;;  %v12805_v52 = vld [vmem:[%s17639_s8 + $0x30] sm:$0xff]   ;;  %v12808_v28 = vld [vmem:[%s17639_s8 + $0x78] sm:$0xff]  }
 0x32b   : > { %v2023_v1 = vadd.f32 %v12293_v13, %v1958_v8  ;;  %v2014_v18 = vpop.f32.mrb[41].mxu1  ;;  %v2085_v57 = vpack.c.bf16 %v2046_v2, %v2045_v39  ;;  %v12806_v8 = vld [vmem:[%s17639_s8 + $0xf0] sm:$0xff]   ;;  %v12810_v11 = vld [vmem:[%s17639_s8 + $0xf8] sm:$0xff]  }
 0x32c   : > { %v2015_v63 = vadd.f32 %v2014_v18, %v1950_v60  ;;  %v12294_v38 = vpop.f32.mrb[42].mxu1  ;;  %v12772_v60 = vld [vmem:[%s17636_s5 + $0x40] sm:$0xff]   ;;  %v12807_v61 = vld [vmem:[%s17639_s8 + $0xb0] sm:$0xff]   ;;  %v2805_v39 = vld [vmem:[#allocation3 + $0x8] sm:$0x1] }
 0x32d   : > { %v2043_v56 = vmul.f32 0.2, %v2023_v1  ;;  %v2026_v15 = vadd.f32 %v12294_v38, %v1961_v4  ;;  %v2017_v21 = vpop.f32.mrb[43].mxu1  ;;  %12295 = vmatprep.subr.bf16.mxu1 %v2085_v57  ;;  %vm2035_vm13 = vcmp.gt.f32.partialorder %v2023_v1, 0.0  ;;  %11252 = vmatpush3.bf16.msra.mxu0 %v12801_v7  ;;  %v12809_v4 = vld [vmem:[%s17639_s8 + $0x38] sm:$0xff]  }
 0x32e   : > { %v2041_v22 = vmul.f32 0.2, %v2015_v63  ;;  %v2018_v23 = vadd.f32 %v2017_v21, %v1953_v35  ;;  %12296 = vmatpush3.bf16.msra.mxu1 %v2085_v57  ;;  %vm2033_vm14 = vcmp.gt.f32.partialorder %v2015_v63, 0.0  ;;  %v12774_v35 = vld [vmem:[%s17636_s5 + $0x50] sm:$0xff]   ;;  %11253 = vmatprep.subr.bf16.mxu0 %v12804_v17  ;;  %v3022_v57 = vshll.u32 %v2805_v39, 16 }
 0x32f   : > { %v2044_v26 = vmul.f32 0.2, %v2026_v15  ;;  %12297 = vmatprep.subr.bf16.mxu1 %v2086_v14  ;;  %vm2036_vm15 = vcmp.gt.f32.partialorder %v2026_v15, 0.0  ;;  %v2051_v20 = vsel %vm2035_vm13, %v2023_v1, %v2043_v56  ;;  %v2803_v51 = vld [vmem:[#allocation3] sm:$0xf]  ;;  %v12811_v56 = vld [vmem:[%s17639_s8 + $0xb8] sm:$0xff]  }
 0x330   : > { %v2042_v16 = vmul.f32 0.2, %v2018_v23  ;;  %vm2034_vm0 = vcmp.gt.f32.partialorder %v2018_v23, 0.0  ;;  %v2049_v12 = vsel %vm2033_vm14, %v2015_v63, %v2041_v22  ;;  %v2804_v13 = vld [vmem:[#allocation3 + $0x4] sm:$0xf]  ;;  %v3003_v2 = vshrl.u32 %v2803_v51, 16 }
 0x331   : > { %v2052_v44 = vsel %vm2036_vm15, %v2026_v15, %v2044_v26  ;;  %11254 = vmatpush3.bf16.msra.mxu0 %v12805_v52  ;;  %v3012_v1 = vshll.u32 %v2804_v13, 16  ;;  %v3016_v18 = vshrl.u32 %v2804_v13, 16  ;;  %v10348_v15 = vrot.slane %v2803_v51, 9 }
 0x332   : > { %12298 = vmatpush3.bf16.msra.mxu1 %v2086_v14  ;;  %v2050_v6 = vsel %vm2034_vm0, %v2018_v23, %v2042_v16  ;;  %v2088_v24 = vpack.c.bf16 %v2052_v44, %v2051_v20  ;;  %v3006_v14 = vshll.u32 %v2803_v51, 16  ;;  %11255 = vmatprep.subr.bf16.mxu0 %v12808_v28  ;;  %v3005_v63 = vrot.slane %v3003_v2, 4 }
 0x333   : > { %v2087_v29 = vpack.c.bf16 %v2050_v6, %v2049_v12  ;;  %v3014_v21 = vrot.slane %v3012_v1, 5  ;;  %v3018_v22 = vrot.slane %v3016_v18, 4  ;;  %v3439_v23 = vrot.slane %v2805_v39, 5  ;;  %v12848_v1 = vld [vmem:[%s17639_s8 + $0x120] sm:$0xff]  }
 0x334   : > { %v3008_v38 = vrot.slane %v3006_v14, 5  ;;  %v3436_v26 = vrot.slane %v2804_v13, 5  ;;  %v3024_v44 = vrot.slane %v3022_v57, 5 }
 0x335   : > { %12299 = vmatprep.subr.bf16.mxu1 %v2087_v29  ;;  %11256 = vmatpush3.bf16.msra.mxu0 %v12809_v4  ;;  %v3019_v20 = vor.u32 %v3018_v22, %v3014_v21 }
 0x336   : > { %12300 = vmatpush3.bf16.msra.mxu1 %v2087_v29  ;;  %v3009_v16 = vor.u32 %v3008_v38, %v3005_v63  ;;  %v13878_v12 = vsel %vm13362_vm6, %v10348_v15, %v3436_v26  ;;  %v3438_v6 = vrot.slane %v3436_v26, 4  ;;  %v12850_v63 = vld [vmem:[%s17639_s8 + $0x168] sm:$0xff]  }
 0x337   : > { %12301 = vmatprep.subr.bf16.mxu1 %v2088_v24  ;;  %v3020_v29 = vrot.slane %v3019_v20, 4  ;;  %v12852_v20 = vld [vmem:[%s17639_s8 + $0x128] sm:$0xff]  }
 0x33a   : > { %12302 = vmatpush3.bf16.msra.mxu1 %v2088_v24  ;;  %v3010_v24 = vrot.slane %v3009_v16, 4 }
 0x33b   : > { %11353 = vmatprep.subr.bf16.mxu1 %v12782_v30  ;;  %v13882_v30 = vsel %vm13362_vm6, %v3438_v6, %v3439_v23 }
 0x33d   : > { %12304 = vmatmul.mubr.msk.bf16.vlgmr.msra.gmra.mrb[44].mxu1 %vm2169_vm8, %v12765_v31  ;;  %v3015_v31 = vsel %vm13377_vm7, %v3010_v24, %v3014_v21 }
 0x33e   : > { %12307 = vmatprep.mubr.msk.bf16.mxu1 %vm2169_vm8, %v12766_v59  ;;  %11354 = vmatpush3.bf16.msra.mxu1 %v12783_v10  ;;  %v10398_v59 = vcombine.low %v13878_v12, %v13882_v30  ;;  %v3025_v10 = vsel %vm13377_vm7, %v3020_v29, %v3024_v44  ;;  %v12856_v12 = vld [vmem:[%s17639_s8 + $0x130] sm:$0xff]   ;;  %v12858_v30 = vld [vmem:[%s17639_s8 + $0x178] sm:$0xff]  }
 0x33f   : > { %11355 = vmatprep.subr.bf16.mxu1 %v12786_v25  ;;  %v10366_v25 = vcombine.low %v2803_v51, %v2804_v13 }
 0x342   : > { %11356 = vmatpush3.bf16.msra.mxu1 %v12787_v27  ;;  %v10382_v27 = vcombine.low %v3015_v31, %v3025_v10 }
 0x343   : > { %11357 = vmatprep.subr.bf16.mxu1 %v12790_v32  ;;  %v12826_v32 = vld [vmem:[%s17639_s8 + $0x1c0] sm:$0xff]  }
 0x344   : > { %4300 = vmatprep.mubr.bf16.mxu0 %v10382_v27 }
 0x345   : > { %12308 = vmatmul.mubr.msk.bf16.gmra.mrb[48].mxu1 %vm2169_vm8, %v12767_v33  ;;  %4301 = vmatmul.mubr.bf16.vlgmr.msra.gmra.mrb[36].mxu0 %v10366_v25  ;;  %v12828_v33 = vld [vmem:[%s17639_s8 + $0x140] sm:$0xff]  }
 0x346   : > { %12311 = vmatprep.mubr.msk.bf16.mxu1 %vm2169_vm8, %v12768_v37  ;;  %11358 = vmatpush3.bf16.msra.mxu1 %v12791_v54  ;;  %v12830_v37 = vld [vmem:[%s17639_s8 + $0x100] sm:$0xff]   ;;  %v12832_v54 = vld [vmem:[%s17639_s8 + $0x148] sm:$0xff]  }
 0x347   : > { %11359 = vmatprep.subr.bf16.mxu1 %v12794_v46  ;;  %11465 = vmatprep.subr.bf16.mxu0 %v12828_v33  ;;  %v12829_v25 = vld [vmem:[%s17639_s8 + $0x180] sm:$0xff]  }
 0x348   : > { %11466 = vmatpush3.bf16.msra.mxu0 %v12830_v37 }
 0x349   : > { %11467 = vmatprep.subr.bf16.mxu0 %v12832_v54 }
 0x34a   : > { %11360 = vmatpush3.bf16.msra.mxu1 %v12795_v47  ;;  %v12841_v47 = vld [vmem:[%s17639_s8 + $0x158] sm:$0xff]  }
 0x34b   : > { %11361 = vmatprep.subr.bf16.mxu1 %v12798_v0 }
 0x34d   : > { %12312 = vmatmul.mubr.msk.bf16.gmra.mrb[52].mxu1 %vm2169_vm8, %v12769_v3  ;;  %v12834_v3 = vld [vmem:[%s17639_s8 + $0x108] sm:$0xff]  }
 0x34e   : > { %12315 = vmatprep.mubr.msk.bf16.mxu1 %vm2169_vm8, %v12770_v43  ;;  %11362 = vmatpush3.bf16.msra.mxu1 %v12799_v48 }
 0x34f   : > { %11363 = vmatprep.subr.bf16.mxu1 %v12802_v62  ;;  %11468 = vmatpush3.bf16.msra.mxu0 %v12834_v3 }
 0x352   : > { %11364 = vmatpush3.bf16.msra.mxu1 %v12803_v36 }
 0x353   : > { %11365 = vmatprep.subr.bf16.mxu1 %v12806_v8  ;;  %v12843_v8 = vld [vmem:[%s17639_s8 + $0x118] sm:$0xff]  }
 0x355   : > { %12316 = vmatmul.mubr.msk.bf16.gmra.mrb[56].mxu1 %vm2169_vm8, %v12771_v50  ;;  %v12836_v50 = vld [vmem:[%s17639_s8 + $0x150] sm:$0xff]  }
 0x356   : > { %12319 = vmatprep.mubr.msk.bf16.mxu1 %vm2169_vm8, %v12772_v60  ;;  %11366 = vmatpush3.bf16.msra.mxu1 %v12807_v61 }
 0x357   : > { %11367 = vmatprep.subr.bf16.mxu1 %v12810_v11  ;;  %11469 = vmatprep.subr.bf16.mxu0 %v12836_v50  ;;  %v12846_v11 = vld [vmem:[%s17639_s8 + $0x160] sm:$0xff]  }
 0x35a   : > { %11368 = vmatpush3.bf16.msra.mxu1 %v12811_v56 }
 0x35b   : > { %11577 = vmatprep.subr.bf16.mxu1 %v12826_v32 }
 0x35d   : > { %12320 = vmatmul.mubr.msk.bf16.gmra.mrb[60].mxu1 %vm2169_vm8, %v12773_v19 }
 0x35e   : > { %12323 = vmatprep.mubr.msk.bf16.mxu1 %vm2169_vm8, %v12774_v35 }
 0x365   : > { %12324 = vmatmul.mubr.msk.bf16.gmra.mrb[64].mxu1 %vm2169_vm8, %v12775_v40 }
 0x366   : > { %12327 = vmatprep.mubr.msk.bf16.mxu1 %vm2169_vm8, %v12776_v41 }
 0x36d   : > { %12328 = vmatmul.mubr.msk.bf16.gmra.mrb[68].mxu1 %vm2169_vm8, %v12777_v42 }
 0x36e   : > { %12331 = vmatprep.mubr.msk.bf16.mxu1 %vm2169_vm8, %v12778_v55  ;;  %v12838_v55 = vld [vmem:[%s17639_s8 + $0x110] sm:$0xff]  }
 0x36f   : > { %11470 = vmatpush3.bf16.msra.mxu0 %v12838_v55 }
 0x370   : > { %11471 = vmatprep.subr.bf16.mxu0 %v12841_v47  ;;  %v12831_v47 = vld [vmem:[%s17639_s8 + $0x1c8] sm:$0xff]  }
 0x373   : > { %11472 = vmatpush3.bf16.msra.mxu0 %v12843_v8 }
 0x374   : > { %11473 = vmatprep.subr.bf16.mxu0 %v12846_v11  ;;  %v12833_v11 = vld [vmem:[%s17639_s8 + $0x188] sm:$0xff]  }
 0x375   : > { %12332 = vmatmul.mubr.msk.bf16.gmra.mrb[72].mxu1 %vm2169_vm8, %v12779_v45 }
 0x377   : > { %11474 = vmatpush3.bf16.msra.mxu0 %v12848_v1 }
 0x378   : > { %11475 = vmatprep.subr.bf16.mxu0 %v12850_v63 }
 0x37b   : > { %11476 = vmatpush3.bf16.msra.mxu0 %v12852_v20 }
 0x410   : > { %v12305_v43 = vpop.f32.mrb[44].mxu1 }
 0x411   : > { %v2414_v60 = vrot.slane %v12305_v43, 7  ;;  %v2252_v19 = vpop.f32.mrb[45].mxu1 }
 0x412   : > { %v2411_v35 = vrot.slane %v2252_v19, 7  ;;  %v12306_v40 = vpop.f32.mrb[46].mxu1 }
 0x413   : > { %v2415_v41 = vrot.slane %v12306_v40, 7  ;;  %v2255_v42 = vpop.f32.mrb[47].mxu1  ;;  %v2508_v49 = vsel %vm708_vm1, 0.0, %v2414_v60 }
 0x414   : > { %v2507_v45 = vsel %vm708_vm1, 0.0, %v2411_v35  ;;  %v2412_v46 = vrot.slane %v2255_v42, 7 }
 0x415   : > { %v10823_v53 = vpack.c.bf16 %v2507_v45, %v2507_v45  ;;  %v2416_v0 = vsel %vm708_vm1, %v2414_v60, %v2415_v41  ;;  %v2524_v48 = vsel %vm708_vm1, %v2415_v41, 0.0 }
 0x416   : > { %v10828_v58 = vpack.c.bf16 %v2524_v48, %v2524_v48  ;;  %v10970_v62 = vpack.c.bf16 %v2416_v0, %v2508_v49  ;;  %v2413_v7 = vsel %vm708_vm1, %v2411_v35, %v2412_v46  ;;  %v2523_v36 = vsel %vm708_vm1, %v2412_v46, 0.0 }
 0x417   : > { %2748 = vst [vmem:[#allocation3 + $0xc] sm:$0xf] %v10823_v53  ;;  %v10824_v17 = vpack.c.bf16 %v2413_v7, %v2413_v7  ;;  %v10825_v52 = vpack.c.bf16 %v2523_v36, %v2523_v36 }
 0x418   : > { %11007 = vst [vmem:[#allocation3 + $0x18] sm:$0xff] %v10970_v62   ;;  %2753 = vst [vmem:[#allocation3 + $0x20] sm:$0x1] %v10828_v58  ;;  %v12309_v61 = vpop.f32.mrb[48].mxu1  ;;  %v12854_v62 = vld [vmem:[%s17639_s8 + $0x170] sm:$0xff]  }
 0x419   : > { %2749 = vst [vmem:[#allocation3 + $0x10] sm:$0xf] %v10824_v17  ;;  %2750 = vst [vmem:[#allocation3 + $0x14] sm:$0x1] %v10825_v52  ;;  %v2420_v28 = vrot.slane %v12309_v61, 7  ;;  %v2268_v4 = vpop.f32.mrb[49].mxu1  ;;  %11477 = vmatprep.subr.bf16.mxu0 %v12854_v62 }
 0x41a   : > { %v2417_v51 = vrot.slane %v2268_v4, 7  ;;  %v12310_v13 = vpop.f32.mrb[50].mxu1  ;;  %11478 = vmatpush3.bf16.msra.mxu0 %v12856_v12  ;;  %v12842_v62 = vld [vmem:[%s17639_s8 + $0x198] sm:$0xff]  }
 0x41b   : > { %v2510_v39 = vsel %vm708_vm1, 0.0, %v2420_v28  ;;  %v2421_v2 = vrot.slane %v12310_v13, 7  ;;  %v2271_v14 = vpop.f32.mrb[51].mxu1  ;;  %11479 = vmatprep.subr.bf16.mxu0 %v12858_v30 }
 0x41c   : > { %v2509_v18 = vsel %vm708_vm1, 0.0, %v2417_v51  ;;  %v2418_v57 = vrot.slane %v2271_v14, 7 }
 0x41d   : > { %v10829_v38 = vpack.c.bf16 %v2509_v18, %v2509_v18  ;;  %v2422_v56 = vsel %vm708_vm1, %v2420_v28, %v2421_v2  ;;  %v2526_v15 = vsel %vm708_vm1, %v2421_v2, 0.0  ;;  %v12835_v2 = vld [vmem:[%s17639_s8 + $0x1d0] sm:$0xff]  }
 0x41e   : > { %v10834_v21 = vpack.c.bf16 %v2526_v15, %v2526_v15  ;;  %v10975_v22 = vpack.c.bf16 %v2422_v56, %v2510_v39  ;;  %v2419_v23 = vsel %vm708_vm1, %v2417_v51, %v2418_v57  ;;  %v2525_v26 = vsel %vm708_vm1, %v2418_v57, 0.0  ;;  %v13938_v16 = vld [vmem:[#allocation3 + $0xc] sm:$0xf] }
 0x41f   : > { %2754 = vst [vmem:[#allocation3 + $0x24] sm:$0xf] %v10829_v38  ;;  %v10830_v44 = vpack.c.bf16 %v2419_v23, %v2419_v23  ;;  %v10831_v6 = vpack.c.bf16 %v2525_v26, %v2525_v26  ;;  %v3027_v24 = vshrl.u32 %v13938_v16, 16  ;;  %v3030_v29 = vshll.u32 %v13938_v16, 16  ;;  %v13945_v31 = vld [vmem:[#allocation3 + $0x18] sm:$0xf] }
 0x420   : > { %v13947_v10 = vld [vmem:[#allocation3 + $0x1c] sm:$0xf]  ;;  %11008 = vst [vmem:[#allocation3 + $0x30] sm:$0xff] %v10975_v22   ;;  %2759 = vst [vmem:[#allocation3 + $0x38] sm:$0x1] %v10834_v21  ;;  %v3051_v32 = vshrl.u32 %v13945_v31, 16 }
 0x421   : > { %v13952_v27 = vld [vmem:[#allocation3 + $0x10] sm:$0xf]  ;;  %v3054_v33 = vshll.u32 %v13945_v31, 16  ;;  %v3064_v37 = vshrl.u32 %v13947_v10, 16  ;;  %v13959_v54 = vcombine.low %v13945_v31, %v13947_v10  ;;  %v12313_v3 = vpop.f32.mrb[52].mxu1  ;;  %v3029_v40 = vrot.slane %v3027_v24, 4 }
 0x422   : > { %2755 = vst [vmem:[#allocation3 + $0x28] sm:$0xf] %v10830_v44  ;;  %2756 = vst [vmem:[#allocation3 + $0x2c] sm:$0x1] %v10831_v6  ;;  %v3040_v43 = vshrl.u32 %v13952_v27, 16  ;;  %v13964_v50 = vcombine.low %v13938_v16, %v13952_v27  ;;  %v2426_v60 = vrot.slane %v12313_v3, 7 }
 0x423   : > { %v2284_v19 = vpop.f32.mrb[53].mxu1  ;;  %v13966_v35 = vld [vmem:[#allocation3 + $0x14] sm:$0x1]  ;;  %v3032_v55 = vrot.slane %v3030_v29, 5  ;;  %v3036_v45 = vshll.u32 %v13952_v27, 16  ;;  %v10349_v58 = vrot.slane %v13938_v16, 9 }
 0x424   : > { %v2423_v41 = vrot.slane %v2284_v19, 7  ;;  %v12314_v42 = vpop.f32.mrb[54].mxu1  ;;  %v3046_v46 = vshll.u32 %v13966_v35, 16  ;;  %4461 = vmatprep.mubr.bf16.mxu1 %v13964_v50  ;;  %v2512_v49 = vsel %vm708_vm1, 0.0, %v2426_v60  ;;  %v3042_v48 = vrot.slane %v3040_v43, 4  ;;  %v12860_v38 = vld [vmem:[%s17639_s8 + $0x138] sm:$0xff]  }
 0x425   : > { %v2427_v53 = vrot.slane %v12314_v42, 7  ;;  %v2287_v0 = vpop.f32.mrb[55].mxu1  ;;  %4462 = vmatmul.mubr.bf16.vlgmr.msra.gmra.mrb[76].mxu1 %v10398_v59  ;;  %v3033_v17 = vor.u32 %v3032_v55, %v3029_v40  ;;  %v3038_v52 = vrot.slane %v3036_v45, 5  ;;  %v14000_v63 = vld [vmem:[#allocation3 + $0x20] sm:$0x1]  ;;  %v3443_v56 = vrot.slane %v13952_v27, 5  ;;  %11480 = vmatpush3.bf16.msra.mxu0 %v12860_v38 }
 0x426   : > { %v2511_v7 = vsel %vm708_vm1, 0.0, %v2423_v41  ;;  %v2424_v36 = vrot.slane %v2287_v0, 7  ;;  %4469 = vmatprep.mubr.bf16.mxu1 %v13959_v54  ;;  %v3048_v4 = vrot.slane %v3046_v46, 5  ;;  %11578 = vmatpush3.bf16.msra.mxu1 %v12829_v25  ;;  %v3446_v15 = vrot.slane %v13966_v35, 5  ;;  %v14007_v23 = vld [vmem:[#allocation3 + $0x24] sm:$0xf] }
 0x427   : > { %v10835_v8 = vpack.c.bf16 %v2511_v7, %v2511_v7  ;;  %v2428_v61 = vsel %vm708_vm1, %v2426_v60, %v2427_v53  ;;  %v2528_v28 = vsel %vm708_vm1, %v2427_v53, 0.0  ;;  %11579 = vmatprep.subr.bf16.mxu1 %v12831_v47  ;;  %v3034_v18 = vrot.slane %v3033_v17, 4  ;;  %v12837_v24 = vld [vmem:[%s17639_s8 + $0x190] sm:$0xff]   ;;  %v14033_v40 = vld [vmem:[#allocation3 + $0x30] sm:$0xf] }
 0x428   : > { %v10840_v59 = vpack.c.bf16 %v2528_v28, %v2528_v28  ;;  %v10980_v51 = vpack.c.bf16 %v2428_v61, %v2512_v49  ;;  %v2425_v13 = vsel %vm708_vm1, %v2423_v41, %v2424_v36  ;;  %v2527_v39 = vsel %vm708_vm1, %v2424_v36, 0.0  ;;  %v14014_v6 = vpop.f32.mrb[56].mxu1  ;;  %v14041_v47 = vld [vmem:[#allocation3 + $0x34] sm:$0xf] }
 0x429   : > { %2760 = vst [vmem:[#allocation3 + $0x3c] sm:$0xf] %v10835_v8  ;;  %v10836_v14 = vpack.c.bf16 %v2425_v13, %v2425_v13  ;;  %v10837_v1 = vpack.c.bf16 %v2527_v39, %v2527_v39  ;;  %v3043_v57 = vor.u32 %v3042_v48, %v3038_v52  ;;  %v3053_v21 = vrot.slane %v3051_v32, 4  ;;  %v14024_v3 = vpop.f32.mrb[57].mxu1  ;;  %v12844_v8 = vld [vmem:[%s17639_s8 + $0x1e0] sm:$0xff]  }
 0x42a   : > { %11009 = vst [vmem:[#allocation3 + $0x48] sm:$0xff] %v10980_v51   ;;  %2765 = vst [vmem:[#allocation3 + $0x50] sm:$0x1] %v10840_v59  ;;  %v3056_v22 = vrot.slane %v3054_v33, 5  ;;  %v3039_v26 = vsel %vm13377_vm7, %v3034_v18, %v3038_v52  ;;  %v3060_v20 = vshll.u32 %v13947_v10, 16  ;;  %v3066_v44 = vrot.slane %v3064_v37, 4  ;;  %11580 = vmatpush3.bf16.msra.mxu1 %v12833_v11 }
 0x42b   : > { %2761 = vst [vmem:[#allocation3 + $0x40] sm:$0xf] %v10836_v14  ;;  %2762 = vst [vmem:[#allocation3 + $0x44] sm:$0x1] %v10837_v1  ;;  %v3044_v16 = vrot.slane %v3043_v57, 4  ;;  %v3444_v29 = vsel %vm13362_vm6, %v10349_v58, %v3443_v56  ;;  %v3445_v25 = vrot.slane %v3443_v56, 4  ;;  %11581 = vmatprep.subr.bf16.mxu1 %v12835_v2  ;;  %v14076_v30 = vcombine.low %v14033_v40, %v14041_v47 }
 0x42c   : > { %v3057_v27 = vor.u32 %v3056_v22, %v3053_v21  ;;  %v3070_v32 = vshll.u32 %v14000_v63, 16  ;;  %v14022_v33 = vld [vmem:[#allocation3 + $0x28] sm:$0xf]  ;;  %v3062_v60 = vrot.slane %v3060_v20, 5  ;;  %v3075_v19 = vshrl.u32 %v14007_v23, 16  ;;  %v14035_v41 = vpop.f32.mrb[58].mxu1 }
 0x42d   : > { %v12840_v37 = vld [vmem:[%s17639_s8 + $0x1d8] sm:$0xff]   ;;  %v3049_v43 = vsel %vm13377_vm7, %v3044_v16, %v3048_v4  ;;  %v3078_v35 = vshll.u32 %v14007_v23, 16  ;;  %v3447_v55 = vsel %vm13362_vm6, %v3445_v25, %v3446_v15  ;;  %v14043_v49 = vpop.f32.mrb[59].mxu1  ;;  %v3088_v48 = vshrl.u32 %v14022_v33, 16  ;;  %v12847_v14 = vld [vmem:[%s17639_s8 + $0x1a0] sm:$0xff]   ;;  %v12849_v56 = vld [vmem:[%s17639_s8 + $0x1e8] sm:$0xff]  }
 0x42e   : > { %v14037_v42 = vcombine.low %v3039_v26, %v3049_v43  ;;  %v3058_v45 = vrot.slane %v3057_v27, 4  ;;  %v3072_v46 = vrot.slane %v3070_v32, 5  ;;  %v14045_v53 = vcombine.low %v3444_v29, %v3447_v55  ;;  %11582 = vmatpush3.bf16.msra.mxu1 %v12837_v24  ;;  %v14069_v11 = vld [vmem:[#allocation3 + $0x2c] sm:$0x1] }
 0x42f   : > { %v3067_v0 = vor.u32 %v3066_v44, %v3062_v60  ;;  %v14050_v58 = vcombine.low %v14007_v23, %v14022_v33  ;;  %v10350_v36 = vrot.slane %v13945_v31, 9  ;;  %v3450_v17 = vrot.slane %v13947_v10, 5  ;;  %11583 = vmatprep.subr.bf16.mxu1 %v12840_v37 }
 0x430   : > { %4308 = vmatprep.mubr.bf16.mxu0 %v14037_v42  ;;  %v3063_v7 = vsel %vm13377_vm7, %v3058_v45, %v3062_v60  ;;  %v3453_v52 = vrot.slane %v14000_v63, 5  ;;  %4470 = vmatmul.mubr.bf16.gmra.mrb[80].mxu1 %v14045_v53  ;;  %v3099_v28 = vshrl.u32 %v14033_v40, 16  ;;  %v3102_v4 = vshll.u32 %v14033_v40, 16  ;;  %v14081_v2 = vpop.f32.mrb[60].mxu1 }
 0x431   : > { %4309 = vmatmul.mubr.bf16.gmra.mrb[40].mxu0 %v13964_v50  ;;  %v3068_v61 = vrot.slane %v3067_v0, 4  ;;  %v3112_v31 = vshrl.u32 %v14041_v47, 16  ;;  %4477 = vmatprep.mubr.bf16.mxu1 %v14050_v58  ;;  %v3451_v10 = vsel %vm13362_vm6, %v10350_v36, %v3450_v17  ;;  %v3452_v12 = vrot.slane %v3450_v17, 4  ;;  %v14092_v38 = vpop.f32.mrb[61].mxu1  ;;  %v14129_v36 = vld [vmem:[#allocation3 + $0x3c] sm:$0xf] }
 0x432   : > { %v3077_v50 = vrot.slane %v3075_v19, 4  ;;  %v3080_v51 = vrot.slane %v3078_v35, 5  ;;  %v3084_v13 = vshll.u32 %v14022_v33, 16  ;;  %v3090_v39 = vrot.slane %v3088_v48, 4  ;;  %11584 = vmatpush3.bf16.msra.mxu1 %v12842_v62  ;;  %v14100_v16 = vpop.f32.mrb[62].mxu1 }
 0x433   : > { %v3073_v59 = vsel %vm13377_vm7, %v3068_v61, %v3072_v46  ;;  %v3454_v18 = vsel %vm13362_vm6, %v3452_v12, %v3453_v52  ;;  %v3094_v57 = vshll.u32 %v14069_v11, 16  ;;  %v2432_v63 = vrot.slane %v14014_v6, 7  ;;  %11585 = vmatprep.subr.bf16.mxu1 %v12844_v8  ;;  %v14106_v29 = vpop.f32.mrb[63].mxu1  ;;  %v14139_v12 = vld [vmem:[#allocation3 + $0x40] sm:$0xf] }
 0x434   : > { %v14086_v1 = vcombine.low %v3063_v7, %v3073_v59  ;;  %v14097_v15 = vcombine.low %v3451_v10, %v3454_v18  ;;  %v3081_v21 = vor.u32 %v3080_v51, %v3077_v50  ;;  %v3086_v22 = vrot.slane %v3084_v13, 5 }
 0x435   : > { %v2429_v26 = vrot.slane %v14024_v3, 7  ;;  %v3096_v20 = vrot.slane %v3094_v57, 5  ;;  %v2514_v44 = vsel %vm708_vm1, 0.0, %v2432_v63  ;;  %v2433_v6 = vrot.slane %v14035_v41, 7  ;;  %v12851_v3 = vld [vmem:[%s17639_s8 + $0x1a8] sm:$0xff]   ;;  %v12853_v41 = vld [vmem:[%s17639_s8 + $0x1f0] sm:$0xff]  }
 0x436   : > { %4316 = vmatprep.mubr.bf16.mxu0 %v14086_v1  ;;  %v2430_v24 = vrot.slane %v14043_v49, 7  ;;  %v3082_v25 = vrot.slane %v3081_v21, 4  ;;  %v3091_v27 = vor.u32 %v3090_v39, %v3086_v22  ;;  %v10351_v37 = vrot.slane %v14007_v23, 9  ;;  %11586 = vmatpush3.bf16.msra.mxu1 %v12847_v14  ;;  %v14123_v49 = vld [vmem:[#allocation3 + $0x38] sm:$0x1] }
 0x437   : > { %v2513_v32 = vsel %vm708_vm1, 0.0, %v2429_v26  ;;  %v2434_v60 = vsel %vm708_vm1, %v2432_v63, %v2433_v6  ;;  %v2530_v19 = vsel %vm708_vm1, %v2433_v6, 0.0  ;;  %11587 = vmatprep.subr.bf16.mxu1 %v12849_v56  ;;  %v3457_v62 = vrot.slane %v14022_v33, 5  ;;  %v14160_v63 = vld [vmem:[#allocation3 + $0x48] sm:$0xf] }
 0x438   : > { %v10841_v43 = vpack.c.bf16 %v2513_v32, %v2513_v32  ;;  %v2431_v35 = vsel %vm708_vm1, %v2429_v26, %v2430_v24  ;;  %4478 = vmatmul.mubr.bf16.gmra.mrb[84].mxu1 %v14097_v15  ;;  %v3087_v23 = vsel %vm13377_vm7, %v3082_v25, %v3086_v22  ;;  %v3092_v55 = vrot.slane %v3091_v27, 4  ;;  %v14131_v17 = vpop.f32.mrb[64].mxu1  ;;  %v12859_v27 = vld [vmem:[%s17639_s8 + $0x1b8] sm:$0xff]  }
 0x439   : > { %4317 = vmatmul.mubr.bf16.gmra.mrb[44].mxu0 %v13959_v54  ;;  %v10846_v45 = vpack.c.bf16 %v2530_v19, %v2530_v19  ;;  %v10985_v46 = vpack.c.bf16 %v2434_v60, %v2514_v44  ;;  %4485 = vmatprep.mubr.bf16.mxu1 %v14076_v30  ;;  %v2529_v0 = vsel %vm708_vm1, %v2430_v24, 0.0  ;;  %v10842_v48 = vpack.c.bf16 %v2431_v35, %v2431_v35  ;;  %v14141_v33 = vpop.f32.mrb[65].mxu1  ;;  %v14169_v44 = vld [vmem:[#allocation3 + $0x4c] sm:$0xf] }
 0x43a   : > { %2766 = vst [vmem:[#allocation3 + $0x54] sm:$0xf] %v10841_v43  ;;  %v3460_v7 = vrot.slane %v14069_v11, 5  ;;  %v3097_v52 = vsel %vm13377_vm7, %v3092_v55, %v3096_v20  ;;  %v10843_v8 = vpack.c.bf16 %v2529_v0, %v2529_v0  ;;  %v3101_v61 = vrot.slane %v3099_v28, 4  ;;  %11588 = vmatpush3.bf16.msra.mxu1 %v12851_v3  ;;  %v12855_v11 = vld [vmem:[%s17639_s8 + $0x1b0] sm:$0xff]   ;;  %v14151_v13 = vpop.f32.mrb[66].mxu1 }
 0x43b   : > { %11010 = vst [vmem:[#allocation3 + $0x60] sm:$0xff] %v10985_v46   ;;  %2771 = vst [vmem:[#allocation3 + $0x68] sm:$0x1] %v10846_v45  ;;  %v3104_v10 = vrot.slane %v3102_v4, 5  ;;  %v14146_v50 = vcombine.low %v3087_v23, %v3097_v52  ;;  %v3458_v59 = vsel %vm13362_vm6, %v10351_v37, %v3457_v62  ;;  %v3459_v51 = vrot.slane %v3457_v62, 4  ;;  %11589 = vmatprep.subr.bf16.mxu1 %v12853_v41  ;;  %v12857_v4 = vld [vmem:[%s17639_s8 + $0x1f8] sm:$0xff]  }
 0x43c   : > { %2767 = vst [vmem:[#allocation3 + $0x58] sm:$0xf] %v10842_v48  ;;  %v3108_v28 = vshll.u32 %v14041_v47, 16  ;;  %2768 = vst [vmem:[#allocation3 + $0x5c] sm:$0x1] %v10843_v8  ;;  %v3114_v14 = vrot.slane %v3112_v31, 4  ;;  %v14175_v25 = vcombine.low %v14129_v36, %v14139_v12  ;;  %v14197_v45 = vcombine.low %v14160_v63, %v14169_v44 }
 0x43d   : > { %v3105_v39 = vor.u32 %v3104_v10, %v3101_v61  ;;  %v3118_v18 = vshll.u32 %v14123_v49, 16  ;;  %v3123_v57 = vshrl.u32 %v14129_v36, 16  ;;  %v14162_v56 = vpop.f32.mrb[67].mxu1  ;;  %4324 = vmatprep.mubr.bf16.mxu0 %v14146_v50  ;;  %v3461_v21 = vsel %vm13362_vm6, %v3459_v51, %v3460_v7  ;;  %v14190_v23 = vld [vmem:[#allocation3 + $0x44] sm:$0x1] }
 0x43e   : > { %v3110_v22 = vrot.slane %v3108_v28, 5  ;;  %v3126_v26 = vshll.u32 %v14129_v36, 16  ;;  %v3136_v20 = vshrl.u32 %v14139_v12, 16  ;;  %v14171_v31 = vcombine.low %v3458_v59, %v3461_v21  ;;  %11590 = vmatpush3.bf16.msra.mxu1 %v12855_v11 }
 0x43f   : > { %v3106_v6 = vrot.slane %v3105_v39, 4  ;;  %v3120_v24 = vrot.slane %v3118_v18, 5  ;;  %v10352_v37 = vrot.slane %v14033_v40, 9  ;;  %v3464_v3 = vrot.slane %v14041_v47, 5  ;;  %11591 = vmatprep.subr.bf16.mxu1 %v12857_v4 }
 0x440   : > { %v3115_v32 = vor.u32 %v3114_v14, %v3110_v22  ;;  %v3467_v43 = vrot.slane %v14123_v49, 5  ;;  %4486 = vmatmul.mubr.bf16.gmra.mrb[88].mxu1 %v14171_v31  ;;  %v3147_v19 = vshrl.u32 %v14160_v63, 16  ;;  %v3150_v35 = vshll.u32 %v14160_v63, 16  ;;  %v14210_v51 = vpop.f32.mrb[68].mxu1 }
 0x441   : > { %4325 = vmatmul.mubr.bf16.gmra.mrb[48].mxu0 %v14050_v58  ;;  %v3111_v60 = vsel %vm13377_vm7, %v3106_v6, %v3110_v22  ;;  %v3160_v41 = vshrl.u32 %v14169_v44, 16  ;;  %4493 = vmatprep.mubr.bf16.mxu1 %v14175_v25  ;;  %v3465_v47 = vsel %vm13362_vm6, %v10352_v37, %v3464_v3  ;;  %v3466_v55 = vrot.slane %v3464_v3, 4  ;;  %v14215_v18 = vpop.f32.mrb[69].mxu1 }
 0x442   : > { %v3116_v40 = vrot.slane %v3115_v32, 4  ;;  %v3125_v46 = vrot.slane %v3123_v57, 4  ;;  %v3128_v49 = vrot.slane %v3126_v26, 5  ;;  %v3132_v0 = vshll.u32 %v14139_v12, 16  ;;  %11592 = vmatpush3.bf16.msra.mxu1 %v12859_v27  ;;  %v14220_v26 = vpop.f32.mrb[70].mxu1 }
 0x443   : > { %v3138_v48 = vrot.slane %v3136_v20, 4  ;;  %v3468_v7 = vsel %vm13362_vm6, %v3466_v55, %v3467_v43  ;;  %v3142_v52 = vshll.u32 %v14190_v23, 16  ;;  %v2438_v8 = vrot.slane %v14081_v2, 7 }
 0x444   : > { %v3121_v62 = vsel %vm13377_vm7, %v3116_v40, %v3120_v24  ;;  %v14208_v10 = vcombine.low %v3465_v47, %v3468_v7  ;;  %v3129_v11 = vor.u32 %v3128_v49, %v3125_v46  ;;  %v3134_v59 = vrot.slane %v3132_v0, 5  ;;  %v14226_v24 = vpop.f32.mrb[71].mxu1  ;;  %v14237_v40 = vld [vmem:[#allocation3 + $0x54] sm:$0xf] }
 0x445   : > { %v14206_v61 = vcombine.low %v3111_v60, %v3121_v62  ;;  %v3144_v28 = vrot.slane %v3142_v52, 5  ;;  %v2516_v4 = vsel %vm708_vm1, 0.0, %v2438_v8  ;;  %v2435_v39 = vrot.slane %v14092_v38, 7  ;;  %v2823_v60 = vld [vmem:[#allocation3 + $0x50] sm:$0x1] }
 0x446   : > { %v2439_v14 = vrot.slane %v14100_v16, 7  ;;  %v3130_v2 = vrot.slane %v3129_v11, 4  ;;  %v3139_v57 = vor.u32 %v3138_v48, %v3134_v59  ;;  %v2436_v21 = vrot.slane %v14106_v29, 7  ;;  %v14243_v48 = vld [vmem:[#allocation3 + $0x58] sm:$0xf] }
 0x447   : > { %4332 = vmatprep.mubr.bf16.mxu0 %v14206_v61  ;;  %v10353_v22 = vrot.slane %v14129_v36, 9  ;;  %v2515_v20 = vsel %vm708_vm1, 0.0, %v2435_v39  ;;  %v3471_v16 = vrot.slane %v14139_v12, 5  ;;  %v3474_v52 = vrot.slane %v14190_v23, 5 }
 0x448   : > { %v2440_v6 = vsel %vm708_vm1, %v2438_v8, %v2439_v14  ;;  %v2532_v38 = vsel %vm708_vm1, %v2439_v14, 0.0  ;;  %4494 = vmatmul.mubr.bf16.gmra.mrb[92].mxu1 %v14208_v10  ;;  %v3135_v29 = vsel %vm13377_vm7, %v3130_v2, %v3134_v59  ;;  %v3140_v36 = vrot.slane %v3139_v57, 4  ;;  %v14239_v47 = vpop.f32.mrb[72].mxu1 }
 0x449   : > { %4333 = vmatmul.mubr.bf16.gmra.mrb[52].mxu0 %v14076_v30  ;;  %v10847_v27 = vpack.c.bf16 %v2515_v20, %v2515_v20  ;;  %v10852_v32 = vpack.c.bf16 %v2532_v38, %v2532_v38  ;;  %4501 = vmatprep.mubr.bf16.mxu1 %v14197_v45  ;;  %v10990_v37 = vpack.c.bf16 %v2440_v6, %v2516_v4  ;;  %v2531_v43 = vsel %vm708_vm1, %v2436_v21, 0.0  ;;  %v14245_v62 = vpop.f32.mrb[73].mxu1 }
 0x44a   : > { %v2437_v3 = vsel %vm708_vm1, %v2435_v39, %v2436_v21  ;;  %v3472_v12 = vsel %vm13362_vm6, %v10353_v22, %v3471_v16  ;;  %v3145_v55 = vsel %vm13377_vm7, %v3140_v36, %v3144_v28  ;;  %v10849_v49 = vpack.c.bf16 %v2531_v43, %v2531_v43  ;;  %v14254_v59 = vpop.f32.mrb[74].mxu1  ;;  %v14267_v21 = vld [vmem:[#allocation3 + $0x60] sm:$0xf]  ;;  %v14269_v22 = vld [vmem:[#allocation3 + $0x64] sm:$0xf] }
 0x44b   : > { %2772 = vst [vmem:[#allocation3 + $0x6c] sm:$0xf] %v10847_v27  ;;  %2777 = vst [vmem:[#allocation3 + $0x80] sm:$0x1] %v10852_v32  ;;  %v10848_v46 = vpack.c.bf16 %v2437_v3, %v2437_v3  ;;  %v3473_v0 = vrot.slane %v3471_v16, 4  ;;  %v14247_v7 = vcombine.low %v3135_v29, %v3145_v55  ;;  %v3149_v8 = vrot.slane %v3147_v19, 4 }
 0x44c   : > { %11011 = vst [vmem:[#allocation3 + $0x78] sm:$0xff] %v10990_v37   ;;  %v3152_v11 = vrot.slane %v3150_v35, 5  ;;  %2774 = vst [vmem:[#allocation3 + $0x74] sm:$0x1] %v10849_v49  ;;  %v3156_v28 = vshll.u32 %v14169_v44, 16  ;;  %v3162_v4 = vrot.slane %v3160_v41, 4  ;;  %v14275_v38 = vcombine.low %v14237_v40, %v14243_v48 }
 0x44d   : > { %2773 = vst [vmem:[#allocation3 + $0x70] sm:$0xf] %v10848_v46  ;;  %v3166_v39 = vshll.u32 %v2823_v60, 16  ;;  %v3171_v14 = vshrl.u32 %v14237_v40, 16  ;;  %v14260_v2 = vpop.f32.mrb[75].mxu1  ;;  %4340 = vmatprep.mubr.bf16.mxu0 %v14247_v7  ;;  %v3475_v19 = vsel %vm13362_vm6, %v3473_v0, %v3474_v52  ;;  %v3174_v23 = vshll.u32 %v14237_v40, 16 }
 0x44e   : > { %v3153_v35 = vor.u32 %v3152_v11, %v3149_v8  ;;  %v3184_v57 = vshrl.u32 %v14243_v48, 16  ;;  %v14271_v41 = vcombine.low %v3472_v12, %v3475_v19  ;;  %v3158_v20 = vrot.slane %v3156_v28, 5  ;;  %v14284_v12 = vld [vmem:[#allocation3 + $0x5c] sm:$0x1] }
 0x44f   : > { %v3168_v6 = vrot.slane %v3166_v39, 5  ;;  %v10354_v29 = vrot.slane %v14160_v63, 9  ;;  %v3478_v36 = vrot.slane %v14169_v44, 5  ;;  %v3481_v27 = vrot.slane %v2823_v60, 5 }
 0x450   : > { %v3154_v16 = vrot.slane %v3153_v35, 4  ;;  %4502 = vmatmul.mubr.bf16.gmra.mrb[96].mxu1 %v14271_v41  ;;  %v3163_v32 = vor.u32 %v3162_v4, %v3158_v20  ;;  %v3195_v37 = vshrl.u32 %v14267_v21, 16  ;;  %v3198_v3 = vshll.u32 %v14267_v21, 16 }
 0x451   : > { %4341 = vmatmul.mubr.bf16.gmra.mrb[56].mxu0 %v14175_v25  ;;  %v3208_v43 = vshrl.u32 %v14269_v22, 16  ;;  %4509 = vmatprep.mubr.bf16.mxu1 %v14275_v38  ;;  %v3479_v63 = vsel %vm13362_vm6, %v10354_v29, %v3478_v36  ;;  %v3480_v44 = vrot.slane %v3478_v36, 4  ;;  %v14293_v60 = vcombine.low %v14267_v21, %v14269_v22 }
 0x452   : > { %v3159_v55 = vsel %vm13377_vm7, %v3154_v16, %v3158_v20  ;;  %v3164_v46 = vrot.slane %v3163_v32, 4  ;;  %v3173_v49 = vrot.slane %v3171_v14, 4  ;;  %v3176_v0 = vrot.slane %v3174_v23, 5 }
 0x453   : > { %v3180_v52 = vshll.u32 %v14243_v48, 16  ;;  %v3482_v8 = vsel %vm13362_vm6, %v3480_v44, %v3481_v27  ;;  %v3186_v11 = vrot.slane %v3184_v57, 4  ;;  %v3190_v28 = vshll.u32 %v14284_v12, 16 }
 0x454   : > { %v2444_v4 = vrot.slane %v14131_v17, 7  ;;  %v3169_v39 = vsel %vm13377_vm7, %v3164_v46, %v3168_v6  ;;  %v14302_v19 = vcombine.low %v3479_v63, %v3482_v8  ;;  %v3177_v35 = vor.u32 %v3176_v0, %v3173_v49  ;;  %v2829_v49 = vld [vmem:[#allocation3 + $0x68] sm:$0x1] }
 0x455   : > { %v3182_v20 = vrot.slane %v3180_v52, 5  ;;  %v14304_v16 = vcombine.low %v3159_v55, %v3169_v39  ;;  %v3192_v14 = vrot.slane %v3190_v28, 5  ;;  %v2441_v29 = vrot.slane %v14141_v33, 7  ;;  %v14326_v28 = vld [vmem:[#allocation3 + $0x6c] sm:$0xf] }
 0x456   : > { %v2518_v23 = vsel %vm708_vm1, 0.0, %v2444_v4  ;;  %v3178_v36 = vrot.slane %v3177_v35, 4  ;;  %v2445_v27 = vrot.slane %v14151_v13, 7  ;;  %v2442_v17 = vrot.slane %v14162_v56, 7 }
 0x457   : > { %v3187_v57 = vor.u32 %v3186_v11, %v3182_v20  ;;  %4348 = vmatprep.mubr.bf16.mxu0 %v14304_v16  ;;  %v2517_v6 = vsel %vm708_vm1, 0.0, %v2441_v29  ;;  %v10355_v32 = vrot.slane %v14237_v40, 9  ;;  %v3485_v55 = vrot.slane %v14243_v48, 5 }
 0x458   : > { %v3488_v63 = vrot.slane %v14284_v12, 5  ;;  %4510 = vmatmul.mubr.bf16.gmra.mrb[100].mxu1 %v14302_v19  ;;  %v3183_v33 = vsel %vm13377_vm7, %v3178_v36, %v3182_v20  ;;  %v10853_v44 = vpack.c.bf16 %v2517_v6, %v2517_v6  ;;  %v2446_v56 = vsel %vm708_vm1, %v2444_v4, %v2445_v27  ;;  %v14328_v4 = vld [vmem:[#allocation3 + $0x70] sm:$0xf] }
 0x459   : > { %4349 = vmatmul.mubr.bf16.gmra.mrb[60].mxu0 %v14197_v45  ;;  %v3188_v13 = vrot.slane %v3187_v57, 4  ;;  %4517 = vmatprep.mubr.bf16.mxu1 %v14293_v60  ;;  %v2534_v46 = vsel %vm708_vm1, %v2445_v27, 0.0  ;;  %v10995_v40 = vpack.c.bf16 %v2446_v56, %v2518_v23  ;;  %v2443_v48 = vsel %vm708_vm1, %v2441_v29, %v2442_v17 }
 0x45a   : > { %v2533_v12 = vsel %vm708_vm1, %v2442_v17, 0.0  ;;  %2778 = vst [vmem:[#allocation3 + $0x84] sm:$0xf] %v10853_v44  ;;  %v10858_v52 = vpack.c.bf16 %v2534_v46, %v2534_v46  ;;  %v10854_v8 = vpack.c.bf16 %v2443_v48, %v2443_v48  ;;  %v3486_v35 = vsel %vm13362_vm6, %v10355_v32, %v3485_v55 }
 0x45b   : > { %v3193_v0 = vsel %vm13377_vm7, %v3188_v13, %v3192_v14  ;;  %v10855_v11 = vpack.c.bf16 %v2533_v12, %v2533_v12  ;;  %11012 = vst [vmem:[#allocation3 + $0x90] sm:$0xff] %v10995_v40   ;;  %v3487_v20 = vrot.slane %v3485_v55, 4  ;;  %v3197_v23 = vrot.slane %v3195_v37, 4  ;;  %v14341_v37 = vld [vmem:[#allocation3 + $0x78] sm:$0xf] }
 0x45c   : > { %v14330_v39 = vcombine.low %v3183_v33, %v3193_v0  ;;  %2783 = vst [vmem:[#allocation3 + $0x98] sm:$0x1] %v10858_v52  ;;  %2779 = vst [vmem:[#allocation3 + $0x88] sm:$0xf] %v10854_v8  ;;  %v3200_v14 = vrot.slane %v3198_v3, 5  ;;  %v3204_v29 = vshll.u32 %v14269_v22, 16  ;;  %v14349_v44 = vcombine.low %v14326_v28, %v14328_v4 }
 0x45d   : > { %2780 = vst [vmem:[#allocation3 + $0x8c] sm:$0x1] %v10855_v11  ;;  %v3210_v36 = vrot.slane %v3208_v43, 4  ;;  %v3214_v57 = vshll.u32 %v2829_v49, 16  ;;  %v3489_v27 = vsel %vm13362_vm6, %v3487_v20, %v3488_v63  ;;  %v3219_v17 = vshrl.u32 %v14326_v28, 16 }
 0x45e   : > { %4356 = vmatprep.mubr.bf16.mxu0 %v14330_v39  ;;  %v3222_v6 = vshll.u32 %v14326_v28, 16  ;;  %v3232_v32 = vshrl.u32 %v14328_v4, 16  ;;  %v14343_v55 = vcombine.low %v3486_v35, %v3489_v27  ;;  %v3201_v3 = vor.u32 %v3200_v14, %v3197_v23  ;;  %v14345_v43 = vld [vmem:[#allocation3 + $0x7c] sm:$0xf]  ;;  %v14357_v52 = vld [vmem:[#allocation3 + $0x74] sm:$0x1] }
 0x45f   : > { %v3206_v33 = vrot.slane %v3204_v29, 5  ;;  %v3216_v13 = vrot.slane %v3214_v57, 5  ;;  %v10356_v63 = vrot.slane %v14267_v21, 9  ;;  %v3492_v56 = vrot.slane %v14269_v22, 5 }
 0x460   : > { %v3495_v46 = vrot.slane %v2829_v49, 5  ;;  %4518 = vmatmul.mubr.bf16.gmra.mrb[104].mxu1 %v14343_v55  ;;  %v3202_v40 = vrot.slane %v3201_v3, 4  ;;  %v3243_v12 = vshrl.u32 %v14341_v37, 16  ;;  %v3246_v0 = vshll.u32 %v14341_v37, 16 }
 0x461   : > { %4357 = vmatmul.mubr.bf16.gmra.mrb[64].mxu0 %v14275_v38  ;;  %v3211_v48 = vor.u32 %v3210_v36, %v3206_v33  ;;  %4525 = vmatprep.mubr.bf16.mxu1 %v14349_v44  ;;  %v3493_v21 = vsel %vm13362_vm6, %v10356_v63, %v3492_v56  ;;  %v3494_v8 = vrot.slane %v3492_v56, 4  ;;  %v3256_v22 = vshrl.u32 %v14345_v43, 16 }
 0x462   : > { %v14365_v49 = vcombine.low %v14341_v37, %v14345_v43  ;;  %v3207_v11 = vsel %vm13377_vm7, %v3202_v40, %v3206_v33  ;;  %v3221_v20 = vrot.slane %v3219_v17, 4  ;;  %v3224_v23 = vrot.slane %v3222_v6, 5 }
 0x463   : > { %v3212_v35 = vrot.slane %v3211_v48, 4  ;;  %v3496_v14 = vsel %vm13362_vm6, %v3494_v8, %v3495_v46  ;;  %v3228_v29 = vshll.u32 %v14328_v4, 16  ;;  %v3234_v36 = vrot.slane %v3232_v32, 4 }
 0x464   : > { %17724 = vst [vmem:[#allocation6_spill] sm:$0xff] %v14365_v49  ;;  %v3238_v57 = vshll.u32 %v14357_v52, 16  ;;  %v14375_v3 = vcombine.low %v3493_v21, %v3496_v14  ;;  %v3225_v63 = vor.u32 %v3224_v23, %v3221_v20  ;;  %v2450_v56 = vrot.slane %v14210_v51, 7 }
 0x465   : > { %v3217_v27 = vsel %vm13377_vm7, %v3212_v35, %v3216_v13  ;;  %v3230_v17 = vrot.slane %v3228_v29, 5  ;;  %v2447_v40 = vrot.slane %v14215_v18, 7  ;;  %v2451_v32 = vrot.slane %v14220_v26, 7 }
 0x466   : > { %v14378_v33 = vcombine.low %v3207_v11, %v3217_v27  ;;  %v3240_v6 = vrot.slane %v3238_v57, 5  ;;  %v3226_v46 = vrot.slane %v3225_v63, 4  ;;  %v2520_v48 = vsel %vm708_vm1, 0.0, %v2450_v56  ;;  %v2835_v27 = vld [vmem:[#allocation3 + $0x80] sm:$0x1] }
 0x467   : > { %v2448_v8 = vrot.slane %v14226_v24, 7  ;;  %v3235_v13 = vor.u32 %v3234_v36, %v3230_v17  ;;  %v2519_v21 = vsel %vm708_vm1, 0.0, %v2447_v40  ;;  %v10357_v51 = vrot.slane %v14326_v28, 9  ;;  %v14399_v63 = vld [vmem:[#allocation3 + $0x84] sm:$0xf] }
 0x468   : > { %4364 = vmatprep.mubr.bf16.mxu0 %v14378_v33  ;;  %v3499_v11 = vrot.slane %v14328_v4, 5  ;;  %4526 = vmatmul.mubr.bf16.gmra.mrb[108].mxu1 %v14375_v3  ;;  %v3231_v18 = vsel %vm13377_vm7, %v3226_v46, %v3230_v17  ;;  %v10859_v35 = vpack.c.bf16 %v2519_v21, %v2519_v21  ;;  %v2452_v26 = vsel %vm708_vm1, %v2450_v56, %v2451_v32 }
 0x469   : > { %4365 = vmatmul.mubr.bf16.gmra.mrb[68].mxu0 %v14293_v60  ;;  %v2536_v24 = vsel %vm708_vm1, %v2451_v32, 0.0  ;;  %4533 = vmatprep.mubr.bf16.mxu1 %v14365_v49  ;;  %v3236_v20 = vrot.slane %v3235_v13, 4  ;;  %v11000_v14 = vpack.c.bf16 %v2452_v26, %v2520_v48  ;;  %v2449_v28 = vsel %vm708_vm1, %v2447_v40, %v2448_v8  ;;  %v14404_v48 = vld [vmem:[#allocation3 + $0x88] sm:$0xf] }
 0x46a   : > { %v10864_v23 = vpack.c.bf16 %v2536_v24, %v2536_v24  ;;  %2784 = vst [vmem:[#allocation3 + $0x9c] sm:$0xf] %v10859_v35  ;;  %v2535_v4 = vsel %vm708_vm1, %v2448_v8, 0.0  ;;  %v10860_v29 = vpack.c.bf16 %v2449_v28, %v2449_v28  ;;  %v3500_v36 = vsel %vm13362_vm6, %v10357_v51, %v3499_v11 }
 0x46b   : > { %v3501_v57 = vrot.slane %v3499_v11, 4  ;;  %v3241_v56 = vsel %vm13377_vm7, %v3236_v20, %v3240_v6  ;;  %11013 = vst [vmem:[#allocation3 + $0xa8] sm:$0xff] %v11000_v14   ;;  %v10861_v17 = vpack.c.bf16 %v2535_v4, %v2535_v4  ;;  %v3502_v46 = vrot.slane %v14357_v52, 5  ;;  %v14413_v52 = vld [vmem:[#allocation3 + $0x90] sm:$0xf] }
 0x46c   : > { %2789 = vst [vmem:[#allocation3 + $0xb0] sm:$0x1] %v10864_v23  ;;  %v3245_v40 = vrot.slane %v3243_v12, 4  ;;  %v14406_v32 = vcombine.low %v3231_v18, %v3241_v56  ;;  %2785 = vst [vmem:[#allocation3 + $0xa0] sm:$0xf] %v10860_v29  ;;  %v3248_v8 = vrot.slane %v3246_v0, 5  ;;  %v14423_v20 = vcombine.low %v14399_v63, %v14404_v48 }
 0x46d   : > { %v3252_v13 = vshll.u32 %v14345_v43, 16  ;;  %v3258_v21 = vrot.slane %v3256_v22, 4  ;;  %2786 = vst [vmem:[#allocation3 + $0xa4] sm:$0x1] %v10861_v17  ;;  %v3503_v51 = vsel %vm13362_vm6, %v3501_v57, %v3502_v46  ;;  %v3262_v6 = vshll.u32 %v2835_v27, 16 }
 0x46e   : > { %v3267_v11 = vshrl.u32 %v14399_v63, 16  ;;  %v3270_v35 = vshll.u32 %v14399_v63, 16  ;;  %4372 = vmatprep.mubr.bf16.mxu0 %v14406_v32  ;;  %v14416_v12 = vcombine.low %v3500_v36, %v3503_v51  ;;  %v3249_v18 = vor.u32 %v3248_v8, %v3245_v40  ;;  %v14419_v22 = vld [vmem:[#allocation3 + $0x94] sm:$0xf]  ;;  %17725 = vst [vmem:[#allocation7_spill] sm:$0xff] %v14423_v20 }
 0x46f   : > { %v3254_v0 = vrot.slane %v3252_v13, 5  ;;  %v3280_v26 = vshrl.u32 %v14404_v48, 16  ;;  %v3264_v24 = vrot.slane %v3262_v6, 5  ;;  %v10358_v23 = vrot.slane %v14341_v37, 9 }
 0x470   : > { %v3506_v14 = vrot.slane %v14345_v43, 5  ;;  %4534 = vmatmul.mubr.bf16.gmra.mrb[112].mxu1 %v14416_v12  ;;  %v3250_v28 = vrot.slane %v3249_v18, 4  ;;  %v3509_v29 = vrot.slane %v2835_v27, 5  ;;  %v3291_v36 = vshrl.u32 %v14413_v52, 16  ;;  %v14435_v43 = vld [vmem:[#allocation3 + $0x8c] sm:$0x1] }
 0x471   : > { %4373 = vmatmul.mubr.bf16.gmra.mrb[72].mxu0 %v14349_v44  ;;  %v3259_v4 = vor.u32 %v3258_v21, %v3254_v0  ;;  %4541 = vmatprep.mubr.bf16.mxu1 %v14423_v20  ;;  %v3294_v17 = vshll.u32 %v14413_v52, 16  ;;  %v3304_v37 = vshrl.u32 %v14419_v22, 16  ;;  %v14441_v27 = vcombine.low %v14413_v52, %v14419_v22 }
 0x472   : > { %v3507_v57 = vsel %vm13362_vm6, %v10358_v23, %v3506_v14  ;;  %v3508_v56 = vrot.slane %v3506_v14, 4  ;;  %v3255_v46 = vsel %vm13377_vm7, %v3250_v28, %v3254_v0  ;;  %v3269_v8 = vrot.slane %v3267_v11, 4 }
 0x473   : > { %v3260_v40 = vrot.slane %v3259_v4, 4  ;;  %17726 = vst [vmem:[#allocation8_spill] sm:$0xff] %v14441_v27  ;;  %v3272_v21 = vrot.slane %v3270_v35, 5  ;;  %v3276_v51 = vshll.u32 %v14404_v48, 16  ;;  %v3282_v6 = vrot.slane %v3280_v26, 4 }
 0x474   : > { %v3510_v13 = vsel %vm13362_vm6, %v3508_v56, %v3509_v29  ;;  %v3286_v0 = vshll.u32 %v14435_v43, 16  ;;  %v2456_v14 = vrot.slane %v14239_v47, 7  ;;  %v2453_v34 = vrot.slane %v14245_v62, 7 }
 0x475   : > { %v3265_v18 = vsel %vm13377_vm7, %v3260_v40, %v3264_v24  ;;  %v14448_v23 = vcombine.low %v3507_v57, %v3510_v13  ;;  %v3273_v4 = vor.u32 %v3272_v21, %v3269_v8  ;;  %v3278_v11 = vrot.slane %v3276_v51, 5 }
 0x476   : > { %v14452_v28 = vcombine.low %v3255_v46, %v3265_v18  ;;  %v3288_v29 = vrot.slane %v3286_v0, 5  ;;  %v2522_v35 = vsel %vm708_vm1, 0.0, %v2456_v14  ;;  %v2457_v26 = vrot.slane %v14254_v59, 7 }
 0x477   : > { %17727 = vst [vmem:[#allocation9_spill] sm:$0xff] %v14448_v23  ;;  %v2454_v56 = vrot.slane %v14260_v2, 7  ;;  %v3274_v24 = vrot.slane %v3273_v4, 4  ;;  %v3283_v57 = vor.u32 %v3282_v6, %v3278_v11  ;;  %v2521_v40 = vsel %vm708_vm1, 0.0, %v2453_v34  ;;  %v14472_v4 = vld [vmem:[#allocation3 + $0x9c] sm:$0xf] }
 0x478   : > { %4380 = vmatprep.mubr.bf16.mxu0 %v14452_v28  ;;  %v10359_v47 = vrot.slane %v14399_v63, 9  ;;  %4542 = vmatmul.mubr.bf16.gmra.mrb[116].mxu1 %v14448_v23  ;;  %v10865_v62 = vpack.c.bf16 %v2521_v40, %v2521_v40  ;;  %v2458_v46 = vsel %vm708_vm1, %v2456_v14, %v2457_v26  ;;  %v2538_v8 = vsel %vm708_vm1, %v2457_v26, 0.0  ;;  %v2841_v63 = vld [vmem:[#allocation3 + $0x98] sm:$0x1] }
 0x479   : > { %4381 = vmatmul.mubr.bf16.gmra.mrb[76].mxu0 %v14365_v49  ;;  %v2455_v59 = vsel %vm708_vm1, %v2453_v34, %v2454_v56  ;;  %4549 = vmatprep.mubr.bf16.mxu1 %v14441_v27  ;;  %v3279_v2 = vsel %vm13377_vm7, %v3274_v24, %v3278_v11  ;;  %v3284_v13 = vrot.slane %v3283_v57, 4  ;;  %v10870_v21 = vpack.c.bf16 %v2538_v8, %v2538_v8 }
 0x47a   : > { %v11005_v51 = vpack.c.bf16 %v2458_v46, %v2522_v35  ;;  %2790 = vst [vmem:[#allocation3 + $0xb4] sm:$0xf] %v10865_v62  ;;  %v2537_v6 = vsel %vm708_vm1, %v2454_v56, 0.0  ;;  %v10866_v18 = vpack.c.bf16 %v2455_v59, %v2455_v59  ;;  %v3513_v0 = vrot.slane %v14404_v48, 5  ;;  %v14476_v35 = vld [vmem:[#allocation3 + $0xa0] sm:$0xf] }
 0x47b   : > { %v3516_v14 = vrot.slane %v14435_v43, 5  ;;  %v3289_v34 = vsel %vm13377_vm7, %v3284_v13, %v3288_v29  ;;  %2795 = vst [vmem:[#allocation3 + $0xc8] sm:$0x1] %v10870_v21  ;;  %v10867_v11 = vpack.c.bf16 %v2537_v6, %v2537_v6  ;;  %v3293_v26 = vrot.slane %v3291_v36, 4 }
 0x47c   : > { %11014 = vst [vmem:[#allocation3 + $0xc0] sm:$0xff] %v11005_v51   ;;  %v3296_v24 = vrot.slane %v3294_v17, 5  ;;  %v14478_v57 = vcombine.low %v3279_v2, %v3289_v34  ;;  %2791 = vst [vmem:[#allocation3 + $0xb8] sm:$0xf] %v10866_v18  ;;  %v3514_v48 = vsel %vm13362_vm6, %v10359_v47, %v3513_v0  ;;  %v3515_v56 = vrot.slane %v3513_v0, 4 }
 0x47d   : > { %v3300_v43 = vshll.u32 %v14419_v22, 16  ;;  %2792 = vst [vmem:[#allocation3 + $0xbc] sm:$0x1] %v10867_v11  ;;  %v3306_v62 = vrot.slane %v3304_v37, 4  ;;  %v3310_v29 = vshll.u32 %v2841_v63, 16  ;;  %v3315_v46 = vshrl.u32 %v14472_v4, 16 }
 0x47e   : > { %17728 = vst [vmem:[#allocation10_spill] sm:$0xff] %v14478_v57  ;;  %v3297_v40 = vor.u32 %v3296_v24, %v3293_v26  ;;  %4388 = vmatprep.mubr.bf16.mxu0 %v14478_v57  ;;  %v3517_v36 = vsel %vm13362_vm6, %v3515_v56, %v3516_v14  ;;  %v3318_v8 = vshll.u32 %v14472_v4, 16  ;;  %v3328_v59 = vshrl.u32 %v14476_v35, 16  ;;  %v14489_v47 = vld [vmem:[#allocation3 + $0xa8] sm:$0xf] }
 0x47f   : > { %v3302_v17 = vrot.slane %v3300_v43, 5  ;;  %v14491_v2 = vcombine.low %v3514_v48, %v3517_v36  ;;  %v3312_v21 = vrot.slane %v3310_v29, 5  ;;  %v14495_v37 = vcombine.low %v14472_v4, %v14476_v35  ;;  %v14497_v51 = vld [vmem:[#allocation3 + $0xac] sm:$0xf]  ;;  %v2844_v24 = vld [vmem:[#allocation3 + $0xa4] sm:$0x1] }
 0x480   : > { %v3298_v13 = vrot.slane %v3297_v40, 4  ;;  %v10360_v18 = vrot.slane %v14413_v52, 9  ;;  %v3520_v0 = vrot.slane %v14419_v22, 5  ;;  %v3523_v14 = vrot.slane %v2841_v63, 5 }
 0x481   : > { %17729 = vst [vmem:[#allocation11_spill] sm:$0xff] %v14491_v2  ;;  %17730 = vst [vmem:[#allocation12_spill] sm:$0xff] %v14495_v37  ;;  %4389 = vmatmul.mubr.bf16.gmra.mrb[80].mxu0 %v14423_v20  ;;  %v3307_v6 = vor.u32 %v3306_v62, %v3302_v17  ;;  %4550 = vmatmul.mubr.bf16.gmra.mrb[120].mxu1 %v14491_v2  ;;  %v3339_v11 = vshrl.u32 %v14489_v47, 16  ;;  %v3342_v26 = vshll.u32 %v14489_v47, 16  ;;  %v3352_v22 = vshrl.u32 %v14497_v51, 16 }
 0x482   : > { %v3303_v34 = vsel %vm13377_vm7, %v3298_v13, %v3302_v17  ;;  %4557 = vmatprep.mubr.bf16.mxu1 %v14495_v37  ;;  %v3521_v56 = vsel %vm13362_vm6, %v10360_v18, %v3520_v0  ;;  %v3522_v52 = vrot.slane %v3520_v0, 4  ;;  %v3317_v63 = vrot.slane %v3315_v46, 4  ;;  %v14523_v2 = vld [vmem:[#allocation3 + $0xb0] sm:$0x1]  ;;  %v2853_v23 = vld [vmem:[#allocation3 + $0xc8] sm:$0x1] }
 0x483   : > { %v3308_v48 = vrot.slane %v3307_v6, 4  ;;  %v3320_v43 = vrot.slane %v3318_v8, 5  ;;  %v3324_v40 = vshll.u32 %v14476_v35, 16  ;;  %v3330_v62 = vrot.slane %v3328_v59, 4  ;;  %v14517_v6 = vpop.f32.mrb[36].mxu0 }
 0x484   : > { %v3524_v36 = vsel %vm13362_vm6, %v3522_v52, %v3523_v14  ;;  %v3334_v17 = vshll.u32 %v2844_v24, 16  ;;  %v10361_v13 = vrot.slane %v14472_v4, 9  ;;  %v14525_v59 = vpop.f32.mrb[37].mxu0  ;;  %v3341_v14 = vrot.slane %v3339_v11, 4 }
 0x485   : > { %v3313_v29 = vsel %vm13377_vm7, %v3308_v48, %v3312_v21  ;;  %v14521_v0 = vcombine.low %v3521_v56, %v3524_v36  ;;  %v3321_v46 = vor.u32 %v3320_v43, %v3317_v63  ;;  %v3326_v8 = vrot.slane %v3324_v40, 5  ;;  %v14528_v52 = vpop.f32.mrb[38].mxu0 }
 0x486   : > { %v14519_v18 = vcombine.low %v3303_v34, %v3313_v29  ;;  %v3336_v20 = vrot.slane %v3334_v17, 5  ;;  %v3527_v21 = vrot.slane %v14476_v35, 5  ;;  %v3530_v48 = vrot.slane %v2844_v24, 5  ;;  %v11261_v63 = vpop.f32.mrb[39].mxu0  ;;  %v14538_v24 = vld [vmem:[#allocation3 + $0xb4] sm:$0xf] }
 0x487   : > { %17732 = vst [vmem:[#allocation14_spill] sm:$0xff] %v14521_v0  ;;  %v3322_v4 = vrot.slane %v3321_v46, 4  ;;  %v3331_v34 = vor.u32 %v3330_v62, %v3326_v8  ;;  %v3344_v29 = vrot.slane %v3342_v26, 5  ;;  %v3348_v56 = vshll.u32 %v14497_v51, 16  ;;  %v14543_v46 = vld [vmem:[#allocation3 + $0xb8] sm:$0xf] }
 0x488   : > { %17731 = vst [vmem:[#allocation13_spill] sm:$0xff] %v14519_v18  ;;  %4396 = vmatprep.mubr.bf16.mxu0 %v14519_v18  ;;  %v14535_v43 = vcombine.low %v14489_v47, %v14497_v51  ;;  %v3529_v40 = vrot.slane %v3527_v21, 4  ;;  %v3354_v35 = vrot.slane %v3352_v22, 4  ;;  %v3358_v11 = vshll.u32 %v14523_v2, 16 }
 0x489   : > { %4397 = vmatmul.mubr.bf16.gmra.mrb[84].mxu0 %v14441_v27  ;;  %4558 = vmatmul.mubr.bf16.gmra.mrb[124].mxu1 %v14521_v0  ;;  %v3327_v26 = vsel %vm13377_vm7, %v3322_v4, %v3326_v8  ;;  %v3332_v62 = vrot.slane %v3331_v34, 4  ;;  %v3345_v36 = vor.u32 %v3344_v29, %v3341_v14  ;;  %v3350_v17 = vrot.slane %v3348_v56, 5  ;;  %v14553_v0 = vld [vmem:[%s17639_s8 + $0x200] sm:$0xff]  }
 0x48a   : > { %4565 = vmatprep.mubr.bf16.mxu1 %v14535_v43  ;;  %v3528_v27 = vsel %vm13362_vm6, %v10361_v13, %v3527_v21  ;;  %v3531_v22 = vsel %vm13362_vm6, %v3529_v40, %v3530_v48  ;;  %v3360_v18 = vrot.slane %v3358_v11, 5  ;;  %v3363_v34 = vshrl.u32 %v14538_v24, 16  ;;  %v14562_v48 = vld [vmem:[#allocation3 + $0xc0] sm:$0xf]  ;;  %12335 = vmatprep.subr.bf16.mxu0 %v14553_v0 }
 0x48b   : > { %v3337_v8 = vsel %vm13377_vm7, %v3332_v62, %v3336_v20  ;;  %v3346_v14 = vrot.slane %v3345_v36, 4  ;;  %v3355_v4 = vor.u32 %v3354_v35, %v3350_v17  ;;  %v3366_v13 = vshll.u32 %v14538_v24, 16  ;;  %v2850_v36 = vld [vmem:[#allocation3 + $0xbc] sm:$0x1] }
 0x48c   : > { %v14558_v29 = vcombine.low %v3327_v26, %v3337_v8  ;;  %v3376_v21 = vshrl.u32 %v14543_v46, 16  ;;  %v10362_v20 = vrot.slane %v14489_v47, 9  ;;  %v3534_v35 = vrot.slane %v14497_v51, 5 }
 0x48d   : > { %v3351_v56 = vsel %vm13377_vm7, %v3346_v14, %v3350_v17  ;;  %v3356_v40 = vrot.slane %v3355_v4, 4  ;;  %v14570_v11 = vcombine.low %v3528_v27, %v3531_v22  ;;  %v14574_v26 = vcombine.low %v14538_v24, %v14543_v46  ;;  %v2852_v27 = vld [vmem:[#allocation3 + $0xc4] sm:$0xf] }
 0x48e   : > { %17733 = vst [vmem:[#allocation15_spill] sm:$0xff] %v14558_v29  ;;  %4404 = vmatprep.mubr.bf16.mxu0 %v14558_v29  ;;  %v3537_v62 = vrot.slane %v14523_v2, 5  ;;  %v3536_v17 = vrot.slane %v3534_v35, 4  ;;  %v3547_v14 = vshrl.u32 %v14562_v48, 16  ;;  %v3365_v47 = vrot.slane %v3363_v34, 4 }
 0x48f   : > { %17734 = vst [vmem:[#allocation16_spill] sm:$0xff] %v14570_v11  ;;  %v3361_v8 = vsel %vm13377_vm7, %v3356_v40, %v3360_v18  ;;  %v3368_v22 = vrot.slane %v3366_v13, 5  ;;  %v3372_v4 = vshll.u32 %v14543_v46, 16  ;;  %v3378_v29 = vrot.slane %v3376_v21, 4 }
 0x490   : > { %v14581_v51 = vcombine.low %v3351_v56, %v3361_v8  ;;  %v3535_v2 = vsel %vm13362_vm6, %v10362_v20, %v3534_v35  ;;  %v3550_v18 = vshll.u32 %v14562_v48, 16  ;;  %v3382_v40 = vshll.u32 %v2850_v36, 16 }
 0x491   : > { %4405 = vmatmul.mubr.bf16.gmra.mrb[88].mxu0 %v14495_v37  ;;  %4566 = vmatmul.mubr.bf16.gmra.mrb[128].mxu1 %v14570_v11  ;;  %v3538_v34 = vsel %vm13362_vm6, %v3536_v17, %v3537_v62  ;;  %v3369_v56 = vor.u32 %v3368_v22, %v3365_v47  ;;  %v3374_v13 = vrot.slane %v3372_v4, 5  ;;  %v3541_v8 = vrot.slane %v14543_v46, 5 }
 0x492   : > { %17735 = vst [vmem:[#allocation17_spill] sm:$0xff] %v14581_v51  ;;  %4412 = vmatprep.mubr.bf16.mxu0 %v14581_v51  ;;  %4573 = vmatprep.mubr.bf16.mxu1 %v14574_v26  ;;  %v3560_v21 = vshrl.u32 %v2852_v27, 16  ;;  %v14594_v11 = vcombine.low %v14562_v48, %v2852_v27  ;;  %v3384_v37 = vrot.slane %v3382_v40, 5  ;;  %v14598_v20 = vadd.f32 %v14525_v59, %v14517_v6 }
 0x493   : > { %v3370_v35 = vrot.slane %v3369_v56, 4  ;;  %v3379_v51 = vor.u32 %v3378_v29, %v3374_v13  ;;  %v14601_v57 = vadd.f32 %v11261_v63, %v14528_v52  ;;  %v3549_v62 = vrot.slane %v3547_v14, 4 }
 0x494   : > { %17736 = vst [vmem:[#allocation18_spill] sm:$0xff] %v14598_v20  ;;  %v14603_v17 = vcombine.low %v3535_v2, %v3538_v34  ;;  %v10363_v46 = vrot.slane %v14538_v24, 9  ;;  %v3552_v47 = vrot.slane %v3550_v18, 5  ;;  %v3556_v22 = vshll.u32 %v2852_v27, 16 }
 0x495   : > { %v3375_v4 = vsel %vm13377_vm7, %v3370_v35, %v3374_v13  ;;  %v3380_v40 = vrot.slane %v3379_v51, 4  ;;  %v3543_v49 = vrot.slane %v3541_v8, 4  ;;  %v3544_v6 = vrot.slane %v2850_v36, 5 }
 0x496   : > { %v3553_v59 = vor.u32 %v3552_v47, %v3549_v62  ;;  %v3558_v56 = vrot.slane %v3556_v22, 5  ;;  %v3562_v29 = vrot.slane %v3560_v21, 4  ;;  %v3566_v20 = vshll.u32 %v2853_v23, 16  ;;  %v17741_v22 = vld [vmem:[#allocation11_spill] sm:$0xff] }
 0x497   : > { %v3385_v52 = vsel %vm13377_vm7, %v3380_v40, %v3384_v37  ;;  %v10364_v63 = vrot.slane %v14562_v48, 9  ;;  %v3575_v24 = vrot.slane %v2852_v27, 5  ;;  %v3578_v14 = vrot.slane %v2853_v23, 5  ;;  %v14723_v40 = vld [vmem:[%s17640_s9] ss:$0 sm:$0xff] }
 0x498   : > { %v14613_v2 = vcombine.low %v3375_v4, %v3385_v52  ;;  %v3554_v51 = vrot.slane %v3553_v59, 4  ;;  %v3563_v18 = vor.u32 %v3562_v29, %v3558_v56  ;;  %v3568_v36 = vrot.slane %v3566_v20, 5  ;;  %v17742_v4 = vld [vmem:[#allocation13_spill] sm:$0xff]  ;;  %v17746_v52 = vld [vmem:[#allocation15_spill] sm:$0xff] }
 0x499   : > { %4413 = vmatmul.mubr.bf16.gmra.mrb[92].mxu0 %v14535_v43  ;;  %4574 = vmatmul.mubr.bf16.gmra.mrb[132].mxu1 %v14603_v17  ;;  %v3576_v34 = vsel %vm13362_vm6, %v10364_v63, %v3575_v24  ;;  %v3577_v13 = vrot.slane %v3575_v24, 4  ;;  %v3542_v23 = vsel %vm13362_vm6, %v10363_v46, %v3541_v8  ;;  %v3545_v27 = vsel %vm13362_vm6, %v3543_v49, %v3544_v6  ;;  %v12862_v49 = vld [vmem:[%s17639_s8 + $0x208] sm:$0xff]   ;;  %v12864_v8 = vld [vmem:[%s17639_s8 + $0x218] sm:$0xff]   ;;  %v17740_v46 = vld [vmem:[#allocation7_spill] sm:$0xff] }
 0x49a   : > { %4581 = vmatprep.mubr.bf16.mxu1 %v14594_v11  ;;  %4420 = vmatprep.mubr.bf16.mxu0 %v14613_v2  ;;  %v3559_v37 = vsel %vm13377_vm7, %v3554_v51, %v3558_v56  ;;  %v3564_v48 = vrot.slane %v3563_v18, 4  ;;  %v14633_v47 = vcombine.low %v3542_v23, %v3545_v27  ;;  %v17744_v56 = vld [vmem:[#allocation8_spill] sm:$0xff]  ;;  %v4306_v63 = vadd.f32 %v14601_v57, %v14723_v40 }
 0x49b   : > { %v3579_v21 = vsel %vm13362_vm6, %v3577_v13, %v3578_v14  ;;  %v17747_v13 = vld [vmem:[#allocation12_spill] sm:$0xff] }
 0x49c   : > { %v3569_v20 = vsel %vm13377_vm7, %v3564_v48, %v3568_v36  ;;  %v14629_v35 = vcombine.low %v3576_v34, %v3579_v21  ;;  %v17749_v48 = vld [vmem:[#allocation17_spill] sm:$0xff] }
 0x49d   : > { %v14631_v62 = vcombine.low %v3559_v37, %v3569_v20  ;;  %v17748_v37 = vld [vmem:[#allocation16_spill] sm:$0xff] }
 0x4a1   : > { %4421 = vmatmul.mubr.bf16.gmra.mrb[96].mxu0 %v14574_v26  ;;  %4582 = vmatmul.mubr.bf16.gmra.mrb[136].mxu1 %v14633_v47 }
 0x4a2   : > { %4622 = vmatprep.mubr.bf16.mxu0 %v14045_v53  ;;  %4783 = vmatprep.mubr.bf16.mxu1 %v14086_v1  ;;  %v12863_v53 = vld [vmem:[%s17639_s8 + $0x210] sm:$0xff]  }
 0x4a9   : > { %4623 = vmatmul.mubr.bf16.vlgmr.msra.gmra.mrb[100].mxu0 %v14037_v42  ;;  %4784 = vmatmul.mubr.bf16.vlgmr.msra.gmra.mrb[140].mxu1 %v13959_v54  ;;  %v12865_v54 = vld [vmem:[%s17639_s8 + $0x220] sm:$0xff]   ;;  %v12866_v42 = vld [vmem:[%s17639_s8 + $0x228] sm:$0xff]  }
 0x4aa   : > { %4630 = vmatprep.mubr.bf16.mxu0 %v14097_v15  ;;  %4791 = vmatprep.mubr.bf16.mxu1 %v14146_v50 }
 0x4ab   : > { %12336 = vmatpush3.bf16.msra.mxu0 %v14553_v0  ;;  %v17739_v0 = vld [vmem:[#allocation10_spill] sm:$0xff] }
 0x4ac   : > { %12337 = vmatprep.subr.bf16.mxu0 %v12862_v49 }
 0x4af   : > { %12338 = vmatpush3.bf16.msra.mxu0 %v12862_v49 }
 0x4b0   : > { %12339 = vmatprep.subr.bf16.mxu0 %v12863_v53 }
 0x4b1   : > { %4631 = vmatmul.mubr.bf16.gmra.mrb[104].mxu0 %v14086_v1  ;;  %4792 = vmatmul.mubr.bf16.gmra.mrb[144].mxu1 %v14050_v58  ;;  %v12867_v58 = vld [vmem:[%s17639_s8 + $0x230] sm:$0xff]   ;;  %v12869_v1 = vld [vmem:[%s17639_s8 + $0x238] sm:$0xff]  }
 0x4b2   : > { %4638 = vmatprep.mubr.bf16.mxu0 %v14171_v31  ;;  %4799 = vmatprep.mubr.bf16.mxu1 %v14206_v61 }
 0x4b3   : > { %12340 = vmatpush3.bf16.msra.mxu0 %v12863_v53 }
 0x4b4   : > { %12341 = vmatprep.subr.bf16.mxu0 %v12864_v8 }
 0x4b7   : > { %12342 = vmatpush3.bf16.msra.mxu0 %v12864_v8 }
 0x4b8   : > { %12343 = vmatprep.subr.bf16.mxu0 %v12865_v54 }
 0x4b9   : > { %4639 = vmatmul.mubr.bf16.gmra.mrb[108].mxu0 %v14146_v50  ;;  %4800 = vmatmul.mubr.bf16.gmra.mrb[148].mxu1 %v14076_v30  ;;  %v14690_v30 = vld [vmem:[#allocation3 + $0xcc] sm:$0xf]  ;;  %v14692_v50 = vld [vmem:[#allocation3 + $0xd0] sm:$0xf] }
 0x4ba   : > { %4646 = vmatprep.mubr.bf16.mxu0 %v14208_v10  ;;  %4807 = vmatprep.mubr.bf16.mxu1 %v14247_v7  ;;  %v3581_v23 = vshrl.u32 %v14690_v30, 16  ;;  %v3584_v57 = vshll.u32 %v14690_v30, 16  ;;  %v3590_v27 = vshll.u32 %v14692_v50, 16  ;;  %v3594_v49 = vshrl.u32 %v14692_v50, 16 }
 0x4bb   : > { %12344 = vmatpush3.bf16.msra.mxu0 %v12865_v54 }
 0x4bc   : > { %12345 = vmatprep.subr.bf16.mxu0 %v12866_v42 }
 0x4bf   : > { %12346 = vmatpush3.bf16.msra.mxu0 %v12866_v42 }
 0x4c0   : > { %12347 = vmatprep.subr.bf16.mxu0 %v12867_v58 }
 0x4c1   : > { %4647 = vmatmul.mubr.bf16.gmra.mrb[112].mxu0 %v14206_v61  ;;  %4808 = vmatmul.mubr.bf16.gmra.mrb[152].mxu1 %v14175_v25  ;;  %v14694_v25 = vld [vmem:[#allocation3 + $0xd4] sm:$0x1]  ;;  %v3609_v61 = vrot.slane %v14692_v50, 5 }
 0x4c2   : > { %4654 = vmatprep.mubr.bf16.mxu0 %v14271_v41  ;;  %4815 = vmatprep.mubr.bf16.mxu1 %v14304_v16 }
 0x4c3   : > { %12348 = vmatpush3.bf16.msra.mxu0 %v12867_v58 }
 0x4c4   : > { %12349 = vmatprep.subr.bf16.mxu0 %v12869_v1 }
 0x4c7   : > { %12350 = vmatpush3.bf16.msra.mxu0 %v12869_v1 }
 0x4c9   : > { %4655 = vmatmul.mubr.bf16.gmra.mrb[116].mxu0 %v14247_v7  ;;  %4816 = vmatmul.mubr.bf16.gmra.mrb[156].mxu1 %v14197_v45  ;;  %v10365_v45 = vrot.slane %v14690_v30, 9  ;;  %v3612_v7 = vrot.slane %v14694_v25, 5 }
 0x4ca   : > { %4662 = vmatprep.mubr.bf16.mxu0 %v14302_v19  ;;  %4823 = vmatprep.mubr.bf16.mxu1 %v14330_v39 }
 0x4d1   : > { %4663 = vmatmul.mubr.bf16.gmra.mrb[120].mxu0 %v14304_v16  ;;  %4824 = vmatmul.mubr.bf16.gmra.mrb[160].mxu1 %v14275_v38  ;;  %v14704_v38 = vsel %vm13362_vm6, %v10365_v45, %v3609_v61 }
 0x4d2   : > { %4670 = vmatprep.mubr.bf16.mxu0 %v14343_v55  ;;  %4831 = vmatprep.mubr.bf16.mxu1 %v14378_v33 }
 0x4d9   : > { %4671 = vmatmul.mubr.bf16.gmra.mrb[124].mxu0 %v14330_v39  ;;  %4832 = vmatmul.mubr.bf16.gmra.mrb[164].mxu1 %v14293_v60  ;;  %v3611_v60 = vrot.slane %v3609_v61, 4 }
 0x4da   : > { %4678 = vmatprep.mubr.bf16.mxu0 %v14375_v3  ;;  %4839 = vmatprep.mubr.bf16.mxu1 %v14406_v32 }
 0x4db   : > { %v14708_v16 = vsel %vm13362_vm6, %v3611_v60, %v3612_v7  ;;  %v3583_v7 = vrot.slane %v3581_v23, 4  ;;  %v3586_v60 = vrot.slane %v3584_v57, 5 }
 0x4dc   : > { %v10419_v39 = vcombine.low %v14704_v38, %v14708_v16 }
 0x4e1   : > { %4679 = vmatmul.mubr.bf16.gmra.mrb[128].mxu0 %v14378_v33  ;;  %4840 = vmatmul.mubr.bf16.gmra.mrb[168].mxu1 %v14349_v44  ;;  %v17737_v44 = vld [vmem:[#allocation6_spill] sm:$0xff]  ;;  %v17738_v33 = vld [vmem:[#allocation9_spill] sm:$0xff] }
 0x4e2   : > { %4686 = vmatprep.mubr.bf16.mxu0 %v14416_v12  ;;  %4847 = vmatprep.mubr.bf16.mxu1 %v14452_v28 }
 0x4e9   : > { %4687 = vmatmul.mubr.bf16.gmra.mrb[132].mxu0 %v14406_v32  ;;  %4848 = vmatmul.mubr.bf16.gmra.mrb[172].mxu1 %v17737_v44  ;;  %v17743_v32 = vld [vmem:[#allocation18_spill] sm:$0xff]  ;;  %v3592_v44 = vrot.slane %v3590_v27, 5 }
 0x4ea   : > { %4694 = vmatprep.mubr.bf16.mxu0 %v17738_v33  ;;  %4855 = vmatprep.mubr.bf16.mxu1 %v17739_v0  ;;  %v4303_v6 = vadd.f32 %v17743_v32, %v14723_v40  ;;  %v3596_v32 = vrot.slane %v3594_v49, 4 }
 0x4f1   : > { %4695 = vmatmul.mubr.bf16.gmra.mrb[136].mxu0 %v14452_v28  ;;  %4856 = vmatmul.mubr.bf16.gmra.mrb[176].mxu1 %v17740_v46  ;;  %v17745_v28 = vld [vmem:[#allocation14_spill] sm:$0xff] }
 0x4f2   : > { %4702 = vmatprep.mubr.bf16.mxu0 %v17741_v22  ;;  %4863 = vmatprep.mubr.bf16.mxu1 %v17742_v4 }
 0x4f8   : > { %v11369_v59 = vpop.f32.mrb[76].mxu1 }
 0x4f9   : > { %4703 = vmatmul.mubr.bf16.gmra.mrb[140].mxu0 %v17739_v0  ;;  %4864 = vmatmul.mubr.bf16.gmra.mrb[180].mxu1 %v17744_v56  ;;  %v11370_v29 = vpop.f32.mrb[77].mxu1  ;;  %v3587_v56 = vor.u32 %v3586_v60, %v3583_v7 }
 0x4fa   : > { %4710 = vmatprep.mubr.bf16.mxu0 %v17745_v28  ;;  %4871 = vmatprep.mubr.bf16.mxu1 %v17746_v52  ;;  %v11371_v24 = vadd.f32 %v11370_v29, %v11369_v59  ;;  %v11372_v14 = vpop.f32.mrb[78].mxu1  ;;  %v3600_v29 = vshll.u32 %v14694_v25, 16 }
 0x4fb   : > { %v11373_v51 = vpop.f32.mrb[79].mxu1 }
 0x4fc   : > { %v11374_v18 = vadd.f32 %v11373_v51, %v11372_v14  ;;  %v14733_v36 = vadd.f32 %v11371_v24, %v4303_v6  ;;  %v3597_v14 = vor.u32 %v3596_v32, %v3592_v44  ;;  %v3602_v49 = vrot.slane %v3600_v29, 5 }
 0x4fe   : > { %v14735_v34 = vadd.f32 %v11374_v18, %v4306_v63  ;;  %v3598_v25 = vrot.slane %v3597_v14, 4 }
 0x500   : > { %v3603_v7 = vsel %vm13377_vm7, %v3598_v25, %v3602_v49 }
 0x501   : > { %4711 = vmatmul.mubr.bf16.gmra.mrb[144].mxu0 %v17742_v4  ;;  %4872 = vmatmul.mubr.bf16.gmra.mrb[184].mxu1 %v17747_v13 }
 0x502   : > { %4718 = vmatprep.mubr.bf16.mxu0 %v17748_v37  ;;  %4879 = vmatprep.mubr.bf16.mxu1 %v17749_v48 }
 0x503   : > { %v11375_v21 = vpop.f32.mrb[80].mxu1 }
 0x504   : > { %v11263_v20 = vpop.f32.mrb[40].mxu0  ;;  %v11376_v53 = vpop.f32.mrb[81].mxu1 }
 0x505   : > { %v11264_v8 = vpop.f32.mrb[41].mxu0  ;;  %v11377_v54 = vadd.f32 %v11376_v53, %v11375_v21  ;;  %v11378_v58 = vpop.f32.mrb[82].mxu1 }
 0x506   : > { %v11265_v42 = vadd.f32 %v11264_v8, %v11263_v20  ;;  %v11266_v1 = vpop.f32.mrb[42].mxu0  ;;  %v11379_v45 = vpop.f32.mrb[83].mxu1  ;;  %v3588_v20 = vrot.slane %v3587_v56, 4 }
 0x507   : > { %v11267_v61 = vpop.f32.mrb[43].mxu0  ;;  %v11380_v46 = vadd.f32 %v11379_v45, %v11378_v58 }
 0x508   : > { %v4311_v0 = vadd.f32 %v11265_v42, %v14723_v40  ;;  %v11268_v4 = vadd.f32 %v11267_v61, %v11266_v1  ;;  %v3593_v61 = vsel %vm13377_vm7, %v3588_v20, %v3592_v44 }
 0x509   : > { %4719 = vmatmul.mubr.bf16.gmra.mrb[148].mxu0 %v17746_v52  ;;  %4880 = vmatmul.mubr.bf16.gmra.mrb[188].mxu1 %v14535_v43  ;;  %v10418_v29 = vcombine.low %v3593_v61, %v3603_v7 }
 0x50a   : > { %v4314_v6 = vadd.f32 %v11268_v4, %v14723_v40  ;;  %4726 = vmatprep.mubr.bf16.mxu0 %v14603_v17  ;;  %v14750_v59 = vadd.f32 %v11377_v54, %v4311_v0  ;;  %4887 = vmatprep.mubr.bf16.mxu1 %v14613_v2 }
 0x50b   : > { %v11381_v63 = vpop.f32.mrb[84].mxu1 }
 0x50c   : > { %v11269_v24 = vpop.f32.mrb[44].mxu0  ;;  %v14754_v51 = vadd.f32 %v11380_v46, %v4314_v6  ;;  %v11382_v18 = vpop.f32.mrb[85].mxu1 }
 0x50d   : > { %v11270_v52 = vpop.f32.mrb[45].mxu0  ;;  %v11383_v13 = vadd.f32 %v11382_v18, %v11381_v63  ;;  %v11384_v57 = vpop.f32.mrb[86].mxu1 }
 0x50e   : > { %v11271_v23 = vadd.f32 %v11270_v52, %v11269_v24  ;;  %v11272_v43 = vpop.f32.mrb[46].mxu0  ;;  %v11385_v27 = vpop.f32.mrb[87].mxu1 }
 0x50f   : > { %v11273_v21 = vpop.f32.mrb[47].mxu0  ;;  %v11386_v8 = vadd.f32 %v11385_v27, %v11384_v57 }
 0x510   : > { %v4319_v53 = vadd.f32 %v11271_v23, %v14723_v40  ;;  %v11274_v54 = vadd.f32 %v11273_v21, %v11272_v43 }
 0x511   : > { %4727 = vmatmul.mubr.bf16.gmra.mrb[152].mxu0 %v17749_v48  ;;  %4888 = vmatmul.mubr.bf16.gmra.mrb[192].mxu1 %v14574_v26 }
 0x512   : > { %v4322_v42 = vadd.f32 %v11274_v54, %v14723_v40  ;;  %4734 = vmatprep.mubr.bf16.mxu0 %v14633_v47  ;;  %v14761_v58 = vadd.f32 %v11383_v13, %v4319_v53  ;;  %4895 = vmatprep.mubr.bf16.mxu1 %v14631_v62 }
 0x513   : > { %v11387_v1 = vpop.f32.mrb[88].mxu1 }
 0x514   : > { %v11275_v45 = vpop.f32.mrb[48].mxu0  ;;  %v14768_v60 = vadd.f32 %v11386_v8, %v4322_v42  ;;  %v11388_v48 = vpop.f32.mrb[89].mxu1 }
 0x515   : > { %v11276_v0 = vpop.f32.mrb[49].mxu0  ;;  %v11389_v46 = vadd.f32 %v11388_v48, %v11387_v1  ;;  %v11390_v4 = vpop.f32.mrb[90].mxu1 }
 0x516   : > { %v11277_v26 = vadd.f32 %v11276_v0, %v11275_v45  ;;  %v11278_v32 = vpop.f32.mrb[50].mxu0  ;;  %v11391_v6 = vpop.f32.mrb[91].mxu1 }
 0x517   : > { %v11279_v56 = vpop.f32.mrb[51].mxu0  ;;  %v11392_v24 = vadd.f32 %v11391_v6, %v11390_v4 }
 0x518   : > { %v4327_v63 = vadd.f32 %v11277_v26, %v14723_v40  ;;  %v11280_v14 = vadd.f32 %v11279_v56, %v11278_v32 }
 0x519   : > { %4735 = vmatmul.mubr.bf16.gmra.mrb[156].mxu0 %v14613_v2  ;;  %4896 = vmatmul.mubr.bf16.gmra.mrb[196].mxu1 %v14594_v11  ;;  %v10417_v2 = vcombine.low %v14690_v30, %v14692_v50 }
 0x51a   : > { %v4330_v44 = vadd.f32 %v11280_v14, %v14723_v40  ;;  %4742 = vmatprep.mubr.bf16.mxu0 %v14629_v35  ;;  %v14775_v18 = vadd.f32 %v11389_v46, %v4327_v63  ;;  %4903 = vmatprep.mubr.bf16.mxu1 %v10418_v29 }
 0x51b   : > { %v11393_v52 = vpop.f32.mrb[92].mxu1 }
 0x51c   : > { %v11281_v13 = vpop.f32.mrb[52].mxu0  ;;  %v14777_v23 = vadd.f32 %v11392_v24, %v4330_v44  ;;  %v11394_v57 = vpop.f32.mrb[93].mxu1 }
 0x51d   : > { %v11282_v43 = vpop.f32.mrb[53].mxu0  ;;  %v11395_v27 = vadd.f32 %v11394_v57, %v11393_v52  ;;  %v11396_v20 = vpop.f32.mrb[94].mxu1 }
 0x51e   : > { %v11283_v21 = vadd.f32 %v11282_v43, %v11281_v13  ;;  %v11284_v49 = vpop.f32.mrb[54].mxu0  ;;  %v11397_v53 = vpop.f32.mrb[95].mxu1 }
 0x51f   : > { %v11285_v11 = vpop.f32.mrb[55].mxu0  ;;  %v11398_v54 = vadd.f32 %v11397_v53, %v11396_v20 }
 0x520   : > { %v4335_v8 = vadd.f32 %v11283_v21, %v14723_v40  ;;  %v11286_v25 = vadd.f32 %v11285_v11, %v11284_v49 }
 0x521   : > { %4743 = vmatmul.mubr.bf16.gmra.mrb[160].mxu0 %v14631_v62  ;;  %4904 = vmatmul.mubr.bf16.gmra.mrb[200].mxu1 %v10417_v2 }
 0x522   : > { %v4338_v42 = vadd.f32 %v11286_v25, %v14723_v40  ;;  %12351 = vmatprep.mubr.bf16.mxu0 %v14097_v15  ;;  %v14785_v1 = vadd.f32 %v11395_v27, %v4335_v8 }
 0x523   : > { %v11399_v45 = vpop.f32.mrb[96].mxu1 }
 0x524   : > { %v11287_v61 = vpop.f32.mrb[56].mxu0  ;;  %v14787_v7 = vadd.f32 %v11398_v54, %v4338_v42  ;;  %v11400_v30 = vpop.f32.mrb[97].mxu1 }
 0x525   : > { %v11288_v50 = vpop.f32.mrb[57].mxu0  ;;  %v11401_v48 = vadd.f32 %v11400_v30, %v11399_v45  ;;  %v11402_v46 = vpop.f32.mrb[98].mxu1 }
 0x526   : > { %v11289_v0 = vadd.f32 %v11288_v50, %v11287_v61  ;;  %v11290_v26 = vpop.f32.mrb[58].mxu0  ;;  %v11403_v4 = vpop.f32.mrb[99].mxu1 }
 0x527   : > { %v11291_v32 = vpop.f32.mrb[59].mxu0  ;;  %v11404_v6 = vadd.f32 %v11403_v4, %v11402_v46 }
 0x528   : > { %v4343_v62 = vadd.f32 %v11289_v0, %v14723_v40  ;;  %v11292_v56 = vadd.f32 %v11291_v32, %v11290_v26 }
 0x529   : > { %12352 = vmatmul.mubr.bf16.vlgmr.msra.gmra.mrb[164].mxu0 %v14171_v31 }
 0x52a   : > { %v4346_v15 = vadd.f32 %v11292_v56, %v14723_v40  ;;  %12355 = vmatprep.mubr.bf16.mxu0 %v14208_v10  ;;  %v14793_v29 = vadd.f32 %v11401_v48, %v4343_v62 }
 0x52b   : > { %v11405_v63 = vpop.f32.mrb[100].mxu1 }
 0x52c   : > { %v11293_v24 = vpop.f32.mrb[60].mxu0  ;;  %v14795_v14 = vadd.f32 %v11404_v6, %v4346_v15  ;;  %v11406_v44 = vpop.f32.mrb[101].mxu1 }
 0x52d   : > { %v11294_v52 = vpop.f32.mrb[61].mxu0  ;;  %v11407_v13 = vadd.f32 %v11406_v44, %v11405_v63  ;;  %v11408_v43 = vpop.f32.mrb[102].mxu1 }
 0x52e   : > { %v11295_v57 = vadd.f32 %v11294_v52, %v11293_v24  ;;  %v11296_v27 = vpop.f32.mrb[62].mxu0  ;;  %v11409_v21 = vpop.f32.mrb[103].mxu1 }
 0x52f   : > { %v11297_v20 = vpop.f32.mrb[63].mxu0  ;;  %v11410_v49 = vadd.f32 %v11409_v21, %v11408_v43 }
 0x530   : > { %v4351_v31 = vadd.f32 %v11295_v57, %v14723_v40  ;;  %v11298_v2 = vadd.f32 %v11297_v20, %v11296_v27 }
 0x531   : > { %12356 = vmatmul.mubr.bf16.gmra.mrb[168].mxu0 %v14271_v41 }
 0x532   : > { %v4354_v10 = vadd.f32 %v11298_v2, %v14723_v40  ;;  %12359 = vmatprep.mubr.bf16.mxu0 %v14302_v19  ;;  %v14801_v53 = vadd.f32 %v11407_v13, %v4351_v31 }
 0x533   : > { %v11411_v11 = vpop.f32.mrb[104].mxu1 }
 0x534   : > { %v11299_v8 = vpop.f32.mrb[64].mxu0  ;;  %v14803_v54 = vadd.f32 %v11410_v49, %v4354_v10  ;;  %v11412_v25 = vpop.f32.mrb[105].mxu1 }
 0x535   : > { %v11300_v42 = vpop.f32.mrb[65].mxu0  ;;  %v11413_v45 = vadd.f32 %v11412_v25, %v11411_v11  ;;  %v11414_v30 = vpop.f32.mrb[106].mxu1 }
 0x536   : > { %v11301_v61 = vadd.f32 %v11300_v42, %v11299_v8  ;;  %v11302_v50 = vpop.f32.mrb[66].mxu0  ;;  %v11415_v48 = vpop.f32.mrb[107].mxu1 }
 0x537   : > { %v11303_v0 = vpop.f32.mrb[67].mxu0  ;;  %v11416_v46 = vadd.f32 %v11415_v48, %v11414_v30 }
 0x538   : > { %v4359_v41 = vadd.f32 %v11301_v61, %v14723_v40  ;;  %v11304_v26 = vadd.f32 %v11303_v0, %v11302_v50 }
 0x539   : > { %12360 = vmatmul.mubr.bf16.gmra.mrb[172].mxu0 %v14343_v55 }
 0x53a   : > { %v4362_v19 = vadd.f32 %v11304_v26, %v14723_v40  ;;  %12363 = vmatprep.mubr.bf16.mxu0 %v14375_v3  ;;  %v14809_v4 = vadd.f32 %v11413_v45, %v4359_v41 }
 0x53b   : > { %v11417_v32 = vpop.f32.mrb[108].mxu1 }
 0x53c   : > { %v11305_v62 = vpop.f32.mrb[68].mxu0  ;;  %v14811_v6 = vadd.f32 %v11416_v46, %v4362_v19  ;;  %v11418_v56 = vpop.f32.mrb[109].mxu1 }
 0x53d   : > { %v11306_v15 = vpop.f32.mrb[69].mxu0  ;;  %v11419_v63 = vadd.f32 %v11418_v56, %v11417_v32  ;;  %v11420_v44 = vpop.f32.mrb[110].mxu1 }
 0x53e   : > { %v11307_v24 = vadd.f32 %v11306_v15, %v11305_v62  ;;  %v11308_v52 = vpop.f32.mrb[70].mxu0  ;;  %v11421_v13 = vpop.f32.mrb[111].mxu1 }
 0x53f   : > { %v11309_v57 = vpop.f32.mrb[71].mxu0  ;;  %v11422_v43 = vadd.f32 %v11421_v13, %v11420_v44 }
 0x540   : > { %v4367_v55 = vadd.f32 %v11307_v24, %v14723_v40  ;;  %v11310_v27 = vadd.f32 %v11309_v57, %v11308_v52 }
 0x541   : > { %12364 = vmatmul.mubr.bf16.gmra.mrb[176].mxu0 %v14416_v12 }
 0x542   : > { %v4370_v3 = vadd.f32 %v11310_v27, %v14723_v40  ;;  %12367 = vmatprep.mubr.bf16.mxu0 %v17738_v33  ;;  %v14817_v21 = vadd.f32 %v11419_v63, %v4367_v55 }
 0x543   : > { %v11423_v20 = vpop.f32.mrb[112].mxu1 }
 0x544   : > { %v11311_v31 = vpop.f32.mrb[72].mxu0  ;;  %v14819_v49 = vadd.f32 %v11422_v43, %v4370_v3  ;;  %v11424_v2 = vpop.f32.mrb[113].mxu1 }
 0x545   : > { %v11312_v10 = vpop.f32.mrb[73].mxu0  ;;  %v11425_v11 = vadd.f32 %v11424_v2, %v11423_v20  ;;  %v11426_v25 = vpop.f32.mrb[114].mxu1 }
 0x546   : > { %v11313_v8 = vadd.f32 %v11312_v10, %v11311_v31  ;;  %v11314_v42 = vpop.f32.mrb[74].mxu0  ;;  %v11427_v45 = vpop.f32.mrb[115].mxu1 }
 0x547   : > { %v11315_v61 = vpop.f32.mrb[75].mxu0  ;;  %v11428_v30 = vadd.f32 %v11427_v45, %v11426_v25 }
 0x548   : > { %v4375_v12 = vadd.f32 %v11313_v8, %v14723_v40  ;;  %v11316_v50 = vadd.f32 %v11315_v61, %v11314_v42 }
 0x549   : > { %12368 = vmatmul.mubr.bf16.gmra.mrb[180].mxu0 %v17741_v22 }
 0x54a   : > { %v4378_v33 = vadd.f32 %v11316_v50, %v14723_v40  ;;  %12371 = vmatprep.mubr.bf16.mxu0 %v17745_v28  ;;  %v14825_v48 = vadd.f32 %v11425_v11, %v4375_v12 }
 0x54b   : > { %v11429_v0 = vpop.f32.mrb[116].mxu1 }
 0x54c   : > { %v11317_v41 = vpop.f32.mrb[76].mxu0  ;;  %v14827_v46 = vadd.f32 %v11428_v30, %v4378_v33  ;;  %v11430_v26 = vpop.f32.mrb[117].mxu1 }
 0x54d   : > { %v11318_v19 = vpop.f32.mrb[77].mxu0  ;;  %v11431_v32 = vadd.f32 %v11430_v26, %v11429_v0  ;;  %v11432_v56 = vpop.f32.mrb[118].mxu1 }
 0x54e   : > { %v11319_v62 = vadd.f32 %v11318_v19, %v11317_v41  ;;  %v11320_v15 = vpop.f32.mrb[78].mxu0  ;;  %v11433_v63 = vpop.f32.mrb[119].mxu1 }
 0x54f   : > { %v11321_v24 = vpop.f32.mrb[79].mxu0  ;;  %v11434_v44 = vadd.f32 %v11433_v63, %v11432_v56 }
 0x550   : > { %v4383_v22 = vadd.f32 %v11319_v62, %v14723_v40  ;;  %v11322_v52 = vadd.f32 %v11321_v24, %v11320_v15 }
 0x551   : > { %12372 = vmatmul.mubr.bf16.gmra.mrb[184].mxu0 %v17748_v37 }
 0x552   : > { %v4386_v28 = vadd.f32 %v11322_v52, %v14723_v40  ;;  %12375 = vmatprep.mubr.bf16.mxu0 %v14603_v17  ;;  %v14833_v13 = vadd.f32 %v11431_v32, %v4383_v22 }
 0x554   : > { %v11323_v57 = vpop.f32.mrb[80].mxu0  ;;  %v14835_v55 = vadd.f32 %v11434_v44, %v4386_v28  ;;  %v11435_v43 = vpop.f32.mrb[120].mxu1 }
 0x555   : > { %v11324_v27 = vpop.f32.mrb[81].mxu0  ;;  %v11436_v3 = vpop.f32.mrb[121].mxu1 }
 0x556   : > { %v11325_v20 = vadd.f32 %v11324_v27, %v11323_v57  ;;  %v11326_v31 = vpop.f32.mrb[82].mxu0  ;;  %v11437_v2 = vadd.f32 %v11436_v3, %v11435_v43  ;;  %v11438_v10 = vpop.f32.mrb[122].mxu1 }
 0x557   : > { %v11327_v11 = vpop.f32.mrb[83].mxu0  ;;  %v11439_v37 = vpop.f32.mrb[123].mxu1 }
 0x558   : > { %v4391_v8 = vadd.f32 %v11325_v20, %v14723_v40  ;;  %v11328_v25 = vadd.f32 %v11327_v11, %v11326_v31  ;;  %v11440_v42 = vadd.f32 %v11439_v37, %v11438_v10 }
 0x559   : > { %12376 = vmatmul.mubr.bf16.gmra.mrb[188].mxu0 %v14633_v47 }
 0x55a   : > { %v4394_v17 = vadd.f32 %v11328_v25, %v14723_v40  ;;  %12379 = vmatprep.mubr.bf16.mxu0 %v14629_v35  ;;  %v14841_v45 = vadd.f32 %v11437_v2, %v4391_v8 }
 0x55c   : > { %v11329_v61 = vpop.f32.mrb[84].mxu0  ;;  %v14843_v12 = vadd.f32 %v11440_v42, %v4394_v17  ;;  %v11441_v30 = vpop.f32.mrb[124].mxu1 }
 0x55d   : > { %v11330_v50 = vpop.f32.mrb[85].mxu0  ;;  %v11442_v33 = vpop.f32.mrb[125].mxu1 }
 0x55e   : > { %v11331_v0 = vadd.f32 %v11330_v50, %v11329_v61  ;;  %v11332_v41 = vpop.f32.mrb[86].mxu0  ;;  %v11443_v26 = vadd.f32 %v11442_v33, %v11441_v30  ;;  %v11444_v19 = vpop.f32.mrb[126].mxu1 }
 0x55f   : > { %v11333_v32 = vpop.f32.mrb[87].mxu0  ;;  %v11445_v47 = vpop.f32.mrb[127].mxu1 }
 0x560   : > { %v4399_v62 = vadd.f32 %v11331_v0, %v14723_v40  ;;  %v11334_v56 = vadd.f32 %v11333_v32, %v11332_v41  ;;  %v11446_v15 = vadd.f32 %v11445_v47, %v11444_v19 }
 0x561   : > { %12380 = vmatmul.mubr.bf16.gmra.mrb[192].mxu0 %v10419_v39 }
 0x562   : > { %v4402_v35 = vadd.f32 %v11334_v56, %v14723_v40  ;;  %v14850_v63 = vadd.f32 %v11443_v26, %v4399_v62 }
 0x564   : > { %v11335_v24 = vpop.f32.mrb[88].mxu0  ;;  %v14852_v22 = vadd.f32 %v11446_v15, %v4402_v35  ;;  %v11447_v44 = vpop.f32.mrb[128].mxu1 }
 0x565   : > { %v11336_v52 = vpop.f32.mrb[89].mxu0  ;;  %v11448_v28 = vpop.f32.mrb[129].mxu1 }
 0x566   : > { %v11337_v57 = vadd.f32 %v11336_v52, %v11335_v24  ;;  %v11338_v43 = vpop.f32.mrb[90].mxu0  ;;  %v11449_v27 = vadd.f32 %v11448_v28, %v11447_v44  ;;  %v11450_v3 = vpop.f32.mrb[130].mxu1 }
 0x567   : > { %v11339_v20 = vpop.f32.mrb[91].mxu0  ;;  %v11451_v2 = vpop.f32.mrb[131].mxu1 }
 0x568   : > { %v4407_v31 = vadd.f32 %v11337_v57, %v14723_v40  ;;  %v11340_v38 = vadd.f32 %v11339_v20, %v11338_v43  ;;  %v11452_v16 = vadd.f32 %v11451_v2, %v11450_v3 }
 0x56a   : > { %v4410_v39 = vadd.f32 %v11340_v38, %v14723_v40  ;;  %v14856_v10 = vadd.f32 %v11449_v27, %v4407_v31 }
 0x56c   : > { %v11341_v11 = vpop.f32.mrb[92].mxu0  ;;  %v14858_v8 = vadd.f32 %v11452_v16, %v4410_v39  ;;  %v11453_v37 = vpop.f32.mrb[132].mxu1 }
 0x56d   : > { %v11342_v25 = vpop.f32.mrb[93].mxu0  ;;  %v11454_v42 = vpop.f32.mrb[133].mxu1 }
 0x56e   : > { %v11343_v17 = vadd.f32 %v11342_v25, %v11341_v11  ;;  %v11344_v61 = vpop.f32.mrb[94].mxu0  ;;  %v11455_v30 = vadd.f32 %v11454_v42, %v11453_v37  ;;  %v11456_v50 = vpop.f32.mrb[134].mxu1 }
 0x56f   : > { %v11345_v33 = vpop.f32.mrb[95].mxu0  ;;  %v11457_v41 = vpop.f32.mrb[135].mxu1 }
 0x570   : > { %v4415_v0 = vadd.f32 %v11343_v17, %v14723_v40  ;;  %v11346_v26 = vadd.f32 %v11345_v33, %v11344_v61  ;;  %v11458_v19 = vadd.f32 %v11457_v41, %v11456_v50 }
 0x572   : > { %v4418_v32 = vadd.f32 %v11346_v26, %v14723_v40  ;;  %v14862_v62 = vadd.f32 %v11455_v30, %v4415_v0 }
 0x574   : > { %v11347_v47 = vpop.f32.mrb[96].mxu0  ;;  %v14864_v56 = vadd.f32 %v11458_v19, %v4418_v32  ;;  %v11459_v15 = vpop.f32.mrb[136].mxu1 }
 0x575   : > { %v11348_v35 = vpop.f32.mrb[97].mxu0  ;;  %v11460_v24 = vpop.f32.mrb[137].mxu1 }
 0x576   : > { %v11349_v44 = vadd.f32 %v11348_v35, %v11347_v47  ;;  %v11350_v52 = vpop.f32.mrb[98].mxu0  ;;  %v11461_v28 = vadd.f32 %v11460_v24, %v11459_v15  ;;  %v11462_v57 = vpop.f32.mrb[138].mxu1 }
 0x577   : > { %v11351_v43 = vpop.f32.mrb[99].mxu0  ;;  %v11463_v3 = vpop.f32.mrb[139].mxu1 }
 0x578   : > { %v4423_v27 = vadd.f32 %v11349_v44, %v14723_v40  ;;  %v11352_v20 = vadd.f32 %v11351_v43, %v11350_v52  ;;  %v11464_v31 = vadd.f32 %v11463_v3, %v11462_v57 }
 0x57a   : > { %v4426_v2 = vadd.f32 %v11352_v20, %v14723_v40  ;;  %v14868_v38 = vadd.f32 %v11461_v28, %v4423_v27  ;;  %v17750_v28 = vmov 0  }
 0x57b   : > { %5588 = vst.msk [vmem:[#allocation4] sm:$0xf] %vm5538_vm2, %v17750_v28  ;;  %5589 = vst.msk [vmem:[#allocation4 + $0x4] sm:$0xf] %vm5538_vm2, %v17750_v28 }
 0x57c   : > { %v11481_v16 = vpop.f32.mrb[100].mxu0  ;;  %v14870_v39 = vadd.f32 %v11464_v31, %v4426_v2  ;;  %v11593_v11 = vpop.f32.mrb[140].mxu1  ;;  %5592 = vst.msk [vmem:[#allocation4 + $0xcc] sm:$0xf] %vm5538_vm2, %v17750_v28  ;;  %5593 = vst.msk [vmem:[#allocation4 + $0xd0] sm:$0xf] %vm5538_vm2, %v17750_v28 }
 0x57d   : > { %v11482_v37 = vpop.f32.mrb[101].mxu0  ;;  %v11594_v25 = vpop.f32.mrb[141].mxu1  ;;  %8048 = vst.msk [vmem:[#allocation5] sm:$0xf] %vm5538_vm2, %v17750_v28  ;;  %8049 = vst.msk [vmem:[#allocation5 + $0x4] sm:$0xf] %vm5538_vm2, %v17750_v28 }
 0x57e   : > { %v11483_v42 = vadd.f32 %v11482_v37, %v11481_v16  ;;  %v11484_v17 = vpop.f32.mrb[102].mxu0  ;;  %v11595_v61 = vadd.f32 %v11594_v25, %v11593_v11  ;;  %v11596_v30 = vpop.f32.mrb[142].mxu1  ;;  %8052 = vst.msk [vmem:[#allocation5 + $0xcc] sm:$0xf] %vm5538_vm2, %v17750_v28  ;;  %8053 = vst.msk [vmem:[#allocation5 + $0xd0] sm:$0xf] %vm5538_vm2, %v17750_v28 }
 0x57f   : > { %v11485_v50 = vpop.f32.mrb[103].mxu0  ;;  %v11597_v0 = vpop.f32.mrb[143].mxu1  ;;  %5590 = vst.msk [vmem:[#allocation4 + $0x8] sm:$0x1] %vm5541_vm3, %v17750_v28  ;;  %5594 = vst.msk [vmem:[#allocation4 + $0xd4] sm:$0x1] %vm5541_vm3, %v17750_v28 }
 0x580   : > { %v4625_v33 = vadd.f32 %v11483_v42, %v14733_v36  ;;  %v11486_v41 = vadd.f32 %v11485_v50, %v11484_v17  ;;  %v11598_v26 = vadd.f32 %v11597_v0, %v11596_v30  ;;  %8050 = vst.msk [vmem:[#allocation5 + $0x8] sm:$0x1] %vm5541_vm3, %v17750_v28  ;;  %8054 = vst.msk [vmem:[#allocation5 + $0xd4] sm:$0x1] %vm5541_vm3, %v17750_v28 }
 0x582   : > { %v4628_v40 = vadd.f32 %v11486_v41, %v14735_v34  ;;  %v14874_v19 = vadd.f32 %v11595_v61, %v4625_v33 }
 0x584   : > { %v11487_v32 = vpop.f32.mrb[104].mxu0  ;;  %v14876_v47 = vadd.f32 %v11598_v26, %v4628_v40  ;;  %v11599_v15 = vpop.f32.mrb[144].mxu1 }
 0x585   : > { %v11488_v35 = vpop.f32.mrb[105].mxu0  ;;  %v11600_v24 = vpop.f32.mrb[145].mxu1 }
 0x586   : > { %v11489_v44 = vadd.f32 %v11488_v35, %v11487_v32  ;;  %v11490_v52 = vpop.f32.mrb[106].mxu0  ;;  %v11601_v36 = vadd.f32 %v11600_v24, %v11599_v15  ;;  %v11602_v34 = vpop.f32.mrb[146].mxu1 }
 0x587   : > { %v11491_v57 = vpop.f32.mrb[107].mxu0  ;;  %v11603_v27 = vpop.f32.mrb[147].mxu1 }
 0x588   : > { %v4633_v43 = vadd.f32 %v11489_v44, %v14750_v59  ;;  %v11492_v3 = vadd.f32 %v11491_v57, %v11490_v52  ;;  %v11604_v20 = vadd.f32 %v11603_v27, %v11602_v34 }
 0x58a   : > { %v4636_v31 = vadd.f32 %v11492_v3, %v14754_v51  ;;  %v14904_v2 = vadd.f32 %v11601_v36, %v4633_v43 }
 0x58c   : > { %v11493_v59 = vpop.f32.mrb[108].mxu0  ;;  %v14906_v16 = vadd.f32 %v11604_v20, %v4636_v31  ;;  %v11605_v11 = vpop.f32.mrb[148].mxu1 }
 0x58d   : > { %v11494_v37 = vpop.f32.mrb[109].mxu0  ;;  %v11606_v25 = vpop.f32.mrb[149].mxu1 }
 0x58e   : > { %v11495_v42 = vadd.f32 %v11494_v37, %v11493_v59  ;;  %v11496_v17 = vpop.f32.mrb[110].mxu0  ;;  %v11607_v61 = vadd.f32 %v11606_v25, %v11605_v11  ;;  %v11608_v30 = vpop.f32.mrb[150].mxu1 }
 0x58f   : > { %v11497_v50 = vpop.f32.mrb[111].mxu0  ;;  %v11609_v0 = vpop.f32.mrb[151].mxu1 }
 0x590   : > { %v4641_v33 = vadd.f32 %v11495_v42, %v14761_v58  ;;  %v11498_v41 = vadd.f32 %v11497_v50, %v11496_v17  ;;  %v11610_v26 = vadd.f32 %v11609_v0, %v11608_v30 }
 0x592   : > { %v4644_v51 = vadd.f32 %v11498_v41, %v14768_v60  ;;  %v14910_v40 = vadd.f32 %v11607_v61, %v4641_v33 }
 0x594   : > { %v11499_v32 = vpop.f32.mrb[112].mxu0  ;;  %v14912_v15 = vadd.f32 %v11610_v26, %v4644_v51  ;;  %v11611_v35 = vpop.f32.mrb[152].mxu1 }
 0x595   : > { %v11500_v24 = vpop.f32.mrb[113].mxu0  ;;  %v11612_v44 = vpop.f32.mrb[153].mxu1 }
 0x596   : > { %v11501_v52 = vadd.f32 %v11500_v24, %v11499_v32  ;;  %v11502_v28 = vpop.f32.mrb[114].mxu0  ;;  %v11613_v36 = vadd.f32 %v11612_v44, %v11611_v35  ;;  %v11614_v34 = vpop.f32.mrb[154].mxu1 }
 0x597   : > { %v11503_v57 = vpop.f32.mrb[115].mxu0  ;;  %v11615_v43 = vpop.f32.mrb[155].mxu1 }
 0x598   : > { %v4649_v58 = vadd.f32 %v11501_v52, %v14775_v18  ;;  %v11504_v27 = vadd.f32 %v11503_v57, %v11502_v28  ;;  %v11616_v3 = vadd.f32 %v11615_v43, %v11614_v34 }
 0x59a   : > { %v4652_v60 = vadd.f32 %v11504_v27, %v14777_v23  ;;  %v14916_v20 = vadd.f32 %v11613_v36, %v4649_v58 }
 0x59c   : > { %v11505_v31 = vpop.f32.mrb[116].mxu0  ;;  %v14918_v59 = vadd.f32 %v11616_v3, %v4652_v60  ;;  %v11617_v11 = vpop.f32.mrb[156].mxu1 }
 0x59d   : > { %v11506_v37 = vpop.f32.mrb[117].mxu0  ;;  %v11618_v25 = vpop.f32.mrb[157].mxu1 }
 0x59e   : > { %v11507_v42 = vadd.f32 %v11506_v37, %v11505_v31  ;;  %v11508_v17 = vpop.f32.mrb[118].mxu0  ;;  %v11619_v61 = vadd.f32 %v11618_v25, %v11617_v11  ;;  %v11620_v30 = vpop.f32.mrb[158].mxu1 }
 0x59f   : > { %v11509_v50 = vpop.f32.mrb[119].mxu0  ;;  %v11621_v33 = vpop.f32.mrb[159].mxu1 }
 0x5a0   : > { %v4657_v18 = vadd.f32 %v11507_v42, %v14785_v1  ;;  %v11510_v0 = vadd.f32 %v11509_v50, %v11508_v17  ;;  %v11622_v41 = vadd.f32 %v11621_v33, %v11620_v30 }
 0x5a2   : > { %v4660_v23 = vadd.f32 %v11510_v0, %v14787_v7  ;;  %v14922_v26 = vadd.f32 %v11619_v61, %v4657_v18 }
 0x5a4   : > { %v11511_v51 = vpop.f32.mrb[120].mxu0  ;;  %v14924_v32 = vadd.f32 %v11622_v41, %v4660_v23  ;;  %v11623_v35 = vpop.f32.mrb[160].mxu1 }
 0x5a5   : > { %v11512_v24 = vpop.f32.mrb[121].mxu0  ;;  %v11624_v44 = vpop.f32.mrb[161].mxu1 }
 0x5a6   : > { %v11513_v52 = vadd.f32 %v11512_v24, %v11511_v51  ;;  %v11514_v28 = vpop.f32.mrb[122].mxu0  ;;  %v11625_v36 = vadd.f32 %v11624_v44, %v11623_v35  ;;  %v11626_v34 = vpop.f32.mrb[162].mxu1 }
 0x5a7   : > { %v11515_v57 = vpop.f32.mrb[123].mxu0  ;;  %v11627_v58 = vpop.f32.mrb[163].mxu1 }
 0x5a8   : > { %v4665_v1 = vadd.f32 %v11513_v52, %v14793_v29  ;;  %v11516_v43 = vadd.f32 %v11515_v57, %v11514_v28  ;;  %v11628_v27 = vadd.f32 %v11627_v58, %v11626_v34 }
 0x5aa   : > { %v4668_v7 = vadd.f32 %v11516_v43, %v14795_v14  ;;  %v14928_v3 = vadd.f32 %v11625_v36, %v4665_v1 }
 0x5ac   : > { %v11517_v60 = vpop.f32.mrb[124].mxu0  ;;  %v14930_v31 = vadd.f32 %v11628_v27, %v4668_v7  ;;  %v11629_v11 = vpop.f32.mrb[164].mxu1 }
 0x5ad   : > { %v11518_v37 = vpop.f32.mrb[125].mxu0  ;;  %v11630_v25 = vpop.f32.mrb[165].mxu1 }
 0x5ae   : > { %v11519_v42 = vadd.f32 %v11518_v37, %v11517_v60  ;;  %v11520_v17 = vpop.f32.mrb[126].mxu0  ;;  %v11631_v61 = vadd.f32 %v11630_v25, %v11629_v11  ;;  %v11632_v30 = vpop.f32.mrb[166].mxu1 }
 0x5af   : > { %v11521_v50 = vpop.f32.mrb[127].mxu0  ;;  %v11633_v18 = vpop.f32.mrb[167].mxu1 }
 0x5b0   : > { %v4673_v29 = vadd.f32 %v11519_v42, %v14801_v53  ;;  %v11522_v33 = vadd.f32 %v11521_v50, %v11520_v17  ;;  %v11634_v0 = vadd.f32 %v11633_v18, %v11632_v30 }
 0x5b2   : > { %v4676_v14 = vadd.f32 %v11522_v33, %v14803_v54  ;;  %v14934_v41 = vadd.f32 %v11631_v61, %v4673_v29 }
 0x5b4   : > { %v11523_v23 = vpop.f32.mrb[128].mxu0  ;;  %v14936_v51 = vadd.f32 %v11634_v0, %v4676_v14  ;;  %v11635_v35 = vpop.f32.mrb[168].mxu1 }
 0x5b5   : > { %v11524_v24 = vpop.f32.mrb[129].mxu0  ;;  %v11636_v44 = vpop.f32.mrb[169].mxu1 }
 0x5b6   : > { %v11525_v52 = vadd.f32 %v11524_v24, %v11523_v23  ;;  %v11526_v28 = vpop.f32.mrb[130].mxu0  ;;  %v11637_v36 = vadd.f32 %v11636_v44, %v11635_v35  ;;  %v11638_v34 = vpop.f32.mrb[170].mxu1 }
 0x5b7   : > { %v11527_v57 = vpop.f32.mrb[131].mxu0  ;;  %v11639_v1 = vpop.f32.mrb[171].mxu1 }
 0x5b8   : > { %v4681_v53 = vadd.f32 %v11525_v52, %v14809_v4  ;;  %v11528_v58 = vadd.f32 %v11527_v57, %v11526_v28  ;;  %v11640_v43 = vadd.f32 %v11639_v1, %v11638_v34 }
 0x5ba   : > { %v4684_v54 = vadd.f32 %v11528_v58, %v14811_v6  ;;  %v14940_v27 = vadd.f32 %v11637_v36, %v4681_v53 }
 0x5bc   : > { %v11529_v7 = vpop.f32.mrb[132].mxu0  ;;  %v14942_v60 = vadd.f32 %v11640_v43, %v4684_v54  ;;  %v11641_v11 = vpop.f32.mrb[172].mxu1 }
 0x5bd   : > { %v11530_v37 = vpop.f32.mrb[133].mxu0  ;;  %v11642_v25 = vpop.f32.mrb[173].mxu1 }
 0x5be   : > { %v11531_v42 = vadd.f32 %v11530_v37, %v11529_v7  ;;  %v11532_v17 = vpop.f32.mrb[134].mxu0  ;;  %v11643_v61 = vadd.f32 %v11642_v25, %v11641_v11  ;;  %v11644_v30 = vpop.f32.mrb[174].mxu1 }
 0x5bf   : > { %v11533_v50 = vpop.f32.mrb[135].mxu0  ;;  %v11645_v29 = vpop.f32.mrb[175].mxu1 }
 0x5c0   : > { %v4689_v4 = vadd.f32 %v11531_v42, %v14817_v21  ;;  %v11534_v18 = vadd.f32 %v11533_v50, %v11532_v17  ;;  %v11646_v33 = vadd.f32 %v11645_v29, %v11644_v30 }
 0x5c2   : > { %v4692_v6 = vadd.f32 %v11534_v18, %v14819_v49  ;;  %v14946_v0 = vadd.f32 %v11643_v61, %v4689_v4 }
 0x5c4   : > { %v11535_v14 = vpop.f32.mrb[136].mxu0  ;;  %v14948_v23 = vadd.f32 %v11646_v33, %v4692_v6  ;;  %v11647_v35 = vpop.f32.mrb[176].mxu1 }
 0x5c5   : > { %v11536_v24 = vpop.f32.mrb[137].mxu0  ;;  %v11648_v44 = vpop.f32.mrb[177].mxu1 }
 0x5c6   : > { %v11537_v52 = vadd.f32 %v11536_v24, %v11535_v14  ;;  %v11538_v28 = vpop.f32.mrb[138].mxu0  ;;  %v11649_v36 = vadd.f32 %v11648_v44, %v11647_v35  ;;  %v11650_v34 = vpop.f32.mrb[178].mxu1 }
 0x5c7   : > { %v11539_v57 = vpop.f32.mrb[139].mxu0  ;;  %v11651_v53 = vpop.f32.mrb[179].mxu1 }
 0x5c8   : > { %v4697_v21 = vadd.f32 %v11537_v52, %v14825_v48  ;;  %v11540_v1 = vadd.f32 %v11539_v57, %v11538_v28  ;;  %v11652_v58 = vadd.f32 %v11651_v53, %v11650_v34 }
 0x5ca   : > { %v4700_v49 = vadd.f32 %v11540_v1, %v14827_v46  ;;  %v14952_v43 = vadd.f32 %v11649_v36, %v4697_v21 }
 0x5cc   : > { %v11541_v54 = vpop.f32.mrb[140].mxu0  ;;  %v14954_v7 = vadd.f32 %v11652_v58, %v4700_v49  ;;  %v11653_v11 = vpop.f32.mrb[180].mxu1 }
 0x5cd   : > { %v11542_v37 = vpop.f32.mrb[141].mxu0  ;;  %v11654_v25 = vpop.f32.mrb[181].mxu1 }
 0x5ce   : > { %v11543_v42 = vadd.f32 %v11542_v37, %v11541_v54  ;;  %v11544_v17 = vpop.f32.mrb[142].mxu0  ;;  %v11655_v61 = vadd.f32 %v11654_v25, %v11653_v11  ;;  %v11656_v30 = vpop.f32.mrb[182].mxu1 }
 0x5cf   : > { %v11545_v50 = vpop.f32.mrb[143].mxu0  ;;  %v11657_v4 = vpop.f32.mrb[183].mxu1 }
 0x5d0   : > { %v4705_v48 = vadd.f32 %v11543_v42, %v14833_v13  ;;  %v11546_v29 = vadd.f32 %v11545_v50, %v11544_v17  ;;  %v11658_v18 = vadd.f32 %v11657_v4, %v11656_v30 }
 0x5d2   : > { %v4708_v46 = vadd.f32 %v11546_v29, %v14835_v55  ;;  %v14958_v33 = vadd.f32 %v11655_v61, %v4705_v48 }
 0x5d4   : > { %v11547_v6 = vpop.f32.mrb[144].mxu0  ;;  %v14960_v14 = vadd.f32 %v11658_v18, %v4708_v46  ;;  %v11659_v35 = vpop.f32.mrb[184].mxu1 }
 0x5d5   : > { %v11548_v24 = vpop.f32.mrb[145].mxu0  ;;  %v11660_v44 = vpop.f32.mrb[185].mxu1 }
 0x5d6   : > { %v11549_v52 = vadd.f32 %v11548_v24, %v11547_v6  ;;  %v11550_v28 = vpop.f32.mrb[146].mxu0  ;;  %v11661_v36 = vadd.f32 %v11660_v44, %v11659_v35  ;;  %v11662_v34 = vpop.f32.mrb[186].mxu1 }
 0x5d7   : > { %v11551_v57 = vpop.f32.mrb[147].mxu0  ;;  %v11663_v21 = vpop.f32.mrb[187].mxu1 }
 0x5d8   : > { %v4713_v13 = vadd.f32 %v11549_v52, %v14841_v45  ;;  %v11552_v53 = vadd.f32 %v11551_v57, %v11550_v28  ;;  %v11664_v1 = vadd.f32 %v11663_v21, %v11662_v34 }
 0x5da   : > { %v4716_v55 = vadd.f32 %v11552_v53, %v14843_v12  ;;  %v14964_v58 = vadd.f32 %v11661_v36, %v4713_v13 }
 0x5dc   : > { %v11553_v49 = vpop.f32.mrb[148].mxu0  ;;  %v14966_v54 = vadd.f32 %v11664_v1, %v4716_v55  ;;  %v11665_v11 = vpop.f32.mrb[188].mxu1 }
 0x5dd   : > { %v11554_v37 = vpop.f32.mrb[149].mxu0  ;;  %v11666_v25 = vpop.f32.mrb[189].mxu1 }
 0x5de   : > { %v11555_v42 = vadd.f32 %v11554_v37, %v11553_v49  ;;  %v11556_v17 = vpop.f32.mrb[150].mxu0  ;;  %v11667_v61 = vadd.f32 %v11666_v25, %v11665_v11  ;;  %v11668_v30 = vpop.f32.mrb[190].mxu1 }
 0x5df   : > { %v11557_v50 = vpop.f32.mrb[151].mxu0  ;;  %v11669_v48 = vpop.f32.mrb[191].mxu1 }
 0x5e0   : > { %v4721_v45 = vadd.f32 %v11555_v42, %v14850_v63  ;;  %v11558_v4 = vadd.f32 %v11557_v50, %v11556_v17  ;;  %v11670_v29 = vadd.f32 %v11669_v48, %v11668_v30 }
 0x5e2   : > { %v4724_v12 = vadd.f32 %v11558_v4, %v14852_v22  ;;  %v14970_v18 = vadd.f32 %v11667_v61, %v4721_v45 }
 0x5e4   : > { %v11559_v46 = vpop.f32.mrb[152].mxu0  ;;  %v14972_v6 = vadd.f32 %v11670_v29, %v4724_v12  ;;  %v11671_v35 = vpop.f32.mrb[192].mxu1 }
 0x5e5   : > { %v11560_v24 = vpop.f32.mrb[153].mxu0  ;;  %v11672_v44 = vpop.f32.mrb[193].mxu1 }
 0x5e6   : > { %v11561_v52 = vadd.f32 %v11560_v24, %v11559_v46  ;;  %v11562_v28 = vpop.f32.mrb[154].mxu0  ;;  %v11673_v36 = vadd.f32 %v11672_v44, %v11671_v35  ;;  %v11674_v34 = vpop.f32.mrb[194].mxu1 }
 0x5e7   : > { %v11563_v57 = vpop.f32.mrb[155].mxu0  ;;  %v11675_v13 = vpop.f32.mrb[195].mxu1 }
 0x5e8   : > { %v4729_v63 = vadd.f32 %v11561_v52, %v14856_v10  ;;  %v11564_v21 = vadd.f32 %v11563_v57, %v11562_v28  ;;  %v11676_v53 = vadd.f32 %v11675_v13, %v11674_v34 }
 0x5ea   : > { %v4732_v22 = vadd.f32 %v11564_v21, %v14858_v8  ;;  %v14976_v1 = vadd.f32 %v11673_v36, %v4729_v63  ;;  %v5595_v63 = vld [vmem:[#allocation4] sm:$0xf] }
 0x5ec   : > { %v11565_v55 = vpop.f32.mrb[156].mxu0  ;;  %v14978_v49 = vadd.f32 %v11676_v53, %v4732_v22  ;;  %v11677_v11 = vpop.f32.mrb[196].mxu1  ;;  %v5596_v53 = vld [vmem:[#allocation4 + $0x4] sm:$0xf] }
 0x5ed   : > { %v11566_v37 = vpop.f32.mrb[157].mxu0  ;;  %v11678_v25 = vpop.f32.mrb[197].mxu1 }
 0x5ee   : > { %v11567_v42 = vadd.f32 %v11566_v37, %v11565_v55  ;;  %v11568_v17 = vpop.f32.mrb[158].mxu0  ;;  %v11679_v61 = vadd.f32 %v11678_v25, %v11677_v11  ;;  %v11680_v30 = vpop.f32.mrb[198].mxu1  ;;  %v5723_v55 = vshrl.u32 %v5595_v63, 16  ;;  %v5726_v11 = vshll.u32 %v5595_v63, 16 }
 0x5ef   : > { %v11569_v50 = vpop.f32.mrb[159].mxu0  ;;  %v11681_v45 = vpop.f32.mrb[199].mxu1  ;;  %v5732_v25 = vshll.u32 %v5596_v53, 16 }
 0x5f0   : > { %v4737_v10 = vadd.f32 %v11567_v42, %v14862_v62  ;;  %v11570_v48 = vadd.f32 %v11569_v50, %v11568_v17  ;;  %v11682_v4 = vadd.f32 %v11681_v45, %v11680_v30  ;;  %v5736_v17 = vshrl.u32 %v5596_v53, 16 }
 0x5f1   : > { %v5725_v45 = vrot.slane %v5723_v55, 4 }
 0x5f2   : > { %v4740_v8 = vadd.f32 %v11570_v48, %v14864_v56  ;;  %v14982_v29 = vadd.f32 %v11679_v61, %v4737_v10  ;;  %v5728_v48 = vrot.slane %v5726_v11, 5 }
 0x5f4   : > { %v11571_v12 = vpop.f32.mrb[160].mxu0  ;;  %v14984_v46 = vadd.f32 %v11682_v4, %v4740_v8  ;;  %v11683_v24 = vpop.f32.mrb[200].mxu1 }
 0x5f5   : > { %v11572_v35 = vpop.f32.mrb[161].mxu0  ;;  %v11684_v28 = vpop.f32.mrb[201].mxu1 }
 0x5f6   : > { %v11573_v44 = vadd.f32 %v11572_v35, %v11571_v12  ;;  %v11574_v52 = vpop.f32.mrb[162].mxu0  ;;  %v11685_v34 = vadd.f32 %v11684_v28, %v11683_v24  ;;  %v11686_v57 = vpop.f32.mrb[202].mxu1  ;;  %v14995_v12 = vrot.slane %v5732_v25, 5 }
 0x5f7   : > { %v11575_v36 = vpop.f32.mrb[163].mxu0  ;;  %v11687_v21 = vpop.f32.mrb[203].mxu1 }
 0x5f8   : > { %v4745_v62 = vadd.f32 %v11573_v44, %v14868_v38  ;;  %v11576_v13 = vadd.f32 %v11575_v36, %v11574_v52  ;;  %v11688_v56 = vadd.f32 %v11687_v21, %v11686_v57  ;;  %v5597_v44 = vld [vmem:[#allocation4 + $0x8] sm:$0x1]  ;;  %v5738_v52 = vrot.slane %v5736_v17, 4 }
 0x5fa   : > { %v4748_v22 = vadd.f32 %v11576_v13, %v14870_v39  ;;  %v14988_v37 = vadd.f32 %v11685_v34, %v4745_v62  ;;  %v5729_v62 = vor.u32 %v5728_v48, %v5725_v45 }
 0x5fc   : > { %v12353_v42 = vpop.f32.mrb[164].mxu0  ;;  %v14990_v61 = vadd.f32 %v11688_v56, %v4748_v22 }
 0x5fd   : > { %v4955_v30 = vadd.f32 %v12353_v42, %v14904_v2  ;;  %v4946_v50 = vpop.f32.mrb[165].mxu0 }
 0x5fe   : > { %v4947_v38 = vadd.f32 %v4946_v50, %v14874_v19  ;;  %v12354_v10 = vpop.f32.mrb[166].mxu0 }
 0x5ff   : > { %vm5075_vm4 = vcmp.gt.f32.partialorder %v4955_v30, 0.0  ;;  %v5107_v4 = vmul.f32 0.2, %v4955_v30  ;;  %v4958_v39 = vadd.f32 %v12354_v10, %v14906_v16  ;;  %v4949_v8 = vpop.f32.mrb[167].mxu0  ;;  %v5742_v16 = vshll.u32 %v5597_v44, 16 }
 0x600   : > { %vm5073_vm5 = vcmp.gt.f32.partialorder %v4947_v38, 0.0  ;;  %v5105_v35 = vmul.f32 0.2, %v4947_v38  ;;  %v4950_v24 = vadd.f32 %v4949_v8, %v14876_v47  ;;  %v5739_v47 = vor.u32 %v5738_v52, %v14995_v12 }
 0x601   : > { %v5139_v2 = vsel %vm5075_vm4, %v4955_v30, %v5107_v4  ;;  %vm5076_vm9 = vcmp.gt.f32.partialorder %v4958_v39, 0.0  ;;  %v5108_v28 = vmul.f32 0.2, %v4958_v39 }
 0x602   : > { %v5204_v19 = vrot.slane %v5139_v2, 7  ;;  %v5137_v36 = vsel %vm5073_vm5, %v4947_v38, %v5105_v35  ;;  %vm5074_vm10 = vcmp.gt.f32.partialorder %v4950_v24, 0.0  ;;  %v5106_v34 = vmul.f32 0.2, %v4950_v24 }
 0x603   : > { %v5201_v57 = vrot.slane %v5137_v36, 7  ;;  %v5140_v63 = vsel %vm5076_vm9, %v4958_v39, %v5108_v28  ;;  %v15015_v28 = vrot.slane %v5729_v62, 4 }
 0x604   : > { %v5298_v13 = vsel %vm708_vm1, 0.0, %v5204_v19  ;;  %v5205_v21 = vrot.slane %v5140_v63, 7  ;;  %v5138_v53 = vsel %vm5074_vm10, %v4950_v24, %v5106_v34  ;;  %v12357_v56 = vpop.f32.mrb[168].mxu0 }
 0x605   : > { %v10874_v22 = vpack.c.bf16 %v5298_v13, %v5298_v13  ;;  %v5297_v55 = vsel %vm708_vm1, 0.0, %v5201_v57  ;;  %v5202_v11 = vrot.slane %v5138_v53, 7  ;;  %v4971_v25 = vadd.f32 %v12357_v56, %v14916_v20  ;;  %v4962_v42 = vpop.f32.mrb[169].mxu0 }
 0x606   : > { %v10871_v17 = vpack.c.bf16 %v5297_v55, %v5297_v55  ;;  %v5206_v30 = vsel %vm708_vm1, %v5204_v19, %v5205_v21  ;;  %v5314_v50 = vsel %vm708_vm1, %v5205_v21, 0.0  ;;  %v4963_v38 = vadd.f32 %v4962_v42, %v14910_v40  ;;  %v12358_v10 = vpop.f32.mrb[170].mxu0 }
 0x607   : > { %5543 = vst.msk [vmem:[#allocation4 + $0x18] sm:$0xf] %vm5538_vm2, %v10874_v22  ;;  %v10875_v45 = vpack.c.bf16 %v5206_v30, %v5206_v30  ;;  %v10876_v48 = vpack.c.bf16 %v5314_v50, %v5314_v50  ;;  %v5203_v4 = vsel %vm708_vm1, %v5201_v57, %v5202_v11  ;;  %v5313_v39 = vsel %vm708_vm1, %v5202_v11, 0.0  ;;  %v4965_v8 = vpop.f32.mrb[171].mxu0 }
 0x608   : > { %5539 = vst.msk [vmem:[#allocation4 + $0xc] sm:$0xf] %vm5538_vm2, %v10871_v17  ;;  %v10872_v20 = vpack.c.bf16 %v5203_v4, %v5203_v4  ;;  %v10873_v35 = vpack.c.bf16 %v5313_v39, %v5313_v39  ;;  %vm5079_vm11 = vcmp.gt.f32.partialorder %v4971_v25, 0.0  ;;  %v5111_v24 = vmul.f32 0.2, %v4971_v25 }
 0x609   : > { %5544 = vst.msk [vmem:[#allocation4 + $0x1c] sm:$0xf] %vm5538_vm2, %v10875_v45  ;;  %vm5077_vm12 = vcmp.gt.f32.partialorder %v4963_v38, 0.0  ;;  %v5109_v40 = vmul.f32 0.2, %v4963_v38  ;;  %v4974_v44 = vadd.f32 %v12358_v10, %v14918_v59  ;;  %v4966_v52 = vadd.f32 %v4965_v8, %v14912_v15 }
 0x60a   : > { %5545 = vst.msk [vmem:[#allocation4 + $0x20] sm:$0x1] %vm5541_vm3, %v10876_v48  ;;  %5542 = vst.msk [vmem:[#allocation4 + $0x14] sm:$0x1] %vm5541_vm3, %v10873_v35  ;;  %v5143_v2 = vsel %vm5079_vm11, %v4971_v25, %v5111_v24  ;;  %v5744_v21 = vrot.slane %v5742_v16, 5  ;;  %v5740_v22 = vrot.slane %v5739_v47, 4 }
 0x60b   : > { %5540 = vst.msk [vmem:[#allocation4 + $0x10] sm:$0xf] %vm5538_vm2, %v10872_v20  ;;  %v5210_v19 = vrot.slane %v5143_v2, 7  ;;  %v5141_v36 = vsel %vm5077_vm12, %v4963_v38, %v5109_v40  ;;  %vm5080_vm13 = vcmp.gt.f32.partialorder %v4974_v44, 0.0  ;;  %v5112_v34 = vmul.f32 0.2, %v4974_v44 }
 0x60c   : > { %v5207_v57 = vrot.slane %v5141_v36, 7  ;;  %vm5078_vm14 = vcmp.gt.f32.partialorder %v4966_v52, 0.0  ;;  %v5110_v63 = vmul.f32 0.2, %v4966_v52  ;;  %v12361_v13 = vpop.f32.mrb[172].mxu0  ;;  %v5735_v36 = vsel %vm13377_vm7, %v15015_v28, %v14995_v12 }
 0x60d   : > { %v5300_v59 = vsel %vm708_vm1, 0.0, %v5210_v19  ;;  %v5144_v53 = vsel %vm5080_vm13, %v4974_v44, %v5112_v34  ;;  %v4987_v15 = vadd.f32 %v12361_v13, %v14928_v3  ;;  %v4978_v56 = vpop.f32.mrb[173].mxu0  ;;  %v5745_v34 = vsel %vm13377_vm7, %v5740_v22, %v5744_v21 }
 0x60e   : > { %v10880_v55 = vpack.c.bf16 %v5300_v59, %v5300_v59  ;;  %v5299_v62 = vsel %vm708_vm1, 0.0, %v5207_v57  ;;  %v5211_v11 = vrot.slane %v5144_v53, 7  ;;  %v5142_v25 = vsel %vm5078_vm14, %v4966_v52, %v5110_v63  ;;  %v12362_v42 = vpop.f32.mrb[174].mxu0  ;;  %v5601_v40 = vld [vmem:[#allocation4 + $0x18] sm:$0xf] }
 0x60f   : > { %v10877_v17 = vpack.c.bf16 %v5299_v62, %v5299_v62  ;;  %v5208_v30 = vrot.slane %v5142_v25, 7  ;;  %vm5083_vm15 = vcmp.gt.f32.partialorder %v4987_v15, 0.0  ;;  %v5115_v50 = vmul.f32 0.2, %v4987_v15  ;;  %v4981_v38 = vpop.f32.mrb[175].mxu0 }
 0x610   : > { %5549 = vst.msk [vmem:[#allocation4 + $0x30] sm:$0xf] %vm5538_vm2, %v10880_v55  ;;  %v5212_v16 = vsel %vm708_vm1, %v5210_v19, %v5211_v11  ;;  %v5316_v10 = vsel %vm708_vm1, %v5211_v11, 0.0  ;;  %v4979_v3 = vadd.f32 %v4978_v56, %v14922_v26  ;;  %v4990_v47 = vadd.f32 %v12362_v42, %v14930_v31  ;;  %v15028_v8 = vld [vmem:[#allocation4 + $0x1c] sm:$0xf] }
 0x611   : > { %5546 = vst.msk [vmem:[#allocation4 + $0x24] sm:$0xf] %vm5538_vm2, %v10877_v17  ;;  %v10881_v45 = vpack.c.bf16 %v5212_v16, %v5212_v16  ;;  %v10882_v48 = vpack.c.bf16 %v5316_v10, %v5316_v10  ;;  %v5209_v4 = vsel %vm708_vm1, %v5207_v57, %v5208_v30  ;;  %v5315_v39 = vsel %vm708_vm1, %v5208_v30, 0.0  ;;  %v5598_v30 = vld [vmem:[#allocation4 + $0xc] sm:$0xf] }
 0x612   : > { %v10878_v20 = vpack.c.bf16 %v5209_v4, %v5209_v4  ;;  %v10879_v35 = vpack.c.bf16 %v5315_v39, %v5315_v39  ;;  %v5147_v24 = vsel %vm5083_vm15, %v4987_v15, %v5115_v50  ;;  %vm5081_vm0 = vcmp.gt.f32.partialorder %v4979_v3, 0.0  ;;  %v15055_v50 = vld [vmem:[#allocation4 + $0x10] sm:$0xf] }
 0x613   : > { %5550 = vst.msk [vmem:[#allocation4 + $0x34] sm:$0xf] %vm5538_vm2, %v10881_v45  ;;  %v5216_v26 = vrot.slane %v5147_v24, 7  ;;  %v5113_v31 = vmul.f32 0.2, %v4979_v3  ;;  %vm5084_vm4 = vcmp.gt.f32.partialorder %v4990_v47, 0.0  ;;  %v4982_v52 = vadd.f32 %v4981_v38, %v14924_v32 }
 0x614   : > { %5551 = vst.msk [vmem:[#allocation4 + $0x38] sm:$0x1] %vm5541_vm3, %v10882_v48  ;;  %v5116_v44 = vmul.f32 0.2, %v4990_v47  ;;  %5548 = vst.msk [vmem:[#allocation4 + $0x2c] sm:$0x1] %vm5541_vm3, %v10879_v35  ;;  %v15037_v2 = vcombine.low %v5601_v40, %v15028_v8  ;;  %v10575_v62 = vcombine.low %v5735_v36, %v5745_v34 }
 0x615   : > { %5547 = vst.msk [vmem:[#allocation4 + $0x28] sm:$0xf] %vm5538_vm2, %v10878_v20  ;;  %v12365_v19 = vpop.f32.mrb[176].mxu0  ;;  %v5302_v57 = vsel %vm708_vm1, 0.0, %v5216_v26  ;;  %v5145_v63 = vsel %vm5081_vm0, %v4979_v3, %v5113_v31  ;;  %v5771_v59 = vshrl.u32 %v5601_v40, 16  ;;  %vm5082_vm5 = vcmp.gt.f32.partialorder %v4982_v52, 0.0 }
 0x616   : > { %17751 = vst [vmem:[#allocation6_spill] sm:$0xff] %v15037_v2  ;;  %v5148_v13 = vsel %vm5084_vm4, %v4990_v47, %v5116_v44  ;;  %v4994_v53 = vpop.f32.mrb[177].mxu0  ;;  %v10886_v32 = vpack.c.bf16 %v5302_v57, %v5302_v57  ;;  %v5213_v15 = vrot.slane %v5145_v63, 7  ;;  %6579 = vrot.lane.b32.xlu1 %v15037_v2, %s12991_s27  ;;  %v5114_v12 = vmul.f32 0.2, %v4982_v52 }
 0x617   : > { %v5217_v56 = vrot.slane %v5148_v13, 7  ;;  %v12366_v55 = vpop.f32.mrb[178].mxu0  ;;  %v5774_v28 = vshll.u32 %v5601_v40, 16  ;;  %v5780_v21 = vshll.u32 %v15028_v8, 16  ;;  %v5003_v17 = vadd.f32 %v12365_v19, %v14940_v27 }
 0x618   : > { %v4997_v22 = vpop.f32.mrb[179].mxu0  ;;  %5555 = vst.msk [vmem:[#allocation4 + $0x48] sm:$0xf] %vm5538_vm2, %v10886_v32  ;;  %v5301_v11 = vsel %vm708_vm1, 0.0, %v5213_v15  ;;  %v5146_v3 = vsel %vm5082_vm5, %v4982_v52, %v5114_v12  ;;  %v15058_v45 = vrot.slane %v5771_v59, 4  ;;  %v5747_v4 = vshrl.u32 %v5598_v30, 16 }
 0x619   : > { %v5218_v25 = vsel %vm708_vm1, %v5216_v26, %v5217_v56  ;;  %v5318_v42 = vsel %vm708_vm1, %v5217_v56, 0.0  ;;  %v10883_v38 = vpack.c.bf16 %v5301_v11, %v5301_v11  ;;  %v5214_v47 = vrot.slane %v5146_v3, 7 }
 0x61a   : > { %v10887_v16 = vpack.c.bf16 %v5218_v25, %v5218_v25  ;;  %v10888_v10 = vpack.c.bf16 %v5318_v42, %v5318_v42  ;;  %vm5087_vm9 = vcmp.gt.f32.partialorder %v5003_v17, 0.0  ;;  %v5119_v48 = vmul.f32 0.2, %v5003_v17 }
 0x61b   : > { %5552 = vst.msk [vmem:[#allocation4 + $0x3c] sm:$0xf] %vm5538_vm2, %v10883_v38  ;;  %v15063_v27 = vrot.slane %v5774_v28, 5  ;;  %v5750_v39 = vshll.u32 %v5598_v30, 16  ;;  %v15066_v20 = vcombine.low %v5598_v30, %v15055_v50  ;;  %v5215_v35 = vsel %vm708_vm1, %v5213_v15, %v5214_v47 }
 0x61c   : > { %5556 = vst.msk [vmem:[#allocation4 + $0x4c] sm:$0xf] %vm5538_vm2, %v10887_v16  ;;  %v5317_v24 = vsel %vm708_vm1, %v5214_v47, 0.0  ;;  %v5784_v40 = vshrl.u32 %v15028_v8, 16  ;;  %v5151_v26 = vsel %vm5087_vm9, %v5003_v17, %v5119_v48  ;;  %v12369_v31 = vpop.f32.mrb[180].mxu0  ;;  %v10884_v44 = vpack.c.bf16 %v5215_v35, %v5215_v35 }
 0x61d   : > { %5557 = vst.msk [vmem:[#allocation4 + $0x50] sm:$0x1] %vm5541_vm3, %v10888_v10  ;;  %17752 = vst [vmem:[#allocation9_spill] sm:$0xff] %v15066_v20  ;;  %v10885_v52 = vpack.c.bf16 %v5317_v24, %v5317_v24  ;;  %v5222_v19 = vrot.slane %v5151_v26, 7  ;;  %6577 = vrot.lane.b32.xlu0 %v15066_v20, %s12991_s27  ;;  %v5756_v36 = vshll.u32 %v15055_v50, 16  ;;  %v5010_v34 = vpop.f32.mrb[181].mxu0  ;;  %v4995_v13 = vadd.f32 %v4994_v53, %v14934_v41 }
 0x61e   : > { %v15074_v57 = vrot.slane %v5747_v4, 4  ;;  %v5760_v63 = vshrl.u32 %v15055_v50, 16  ;;  %v5006_v59 = vadd.f32 %v12366_v55, %v14942_v60  ;;  %v15079_v32 = vpop.f32.mrb[182].mxu0  ;;  %5553 = vst.msk [vmem:[#allocation4 + $0x40] sm:$0xf] %vm5538_vm2, %v10884_v44  ;;  %v5752_v56 = vrot.slane %v5750_v39, 5 }
 0x61f   : > { %5554 = vst.msk [vmem:[#allocation4 + $0x44] sm:$0x1] %vm5541_vm3, %v10885_v52  ;;  %v5304_v15 = vsel %vm708_vm1, 0.0, %v5222_v19  ;;  %v4998_v12 = vadd.f32 %v4997_v22, %v14936_v51  ;;  %v5019_v28 = vadd.f32 %v12369_v31, %v14952_v43  ;;  %v15086_v11 = vpop.f32.mrb[183].mxu0  ;;  %vm5085_vm10 = vcmp.gt.f32.partialorder %v4995_v13, 0.0  ;;  %v12887_v39 = vld [vmem:[%s17641_s10] sm:$0xff]  }
 0x620   : > { %v10892_v25 = vpack.c.bf16 %v5304_v15, %v5304_v15  ;;  %v5117_v41 = vmul.f32 0.2, %v4995_v13  ;;  %vm5088_vm11 = vcmp.gt.f32.partialorder %v5006_v59, 0.0  ;;  %v15088_v60 = vld [vmem:[#allocation4 + $0x28] sm:$0xf]  ;;  %v15091_v42 = vrot.slane %v5784_v40, 4 }
 0x621   : > { %v5120_v53 = vmul.f32 0.2, %v5006_v59  ;;  %vm5086_vm12 = vcmp.gt.f32.partialorder %v4998_v12, 0.0  ;;  %v5118_v55 = vmul.f32 0.2, %v4998_v12  ;;  %6430 = vrot.lane.b32.xlu0 %v10575_v62, %s12991_s27  ;;  %vm5091_vm13 = vcmp.gt.f32.partialorder %v5019_v28, 0.0 }
 0x622   : > { %5561 = vst.msk [vmem:[#allocation4 + $0x60] sm:$0xf] %vm5538_vm2, %v10892_v25  ;;  %v5762_v51 = vrot.slane %v5760_v63, 4  ;;  %v5149_v43 = vsel %vm5085_vm10, %v4995_v13, %v5117_v41  ;;  %v5123_v22 = vmul.f32 0.2, %v5019_v28  ;;  %v12886_v62 = vld [vmem:[%s17641_s10 + $0x40] sm:$0xff]   ;;  %v5011_v48 = vadd.f32 %v5010_v34, %v14946_v0 }
 0x623   : > { %v15094_v17 = vld [vmem:[#allocation4 + $0x24] sm:$0xf]  ;;  %v5219_v30 = vrot.slane %v5149_v43, 7  ;;  %v5152_v50 = vsel %vm5088_vm11, %v5006_v59, %v5120_v53  ;;  %v5150_v38 = vsel %vm5086_vm12, %v4998_v12, %v5118_v55  ;;  %v5753_v40 = vor.u32 %v5752_v56, %v15074_v57  ;;  %11713 = vmatprep.subr.bf16.mxu1 %v12886_v62  ;;  %v5600_v63 = vld [vmem:[#allocation4 + $0x14] sm:$0x1] }
 0x624   : > { %v15098_v16 = vcombine.low %v15094_v17, %v15088_v60  ;;  %v5223_v10 = vrot.slane %v5152_v50, 7  ;;  %v5220_v3 = vrot.slane %v5150_v38, 7  ;;  %v15103_v47 = vsel %vm5091_vm13, %v5019_v28, %v5123_v22  ;;  %v15106_v4 = vpop.f32.mrb[184].mxu0  ;;  %11714 = vmatpush3.bf16.msra.mxu1 %v12887_v39  ;;  %v12888_v56 = vld [vmem:[%s17641_s10 + $0x48] sm:$0xff]  }
 0x625   : > { %v5303_v35 = vsel %vm708_vm1, 0.0, %v5219_v30  ;;  %v5228_v24 = vrot.slane %v15103_v47, 7  ;;  %v5758_v26 = vrot.slane %v5756_v36, 5  ;;  %v15116_v31 = vpop.f32.mrb[185].mxu0  ;;  %vm5089_vm14 = vcmp.gt.f32.partialorder %v5011_v48, 0.0  ;;  %11715 = vmatprep.subr.bf16.mxu1 %v12888_v56  ;;  %v12894_v47 = vld [vmem:[%s17641_s10 + $0x60] sm:$0xff]  }
 0x626   : > { %17753 = vst [vmem:[#allocation10_spill] sm:$0xff] %v15098_v16  ;;  %6581 = vrot.lane.b32.xlu0 %v15098_v16, %s12991_s27  ;;  %v10889_v0 = vpack.c.bf16 %v5303_v35, %v5303_v35  ;;  %v5224_v44 = vsel %vm708_vm1, %v5222_v19, %v5223_v10  ;;  %v5320_v52 = vsel %vm708_vm1, %v5223_v10, 0.0  ;;  %v5221_v34 = vsel %vm708_vm1, %v5219_v30, %v5220_v3  ;;  %v15121_v13 = vpop.f32.mrb[186].mxu0  ;;  %v12889_v19 = vld [vmem:[%s17641_s10 + $0x8] sm:$0xff]   ;;  %v12890_v10 = vld [vmem:[%s17641_s10 + $0x50] sm:$0xff]  }
 0x627   : > { %v10893_v59 = vpack.c.bf16 %v5224_v44, %v5224_v44  ;;  %v10894_v15 = vpack.c.bf16 %v5320_v52, %v5320_v52  ;;  %v5319_v12 = vsel %vm708_vm1, %v5220_v3, 0.0  ;;  %v10890_v57 = vpack.c.bf16 %v5221_v34, %v5221_v34  ;;  %v15124_v36 = vpop.f32.mrb[187].mxu0  ;;  %v15161_v34 = vld [vmem:[#allocation4 + $0x30] sm:$0xf]  ;;  %v15201_v8 = vld [vmem:[#allocation4 + $0x40] sm:$0xf] }
 0x628   : > { %5558 = vst.msk [vmem:[#allocation4 + $0x54] sm:$0xf] %vm5538_vm2, %v10889_v0  ;;  %v10891_v28 = vpack.c.bf16 %v5319_v12, %v5319_v12  ;;  %v5306_v25 = vsel %vm708_vm1, 0.0, %v5228_v24  ;;  %v5121_v41 = vmul.f32 0.2, %v5011_v48  ;;  %v5754_v55 = vrot.slane %v5753_v40, 4  ;;  %11716 = vmatpush3.bf16.msra.mxu1 %v12889_v19 }
 0x629   : > { %5562 = vst.msk [vmem:[#allocation4 + $0x64] sm:$0xf] %vm5538_vm2, %v10893_v59  ;;  %5559 = vst.msk [vmem:[#allocation4 + $0x58] sm:$0xf] %vm5538_vm2, %v10890_v57  ;;  %v10898_v53 = vpack.c.bf16 %v5306_v25, %v5306_v25  ;;  %v5763_v43 = vor.u32 %v5762_v51, %v5758_v26  ;;  %v5766_v22 = vshll.u32 %v5600_v63, 16  ;;  %v5795_v30 = vshrl.u32 %v15094_v17, 16  ;;  %11717 = vmatprep.subr.bf16.mxu1 %v12890_v10 }
 0x62a   : > { %5563 = vst.msk [vmem:[#allocation4 + $0x68] sm:$0x1] %vm5541_vm3, %v10894_v15  ;;  %5560 = vst.msk [vmem:[#allocation4 + $0x5c] sm:$0x1] %vm5541_vm3, %v10891_v28  ;;  %v5153_v50 = vsel %vm5089_vm14, %v5011_v48, %v5121_v41  ;;  %v5022_v38 = vadd.f32 %v15079_v32, %v14954_v7  ;;  %v5014_v62 = vadd.f32 %v15086_v11, %v14948_v23  ;;  %v12891_v51 = vld [vmem:[%s17641_s10 + $0x10] sm:$0xff]   ;;  %v5798_v3 = vshll.u32 %v15094_v17, 16 }
 0x62b   : > { %5567 = vst.msk [vmem:[#allocation4 + $0x78] sm:$0xf] %vm5538_vm2, %v10898_v53  ;;  %v5225_v48 = vrot.slane %v5153_v50, 7  ;;  %v5764_v39 = vrot.slane %v5763_v43, 4  ;;  %v5768_v35 = vrot.slane %v5766_v22, 5  ;;  %v5808_v40 = vshrl.u32 %v15088_v60, 16 }
 0x62c   : > { %v15153_v7 = vld [vmem:[#allocation4 + $0x34] sm:$0xf]  ;;  %v5603_v32 = vld [vmem:[#allocation4 + $0x20] sm:$0x1]  ;;  %vm5092_vm15 = vcmp.gt.f32.partialorder %v5022_v38, 0.0  ;;  %vm5090_vm0 = vcmp.gt.f32.partialorder %v5014_v62, 0.0  ;;  %v5759_v44 = vsel %vm13377_vm7, %v5754_v55, %v5758_v26  ;;  %11718 = vmatpush3.bf16.msra.mxu1 %v12891_v51  ;;  %v5777_v53 = vor.u32 %v15063_v27, %v15058_v45 }
 0x62d   : > { %v5124_v23 = vmul.f32 0.2, %v5022_v38  ;;  %v5122_v11 = vmul.f32 0.2, %v5014_v62  ;;  %v5305_v0 = vsel %vm708_vm1, 0.0, %v5225_v48  ;;  %v5769_v52 = vsel %vm13377_vm7, %v5764_v39, %v5768_v35  ;;  %v15163_v63 = vpop.f32.mrb[188].mxu0 }
 0x62e   : > { %v10895_v59 = vpack.c.bf16 %v5305_v0, %v5305_v0  ;;  %v15165_v15 = vcombine.low %v5759_v44, %v5769_v52  ;;  %v15167_v56 = vpop.f32.mrb[189].mxu0  ;;  %v12892_v19 = vld [vmem:[%s17641_s10 + $0x58] sm:$0xff]   ;;  %v15177_v41 = vcombine.low %v15161_v34, %v15153_v7  ;;  %v5819_v43 = vshrl.u32 %v15161_v34, 16  ;;  %v15203_v35 = vld [vmem:[#allocation4 + $0x3c] sm:$0xf]  ;;  %v12898_v17 = vld [vmem:[%s17641_s10 + $0x70] sm:$0xff]  }
 0x62f   : > { %v5156_v12 = vsel %vm5092_vm15, %v5022_v38, %v5124_v23  ;;  %v5154_v57 = vsel %vm5090_vm0, %v5014_v62, %v5122_v11  ;;  %v12893_v26 = vld [vmem:[%s17641_s10 + $0x18] sm:$0xff]   ;;  %v15181_v55 = vpop.f32.mrb[190].mxu0  ;;  %v5782_v22 = vrot.slane %v5780_v21, 5  ;;  %v5790_v50 = vshll.u32 %v5603_v32, 16  ;;  %11719 = vmatprep.subr.bf16.mxu1 %v12892_v19  ;;  %v12895_v23 = vld [vmem:[%s17641_s10 + $0x20] sm:$0xff]   ;;  %v12896_v11 = vld [vmem:[%s17641_s10 + $0x68] sm:$0xff]  }
 0x630   : > { %17754 = vst [vmem:[#allocation7_spill] sm:$0xff] %v15165_v15  ;;  %v5229_v28 = vrot.slane %v5156_v12, 7  ;;  %v5226_v25 = vrot.slane %v5154_v57, 7  ;;  %17755 = vst [vmem:[#allocation11_spill] sm:$0xff] %v15177_v41  ;;  %6432 = vrot.lane.b32.xlu1 %v15165_v15, %s12991_s27  ;;  %v5035_v38 = vadd.f32 %v15106_v4, %v14964_v58  ;;  %v15191_v62 = vpop.f32.mrb[191].mxu0  ;;  %6583 = vrot.lane.b32.xlu0 %v15177_v41, %s12991_s27  ;;  %v5832_v0 = vshrl.u32 %v15153_v7, 16 }
 0x631   : > { %5564 = vst.msk [vmem:[#allocation4 + $0x6c] sm:$0xf] %vm5538_vm2, %v10895_v59  ;;  %11720 = vmatpush3.bf16.msra.mxu1 %v12893_v26  ;;  %v5787_v32 = vor.u32 %v15091_v42, %v5782_v22  ;;  %v5792_v42 = vrot.slane %v5790_v50, 5  ;;  %v15223_v52 = vcombine.low %v15203_v35, %v15201_v8  ;;  %v5027_v19 = vadd.f32 %v15116_v31, %v14958_v33  ;;  %v15231_v26 = vld [vmem:[#allocation4 + $0x2c] sm:$0x1] }
 0x632   : > { %v5230_v45 = vsel %vm708_vm1, %v5228_v24, %v5229_v28  ;;  %v5322_v27 = vsel %vm708_vm1, %v5229_v28, 0.0  ;;  %v5227_v10 = vsel %vm708_vm1, %v5225_v48, %v5226_v25  ;;  %v5321_v51 = vsel %vm708_vm1, %v5226_v25, 0.0  ;;  %11721 = vmatprep.subr.bf16.mxu1 %v12894_v47 }
 0x633   : > { %v10899_v21 = vpack.c.bf16 %v5230_v45, %v5230_v45  ;;  %v10900_v58 = vpack.c.bf16 %v5322_v27, %v5322_v27  ;;  %v10896_v4 = vpack.c.bf16 %v5227_v10, %v5227_v10  ;;  %v10897_v39 = vpack.c.bf16 %v5321_v51, %v5321_v51  ;;  %17756 = vst [vmem:[#allocation13_spill] sm:$0xff] %v15223_v52 }
 0x634   : > { %v5822_v24 = vshll.u32 %v15161_v34, 16  ;;  %v5778_v48 = vrot.slane %v5777_v53, 4  ;;  %vm5095_vm4 = vcmp.gt.f32.partialorder %v5035_v38, 0.0  ;;  %v5127_v44 = vmul.f32 0.2, %v5035_v38  ;;  %v15225_v59 = vpop.f32.mrb[192].mxu0  ;;  %6585 = vrot.lane.b32.xlu0 %v15223_v52, %s12991_s27 }
 0x635   : > { %5568 = vst.msk [vmem:[#allocation4 + $0x7c] sm:$0xf] %vm5538_vm2, %v10899_v21  ;;  %5565 = vst.msk [vmem:[#allocation4 + $0x70] sm:$0xf] %vm5538_vm2, %v10896_v4  ;;  %v5788_v57 = vrot.slane %v5787_v32, 4  ;;  %v5797_v28 = vrot.slane %v5795_v30, 4  ;;  %11722 = vmatpush3.bf16.msra.mxu1 %v12895_v23  ;;  %v5038_v4 = vadd.f32 %v15121_v13, %v14966_v54 }
 0x636   : > { %5569 = vst.msk [vmem:[#allocation4 + $0x80] sm:$0x1] %vm5541_vm3, %v10900_v58  ;;  %5566 = vst.msk [vmem:[#allocation4 + $0x74] sm:$0x1] %vm5541_vm3, %v10897_v39  ;;  %v5783_v12 = vsel %vm13377_vm7, %v5778_v48, %v5782_v22  ;;  %v15235_v25 = vpop.f32.mrb[193].mxu0  ;;  %v5159_v53 = vsel %vm5095_vm4, %v5035_v38, %v5127_v44  ;;  %v5800_v50 = vrot.slane %v5798_v3, 5  ;;  %11723 = vmatprep.subr.bf16.mxu1 %v12896_v11 }
 0x637   : > { %v5804_v22 = vshll.u32 %v15088_v60, 16  ;;  %v5810_v33 = vrot.slane %v5808_v40, 4  ;;  %v15245_v31 = vpop.f32.mrb[194].mxu0  ;;  %v12897_v30 = vld [vmem:[%s17641_s10 + $0x28] sm:$0xff]   ;;  %v5793_v38 = vsel %vm13377_vm7, %v5788_v57, %v5792_v42  ;;  %v5234_v45 = vrot.slane %v5159_v53, 7  ;;  %v12899_v42 = vld [vmem:[%s17641_s10 + $0x30] sm:$0xff]  }
 0x638   : > { %vm5093_vm5 = vcmp.gt.f32.partialorder %v5027_v19, 0.0  ;;  %v5125_v27 = vmul.f32 0.2, %v5027_v19  ;;  %v15255_v60 = vcombine.low %v5783_v12, %v5793_v38  ;;  %v5801_v3 = vor.u32 %v5800_v50, %v5797_v28  ;;  %v15258_v51 = vpop.f32.mrb[195].mxu0  ;;  %v15267_v11 = vld [vmem:[#allocation4 + $0x4c] sm:$0xf] }
 0x639   : > { %v5806_v40 = vrot.slane %v5804_v22, 5  ;;  %v5814_v10 = vshll.u32 %v15231_v26, 16  ;;  %v5308_v21 = vsel %vm708_vm1, 0.0, %v5234_v45  ;;  %v5030_v39 = vadd.f32 %v15124_v36, %v14960_v14  ;;  %11724 = vmatpush3.bf16.msra.mxu1 %v12897_v30  ;;  %v12900_v14 = vld [vmem:[%s17641_s10 + $0x78] sm:$0xff]  }
 0x63a   : > { %17757 = vst [vmem:[#allocation18_spill] sm:$0xff] %v15255_v60  ;;  %v5157_v58 = vsel %vm5093_vm5, %v5027_v19, %v5125_v27  ;;  %6434 = vrot.lane.b32.xlu1 %v15255_v60, %s12991_s27  ;;  %v10904_v47 = vpack.c.bf16 %v5308_v21, %v5308_v21  ;;  %v5802_v32 = vrot.slane %v5801_v3, 4  ;;  %v5843_v44 = vshrl.u32 %v15203_v35, 16  ;;  %11725 = vmatprep.subr.bf16.mxu1 %v12898_v17  ;;  %v15284_v27 = vld [vmem:[#allocation4 + $0x48] sm:$0xf]  ;;  %v12901_v17 = vld [vmem:[%s17641_s10 + $0x38] sm:$0xff]  }
 0x63b   : > { %v5231_v48 = vrot.slane %v5157_v58, 7  ;;  %v5811_v23 = vor.u32 %v5810_v33, %v5806_v40  ;;  %vm5096_vm9 = vcmp.gt.f32.partialorder %v5038_v4, 0.0  ;;  %v5128_v54 = vmul.f32 0.2, %v5038_v4 }
 0x63c   : > { %vm5094_vm10 = vcmp.gt.f32.partialorder %v5030_v39, 0.0  ;;  %5573 = vst.msk [vmem:[#allocation4 + $0x90] sm:$0xf] %vm5538_vm2, %v10904_v47  ;;  %v5816_v12 = vrot.slane %v5814_v10, 5  ;;  %v5126_v57 = vmul.f32 0.2, %v5030_v39  ;;  %v5807_v22 = vsel %vm13377_vm7, %v5802_v32, %v5806_v40 }
 0x63d   : > { %v5307_v13 = vsel %vm708_vm1, 0.0, %v5231_v48  ;;  %v5812_v36 = vrot.slane %v5811_v23, 4  ;;  %v5846_v19 = vshll.u32 %v15203_v35, 16  ;;  %v5856_v28 = vshrl.u32 %v15201_v8, 16  ;;  %11726 = vmatpush3.bf16.msra.mxu1 %v12899_v42 }
 0x63e   : > { %v10901_v53 = vpack.c.bf16 %v5307_v13, %v5307_v13  ;;  %v5160_v50 = vsel %vm5096_vm9, %v5038_v4, %v5128_v54  ;;  %v5158_v38 = vsel %vm5094_vm10, %v5030_v39, %v5126_v57  ;;  %v15294_v40 = vcombine.low %v15284_v27, %v15267_v11  ;;  %11727 = vmatprep.subr.bf16.mxu1 %v12900_v14  ;;  %v15300_v39 = vld [vmem:[#allocation4 + $0x38] sm:$0x1] }
 0x63f   : > { %v5817_v33 = vsel %vm13377_vm7, %v5812_v36, %v5816_v12  ;;  %v5235_v30 = vrot.slane %v5160_v50, 7  ;;  %v5232_v10 = vrot.slane %v5158_v38, 7  ;;  %v5821_v21 = vrot.slane %v5819_v43, 4 }
 0x640   : > { %5570 = vst.msk [vmem:[#allocation4 + $0x84] sm:$0xf] %vm5538_vm2, %v10901_v53  ;;  %v15290_v3 = vcombine.low %v5807_v22, %v5817_v33  ;;  %17759 = vst [vmem:[#allocation14_spill] sm:$0xff] %v15294_v40  ;;  %v5824_v47 = vrot.slane %v5822_v24, 5  ;;  %v5828_v32 = vshll.u32 %v15153_v7, 16  ;;  %6587 = vrot.lane.b32.xlu0 %v15294_v40, %s12991_s27  ;;  %v5867_v36 = vshrl.u32 %v15284_v27, 16 }
 0x641   : > { %v5236_v58 = vsel %vm708_vm1, %v5234_v45, %v5235_v30  ;;  %v5324_v4 = vsel %vm708_vm1, %v5235_v30, 0.0  ;;  %v5233_v54 = vsel %vm708_vm1, %v5231_v48, %v5232_v10  ;;  %v5323_v43 = vsel %vm708_vm1, %v5232_v10, 0.0  ;;  %v15311_v45 = vld [vmem:[#allocation4 + $0x58] sm:$0xf]  ;;  %11728 = vmatpush3.bf16.msra.mxu1 %v12901_v17  ;;  %v15321_v53 = vld [vmem:[#allocation4 + $0x54] sm:$0xf] }
 0x642   : > { %17758 = vst [vmem:[#allocation8_spill] sm:$0xff] %v15290_v3  ;;  %6436 = vrot.lane.b32.xlu1 %v15290_v3, %s12991_s27  ;;  %v10905_v23 = vpack.c.bf16 %v5236_v58, %v5236_v58  ;;  %v10906_v42 = vpack.c.bf16 %v5324_v4, %v5324_v4  ;;  %v10902_v14 = vpack.c.bf16 %v5233_v54, %v5233_v54  ;;  %v5830_v24 = vrot.slane %v5828_v32, 5  ;;  %v15337_v17 = vld [vmem:[#allocation4 + $0x44] sm:$0x1] }
 0x643   : > { %v10903_v13 = vpack.c.bf16 %v5323_v43, %v5323_v43  ;;  %v5825_v34 = vor.u32 %v5824_v47, %v5821_v21  ;;  %v5834_v48 = vrot.slane %v5832_v0, 4  ;;  %v5838_v12 = vshll.u32 %v15300_v39, 16 }
 0x644   : > { %5574 = vst.msk [vmem:[#allocation4 + $0x94] sm:$0xf] %vm5538_vm2, %v10905_v23  ;;  %v5051_v57 = vadd.f32 %v15163_v63, %v14976_v1  ;;  %5571 = vst.msk [vmem:[#allocation4 + $0x88] sm:$0xf] %vm5538_vm2, %v10902_v14  ;;  %v5870_v50 = vshll.u32 %v15284_v27, 16  ;;  %v5880_v22 = vshrl.u32 %v15267_v11, 16  ;;  %v15329_v7 = vcombine.low %v15321_v53, %v15311_v45 }
 0x645   : > { %5575 = vst.msk [vmem:[#allocation4 + $0x98] sm:$0x1] %vm5541_vm3, %v10906_v42  ;;  %5572 = vst.msk [vmem:[#allocation4 + $0x8c] sm:$0x1] %vm5541_vm3, %v10903_v13  ;;  %v5826_v33 = vrot.slane %v5825_v34, 4  ;;  %v5835_v0 = vor.u32 %v5834_v48, %v5830_v24  ;;  %v5840_v30 = vrot.slane %v5838_v12, 5  ;;  %v5043_v63 = vadd.f32 %v15167_v56, %v14970_v18 }
 0x646   : > { %17760 = vst [vmem:[#allocation15_spill] sm:$0xff] %v15329_v7  ;;  %vm5099_vm11 = vcmp.gt.f32.partialorder %v5051_v57, 0.0  ;;  %v5131_v38 = vmul.f32 0.2, %v5051_v57  ;;  %6589 = vrot.lane.b32.xlu0 %v15329_v7, %s12991_s27  ;;  %v5845_v10 = vrot.slane %v5843_v44, 4  ;;  %v5848_v21 = vrot.slane %v5846_v19, 5 }
 0x647   : > { %v5831_v1 = vsel %vm13377_vm7, %v5826_v33, %v5830_v24  ;;  %v5836_v58 = vrot.slane %v5835_v0, 4  ;;  %v5852_v47 = vshll.u32 %v15201_v8, 16  ;;  %v5858_v32 = vrot.slane %v5856_v28, 4 }
 0x648   : > { %v5163_v4 = vsel %vm5099_vm11, %v5051_v57, %v5131_v38  ;;  %vm5097_vm12 = vcmp.gt.f32.partialorder %v5043_v63, 0.0  ;;  %v5129_v42 = vmul.f32 0.2, %v5043_v63  ;;  %v5849_v54 = vor.u32 %v5848_v21, %v5845_v10 }
 0x649   : > { %v5240_v23 = vrot.slane %v5163_v4, 7  ;;  %v5841_v43 = vsel %vm13377_vm7, %v5836_v58, %v5840_v30  ;;  %v5854_v14 = vrot.slane %v5852_v47, 5  ;;  %v5862_v18 = vshll.u32 %v15337_v17, 16  ;;  %v15361_v58 = vld [vmem:[#allocation4 + $0x60] sm:$0xf] }
 0x64a   : > { %v5054_v56 = vadd.f32 %v15181_v55, %v14978_v49  ;;  %v15347_v44 = vcombine.low %v5831_v1, %v5841_v43  ;;  %v5891_v13 = vshrl.u32 %v15321_v53, 16  ;;  %v5161_v28 = vsel %vm5097_vm12, %v5043_v63, %v5129_v42  ;;  %v15356_v55 = vld [vmem:[#allocation4 + $0x64] sm:$0xf] }
 0x64b   : > { %v5310_v19 = vsel %vm708_vm1, 0.0, %v5240_v23  ;;  %v5237_v24 = vrot.slane %v5161_v28, 7  ;;  %v5850_v48 = vrot.slane %v5849_v54, 4  ;;  %v5859_v12 = vor.u32 %v5858_v32, %v5854_v14  ;;  %v15374_v54 = vld [vmem:[#allocation4 + $0x50] sm:$0x1] }
 0x64c   : > { %17761 = vst [vmem:[#allocation12_spill] sm:$0xff] %v15347_v44  ;;  %v10910_v34 = vpack.c.bf16 %v5310_v19, %v5310_v19  ;;  %6438 = vrot.lane.b32.xlu1 %v15347_v44, %s12991_s27  ;;  %v5894_v57 = vshll.u32 %v15321_v53, 16  ;;  %vm5100_vm13 = vcmp.gt.f32.partialorder %v5054_v56, 0.0  ;;  %v5132_v33 = vmul.f32 0.2, %v5054_v56 }
 0x64d   : > { %v5046_v49 = vadd.f32 %v15191_v62, %v14972_v6  ;;  %v5904_v0 = vshrl.u32 %v15311_v45, 16  ;;  %v5309_v30 = vsel %vm708_vm1, 0.0, %v5237_v24  ;;  %v5860_v38 = vrot.slane %v5859_v12, 4 }
 0x64e   : > { %5579 = vst.msk [vmem:[#allocation4 + $0xa8] sm:$0xf] %vm5538_vm2, %v10910_v34  ;;  %v5864_v1 = vrot.slane %v5862_v18, 5  ;;  %v10907_v63 = vpack.c.bf16 %v5309_v30, %v5309_v30  ;;  %v5164_v10 = vsel %vm5100_vm13, %v5054_v56, %v5132_v33  ;;  %v5855_v4 = vsel %vm13377_vm7, %v5850_v48, %v5854_v14 }
 0x64f   : > { %vm5098_vm14 = vcmp.gt.f32.partialorder %v5046_v49, 0.0  ;;  %v5130_v21 = vmul.f32 0.2, %v5046_v49  ;;  %v5241_v62 = vrot.slane %v5164_v10, 7  ;;  %v15369_v47 = vcombine.low %v15361_v58, %v15356_v55  ;;  %v15394_v10 = vld [vmem:[#allocation4 + $0x70] sm:$0xf] }
 0x650   : > { %v5865_v6 = vsel %vm13377_vm7, %v5860_v38, %v5864_v1  ;;  %5576 = vst.msk [vmem:[#allocation4 + $0x9c] sm:$0xf] %vm5538_vm2, %v10907_v63  ;;  %v5869_v43 = vrot.slane %v5867_v36, 4  ;;  %v5872_v18 = vrot.slane %v5870_v50, 5  ;;  %v5876_v28 = vshll.u32 %v15267_v11, 16 }
 0x651   : > { %17762 = vst [vmem:[#allocation16_spill] sm:$0xff] %v15369_v47  ;;  %v15372_v32 = vcombine.low %v5855_v4, %v5865_v6  ;;  %v5162_v42 = vsel %vm5098_vm14, %v5046_v49, %v5130_v21  ;;  %v5242_v14 = vsel %vm708_vm1, %v5240_v23, %v5241_v62  ;;  %v5326_v56 = vsel %vm708_vm1, %v5241_v62, 0.0  ;;  %6591 = vrot.lane.b32.xlu0 %v15369_v47, %s12991_s27  ;;  %v12902_v6 = vld [vmem:[%s17641_s10 + $0xc0] sm:$0xff]  }
 0x652   : > { %v5238_v19 = vrot.slane %v5162_v42, 7  ;;  %v10911_v34 = vpack.c.bf16 %v5242_v14, %v5242_v14  ;;  %v10912_v48 = vpack.c.bf16 %v5326_v56, %v5326_v56  ;;  %v5873_v12 = vor.u32 %v5872_v18, %v5869_v43  ;;  %v12903_v62 = vld [vmem:[%s17641_s10 + $0x80] sm:$0xff]   ;;  %v15409_v43 = vld [vmem:[#allocation4 + $0x6c] sm:$0xf]  ;;  %11825 = vmatprep.subr.bf16.mxu0 %v12902_v6 }
 0x653   : > { %17763 = vst [vmem:[#allocation17_spill] sm:$0xff] %v15372_v32  ;;  %6440 = vrot.lane.b32.xlu1 %v15372_v32, %s12991_s27  ;;  %v5882_v36 = vrot.slane %v5880_v22, 4  ;;  %v5878_v33 = vrot.slane %v5876_v28, 5  ;;  %v5886_v49 = vshll.u32 %v15374_v54, 16  ;;  %v5067_v63 = vadd.f32 %v15225_v59, %v14988_v37  ;;  %11826 = vmatpush3.bf16.msra.mxu0 %v12903_v62  ;;  %v15438_v62 = vld [vmem:[#allocation4 + $0x7c] sm:$0xf] }
 0x654   : > { %v5239_v50 = vsel %vm708_vm1, %v5237_v24, %v5238_v19  ;;  %v5325_v23 = vsel %vm708_vm1, %v5238_v19, 0.0  ;;  %5580 = vst.msk [vmem:[#allocation4 + $0xac] sm:$0xf] %vm5538_vm2, %v10911_v34  ;;  %v5874_v1 = vrot.slane %v5873_v12, 4  ;;  %v5915_v22 = vshrl.u32 %v15361_v58, 16 }
 0x655   : > { %5581 = vst.msk [vmem:[#allocation4 + $0xb0] sm:$0x1] %vm5541_vm3, %v10912_v48  ;;  %v10908_v30 = vpack.c.bf16 %v5239_v50, %v5239_v50  ;;  %v10909_v38 = vpack.c.bf16 %v5325_v23, %v5325_v23  ;;  %v5918_v24 = vshll.u32 %v15361_v58, 16  ;;  %v5928_v21 = vshrl.u32 %v15356_v55, 16  ;;  %v15417_v19 = vld [vmem:[#allocation4 + $0x5c] sm:$0x1] }
 0x656   : > { %v5883_v4 = vor.u32 %v5882_v36, %v5878_v33  ;;  %v5879_v37 = vsel %vm13377_vm7, %v5874_v1, %v5878_v33  ;;  %v5888_v59 = vrot.slane %v5886_v49, 5  ;;  %vm5103_vm15 = vcmp.gt.f32.partialorder %v5067_v63, 0.0 }
 0x657   : > { %5577 = vst.msk [vmem:[#allocation4 + $0xa0] sm:$0xf] %vm5538_vm2, %v10908_v30  ;;  %v5135_v42 = vmul.f32 0.2, %v5067_v63  ;;  %v15413_v14 = vcombine.low %v15409_v43, %v15394_v10  ;;  %v5059_v56 = vadd.f32 %v15235_v25, %v14982_v29  ;;  %v5893_v28 = vrot.slane %v5891_v13, 4 }
 0x658   : > { %5578 = vst.msk [vmem:[#allocation4 + $0xa4] sm:$0x1] %vm5541_vm3, %v10909_v38  ;;  %v5884_v18 = vrot.slane %v5883_v4, 4  ;;  %v5896_v48 = vrot.slane %v5894_v57, 5  ;;  %v5900_v12 = vshll.u32 %v15311_v45, 16  ;;  %v5906_v36 = vrot.slane %v5904_v0, 4 }
 0x659   : > { %17764 = vst [vmem:[#allocation19_spill] sm:$0xff] %v15413_v14  ;;  %v5167_v34 = vsel %vm5103_vm15, %v5067_v63, %v5135_v42  ;;  %6593 = vrot.lane.b32.xlu0 %v15413_v14, %s12991_s27  ;;  %vm5101_vm0 = vcmp.gt.f32.partialorder %v5059_v56, 0.0  ;;  %v5133_v29 = vmul.f32 0.2, %v5059_v56  ;;  %v5910_v49 = vshll.u32 %v15417_v19, 16 }
 0x65a   : > { %v5889_v50 = vsel %vm13377_vm7, %v5884_v18, %v5888_v59  ;;  %v5246_v23 = vrot.slane %v5167_v34, 7  ;;  %v5897_v13 = vor.u32 %v5896_v48, %v5893_v28  ;;  %v5902_v33 = vrot.slane %v5900_v12, 5 }
 0x65b   : > { %v15428_v25 = vcombine.low %v5879_v37, %v5889_v50  ;;  %v5165_v30 = vsel %vm5101_vm0, %v5059_v56, %v5133_v29  ;;  %v5070_v0 = vadd.f32 %v15245_v31, %v14990_v61  ;;  %v5062_v38 = vadd.f32 %v15258_v51, %v14984_v46  ;;  %v15449_v50 = vld [vmem:[#allocation4 + $0x78] sm:$0xf]  ;;  %v12904_v29 = vld [vmem:[%s17641_s10 + $0xc8] sm:$0xff]  }
 0x65c   : > { %v5312_v57 = vsel %vm708_vm1, 0.0, %v5246_v23  ;;  %v5243_v63 = vrot.slane %v5165_v30, 7  ;;  %v5898_v4 = vrot.slane %v5897_v13, 4  ;;  %v5907_v6 = vor.u32 %v5906_v36, %v5902_v33  ;;  %v12905_v13 = vld [vmem:[%s17641_s10 + $0x88] sm:$0xff]   ;;  %11827 = vmatprep.subr.bf16.mxu0 %v12904_v29 }
 0x65d   : > { %17765 = vst [vmem:[#allocation20_spill] sm:$0xff] %v15428_v25  ;;  %6442 = vrot.lane.b32.xlu1 %v15428_v25, %s12991_s27  ;;  %v10916_v1 = vpack.c.bf16 %v5312_v57, %v5312_v57  ;;  %v5939_v37 = vshrl.u32 %v15409_v43, 16  ;;  %vm5104_vm4 = vcmp.gt.f32.partialorder %v5070_v0, 0.0  ;;  %v5136_v59 = vmul.f32 0.2, %v5070_v0  ;;  %11828 = vmatpush3.bf16.msra.mxu0 %v12905_v13 }
 0x65e   : > { %vm5102_vm5 = vcmp.gt.f32.partialorder %v5062_v38, 0.0  ;;  %v5311_v61 = vsel %vm708_vm1, 0.0, %v5243_v63  ;;  %v5908_v31 = vrot.slane %v5907_v6, 4  ;;  %v5912_v46 = vrot.slane %v5910_v49, 5  ;;  %v15537_v3 = vld [vmem:[#allocation4 + $0xa0] sm:$0xf] }
 0x65f   : > { %5585 = vst.msk [vmem:[#allocation4 + $0xc0] sm:$0xf] %vm5538_vm2, %v10916_v1  ;;  %v5134_v51 = vmul.f32 0.2, %v5062_v38  ;;  %v5942_v42 = vshll.u32 %v15409_v43, 16  ;;  %v5952_v18 = vshrl.u32 %v15394_v10, 16  ;;  %v10913_v56 = vpack.c.bf16 %v5311_v61, %v5311_v61 }
 0x660   : > { %v5168_v28 = vsel %vm5104_vm4, %v5070_v0, %v5136_v59  ;;  %v5903_v34 = vsel %vm13377_vm7, %v5898_v4, %v5902_v33  ;;  %v5913_v48 = vsel %vm13377_vm7, %v5908_v31, %v5912_v46  ;;  %v15462_v57 = vcombine.low %v15449_v50, %v15438_v62  ;;  %v15468_v1 = vld [vmem:[#allocation4 + $0x68] sm:$0x1] }
 0x661   : > { %v5247_v12 = vrot.slane %v5168_v28, 7  ;;  %v5166_v36 = vsel %vm5102_vm5, %v5062_v38, %v5134_v51  ;;  %5582 = vst.msk [vmem:[#allocation4 + $0xb4] sm:$0xf] %vm5538_vm2, %v10913_v56  ;;  %v15458_v49 = vcombine.low %v5903_v34, %v5913_v48  ;;  %v5917_v30 = vrot.slane %v5915_v22, 4  ;;  %v12906_v28 = vld [vmem:[%s17641_s10 + $0xd0] sm:$0xff]  }
 0x662   : > { %v5244_v33 = vrot.slane %v5166_v36, 7  ;;  %17767 = vst [vmem:[#allocation22_spill] sm:$0xff] %v15462_v57  ;;  %v5920_v4 = vrot.slane %v5918_v24, 5  ;;  %v5924_v6 = vshll.u32 %v15356_v55, 16  ;;  %6595 = vrot.lane.b32.xlu0 %v15462_v57, %s12991_s27  ;;  %v5930_v34 = vrot.slane %v5928_v21, 4  ;;  %11829 = vmatprep.subr.bf16.mxu0 %v12906_v28  ;;  %v12908_v28 = vld [vmem:[%s17641_s10 + $0xd8] sm:$0xff]  }
 0x663   : > { %17766 = vst [vmem:[#allocation21_spill] sm:$0xff] %v15458_v49  ;;  %v5248_v0 = vsel %vm708_vm1, %v5246_v23, %v5247_v12  ;;  %v5328_v38 = vsel %vm708_vm1, %v5247_v12, 0.0  ;;  %6444 = vrot.lane.b32.xlu1 %v15458_v49, %s12991_s27  ;;  %v15479_v23 = vld [vmem:[#allocation4 + $0x88] sm:$0xf]  ;;  %v5934_v48 = vshll.u32 %v15468_v1, 16  ;;  %v5963_v36 = vshrl.u32 %v15449_v50, 16 }
 0x664   : > { %v10917_v59 = vpack.c.bf16 %v5248_v0, %v5248_v0  ;;  %v10918_v61 = vpack.c.bf16 %v5328_v38, %v5328_v38  ;;  %v5245_v31 = vsel %vm708_vm1, %v5243_v63, %v5244_v33  ;;  %v5327_v22 = vsel %vm708_vm1, %v5244_v33, 0.0  ;;  %v12907_v63 = vld [vmem:[%s17641_s10 + $0x90] sm:$0xff]   ;;  %v15492_v12 = vld [vmem:[#allocation4 + $0x84] sm:$0xf]  ;;  %v15501_v33 = vld [vmem:[#allocation4 + $0x74] sm:$0x1] }
 0x665   : > { %v10914_v46 = vpack.c.bf16 %v5245_v31, %v5245_v31  ;;  %v10915_v51 = vpack.c.bf16 %v5327_v22, %v5327_v22  ;;  %v5921_v24 = vor.u32 %v5920_v4, %v5917_v30  ;;  %v5926_v56 = vrot.slane %v5924_v6, 5  ;;  %v15505_v6 = vld [vmem:[#allocation4 + $0x94] sm:$0xf]  ;;  %11830 = vmatpush3.bf16.msra.mxu0 %v12907_v63 }
 0x666   : > { %5586 = vst.msk [vmem:[#allocation4 + $0xc4] sm:$0xf] %vm5538_vm2, %v10917_v59  ;;  %v15499_v13 = vcombine.low %v15492_v12, %v15479_v23  ;;  %v5941_v30 = vrot.slane %v5939_v37, 4  ;;  %v5966_v21 = vshll.u32 %v15449_v50, 16  ;;  %v5944_v38 = vrot.slane %v5942_v42, 5  ;;  %11831 = vmatprep.subr.bf16.mxu0 %v12908_v28 }
 0x667   : > { %5587 = vst.msk [vmem:[#allocation4 + $0xc8] sm:$0x1] %vm5541_vm3, %v10918_v61  ;;  %5584 = vst.msk [vmem:[#allocation4 + $0xbc] sm:$0x1] %vm5541_vm3, %v10915_v51  ;;  %v5922_v29 = vrot.slane %v5921_v24, 4  ;;  %v5931_v0 = vor.u32 %v5930_v34, %v5926_v56  ;;  %v5948_v4 = vshll.u32 %v15394_v10, 16 }
 0x668   : > { %5583 = vst.msk [vmem:[#allocation4 + $0xb8] sm:$0xf] %vm5538_vm2, %v10914_v46  ;;  %17768 = vst [vmem:[#allocation23_spill] sm:$0xff] %v15499_v13  ;;  %v5976_v59 = vshrl.u32 %v15438_v62, 16  ;;  %v5936_v61 = vrot.slane %v5934_v48, 5  ;;  %v5987_v31 = vshrl.u32 %v15492_v12, 16  ;;  %6597 = vrot.lane.b32.xlu0 %v15499_v13, %s12991_s27  ;;  %v5945_v51 = vor.u32 %v5944_v38, %v5941_v30 }
 0x669   : > { %v5954_v22 = vrot.slane %v5952_v18, 4  ;;  %v15511_v46 = vld [vmem:[#allocation4 + $0x90] sm:$0xf]  ;;  %v5932_v37 = vrot.slane %v5931_v0, 4  ;;  %v5950_v24 = vrot.slane %v5948_v4, 5  ;;  %v5958_v42 = vshll.u32 %v15501_v33, 16 }
 0x66a   : > { %v12909_v34 = vld [vmem:[%s17641_s10 + $0x98] sm:$0xff]   ;;  %v5927_v48 = vsel %vm13377_vm7, %v5922_v29, %v5926_v56  ;;  %v5990_v18 = vshll.u32 %v15492_v12, 16  ;;  %v15525_v63 = vcombine.low %v15511_v46, %v15505_v6  ;;  %v15527_v30 = vld [vmem:[#allocation4 + $0x80] sm:$0x1]  ;;  %v5965_v0 = vrot.slane %v5963_v36, 4 }
 0x66b   : > { %v5937_v38 = vsel %vm13377_vm7, %v5932_v37, %v5936_v61  ;;  %v5946_v4 = vrot.slane %v5945_v51, 4  ;;  %v5955_v49 = vor.u32 %v5954_v22, %v5950_v24  ;;  %v5968_v25 = vrot.slane %v5966_v21, 5  ;;  %11832 = vmatpush3.bf16.msra.mxu0 %v12909_v34  ;;  %v15554_v34 = vld [vmem:[#allocation4 + $0x8c] sm:$0x1]  ;;  %v15571_v13 = vld [vmem:[#allocation4 + $0xa8] sm:$0xf] }
 0x66c   : > { %17769 = vst [vmem:[#allocation24_spill] sm:$0xff] %v15525_v63  ;;  %v15531_v32 = vcombine.low %v5927_v48, %v5937_v38  ;;  %v6000_v56 = vshrl.u32 %v15479_v23, 16  ;;  %6599 = vrot.lane.b32.xlu0 %v15525_v63, %s12991_s27  ;;  %v5972_v29 = vshll.u32 %v15438_v62, 16  ;;  %v5978_v44 = vrot.slane %v5976_v59, 4  ;;  %v15546_v59 = vld [vmem:[#allocation4 + $0x9c] sm:$0xf] }
 0x66d   : > { %v5956_v36 = vrot.slane %v5955_v49, 4  ;;  %v5960_v60 = vrot.slane %v5958_v42, 5  ;;  %v5969_v61 = vor.u32 %v5968_v25, %v5965_v0  ;;  %v5982_v22 = vshll.u32 %v15527_v30, 16  ;;  %v12911_v0 = vld [vmem:[%s17641_s10 + $0xa0] sm:$0xff]  }
 0x66e   : > { %17770 = vst [vmem:[#allocation25_spill] sm:$0xff] %v15531_v32  ;;  %6446 = vrot.lane.b32.xlu1 %v15531_v32, %s12991_s27  ;;  %v5951_v21 = vsel %vm13377_vm7, %v5946_v4, %v5950_v24  ;;  %v6011_v37 = vshrl.u32 %v15511_v46, 16  ;;  %v6014_v51 = vshll.u32 %v15511_v46, 16  ;;  %v5974_v28 = vrot.slane %v5972_v29, 5  ;;  %v12910_v24 = vld [vmem:[%s17641_s10 + $0xe0] sm:$0xff]  }
 0x66f   : > { %v5961_v49 = vsel %vm13377_vm7, %v5956_v36, %v5960_v60  ;;  %v5970_v42 = vrot.slane %v5969_v61, 4  ;;  %v15552_v25 = vcombine.low %v15546_v59, %v15537_v3  ;;  %v5989_v48 = vrot.slane %v5987_v31, 4  ;;  %v15565_v36 = vld [vmem:[#allocation4 + $0xac] sm:$0xf]  ;;  %11833 = vmatprep.subr.bf16.mxu0 %v12910_v24  ;;  %v15599_v47 = vld [vmem:[#allocation4 + $0xb8] sm:$0xf] }
 0x670   : > { %v15562_v38 = vcombine.low %v5951_v21, %v5961_v49  ;;  %v5979_v4 = vor.u32 %v5978_v44, %v5974_v28  ;;  %v5992_v60 = vrot.slane %v5990_v18, 5  ;;  %v5996_v29 = vshll.u32 %v15479_v23, 16  ;;  %11834 = vmatpush3.bf16.msra.mxu0 %v12911_v0 }
 0x671   : > { %17771 = vst [vmem:[#allocation26_spill] sm:$0xff] %v15552_v25  ;;  %v6024_v61 = vshrl.u32 %v15505_v6, 16  ;;  %v5984_v32 = vrot.slane %v5982_v22, 5  ;;  %v6035_v31 = vshrl.u32 %v15546_v59, 16  ;;  %6601 = vrot.lane.b32.xlu0 %v15552_v25, %s12991_s27  ;;  %v6002_v63 = vrot.slane %v6000_v56, 4  ;;  %v12912_v22 = vld [vmem:[%s17641_s10 + $0xe8] sm:$0xff]  }
 0x672   : > { %17772 = vst [vmem:[#allocation27_spill] sm:$0xff] %v15562_v38  ;;  %6448 = vrot.lane.b32.xlu1 %v15562_v38, %s12991_s27  ;;  %v5980_v44 = vrot.slane %v5979_v4, 4  ;;  %v5993_v18 = vor.u32 %v5992_v60, %v5989_v48  ;;  %v5998_v21 = vrot.slane %v5996_v29, 5  ;;  %v6006_v49 = vshll.u32 %v15554_v34, 16  ;;  %v12913_v56 = vld [vmem:[%s17641_s10 + $0xa8] sm:$0xff]   ;;  %11835 = vmatprep.subr.bf16.mxu0 %v12912_v22 }
 0x673   : > { %v5975_v24 = vsel %vm13377_vm7, %v5970_v42, %v5974_v28  ;;  %v6038_v25 = vshll.u32 %v15546_v59, 16  ;;  %v15587_v48 = vcombine.low %v15571_v13, %v15565_v36  ;;  %v15589_v4 = vld [vmem:[#allocation4 + $0x98] sm:$0x1]  ;;  %v6013_v0 = vrot.slane %v6011_v37, 4 }
 0x674   : > { %v5985_v60 = vsel %vm13377_vm7, %v5980_v44, %v5984_v32  ;;  %v5994_v29 = vrot.slane %v5993_v18, 4  ;;  %v6003_v38 = vor.u32 %v6002_v63, %v5998_v21  ;;  %v6016_v57 = vrot.slane %v6014_v51, 5  ;;  %v15602_v63 = vld [vmem:[#allocation4 + $0xb4] sm:$0xf]  ;;  %11836 = vmatpush3.bf16.msra.mxu0 %v12913_v56  ;;  %v15622_v56 = vld [vmem:[#allocation4 + $0xa4] sm:$0x1] }
 0x675   : > { %17773 = vst [vmem:[#allocation28_spill] sm:$0xff] %v15587_v48  ;;  %v15593_v15 = vcombine.low %v5975_v24, %v5985_v60  ;;  %v6048_v28 = vshrl.u32 %v15537_v3, 16  ;;  %6603 = vrot.lane.b32.xlu0 %v15587_v48, %s12991_s27  ;;  %v6020_v42 = vshll.u32 %v15505_v6, 16  ;;  %v6026_v14 = vrot.slane %v6024_v61, 4  ;;  %17775 = vst [vmem:[#allocation30_spill] sm:$0xff] %v15602_v63 }
 0x676   : > { %v6004_v37 = vrot.slane %v6003_v38, 4  ;;  %v6008_v7 = vrot.slane %v6006_v49, 5  ;;  %v6017_v40 = vor.u32 %v6016_v57, %v6013_v0  ;;  %v6030_v32 = vshll.u32 %v15589_v4, 16  ;;  %v12914_v57 = vld [vmem:[%s17641_s10 + $0xf0] sm:$0xff]  }
 0x677   : > { %17774 = vst [vmem:[#allocation29_spill] sm:$0xff] %v15593_v15  ;;  %6450 = vrot.lane.b32.xlu1 %v15593_v15, %s12991_s27  ;;  %v5999_v51 = vsel %vm13377_vm7, %v5994_v29, %v5998_v21  ;;  %v6059_v44 = vshrl.u32 %v15571_v13, 16  ;;  %v6062_v61 = vshll.u32 %v15571_v13, 16  ;;  %v6022_v18 = vrot.slane %v6020_v42, 5  ;;  %v12915_v38 = vld [vmem:[%s17641_s10 + $0xb0] sm:$0xff]   ;;  %11837 = vmatprep.subr.bf16.mxu0 %v12914_v57 }
 0x678   : > { %v6009_v49 = vsel %vm13377_vm7, %v6004_v37, %v6008_v7  ;;  %v6018_v22 = vrot.slane %v6017_v40, 4  ;;  %v15620_v21 = vcombine.low %v15602_v63, %v15599_v47  ;;  %v6037_v24 = vrot.slane %v6035_v31, 4  ;;  %v15627_v15 = vld [vmem:[#allocation4 + $0xc4] sm:$0xf]  ;;  %11838 = vmatpush3.bf16.msra.mxu0 %v12915_v38 }
 0x679   : > { %v15624_v0 = vcombine.low %v5999_v51, %v6009_v49  ;;  %v6027_v60 = vor.u32 %v6026_v14, %v6022_v18  ;;  %v6040_v29 = vrot.slane %v6038_v25, 5  ;;  %v6044_v42 = vshll.u32 %v15537_v3, 16  ;;  %v15636_v49 = vld [vmem:[#allocation4 + $0xc0] sm:$0xf] }
 0x67a   : > { %17776 = vst [vmem:[#allocation31_spill] sm:$0xff] %v15620_v21  ;;  %v6072_v48 = vshrl.u32 %v15565_v36, 16  ;;  %v6032_v7 = vrot.slane %v6030_v32, 5  ;;  %v6083_v40 = vshrl.u32 %v15602_v63, 16  ;;  %6605 = vrot.lane.b32.xlu0 %v15620_v21, %s12991_s27  ;;  %v6050_v37 = vrot.slane %v6048_v28, 4 }
 0x67b   : > { %17777 = vst [vmem:[#allocation32_spill] sm:$0xff] %v15624_v0  ;;  %6452 = vrot.lane.b32.xlu1 %v15624_v0, %s12991_s27  ;;  %v6028_v14 = vrot.slane %v6027_v60, 4  ;;  %v6041_v25 = vor.u32 %v6040_v29, %v6037_v24  ;;  %v6046_v31 = vrot.slane %v6044_v42, 5  ;;  %v6054_v51 = vshll.u32 %v15622_v56, 16  ;;  %v15645_v28 = vld [vmem:[#allocation4 + $0xb0] sm:$0x1] }
 0x67c   : > { %v6023_v32 = vsel %vm13377_vm7, %v6018_v22, %v6022_v18  ;;  %v6086_v57 = vshll.u32 %v15602_v63, 16  ;;  %v15643_v21 = vcombine.low %v15636_v49, %v15627_v15  ;;  %v6061_v38 = vrot.slane %v6059_v44, 4  ;;  %v12916_v24 = vld [vmem:[%s17641_s10 + $0xf8] sm:$0xff]  }
 0x67d   : > { %v12917_v60 = vld [vmem:[%s17641_s10 + $0xb8] sm:$0xff]   ;;  %v6033_v18 = vsel %vm13377_vm7, %v6028_v14, %v6032_v7  ;;  %v6042_v22 = vrot.slane %v6041_v25, 4  ;;  %v6051_v29 = vor.u32 %v6050_v37, %v6046_v31  ;;  %v6064_v42 = vrot.slane %v6062_v61, 5  ;;  %11839 = vmatprep.subr.bf16.mxu0 %v12916_v24  ;;  %v12954_v37 = vld [vmem:[#allocation4 + $0xc] sm:$0xf] }
 0x67e   : > { %17778 = vst [vmem:[#allocation33_spill] sm:$0xff] %v15643_v21  ;;  %v15655_v0 = vcombine.low %v6023_v32, %v6033_v18  ;;  %v6096_v52 = vshrl.u32 %v15599_v47, 16  ;;  %6607 = vrot.lane.b32.xlu0 %v15643_v21, %s12991_s27  ;;  %v6068_v44 = vshll.u32 %v15565_v36, 16  ;;  %v6074_v41 = vrot.slane %v6072_v48, 4  ;;  %11840 = vmatpush3.bf16.msra.mxu0 %v12917_v60  ;;  %v12955_v25 = vld [vmem:[#allocation4 + $0x10] sm:$0xf] }
 0x67f   : > { %v6052_v16 = vrot.slane %v6051_v29, 4  ;;  %v6056_v20 = vrot.slane %v6054_v51, 5  ;;  %v6065_v2 = vor.u32 %v6064_v42, %v6061_v38  ;;  %v6078_v63 = vshll.u32 %v15645_v28, 16  ;;  %v12956_v24 = vld [vmem:[#allocation4 + $0x14] sm:$0x1] }
 0x680   : > { %17779 = vst [vmem:[#allocation34_spill] sm:$0xff] %v15655_v0  ;;  %6454 = vrot.lane.b32.xlu1 %v15655_v0, %s12991_s27  ;;  %v6047_v61 = vsel %vm13377_vm7, %v6042_v22, %v6046_v31  ;;  %v6070_v7 = vrot.slane %v6068_v44, 5  ;;  %v10542_v14 = vrot.slane %v12954_v37, 9  ;;  %v6163_v32 = vrot.slane %v12955_v25, 5  ;;  %v15668_v38 = vld [vmem:[#allocation4 + $0xbc] sm:$0x1] }
 0x681   : > { %v6057_v48 = vsel %vm13377_vm7, %v6052_v16, %v6056_v20  ;;  %v6166_v51 = vrot.slane %v12956_v24, 5  ;;  %v6085_v18 = vrot.slane %v6083_v40, 4  ;;  %v6088_v60 = vrot.slane %v6086_v57, 5 }
 0x682   : > { %v15670_v29 = vcombine.low %v6047_v61, %v6057_v48  ;;  %v6066_v42 = vrot.slane %v6065_v2, 4  ;;  %v6075_v21 = vor.u32 %v6074_v41, %v6070_v7  ;;  %v6165_v0 = vrot.slane %v6163_v32, 4  ;;  %v12957_v61 = vld [vmem:[#allocation4 + $0x28] sm:$0xf] }
 0x683   : > { %v6080_v31 = vrot.slane %v6078_v63, 5  ;;  %v6089_v22 = vor.u32 %v6088_v60, %v6085_v18  ;;  %v6092_v44 = vshll.u32 %v15599_v47, 16  ;;  %v6098_v37 = vrot.slane %v6096_v52, 4  ;;  %v12959_v60 = vld [vmem:[#allocation4 + $0x1c] sm:$0xf] }
 0x684   : > { %6456 = vrot.lane.b32.xlu1 %v15670_v29, %s12991_s27  ;;  %v6076_v20 = vrot.slane %v6075_v21, 4  ;;  %v6164_v16 = vsel %vm13362_vm6, %v10542_v14, %v6163_v32  ;;  %v6167_v40 = vsel %vm13362_vm6, %v6165_v0, %v6166_v51  ;;  %v6102_v57 = vshll.u32 %v15668_v38, 16  ;;  %v12958_v14 = vld [vmem:[#allocation4 + $0x24] sm:$0xf] }
 0x685   : > { %v15680_v2 = vcombine.low %v6164_v16, %v6167_v40  ;;  %v6090_v41 = vrot.slane %v6089_v22, 4  ;;  %v6094_v63 = vrot.slane %v6092_v44, 5  ;;  %v6177_v25 = vrot.slane %v12957_v61, 5  ;;  %v12960_v16 = vld [vmem:[#allocation4 + $0x20] sm:$0x1] }
 0x686   : > { %v6071_v52 = vsel %vm13377_vm7, %v6066_v42, %v6070_v7  ;;  %v6081_v21 = vsel %vm13377_vm7, %v6076_v20, %v6080_v31  ;;  %v10544_v32 = vrot.slane %v12958_v14, 9  ;;  %v6104_v24 = vrot.slane %v6102_v57, 5  ;;  %v12961_v40 = vld [vmem:[#allocation4 + $0x34] sm:$0xf] }
 0x687   : > { %v15686_v48 = vcombine.low %v6071_v52, %v6081_v21  ;;  %6679 = vrot.lane.b32.xlu0 %v15680_v2, %s12991_s27  ;;  %v6099_v0 = vor.u32 %v6098_v37, %v6094_v63  ;;  %v6179_v51 = vrot.slane %v6177_v25, 4  ;;  %v6180_v18 = vrot.slane %v15231_v26, 5 }
 0x688   : > { %v6170_v22 = vrot.slane %v12959_v60, 5  ;;  %v6095_v7 = vsel %vm13377_vm7, %v6090_v41, %v6094_v63  ;;  %v6178_v31 = vsel %vm13362_vm6, %v10544_v32, %v6177_v25  ;;  %v6191_v44 = vrot.slane %v15201_v8, 5  ;;  %v12962_v25 = vld [vmem:[#allocation4 + $0x18] sm:$0xf] }
 0x689   : > { %6458 = vrot.lane.b32.xlu1 %v15686_v48, %s12991_s27  ;;  %v6100_v42 = vrot.slane %v6099_v0, 4  ;;  %v6181_v37 = vsel %vm13362_vm6, %v6179_v51, %v6180_v18  ;;  %v6173_v26 = vrot.slane %v12960_v16, 5  ;;  %v6184_v57 = vrot.slane %v12961_v40, 5 }
 0x68a   : > { %v6172_v20 = vrot.slane %v6170_v22, 4  ;;  %v15702_v52 = vcombine.low %v6178_v31, %v6181_v37  ;;  %v6193_v41 = vrot.slane %v6191_v44, 4  ;;  %v6194_v63 = vrot.slane %v15337_v17, 5 }
 0x68b   : > { %v6105_v61 = vsel %vm13377_vm7, %v6100_v42, %v6104_v24  ;;  %v10543_v8 = vrot.slane %v12962_v25, 9  ;;  %v10546_v0 = vrot.slane %v15203_v35, 9  ;;  %v6267_v14 = vshrl.u32 %v15636_v49, 16 }
 0x68c   : > { %v15705_v21 = vcombine.low %v6095_v7, %v6105_v61  ;;  %6683 = vrot.lane.b32.xlu0 %v15702_v52, %s12991_s27  ;;  %v6174_v32 = vsel %vm13362_vm6, %v6172_v20, %v6173_v26  ;;  %v6195_v24 = vsel %vm13362_vm6, %v6193_v41, %v6194_v63  ;;  %v6186_v51 = vrot.slane %v6184_v57, 4 }
 0x68d   : > { %v6270_v17 = vshll.u32 %v15636_v49, 16  ;;  %v6171_v35 = vsel %vm13362_vm6, %v10543_v8, %v6170_v22  ;;  %v6192_v18 = vsel %vm13362_vm6, %v10546_v0, %v6191_v44  ;;  %v6205_v60 = vrot.slane %v15311_v45, 5  ;;  %v12963_v44 = vld [vmem:[#allocation4 + $0x30] sm:$0xf] }
 0x68e   : > { %6460 = vrot.lane.b32.xlu1 %v15705_v21, %s12991_s27  ;;  %v15723_v7 = vcombine.low %v6192_v18, %v6195_v24  ;;  %v6187_v42 = vrot.slane %v15300_v39, 5  ;;  %v10548_v31 = vrot.slane %v15321_v53, 9  ;;  %v6198_v37 = vrot.slane %v15267_v11, 5 }
 0x68f   : > { %v15728_v20 = vcombine.low %v6171_v35, %v6174_v32  ;;  %v6207_v16 = vrot.slane %v6205_v60, 4  ;;  %v6208_v26 = vrot.slane %v15417_v19, 5  ;;  %v6219_v22 = vrot.slane %v15394_v10, 5 }
 0x690   : > { %6687 = vrot.lane.b32.xlu0 %v15723_v7, %s12991_s27  ;;  %v10545_v45 = vrot.slane %v12963_v44, 9  ;;  %v6188_v40 = vsel %vm13362_vm6, %v6186_v51, %v6187_v42  ;;  %v6206_v39 = vsel %vm13362_vm6, %v10548_v31, %v6205_v60  ;;  %v6200_v53 = vrot.slane %v6198_v37, 4 }
 0x691   : > { %v6209_v11 = vsel %vm13362_vm6, %v6207_v16, %v6208_v26  ;;  %v6221_v19 = vrot.slane %v6219_v22, 4  ;;  %v6222_v10 = vrot.slane %v15501_v33, 5  ;;  %v6212_v61 = vrot.slane %v15356_v55, 5 }
 0x692   : > { %6681 = vrot.lane.b32.xlu1 %v15728_v20, %s12991_s27  ;;  %v6185_v41 = vsel %vm13362_vm6, %v10545_v45, %v6184_v57  ;;  %v15746_v63 = vcombine.low %v6206_v39, %v6209_v11  ;;  %v10547_v25 = vrot.slane %v15284_v27, 9  ;;  %v6201_v8 = vrot.slane %v15374_v54, 5 }
 0x693   : > { %v15750_v0 = vcombine.low %v6185_v41, %v6188_v40  ;;  %v10550_v32 = vrot.slane %v15409_v43, 9  ;;  %v6223_v24 = vsel %vm13362_vm6, %v6221_v19, %v6222_v10  ;;  %v6214_v51 = vrot.slane %v6212_v61, 4 }
 0x694   : > { %v6280_v33 = vshrl.u32 %v15627_v15, 16  ;;  %6691 = vrot.lane.b32.xlu0 %v15746_v63, %s12991_s27  ;;  %v6199_v55 = vsel %vm13362_vm6, %v10547_v25, %v6198_v37  ;;  %v6202_v27 = vsel %vm13362_vm6, %v6200_v53, %v6201_v8  ;;  %v6233_v54 = vrot.slane %v15479_v23, 5  ;;  %v15801_v53 = vld [vmem:[#allocation4 + $0xc8] sm:$0x1] }
 0x695   : > { %v6220_v43 = vsel %vm13362_vm6, %v10550_v32, %v6219_v22  ;;  %v10549_v57 = vrot.slane %v15361_v58, 9  ;;  %v6215_v35 = vrot.slane %v15468_v1, 5  ;;  %v6226_v18 = vrot.slane %v15438_v62, 5 }
 0x696   : > { %6685 = vrot.lane.b32.xlu1 %v15750_v0, %s12991_s27  ;;  %v15770_v60 = vcombine.low %v6220_v43, %v6223_v24  ;;  %v6235_v42 = vrot.slane %v6233_v54, 4  ;;  %v6236_v31 = vrot.slane %v15554_v34, 5  ;;  %v6247_v37 = vrot.slane %v15537_v3, 5 }
 0x697   : > { %v15774_v23 = vcombine.low %v6199_v55, %v6202_v27  ;;  %v6216_v16 = vsel %vm13362_vm6, %v6214_v51, %v6215_v35  ;;  %v10552_v26 = vrot.slane %v15492_v12, 9  ;;  %v6228_v22 = vrot.slane %v6226_v18, 4  ;;  %v6578_v55 = vpop.permute.xlu0 %6577 }
 0x698   : > { %6695 = vrot.lane.b32.xlu0 %v15770_v60, %s12991_s27  ;;  %v6237_v58 = vsel %vm13362_vm6, %v6235_v42, %v6236_v31  ;;  %v6249_v62 = vrot.slane %v6247_v37, 4  ;;  %v6250_v1 = vrot.slane %v15622_v56, 5  ;;  %v6240_v34 = vrot.slane %v15505_v6, 5  ;;  %v6580_v31 = vpop.permute.xlu1 %6579 }
 0x699   : > { %v6213_v3 = vsel %vm13362_vm6, %v10549_v57, %v6212_v61  ;;  %v6234_v12 = vsel %vm13362_vm6, %v10552_v26, %v6233_v54  ;;  %v6229_v44 = vrot.slane %v15527_v30, 5  ;;  %v6269_v45 = vrot.slane %v6267_v14, 4  ;;  %v12964_v26 = vld [vmem:[#allocation4] sm:$0xf] }
 0x69a   : > { %6689 = vrot.lane.b32.xlu1 %v15774_v23, %s12991_s27  ;;  %v15794_v40 = vcombine.low %v6213_v3, %v6216_v16  ;;  %v15796_v39 = vcombine.low %v6234_v12, %v6237_v58  ;;  %v10554_v6 = vrot.slane %v15546_v59, 9  ;;  %v6251_v56 = vsel %vm13362_vm6, %v6249_v62, %v6250_v1  ;;  %v12965_v62 = vld [vmem:[#allocation4 + $0x4] sm:$0xf] }
 0x69b   : > { %v6242_v11 = vrot.slane %v6240_v34, 4  ;;  %v6272_v19 = vrot.slane %v6270_v17, 5  ;;  %v6276_v30 = vshll.u32 %v15627_v15, 16  ;;  %v6282_v10 = vrot.slane %v6280_v33, 4 }
 0x69c   : > { %6699 = vrot.lane.b32.xlu0 %v15796_v39, %s12991_s27  ;;  %v10551_v14 = vrot.slane %v15449_v50, 9  ;;  %v6230_v59 = vsel %vm13362_vm6, %v6228_v22, %v6229_v44  ;;  %v6248_v61 = vsel %vm13362_vm6, %v10554_v6, %v6247_v37  ;;  %v6254_v41 = vrot.slane %v15565_v36, 5  ;;  %v15851_v6 = vld [vmem:[#allocation4 + $0xd0] sm:$0xf] }
 0x69d   : > { %v6243_v17 = vrot.slane %v15589_v4, 5  ;;  %v6273_v25 = vor.u32 %v6272_v19, %v6269_v45  ;;  %v6278_v8 = vrot.slane %v6276_v30, 5  ;;  %v6286_v32 = vshll.u32 %v15801_v53, 16  ;;  %v6431_v45 = vpop.permute.xlu0 %6430 }
 0x69e   : > { %6693 = vrot.lane.b32.xlu1 %v15794_v40, %s12991_s27  ;;  %v6227_v50 = vsel %vm13362_vm6, %v10551_v14, %v6226_v18  ;;  %v15820_v24 = vcombine.low %v6248_v61, %v6251_v56  ;;  %v10553_v51 = vrot.slane %v15511_v46, 9  ;;  %v6256_v33 = vrot.slane %v6254_v41, 4  ;;  %v17780_v56 = vld [vmem:[#allocation30_spill] sm:$0xff]  ;;  %v12918_v61 = vld [vmem:[%s17641_s10 + $0x100] sm:$0xff]  }
 0x69f   : > { %v15823_v27 = vcombine.low %v6227_v50, %v6230_v59  ;;  %v6244_v36 = vsel %vm13362_vm6, %v6242_v11, %v6243_v17  ;;  %v6274_v54 = vrot.slane %v6273_v25, 4  ;;  %v6283_v4 = vor.u32 %v6282_v10, %v6278_v8  ;;  %v15858_v59 = vld [vmem:[#allocation4 + $0xd4] sm:$0x1]  ;;  %12383 = vmatprep.subr.bf16.mxu1 %v12918_v61 }
 0x6a0   : > { %6703 = vrot.lane.b32.xlu0 %v15820_v24, %s12991_s27  ;;  %v6257_v43 = vrot.slane %v15645_v28, 5  ;;  %v6261_v57 = vrot.slane %v15599_v47, 5  ;;  %v6241_v46 = vsel %vm13362_vm6, %v10553_v51, %v6240_v34  ;;  %v6288_v18 = vrot.slane %v6286_v32, 5  ;;  %v12966_v34 = vld [vmem:[#allocation4 + $0x8] sm:$0x1] }
 0x6a1   : > { %v6284_v35 = vrot.slane %v6283_v4, 4  ;;  %v10555_v42 = vrot.slane %v15571_v13, 9  ;;  %v15836_v37 = vcombine.low %v6241_v46, %v6244_v36  ;;  %v6295_v28 = vrot.slane %v15627_v15, 5  ;;  %v15849_v15 = vld [vmem:[#allocation4 + $0xcc] sm:$0xf] }
 0x6a2   : > { %6697 = vrot.lane.b32.xlu1 %v15823_v27, %s12991_s27  ;;  %v6258_v16 = vsel %vm13362_vm6, %v6256_v33, %v6257_v43  ;;  %v10541_v47 = vrot.slane %v12964_v26, 9  ;;  %v6279_v22 = vsel %vm13377_vm7, %v6274_v54, %v6278_v8  ;;  %v6156_v1 = vrot.slane %v12965_v62, 5  ;;  %v6433_v14 = vpop.permute.xlu1 %6432 }
 0x6a3   : > { %v6289_v58 = vsel %vm13377_vm7, %v6284_v35, %v6288_v18  ;;  %v6159_v13 = vrot.slane %v12966_v34, 5  ;;  %v6255_v12 = vsel %vm13362_vm6, %v10555_v42, %v6254_v41  ;;  %v6263_v44 = vrot.slane %v6261_v57, 4 }
 0x6a4   : > { %v15845_v3 = vcombine.low %v6279_v22, %v6289_v58  ;;  %v10556_v11 = vrot.slane %v17780_v56, 9  ;;  %v6157_v19 = vsel %vm13362_vm6, %v10541_v47, %v6156_v1  ;;  %v6158_v30 = vrot.slane %v6156_v1, 4 }
 0x6a5   : > { %v10559_v10 = vcombine.low %v12964_v26, %v12965_v62  ;;  %v15865_v41 = vcombine.low %v6255_v12, %v6258_v16  ;;  %v6264_v17 = vrot.slane %v15668_v38, 5  ;;  %v6297_v25 = vrot.slane %v6295_v28, 4  ;;  %v6582_v16 = vpop.permute.xlu0 %6581 }
 0x6a6   : > { %6701 = vrot.lane.b32.xlu1 %v15836_v37, %s12991_s27  ;;  %6781 = vrot.lane.b32.xlu0 %v15845_v3, %s12991_s27  ;;  %v6298_v8 = vrot.slane %v15801_v53, 5  ;;  %v6160_v32 = vsel %vm13362_vm6, %v6158_v30, %v6159_v13  ;;  %v6301_v50 = vshrl.u32 %v15849_v15, 16  ;;  %v6304_v51 = vshll.u32 %v15849_v15, 16  ;;  %v17781_v13 = vld [vmem:[#allocation6_spill] sm:$0xff]  ;;  %v17782_v30 = vld [vmem:[#allocation9_spill] sm:$0xff] }
 0x6a7   : > { %v6310_v33 = vshll.u32 %v15851_v6, 16  ;;  %v6265_v36 = vsel %vm13362_vm6, %v6263_v44, %v6264_v17  ;;  %v10591_v54 = vcombine.low %v6157_v19, %v6160_v32  ;;  %v6314_v4 = vshrl.u32 %v15851_v6, 16  ;;  %v12921_v32 = vld [vmem:[%s17641_s10 + $0x118] sm:$0xff]  }
 0x6a8   : > { %v6320_v38 = vshll.u32 %v15858_v59, 16  ;;  %v6464_v53 = vsel %vm2169_vm8, %v10559_v10, %v6431_v45  ;;  %v6303_v43 = vrot.slane %v6301_v50, 4  ;;  %v6306_v46 = vrot.slane %v6304_v51, 5 }
 0x6a9   : > { %v6312_v35 = vrot.slane %v6310_v33, 5  ;;  %v6262_v18 = vsel %vm13362_vm6, %v10556_v11, %v6261_v57  ;;  %v6611_v42 = vsel %vm2169_vm8, %v10591_v54, %v6578_v55  ;;  %v6316_v26 = vrot.slane %v6314_v4, 4  ;;  %v17783_v33 = vld [vmem:[#allocation10_spill] sm:$0xff] }
 0x6aa   : > { %6705 = vrot.lane.b32.xlu1 %v15865_v41, %s12991_s27  ;;  %v15884_v47 = vcombine.low %v6262_v18, %v6265_v36  ;;  %v10557_v22 = vrot.slane %v15636_v49, 9  ;;  %v6299_v58 = vsel %vm13362_vm6, %v6297_v25, %v6298_v8  ;;  %7084 = vmatprep.mubr.bf16.mxu1 %v6611_v42  ;;  %v6307_v1 = vor.u32 %v6306_v46, %v6303_v43  ;;  %v12920_v25 = vld [vmem:[%s17641_s10 + $0x110] sm:$0xff]  }
 0x6ab   : > { %7085 = vmatmul.mubr.bf16.vlgmr.msra.gmra.mrb[204].mxu1 %v6464_v53  ;;  %v6615_v34 = vsel %vm2169_vm8, %v15680_v2, %v6580_v31  ;;  %v6317_v55 = vor.u32 %v6316_v26, %v6312_v35  ;;  %v6322_v12 = vrot.slane %v6320_v38, 5  ;;  %v6584_v31 = vpop.permute.xlu0 %6583  ;;  %v6468_v10 = vsel %vm2169_vm8, %v17782_v30, %v6433_v14  ;;  %v17784_v53 = vld [vmem:[#allocation11_spill] sm:$0xff]  ;;  %v17788_v30 = vld [vmem:[#allocation16_spill] sm:$0xff] }
 0x6ac   : > { %v6435_v62 = vpop.permute.xlu1 %6434  ;;  %7092 = vmatprep.mubr.bf16.mxu1 %v6615_v34  ;;  %v6308_v49 = vrot.slane %v6307_v1, 4  ;;  %v6296_v44 = vsel %vm13362_vm6, %v10557_v22, %v6295_v28  ;;  %12384 = vmatpush3.bf16.msra.mxu1 %v12918_v61  ;;  %v6619_v28 = vsel %vm2169_vm8, %v15728_v20, %v6582_v16  ;;  %v12919_v61 = vld [vmem:[%s17641_s10 + $0x108] sm:$0xff]   ;;  %v6623_v8 = vsel %vm2169_vm8, %v15702_v52, %v6584_v31  ;;  %v17785_v16 = vld [vmem:[#allocation13_spill] sm:$0xff]  ;;  %v17786_v34 = vld [vmem:[#allocation14_spill] sm:$0xff] }
 0x6ad   : > { %v6472_v57 = vsel %vm2169_vm8, %v17781_v13, %v6435_v62  ;;  %v6318_v45 = vrot.slane %v6317_v55, 4  ;;  %v15897_v56 = vcombine.low %v6296_v44, %v6299_v58  ;;  %12385 = vmatprep.subr.bf16.mxu1 %v12919_v61 }
 0x6ae   : > { %6707 = vrot.lane.b32.xlu1 %v15884_v47, %s12991_s27  ;;  %7245 = vmatprep.mubr.bf16.mxu0 %v6472_v57  ;;  %v6313_v2 = vsel %vm13377_vm7, %v6308_v49, %v6312_v35 }
 0x6af   : > { %v6323_v11 = vsel %vm13377_vm7, %v6318_v45, %v6322_v12  ;;  %v6586_v17 = vpop.permute.xlu0 %6585  ;;  %v17787_v45 = vld [vmem:[#allocation15_spill] sm:$0xff] }
 0x6b0   : > { %v10611_v19 = vcombine.low %v6313_v2, %v6323_v11  ;;  %12386 = vmatpush3.bf16.msra.mxu1 %v12919_v61  ;;  %v6627_v54 = vsel %vm2169_vm8, %v15750_v0, %v6586_v17 }
 0x6b1   : > { %12387 = vmatprep.subr.bf16.mxu1 %v12920_v25 }
 0x6b2   : > { %6709 = vrot.lane.b32.xlu1 %v15897_v56, %s12991_s27  ;;  %6783 = vrot.lane.b32.xlu0 %v10611_v19, %s12991_s27 }
 0x6b3   : > { %7093 = vmatmul.mubr.bf16.gmra.mrb[208].mxu1 %v6468_v10  ;;  %v6588_v14 = vpop.permute.xlu0 %6587 }
 0x6b4   : > { %7100 = vmatprep.mubr.bf16.mxu1 %v6619_v28  ;;  %12388 = vmatpush3.bf16.msra.mxu1 %v12920_v25  ;;  %v6437_v50 = vpop.permute.xlu1 %6436  ;;  %v6631_v46 = vsel %vm2169_vm8, %v15723_v7, %v6588_v14 }
 0x6b5   : > { %12389 = vmatprep.subr.bf16.mxu1 %v12921_v32  ;;  %v6476_v36 = vsel %vm2169_vm8, %v17783_v33, %v6437_v50 }
 0x6b8   : > { %12390 = vmatpush3.bf16.msra.mxu1 %v12921_v32  ;;  %v6590_v51 = vpop.permute.xlu0 %6589 }
 0x6b9   : > { %v6635_v58 = vsel %vm2169_vm8, %v15774_v23, %v6590_v51 }
 0x6bb   : > { %7101 = vmatmul.mubr.bf16.gmra.mrb[212].mxu1 %v6472_v57 }
 0x6bc   : > { %7108 = vmatprep.mubr.bf16.mxu1 %v6623_v8  ;;  %v17789_v8 = vld [vmem:[#allocation19_spill] sm:$0xff] }
 0x6be   : > { %v6439_v4 = vpop.permute.xlu1 %6438 }
 0x6bf   : > { %v6480_v43 = vsel %vm2169_vm8, %v17784_v53, %v6439_v4  ;;  %v17791_v53 = vld [vmem:[#allocation22_spill] sm:$0xff] }
 0x6c3   : > { %7109 = vmatmul.mubr.bf16.gmra.mrb[216].mxu1 %v6476_v36  ;;  %v6592_v38 = vpop.permute.xlu0 %6591 }
 0x6c4   : > { %7116 = vmatprep.mubr.bf16.mxu1 %v6627_v54  ;;  %v6639_v57 = vsel %vm2169_vm8, %v15746_v63, %v6592_v38  ;;  %v17790_v54 = vld [vmem:[#allocation7_spill] sm:$0xff] }
 0x6c5   : > { %v6441_v35 = vpop.permute.xlu1 %6440 }
 0x6c6   : > { %v6484_v26 = vsel %vm2169_vm8, %v17785_v16, %v6441_v35  ;;  %v17792_v16 = vld [vmem:[#allocation23_spill] sm:$0xff] }
 0x6cb   : > { %7117 = vmatmul.mubr.bf16.gmra.mrb[220].mxu1 %v6480_v43  ;;  %v6594_v18 = vpop.permute.xlu0 %6593 }
 0x6cc   : > { %7124 = vmatprep.mubr.bf16.mxu1 %v6631_v46  ;;  %v6643_v31 = vsel %vm2169_vm8, %v15794_v40, %v6594_v18 }
 0x6cf   : > { %v6443_v42 = vpop.permute.xlu1 %6442 }
 0x6d0   : > { %v6488_v13 = vsel %vm2169_vm8, %v17786_v34, %v6443_v42  ;;  %v17794_v34 = vld [vmem:[#allocation24_spill] sm:$0xff] }
 0x6d3   : > { %7125 = vmatmul.mubr.bf16.gmra.mrb[224].mxu1 %v6484_v26 }
 0x6d4   : > { %v6596_v22 = vpop.permute.xlu0 %6595  ;;  %7132 = vmatprep.mubr.bf16.mxu1 %v6635_v58  ;;  %v17793_v58 = vld [vmem:[#allocation18_spill] sm:$0xff] }
 0x6d5   : > { %v6445_v62 = vpop.permute.xlu1 %6444  ;;  %v6647_v17 = vsel %vm2169_vm8, %v15770_v60, %v6596_v22 }
 0x6d6   : > { %v6492_v2 = vsel %vm2169_vm8, %v17787_v45, %v6445_v62 }
 0x6da   : > { %v6598_v1 = vpop.permute.xlu0 %6597 }
 0x6db   : > { %7133 = vmatmul.mubr.bf16.gmra.mrb[228].mxu1 %v6488_v13  ;;  %v6651_v50 = vsel %vm2169_vm8, %v15823_v27, %v6598_v1 }
 0x6dc   : > { %7140 = vmatprep.mubr.bf16.mxu1 %v6639_v57 }
 0x6de   : > { %v6600_v55 = vpop.permute.xlu0 %6599 }
 0x6df   : > { %v6655_v35 = vsel %vm2169_vm8, %v15796_v39, %v6600_v55  ;;  %v17795_v55 = vld [vmem:[#allocation8_spill] sm:$0xff] }
 0x6e0   : > { %v6447_v12 = vpop.permute.xlu1 %6446 }
 0x6e1   : > { %v6496_v10 = vsel %vm2169_vm8, %v17788_v30, %v6447_v12 }
 0x6e3   : > { %v6602_v49 = vpop.permute.xlu0 %6601  ;;  %7141 = vmatmul.mubr.bf16.gmra.mrb[232].mxu1 %v6492_v2 }
 0x6e4   : > { %v6449_v44 = vpop.permute.xlu1 %6448  ;;  %7148 = vmatprep.mubr.bf16.mxu1 %v6643_v31  ;;  %v17796_v31 = vld [vmem:[#allocation26_spill] sm:$0xff] }
 0x6e5   : > { %v6500_v32 = vsel %vm2169_vm8, %v17789_v8, %v6449_v44 }
 0x6e7   : > { %v6604_v11 = vpop.permute.xlu0 %6603 }
 0x6e8   : > { %v6663_v44 = vsel %vm2169_vm8, %v15820_v24, %v6604_v11 }
 0x6e9   : > { %v6451_v19 = vpop.permute.xlu1 %6450 }
 0x6ea   : > { %v6504_v46 = vsel %vm2169_vm8, %v17791_v53, %v6451_v19  ;;  %v17797_v19 = vld [vmem:[#allocation12_spill] sm:$0xff] }
 0x6eb   : > { %7149 = vmatmul.mubr.bf16.gmra.mrb[236].mxu1 %v6496_v10 }
 0x6ec   : > { %v6606_v61 = vpop.permute.xlu0 %6605  ;;  %7156 = vmatprep.mubr.bf16.mxu1 %v6647_v17  ;;  %v17798_v17 = vld [vmem:[#allocation28_spill] sm:$0xff] }
 0x6ed   : > { %v6453_v28 = vpop.permute.xlu1 %6452  ;;  %v6667_v30 = vsel %vm2169_vm8, %v15865_v41, %v6606_v61 }
 0x6ee   : > { %v6508_v22 = vsel %vm2169_vm8, %v17792_v16, %v6453_v28 }
 0x6f0   : > { %v6608_v14 = vpop.permute.xlu0 %6607 }
 0x6f1   : > { %v6671_v8 = vsel %vm2169_vm8, %v15884_v47, %v6608_v14 }
 0x6f2   : > { %v6455_v25 = vpop.permute.xlu1 %6454 }
 0x6f3   : > { %7157 = vmatmul.mubr.bf16.gmra.mrb[240].mxu1 %v6500_v32  ;;  %v6512_v57 = vsel %vm2169_vm8, %v17794_v34, %v6455_v25  ;;  %v17799_v25 = vld [vmem:[#allocation17_spill] sm:$0xff] }
 0x6f4   : > { %7164 = vmatprep.mubr.bf16.mxu1 %v6651_v50 }
 0x6f6   : > { %v6457_v51 = vpop.permute.xlu1 %6456 }
 0x6f9   : > { %v6680_v33 = vpop.permute.xlu0 %6679 }
 0x6fa   : > { %v6713_v4 = vsel %vm2169_vm8, %v17790_v54, %v6680_v33  ;;  %v17801_v33 = vld [vmem:[#allocation20_spill] sm:$0xff] }
 0x6fb   : > { %v6459_v38 = vpop.permute.xlu1 %6458  ;;  %7246 = vmatmul.mubr.bf16.vlgmr.msra.gmra.mrb[196].mxu0 %v6713_v4  ;;  %7165 = vmatmul.mubr.bf16.gmra.mrb[244].mxu1 %v6504_v46  ;;  %v17802_v4 = vld [vmem:[#allocation21_spill] sm:$0xff] }
 0x6fc   : > { %7253 = vmatprep.mubr.bf16.mxu0 %v6476_v36  ;;  %7172 = vmatprep.mubr.bf16.mxu1 %v6655_v35  ;;  %v6659_v36 = vsel %vm2169_vm8, %v15836_v37, %v6602_v49  ;;  %v6516_v49 = vsel %vm2169_vm8, %v17796_v31, %v6457_v51  ;;  %v6520_v11 = vsel %vm2169_vm8, %v17798_v17, %v6459_v38  ;;  %v17800_v51 = vld [vmem:[#allocation31_spill] sm:$0xff]  ;;  %v17803_v38 = vld [vmem:[#allocation25_spill] sm:$0xff] }
 0x6fe   : > { %v6684_v1 = vpop.permute.xlu0 %6683 }
 0x6ff   : > { %v6721_v12 = vsel %vm2169_vm8, %v17795_v55, %v6684_v1 }
 0x700   : > { %v6461_v18 = vpop.permute.xlu1 %6460 }
 0x701   : > { %v6524_v61 = vsel %vm2169_vm8, %v17800_v51, %v6461_v18 }
 0x702   : > { %v6688_v28 = vpop.permute.xlu0 %6687 }
 0x703   : > { %7173 = vmatmul.mubr.bf16.gmra.mrb[248].mxu1 %v6508_v22 }
 0x704   : > { %v6682_v42 = vpop.permute.xlu1 %6681  ;;  %7180 = vmatprep.mubr.bf16.mxu1 %v6659_v36 }
 0x705   : > { %v6717_v62 = vsel %vm2169_vm8, %v17793_v58, %v6682_v42 }
 0x706   : > { %7254 = vmatmul.mubr.bf16.gmra.mrb[200].mxu0 %v6717_v62  ;;  %v6692_v54 = vpop.permute.xlu0 %6691 }
 0x707   : > { %7261 = vmatprep.mubr.bf16.mxu0 %v6480_v43  ;;  %v6737_v14 = vsel %vm2169_vm8, %v17802_v4, %v6692_v54 }
 0x708   : > { %v6686_v45 = vpop.permute.xlu1 %6685 }
 0x709   : > { %v6725_v43 = vsel %vm2169_vm8, %v17797_v19, %v6686_v45 }
 0x70b   : > { %7181 = vmatmul.mubr.bf16.gmra.mrb[252].mxu1 %v6512_v57 }
 0x70c   : > { %7188 = vmatprep.mubr.bf16.mxu1 %v6663_v44  ;;  %v6690_v50 = vpop.permute.xlu1 %6689 }
 0x70e   : > { %7262 = vmatmul.mubr.bf16.gmra.mrb[204].mxu0 %v6721_v12 }
 0x70f   : > { %7269 = vmatprep.mubr.bf16.mxu0 %v6484_v26  ;;  %v6729_v26 = vsel %vm2169_vm8, %v17799_v25, %v6688_v28 }
 0x713   : > { %7189 = vmatmul.mubr.bf16.gmra.mrb[0].mxu1 %v6516_v49 }
 0x714   : > { %7196 = vmatprep.mubr.bf16.mxu1 %v6667_v30 }
 0x716   : > { %7270 = vmatmul.mubr.bf16.gmra.mrb[208].mxu0 %v6725_v43 }
 0x717   : > { %7277 = vmatprep.mubr.bf16.mxu0 %v6488_v13  ;;  %v6733_v13 = vsel %vm2169_vm8, %v17801_v33, %v6690_v50 }
 0x71b   : > { %7197 = vmatmul.mubr.bf16.gmra.mrb[4].mxu1 %v6520_v11 }
 0x71c   : > { %7204 = vmatprep.mubr.bf16.mxu1 %v6671_v8 }
 0x71e   : > { %7278 = vmatmul.mubr.bf16.gmra.mrb[212].mxu0 %v6729_v26 }
 0x71f   : > { %7285 = vmatprep.mubr.bf16.mxu0 %v6492_v2  ;;  %v6694_v2 = vpop.permute.xlu1 %6693 }
 0x720   : > { %v6741_v53 = vsel %vm2169_vm8, %v17803_v38, %v6694_v2 }
 0x723   : > { %7205 = vmatmul.mubr.bf16.gmra.mrb[8].mxu1 %v6524_v61 }
 0x724   : > { %12391 = vmatprep.mubr.msk.bf16.mxu1 %vm2169_vm8, %v15728_v20  ;;  %v6696_v20 = vpop.permute.xlu0 %6695 }
 0x726   : > { %7286 = vmatmul.mubr.bf16.gmra.mrb[216].mxu0 %v6733_v13 }
 0x727   : > { %7293 = vmatprep.mubr.bf16.mxu0 %v6496_v10  ;;  %v17804_v10 = vld [vmem:[#allocation27_spill] sm:$0xff] }
 0x72b   : > { %12392 = vmatmul.mubr.msk.bf16.vlgmr.msra.gmra.mrb[12].mxu1 %vm2169_vm8, %v15702_v52  ;;  %v6745_v52 = vsel %vm2169_vm8, %v17804_v10, %v6696_v20 }
 0x72c   : > { %12395 = vmatprep.mubr.msk.bf16.mxu1 %vm2169_vm8, %v15750_v0  ;;  %v6698_v0 = vpop.permute.xlu1 %6697 }
 0x72e   : > { %7294 = vmatmul.mubr.bf16.gmra.mrb[220].mxu0 %v6737_v14 }
 0x72f   : > { %7301 = vmatprep.mubr.bf16.mxu0 %v6500_v32  ;;  %v17805_v32 = vld [vmem:[#allocation29_spill] sm:$0xff] }
 0x733   : > { %12396 = vmatmul.mubr.msk.bf16.gmra.mrb[16].mxu1 %vm2169_vm8, %v15723_v7  ;;  %v6749_v7 = vsel %vm2169_vm8, %v17805_v32, %v6698_v0  ;;  %v8260_v32 = vld [vmem:[#allocation5] sm:$0xf] }
 0x734   : > { %12399 = vmatprep.mubr.msk.bf16.mxu1 %vm2169_vm8, %v15774_v23  ;;  %v6700_v23 = vpop.permute.xlu0 %6699 }
 0x736   : > { %7302 = vmatmul.mubr.bf16.gmra.mrb[224].mxu0 %v6741_v53 }
 0x737   : > { %7309 = vmatprep.mubr.bf16.mxu0 %v6504_v46  ;;  %v17806_v46 = vld [vmem:[#allocation32_spill] sm:$0xff] }
 0x738   : > { %v6704_v58 = vpop.permute.xlu0 %6703 }
 0x739   : > { %v6761_v62 = vsel %vm2169_vm8, %v15670_v29, %v6704_v58 }
 0x73b   : > { %12400 = vmatmul.mubr.msk.bf16.gmra.mrb[20].mxu1 %vm2169_vm8, %v15746_v63  ;;  %v6753_v63 = vsel %vm2169_vm8, %v17806_v46, %v6700_v23  ;;  %v8262_v23 = vld [vmem:[#allocation5 + $0x8] sm:$0x1]  ;;  %v8316_v46 = vshrl.u32 %v8260_v32, 16 }
 0x73c   : > { %12403 = vmatprep.mubr.msk.bf16.mxu1 %vm2169_vm8, %v15794_v40  ;;  %v6702_v40 = vpop.permute.xlu1 %6701  ;;  %v6782_v1 = vpop.permute.xlu0 %6781 }
 0x73e   : > { %7310 = vmatmul.mubr.bf16.gmra.mrb[228].mxu0 %v6745_v52 }
 0x73f   : > { %7317 = vmatprep.mubr.bf16.mxu0 %v6508_v22  ;;  %v6332_v22 = vrot.slane %v15858_v59, 5 }
 0x740   : > { %v6706_v59 = vpop.permute.xlu1 %6705  ;;  %v6784_v55 = vpop.permute.xlu0 %6783 }
 0x741   : > { %v6765_v29 = vsel %vm2169_vm8, %v15686_v48, %v6706_v59 }
 0x743   : > { %12404 = vmatmul.mubr.msk.bf16.gmra.mrb[24].mxu1 %vm2169_vm8, %v15770_v60  ;;  %v8055_v60 = vld [vmem:[%s17643_s12] sm:$0x77] }
 0x744   : > { %12407 = vmatprep.mubr.msk.bf16.mxu1 %vm2169_vm8, %v15823_v27  ;;  %v8060_v35 = vcombine.high %v8055_v60, %v8055_v60  ;;  %v17807_v27 = vld [vmem:[#allocation34_spill] sm:$0xff]  ;;  %v6708_v12 = vpop.permute.xlu1 %6707 }
 0x745   : > { %v6757_v18 = vsel %vm2169_vm8, %v17807_v27, %v6702_v40  ;;  %v6769_v44 = vsel %vm2169_vm8, %v15705_v21, %v6708_v12 }
 0x746   : > { %7318 = vmatmul.mubr.bf16.gmra.mrb[232].mxu0 %v6749_v7  ;;  %v12524_v42 = vpack.i.bf16 %v8055_v60, %v8060_v35  ;;  %v8261_v7 = vld [vmem:[#allocation5 + $0x4] sm:$0xf]  ;;  %v8335_v35 = vshll.u32 %v8262_v23, 16 }
 0x747   : > { %7325 = vmatprep.mubr.bf16.mxu0 %v6512_v57  ;;  %v10610_v57 = vcombine.low %v15849_v15, %v15851_v6  ;;  %v8325_v40 = vshll.u32 %v8261_v7, 16  ;;  %v8329_v60 = vshrl.u32 %v8261_v7, 16 }
 0x748   : > { %12525 = vxpose.xlu0.b32.start.end [1/1] (short) %v12524_v42, 128  ;;  %v6710_v48 = vpop.permute.xlu1 %6709 }
 0x749   : > { %v6773_v45 = vsel %vm2169_vm8, %v15845_v3, %v6710_v48 }
 0x74b   : > { %12408 = vmatmul.mubr.msk.bf16.gmra.mrb[28].mxu1 %vm2169_vm8, %v15796_v39  ;;  %v6329_v39 = vrot.slane %v15851_v6, 5 }
 0x74c   : > { %12411 = vmatprep.mubr.msk.bf16.mxu1 %vm2169_vm8, %v15836_v37  ;;  %v10558_v37 = vrot.slane %v15849_v15, 9 }
 0x74d   : > { %v6331_v16 = vrot.slane %v6329_v39, 4 }
 0x74e   : > { %7326 = vmatmul.mubr.bf16.gmra.mrb[236].mxu0 %v6753_v63  ;;  %v8319_v63 = vshll.u32 %v8260_v32, 16 }
 0x74f   : > { %7333 = vmatprep.mubr.bf16.mxu0 %v6516_v49 }
 0x750   : > { %v8321_v42 = vrot.slane %v8319_v63, 5 }
 0x753   : > { %12412 = vmatmul.mubr.msk.bf16.gmra.mrb[32].mxu1 %vm2169_vm8, %v15820_v24  ;;  %v6330_v24 = vsel %vm13362_vm6, %v10558_v37, %v6329_v39  ;;  %v8327_v39 = vrot.slane %v8325_v40, 5 }
 0x754   : > { %12415 = vmatprep.mubr.msk.bf16.mxu1 %vm2169_vm8, %v15865_v41  ;;  %v6333_v41 = vsel %vm13362_vm6, %v6331_v16, %v6332_v22  ;;  %v8331_v16 = vrot.slane %v8329_v60, 4 }
 0x755   : > { %v10612_v36 = vcombine.low %v6330_v24, %v6333_v41 }
 0x756   : > { %7334 = vmatmul.mubr.bf16.gmra.mrb[240].mxu0 %v6757_v18  ;;  %v8318_v18 = vrot.slane %v8316_v46, 4  ;;  %v8332_v41 = vor.u32 %v8331_v16, %v8327_v39 }
 0x757   : > { %7341 = vmatprep.mubr.bf16.mxu0 %v6520_v11 }
 0x75b   : > { %12416 = vmatmul.mubr.msk.bf16.gmra.mrb[36].mxu1 %vm2169_vm8, %v15884_v47  ;;  %v17808_v47 = vld [vmem:[#allocation33_spill] sm:$0xff] }
 0x75c   : > { %12419 = vmatprep.mubr.msk.bf16.mxu1 %vm2169_vm8, %v15897_v56  ;;  %v6787_v34 = vsel %vm2169_vm8, %v17808_v47, %v6782_v1  ;;  %v6791_v56 = vsel %vm2169_vm8, %v10610_v57, %v6784_v55 }
 0x75e   : > { %7342 = vmatmul.mubr.bf16.gmra.mrb[244].mxu0 %v6761_v62  ;;  %v8322_v62 = vor.u32 %v8321_v42, %v8318_v18 }
 0x75f   : > { %7349 = vmatprep.mubr.bf16.mxu0 %v6524_v61 }
 0x760   : > { %v8323_v1 = vrot.slane %v8322_v62, 4 }
 0x762   : > { %v8328_v47 = vsel %vm13377_vm7, %v8323_v1, %v8327_v39 }
 0x763   : > { %12420 = vmatmul.mubr.msk.bf16.gmra.mrb[40].mxu1 %vm2169_vm8, %v10612_v36  ;;  %v8337_v36 = vrot.slane %v8335_v35, 5 }
 0x766   : > { %7350 = vmatmul.mubr.bf16.gmra.mrb[248].mxu0 %v6765_v29  ;;  %v8333_v29 = vrot.slane %v8332_v41, 4 }
 0x767   : > { %7357 = vmatprep.mubr.bf16.mxu0 %v6787_v34 }
 0x768   : > { %v8338_v34 = vsel %vm13377_vm7, %v8333_v29, %v8337_v36 }
 0x769   : > { %v10748_v55 = vcombine.low %v8328_v47, %v8338_v34 }
 0x76b   : > { %9023 = vrot.lane.b32.xlu1 %v10748_v55, %s12991_s27 }
 0x76e   : > { %7358 = vmatmul.mubr.bf16.gmra.mrb[252].mxu0 %v6769_v44 }
 0x76f   : > { %7365 = vmatprep.mubr.bf16.mxu0 %v6791_v56 }
 0x776   : > { %7366 = vmatmul.mubr.bf16.gmra.mrb[0].mxu0 %v6773_v45 }
 0x77e   : > { %v11729_v31 = vpop.f32.mrb[204].mxu1 }
 0x77f   : > { %v11730_v49 = vpop.f32.mrb[205].mxu1 }
 0x780   : > { %v16049_v19 = vadd.f32 %v11730_v49, %v11729_v31  ;;  %v11732_v43 = vpop.f32.mrb[206].mxu1 }
 0x781   : > { %v11733_v15 = vpop.f32.mrb[207].mxu1 }
 0x782   : > { %v16051_v6 = vadd.f32 %v11733_v15, %v11732_v43 }
 0x786   : > { %v11735_v30 = vpop.f32.mrb[208].mxu1 }
 0x787   : > { %v11736_v28 = vpop.f32.mrb[209].mxu1 }
 0x788   : > { %v16053_v17 = vadd.f32 %v11736_v28, %v11735_v30  ;;  %v11738_v21 = vpop.f32.mrb[210].mxu1 }
 0x789   : > { %v11739_v11 = vpop.f32.mrb[211].mxu1 }
 0x78a   : > { %v16055_v25 = vadd.f32 %v11739_v11, %v11738_v21 }
 0x78e   : > { %v11741_v26 = vpop.f32.mrb[212].mxu1 }
 0x78f   : > { %v11742_v8 = vpop.f32.mrb[213].mxu1 }
 0x790   : > { %v16057_v3 = vadd.f32 %v11742_v8, %v11741_v26  ;;  %v11744_v50 = vpop.f32.mrb[214].mxu1 }
 0x791   : > { %v11745_v51 = vpop.f32.mrb[215].mxu1 }
 0x792   : > { %v16059_v61 = vadd.f32 %v11745_v51, %v11744_v50 }
 0x796   : > { %v11747_v33 = vpop.f32.mrb[216].mxu1 }
 0x797   : > { %v11748_v13 = vpop.f32.mrb[217].mxu1 }
 0x798   : > { %v16061_v54 = vadd.f32 %v11748_v13, %v11747_v33  ;;  %v11750_v4 = vpop.f32.mrb[218].mxu1 }
 0x799   : > { %v11751_v14 = vpop.f32.mrb[219].mxu1 }
 0x79a   : > { %v16063_v2 = vadd.f32 %v11751_v14, %v11750_v4 }
 0x79e   : > { %v11753_v38 = vpop.f32.mrb[220].mxu1 }
 0x79f   : > { %v11754_v53 = vpop.f32.mrb[221].mxu1 }
 0x7a0   : > { %v16065_v20 = vadd.f32 %v11754_v53, %v11753_v38  ;;  %v11756_v10 = vpop.f32.mrb[222].mxu1 }
 0x7a1   : > { %v11757_v52 = vpop.f32.mrb[223].mxu1 }
 0x7a2   : > { %v16067_v0 = vadd.f32 %v11757_v52, %v11756_v10  ;;  %v16097_v10 = vld [vmem:[%s17642_s11] ss:$0 sm:$0xff] }
 0x7a3   : > { %v7087_v7 = vadd.f32 %v16049_v19, %v16097_v10  ;;  %v7090_v35 = vadd.f32 %v16051_v6, %v16097_v10  ;;  %v7095_v6 = vadd.f32 %v16053_v17, %v16097_v10 }
 0x7a6   : > { %v11759_v27 = vpop.f32.mrb[224].mxu1 }
 0x7a7   : > { %v11760_v37 = vpop.f32.mrb[225].mxu1 }
 0x7a8   : > { %v16069_v22 = vadd.f32 %v11760_v37, %v11759_v27  ;;  %v11762_v58 = vpop.f32.mrb[226].mxu1 }
 0x7a9   : > { %v11763_v24 = vpop.f32.mrb[227].mxu1 }
 0x7aa   : > { %v16071_v59 = vadd.f32 %v11763_v24, %v11762_v58 }
 0x7ae   : > { %v11765_v57 = vpop.f32.mrb[228].mxu1 }
 0x7af   : > { %v11766_v12 = vpop.f32.mrb[229].mxu1 }
 0x7b0   : > { %v16077_v56 = vadd.f32 %v11766_v12, %v11765_v57  ;;  %v11768_v44 = vpop.f32.mrb[230].mxu1  ;;  %v7098_v12 = vadd.f32 %v16055_v25, %v16097_v10 }
 0x7b1   : > { %v11769_v48 = vpop.f32.mrb[231].mxu1 }
 0x7b2   : > { %v16080_v45 = vadd.f32 %v11769_v48, %v11768_v44 }
 0x7b6   : > { %v11771_v31 = vpop.f32.mrb[232].mxu1 }
 0x7b7   : > { %v11772_v49 = vpop.f32.mrb[233].mxu1 }
 0x7b8   : > { %v16082_v43 = vadd.f32 %v11772_v49, %v11771_v31  ;;  %v11774_v15 = vpop.f32.mrb[234].mxu1 }
 0x7b9   : > { %v11775_v30 = vpop.f32.mrb[235].mxu1 }
 0x7ba   : > { %v16084_v28 = vadd.f32 %v11775_v30, %v11774_v15 }
 0x7be   : > { %v11777_v21 = vpop.f32.mrb[236].mxu1 }
 0x7bf   : > { %v11778_v11 = vpop.f32.mrb[237].mxu1 }
 0x7c0   : > { %v16086_v26 = vadd.f32 %v11778_v11, %v11777_v21  ;;  %v11780_v8 = vpop.f32.mrb[238].mxu1 }
 0x7c1   : > { %v11781_v50 = vpop.f32.mrb[239].mxu1 }
 0x7c2   : > { %v16088_v51 = vadd.f32 %v11781_v50, %v11780_v8  ;;  %v7103_v8 = vadd.f32 %v16057_v3, %v16097_v10 }
 0x7c6   : > { %v11783_v33 = vpop.f32.mrb[240].mxu1 }
 0x7c7   : > { %v11784_v13 = vpop.f32.mrb[241].mxu1 }
 0x7c8   : > { %v16090_v4 = vadd.f32 %v11784_v13, %v11783_v33  ;;  %v11786_v14 = vpop.f32.mrb[242].mxu1 }
 0x7c9   : > { %v11787_v38 = vpop.f32.mrb[243].mxu1 }
 0x7ca   : > { %v16092_v53 = vadd.f32 %v11787_v38, %v11786_v14  ;;  %v7106_v38 = vadd.f32 %v16059_v61, %v16097_v10 }
 0x7ce   : > { %v11841_v52 = vpop.f32.mrb[196].mxu0  ;;  %v11789_v63 = vpop.f32.mrb[244].mxu1 }
 0x7cf   : > { %v11842_v32 = vpop.f32.mrb[197].mxu0  ;;  %v11790_v60 = vpop.f32.mrb[245].mxu1 }
 0x7d0   : > { %v11843_v23 = vadd.f32 %v11842_v32, %v11841_v52  ;;  %v11844_v46 = vpop.f32.mrb[198].mxu0  ;;  %v16103_v18 = vadd.f32 %v11790_v60, %v11789_v63  ;;  %v11792_v42 = vpop.f32.mrb[246].mxu1 }
 0x7d1   : > { %v11845_v40 = vpop.f32.mrb[199].mxu0  ;;  %v11793_v37 = vpop.f32.mrb[247].mxu1 }
 0x7d2   : > { %v11846_v27 = vadd.f32 %v11845_v40, %v11844_v46  ;;  %v16105_v39 = vadd.f32 %v11843_v23, %v7087_v7  ;;  %v16107_v16 = vadd.f32 %v11793_v37, %v11792_v42 }
 0x7d4   : > { %v16109_v58 = vadd.f32 %v11846_v27, %v7090_v35  ;;  %v7111_v35 = vadd.f32 %v16061_v54, %v16097_v10 }
 0x7d6   : > { %v11795_v19 = vpop.f32.mrb[248].mxu1 }
 0x7d7   : > { %v11796_v24 = vpop.f32.mrb[249].mxu1 }
 0x7d8   : > { %v16111_v36 = vadd.f32 %v11796_v24, %v11795_v19  ;;  %v11798_v1 = vpop.f32.mrb[250].mxu1 }
 0x7d9   : > { %v11847_v62 = vpop.f32.mrb[200].mxu0  ;;  %v11799_v34 = vpop.f32.mrb[251].mxu1 }
 0x7da   : > { %v11848_v41 = vpop.f32.mrb[201].mxu0  ;;  %v16115_v55 = vadd.f32 %v11799_v34, %v11798_v1 }
 0x7db   : > { %v11849_v29 = vadd.f32 %v11848_v41, %v11847_v62  ;;  %v11850_v47 = vpop.f32.mrb[202].mxu0  ;;  %v7114_v62 = vadd.f32 %v16063_v2, %v16097_v10 }
 0x7dc   : > { %v11851_v57 = vpop.f32.mrb[203].mxu0 }
 0x7dd   : > { %v11852_v44 = vadd.f32 %v11851_v57, %v11850_v47  ;;  %v16119_v48 = vadd.f32 %v11849_v29, %v7095_v6 }
 0x7de   : > { %v11801_v49 = vpop.f32.mrb[252].mxu1 }
 0x7df   : > { %v16121_v31 = vadd.f32 %v11852_v44, %v7098_v12  ;;  %v11802_v30 = vpop.f32.mrb[253].mxu1  ;;  %v7119_v12 = vadd.f32 %v16065_v20, %v16097_v10 }
 0x7e0   : > { %v16123_v11 = vadd.f32 %v11802_v30, %v11801_v49  ;;  %v11804_v17 = vpop.f32.mrb[254].mxu1 }
 0x7e1   : > { %v11853_v15 = vpop.f32.mrb[204].mxu0  ;;  %v11805_v13 = vpop.f32.mrb[255].mxu1 }
 0x7e2   : > { %v11854_v21 = vpop.f32.mrb[205].mxu0  ;;  %v16127_v25 = vadd.f32 %v11805_v13, %v11804_v17 }
 0x7e3   : > { %v11855_v50 = vadd.f32 %v11854_v21, %v11853_v15  ;;  %v11856_v33 = vpop.f32.mrb[206].mxu0  ;;  %v7122_v21 = vadd.f32 %v16067_v0, %v16097_v10 }
 0x7e4   : > { %v11857_v14 = vpop.f32.mrb[207].mxu0 }
 0x7e5   : > { %v11858_v52 = vadd.f32 %v11857_v14, %v11856_v33  ;;  %v16131_v32 = vadd.f32 %v11855_v50, %v7103_v8 }
 0x7e6   : > { %v11807_v23 = vpop.f32.mrb[0].mxu1 }
 0x7e7   : > { %v16133_v7 = vadd.f32 %v11858_v52, %v7106_v38  ;;  %v11808_v63 = vpop.f32.mrb[1].mxu1 }
 0x7e8   : > { %v16135_v60 = vadd.f32 %v11808_v63, %v11807_v23  ;;  %v11810_v3 = vpop.f32.mrb[2].mxu1  ;;  %v7127_v23 = vadd.f32 %v16069_v22, %v16097_v10  ;;  %v7135_v22 = vadd.f32 %v16077_v56, %v16097_v10 }
 0x7e9   : > { %v11859_v46 = vpop.f32.mrb[208].mxu0  ;;  %v11811_v37 = vpop.f32.mrb[3].mxu1 }
 0x7ea   : > { %v11860_v40 = vpop.f32.mrb[209].mxu0  ;;  %v16139_v61 = vadd.f32 %v11811_v37, %v11810_v3 }
 0x7eb   : > { %v11861_v27 = vadd.f32 %v11860_v40, %v11859_v46  ;;  %v11862_v42 = vpop.f32.mrb[210].mxu0 }
 0x7ec   : > { %v11863_v19 = vpop.f32.mrb[211].mxu0 }
 0x7ed   : > { %v11864_v24 = vadd.f32 %v11863_v19, %v11862_v42  ;;  %v16143_v41 = vadd.f32 %v11861_v27, %v7111_v35  ;;  %v7130_v35 = vadd.f32 %v16071_v59, %v16097_v10 }
 0x7ee   : > { %v11813_v6 = vpop.f32.mrb[4].mxu1 }
 0x7ef   : > { %v16145_v1 = vadd.f32 %v11864_v24, %v7114_v62  ;;  %v11814_v47 = vpop.f32.mrb[5].mxu1 }
 0x7f0   : > { %v16147_v57 = vadd.f32 %v11814_v47, %v11813_v6  ;;  %v11816_v54 = vpop.f32.mrb[6].mxu1 }
 0x7f1   : > { %v11865_v29 = vpop.f32.mrb[212].mxu0  ;;  %v11817_v15 = vpop.f32.mrb[7].mxu1 }
 0x7f2   : > { %v11866_v34 = vpop.f32.mrb[213].mxu0  ;;  %v16151_v2 = vadd.f32 %v11817_v15, %v11816_v54 }
 0x7f3   : > { %v11867_v44 = vadd.f32 %v11866_v34, %v11865_v29  ;;  %v11868_v49 = vpop.f32.mrb[214].mxu0  ;;  %v7138_v29 = vadd.f32 %v16080_v45, %v16097_v10 }
 0x7f4   : > { %v11869_v30 = vpop.f32.mrb[215].mxu0 }
 0x7f5   : > { %v11870_v17 = vadd.f32 %v11869_v30, %v11868_v49  ;;  %v16155_v8 = vadd.f32 %v11867_v44, %v7119_v12 }
 0x7f6   : > { %v11819_v33 = vpop.f32.mrb[8].mxu1 }
 0x7f7   : > { %v16157_v50 = vadd.f32 %v11870_v17, %v7122_v21  ;;  %v11820_v14 = vpop.f32.mrb[9].mxu1 }
 0x7f8   : > { %v16159_v52 = vadd.f32 %v11820_v14, %v11819_v33  ;;  %v11822_v20 = vpop.f32.mrb[10].mxu1 }
 0x7f9   : > { %v11871_v13 = vpop.f32.mrb[216].mxu0  ;;  %v11823_v40 = vpop.f32.mrb[11].mxu1 }
 0x7fa   : > { %v11872_v38 = vpop.f32.mrb[217].mxu0  ;;  %v16163_v0 = vadd.f32 %v11823_v40, %v11822_v20 }
 0x7fb   : > { %v11873_v46 = vadd.f32 %v11872_v38, %v11871_v13  ;;  %v11874_v63 = vpop.f32.mrb[218].mxu0 }
 0x7fc   : > { %v11875_v3 = vpop.f32.mrb[219].mxu0 }
 0x7fd   : > { %v11876_v27 = vadd.f32 %v11875_v3, %v11874_v63  ;;  %v16167_v42 = vadd.f32 %v11873_v46, %v7127_v23 }
 0x7fe   : > { %v12393_v19 = vpop.f32.mrb[12].mxu1 }
 0x7ff   : > { %v16169_v37 = vadd.f32 %v11876_v27, %v7130_v35  ;;  %v7417_v24 = vadd.f32 %v12393_v19, %v16119_v48  ;;  %v7408_v6 = vpop.f32.mrb[13].mxu1  ;;  %v7143_v48 = vadd.f32 %v16082_v43, %v16097_v10  ;;  %v7146_v43 = vadd.f32 %v16084_v28, %v16097_v10 }
 0x800   : > { %v7409_v34 = vadd.f32 %v7408_v6, %v16105_v39  ;;  %v12394_v59 = vpop.f32.mrb[14].mxu1 }
 0x801   : > { %v11877_v62 = vpop.f32.mrb[220].mxu0  ;;  %vm7537_vm9 = vcmp.gt.f32.partialorder %v7417_v24, 0.0  ;;  %v7569_v44 = vmul.f32 0.2, %v7417_v24  ;;  %v7420_v49 = vadd.f32 %v12394_v59, %v16121_v31  ;;  %v7411_v15 = vpop.f32.mrb[15].mxu1 }
 0x802   : > { %v11878_v47 = vpop.f32.mrb[221].mxu0  ;;  %vm7535_vm10 = vcmp.gt.f32.partialorder %v7409_v34, 0.0  ;;  %v7567_v56 = vmul.f32 0.2, %v7409_v34  ;;  %v7412_v21 = vadd.f32 %v7411_v15, %v16109_v58 }
 0x803   : > { %v11879_v54 = vadd.f32 %v11878_v47, %v11877_v62  ;;  %v11880_v12 = vpop.f32.mrb[222].mxu0  ;;  %v7601_v17 = vsel %vm7537_vm9, %v7417_v24, %v7569_v44  ;;  %vm7538_vm11 = vcmp.gt.f32.partialorder %v7420_v49, 0.0  ;;  %v7570_v39 = vmul.f32 0.2, %v7420_v49 }
 0x804   : > { %v11881_v30 = vpop.f32.mrb[223].mxu0  ;;  %v7666_v33 = vrot.slane %v7601_v17, 7  ;;  %v7599_v13 = vsel %vm7535_vm10, %v7409_v34, %v7567_v56  ;;  %vm7536_vm12 = vcmp.gt.f32.partialorder %v7412_v21, 0.0  ;;  %v7568_v14 = vmul.f32 0.2, %v7412_v21 }
 0x805   : > { %v11882_v45 = vadd.f32 %v11881_v30, %v11880_v12  ;;  %v7663_v38 = vrot.slane %v7599_v13, 7  ;;  %v7602_v20 = vsel %vm7538_vm11, %v7420_v49, %v7570_v39  ;;  %v16181_v31 = vadd.f32 %v11879_v54, %v7135_v22 }
 0x806   : > { %v7760_v46 = vsel %vm708_vm1, 0.0, %v7666_v33  ;;  %v7667_v58 = vrot.slane %v7602_v20, 7  ;;  %v7600_v63 = vsel %vm7536_vm12, %v7412_v21, %v7568_v14  ;;  %v12397_v40 = vpop.f32.mrb[16].mxu1 }
 0x807   : > { %v16183_v23 = vadd.f32 %v11882_v45, %v7138_v29  ;;  %v10922_v35 = vpack.c.bf16 %v7760_v46, %v7760_v46  ;;  %v7759_v27 = vsel %vm708_vm1, 0.0, %v7663_v38  ;;  %v7664_v19 = vrot.slane %v7600_v63, 7  ;;  %v7424_v24 = vpop.f32.mrb[17].mxu1 }
 0x808   : > { %v7433_v62 = vadd.f32 %v12397_v40, %v16143_v41  ;;  %v10919_v22 = vpack.c.bf16 %v7759_v27, %v7759_v27  ;;  %v7668_v29 = vsel %vm708_vm1, %v7666_v33, %v7667_v58  ;;  %v7776_v47 = vsel %vm708_vm1, %v7667_v58, 0.0  ;;  %v12398_v34 = vpop.f32.mrb[18].mxu1 }
 0x809   : > { %v11883_v3 = vpop.f32.mrb[224].mxu0  ;;  %v7425_v28 = vadd.f32 %v7424_v24, %v16131_v32  ;;  %8003 = vst.msk [vmem:[#allocation5 + $0x18] sm:$0xf] %vm5538_vm2, %v10922_v35  ;;  %v10923_v12 = vpack.c.bf16 %v7668_v29, %v7668_v29  ;;  %v10924_v44 = vpack.c.bf16 %v7776_v47, %v7776_v47  ;;  %v7665_v49 = vsel %vm708_vm1, %v7663_v38, %v7664_v19  ;;  %v7427_v15 = vpop.f32.mrb[19].mxu1 }
 0x80a   : > { %v11884_v6 = vpop.f32.mrb[225].mxu0  ;;  %8000 = vst.msk [vmem:[#allocation5 + $0xc] sm:$0xf] %vm5538_vm2, %v10919_v22  ;;  %v7775_v30 = vsel %vm708_vm1, %v7664_v19, 0.0  ;;  %v10920_v56 = vpack.c.bf16 %v7665_v49, %v7665_v49  ;;  %vm7541_vm13 = vcmp.gt.f32.partialorder %v7433_v62, 0.0  ;;  %v7436_v33 = vadd.f32 %v12398_v34, %v16145_v1 }
 0x80b   : > { %v11885_v59 = vadd.f32 %v11884_v6, %v11883_v3  ;;  %v11886_v54 = vpop.f32.mrb[226].mxu0  ;;  %v7573_v21 = vmul.f32 0.2, %v7433_v62  ;;  %8004 = vst.msk [vmem:[#allocation5 + $0x1c] sm:$0xf] %vm5538_vm2, %v10923_v12  ;;  %v10921_v32 = vpack.c.bf16 %v7775_v30, %v7775_v30  ;;  %vm7539_vm14 = vcmp.gt.f32.partialorder %v7425_v28, 0.0  ;;  %v16207_v3 = vpop.trf.xlu0 }
 0x80c   : > { %v11887_v41 = vpop.f32.mrb[227].mxu0  ;;  %8005 = vst.msk [vmem:[#allocation5 + $0x20] sm:$0x1] %vm5541_vm3, %v10924_v44  ;;  %v7571_v17 = vmul.f32 0.2, %v7425_v28  ;;  %v7428_v13 = vadd.f32 %v7427_v15, %v16133_v7  ;;  %vm7542_vm15 = vcmp.gt.f32.partialorder %v7436_v33, 0.0 }
 0x80d   : > { %v11888_v45 = vadd.f32 %v11887_v41, %v11886_v54  ;;  %8001 = vst.msk [vmem:[#allocation5 + $0x10] sm:$0xf] %vm5538_vm2, %v10920_v56  ;;  %v7605_v39 = vsel %vm7541_vm13, %v7433_v62, %v7573_v21  ;;  %v16202_v14 = vadd.f32 %v11885_v59, %v7143_v48  ;;  %v7574_v63 = vmul.f32 0.2, %v7436_v33 }
 0x80e   : > { %8002 = vst.msk [vmem:[#allocation5 + $0x14] sm:$0x1] %vm5541_vm3, %v10921_v32  ;;  %v7672_v38 = vrot.slane %v7605_v39, 7  ;;  %v7603_v20 = vsel %vm7539_vm14, %v7425_v28, %v7571_v17  ;;  %vm7540_vm0 = vcmp.gt.f32.partialorder %v7428_v13, 0.0  ;;  %v12401_v40 = vpop.f32.mrb[20].mxu1 }
 0x80f   : > { %v16205_v46 = vadd.f32 %v11888_v45, %v7146_v43  ;;  %v7669_v58 = vrot.slane %v7603_v20, 7  ;;  %v7572_v27 = vmul.f32 0.2, %v7428_v13  ;;  %v7449_v7 = vadd.f32 %v12401_v40, %v16167_v42  ;;  %v7440_v48 = vpop.f32.mrb[21].mxu1 }
 0x810   : > { %v7762_v1 = vsel %vm708_vm1, 0.0, %v7672_v38  ;;  %v7606_v43 = vsel %vm7542_vm15, %v7436_v33, %v7574_v63  ;;  %v7441_v6 = vadd.f32 %v7440_v48, %v16155_v8  ;;  %v12402_v22 = vpop.f32.mrb[22].mxu1 }
 0x811   : > { %v11889_v35 = vpop.f32.mrb[228].mxu0  ;;  %v10928_v62 = vpack.c.bf16 %v7762_v1, %v7762_v1  ;;  %v7761_v24 = vsel %vm708_vm1, 0.0, %v7669_v58  ;;  %v7673_v34 = vrot.slane %v7606_v43, 7  ;;  %v7604_v59 = vsel %vm7540_vm0, %v7428_v13, %v7572_v27  ;;  %v7443_v54 = vpop.f32.mrb[23].mxu1 }
 0x812   : > { %v11890_v19 = vpop.f32.mrb[229].mxu0  ;;  %v10925_v28 = vpack.c.bf16 %v7761_v24, %v7761_v24  ;;  %v7670_v42 = vrot.slane %v7604_v59, 7  ;;  %vm7545_vm4 = vcmp.gt.f32.partialorder %v7449_v7, 0.0  ;;  %v7577_v44 = vmul.f32 0.2, %v7449_v7 }
 0x813   : > { %v16213_v29 = vadd.f32 %v11890_v19, %v11889_v35  ;;  %v11892_v47 = vpop.f32.mrb[230].mxu0  ;;  %8009 = vst.msk [vmem:[#allocation5 + $0x30] sm:$0xf] %vm5538_vm2, %v10928_v62  ;;  %vm7543_vm5 = vcmp.gt.f32.partialorder %v7441_v6, 0.0  ;;  %v7674_v8 = vsel %vm708_vm1, %v7672_v38, %v7673_v34  ;;  %v7778_v15 = vsel %vm708_vm1, %v7673_v34, 0.0 }
 0x814   : > { %v11893_v12 = vpop.f32.mrb[231].mxu0  ;;  %8006 = vst.msk [vmem:[#allocation5 + $0x24] sm:$0xf] %vm5538_vm2, %v10925_v28  ;;  %v7575_v41 = vmul.f32 0.2, %v7441_v6  ;;  %v10929_v30 = vpack.c.bf16 %v7674_v8, %v7674_v8  ;;  %v10930_v56 = vpack.c.bf16 %v7778_v15, %v7778_v15  ;;  %v7671_v21 = vsel %vm708_vm1, %v7669_v58, %v7670_v42 }
 0x815   : > { %v16217_v49 = vadd.f32 %v11893_v12, %v11892_v47  ;;  %v7777_v45 = vsel %vm708_vm1, %v7670_v42, 0.0  ;;  %v16224_v32 = vld [vmem:[#allocation5 + $0x1c] sm:$0xf]  ;;  %v10926_v17 = vpack.c.bf16 %v7671_v21, %v7671_v21  ;;  %v7609_v33 = vsel %vm7545_vm4, %v7449_v7, %v7577_v44  ;;  %v16230_v35 = vld [vmem:[#allocation5 + $0x18] sm:$0xf] }
 0x816   : > { %v10927_v39 = vpack.c.bf16 %v7777_v45, %v7777_v45  ;;  %v7607_v13 = vsel %vm7543_vm5, %v7441_v6, %v7575_v41  ;;  %8010 = vst.msk [vmem:[#allocation5 + $0x34] sm:$0xf] %vm5538_vm2, %v10929_v30  ;;  %v7678_v38 = vrot.slane %v7609_v33, 7  ;;  %v7452_v63 = vadd.f32 %v12402_v22, %v16169_v37  ;;  %v12405_v58 = vpop.f32.mrb[24].mxu1 }
 0x817   : > { %8011 = vst.msk [vmem:[#allocation5 + $0x38] sm:$0x1] %vm5541_vm3, %v10930_v56  ;;  %v7675_v20 = vrot.slane %v7607_v13, 7  ;;  %v7444_v40 = vadd.f32 %v7443_v54, %v16157_v50  ;;  %v16234_v1 = vadd.f32 %v16086_v26, %v16097_v10  ;;  %v16240_v7 = vcombine.low %v16230_v35, %v16224_v32  ;;  %v7456_v48 = vpop.f32.mrb[25].mxu1 }
 0x818   : > { %8007 = vst.msk [vmem:[#allocation5 + $0x28] sm:$0xf] %vm5538_vm2, %v10926_v17  ;;  %v7764_v50 = vsel %vm708_vm1, 0.0, %v7678_v38  ;;  %vm7546_vm9 = vcmp.gt.f32.partialorder %v7452_v63, 0.0  ;;  %v7578_v62 = vmul.f32 0.2, %v7452_v63  ;;  %v7465_v59 = vadd.f32 %v12405_v58, %v16202_v14 }
 0x819   : > { %v11895_v27 = vpop.f32.mrb[232].mxu0  ;;  %8008 = vst.msk [vmem:[#allocation5 + $0x2c] sm:$0x1] %vm5541_vm3, %v10927_v39  ;;  %v7763_v19 = vsel %vm708_vm1, 0.0, %v7675_v20  ;;  %v10934_v43 = vpack.c.bf16 %v7764_v50, %v7764_v50  ;;  %vm7544_vm10 = vcmp.gt.f32.partialorder %v7444_v40, 0.0  ;;  %9172 = vrot.lane.b32.xlu1 %v16240_v7, %s12991_s27  ;;  %v12406_v22 = vpop.f32.mrb[26].mxu1  ;;  %v7457_v54 = vadd.f32 %v7456_v48, %v16181_v31 }
 0x81a   : > { %v11896_v37 = vpop.f32.mrb[233].mxu0  ;;  %v10931_v6 = vpack.c.bf16 %v7763_v19, %v7763_v19  ;;  %v7610_v28 = vsel %vm7546_vm9, %v7452_v63, %v7578_v62  ;;  %v7576_v34 = vmul.f32 0.2, %v7444_v40  ;;  %v7459_v12 = vpop.f32.mrb[27].mxu1  ;;  %v7468_v8 = vadd.f32 %v12406_v22, %v16205_v46  ;;  %v16262_v58 = vld [vmem:[#allocation5 + $0x10] sm:$0xf] }
 0x81b   : > { %v16244_v24 = vadd.f32 %v11896_v37, %v11895_v27  ;;  %v11898_v26 = vpop.f32.mrb[234].mxu0  ;;  %8015 = vst.msk [vmem:[#allocation5 + $0x48] sm:$0xf] %vm5538_vm2, %v10934_v43  ;;  %v7679_v44 = vrot.slane %v7610_v28, 7  ;;  %v7460_v15 = vadd.f32 %v7459_v12, %v16183_v23  ;;  %vm7549_vm11 = vcmp.gt.f32.partialorder %v7465_v59, 0.0 }
 0x81c   : > { %v11899_v47 = vpop.f32.mrb[235].mxu0  ;;  %8012 = vst.msk [vmem:[#allocation5 + $0x3c] sm:$0xf] %vm5538_vm2, %v10931_v6  ;;  %v7608_v41 = vsel %vm7544_vm10, %v7444_v40, %v7576_v34  ;;  %v7581_v30 = vmul.f32 0.2, %v7465_v59  ;;  %vm7547_vm12 = vcmp.gt.f32.partialorder %v7457_v54, 0.0 }
 0x81d   : > { %v16250_v42 = vadd.f32 %v11899_v47, %v11898_v26  ;;  %v7680_v14 = vsel %vm708_vm1, %v7678_v38, %v7679_v44  ;;  %v7780_v31 = vsel %vm708_vm1, %v7679_v44, 0.0  ;;  %v7676_v56 = vrot.slane %v7608_v41, 7 }
 0x81e   : > { %v7579_v21 = vmul.f32 0.2, %v7457_v54  ;;  %v10935_v45 = vpack.c.bf16 %v7680_v14, %v7680_v14  ;;  %v10936_v17 = vpack.c.bf16 %v7780_v31, %v7780_v31  ;;  %v7613_v39 = vsel %vm7549_vm11, %v7465_v59, %v7581_v30  ;;  %v16258_v33 = vpop.f32.mrb[28].mxu1  ;;  %v16281_v14 = vld [vmem:[#allocation5 + $0xc] sm:$0xf] }
 0x81f   : > { %vm7550_vm13 = vcmp.gt.f32.partialorder %v7468_v8, 0.0  ;;  %v7677_v46 = vsel %vm708_vm1, %v7675_v20, %v7676_v56  ;;  %v7779_v23 = vsel %vm708_vm1, %v7676_v56, 0.0  ;;  %v7684_v63 = vrot.slane %v7613_v39, 7  ;;  %v16264_v38 = vpop.f32.mrb[29].mxu1 }
 0x820   : > { %v7611_v40 = vsel %vm7547_vm12, %v7457_v54, %v7579_v21  ;;  %8016 = vst.msk [vmem:[#allocation5 + $0x4c] sm:$0xf] %vm5538_vm2, %v10935_v45  ;;  %v10932_v48 = vpack.c.bf16 %v7677_v46, %v7677_v46  ;;  %v10933_v37 = vpack.c.bf16 %v7779_v23, %v7779_v23  ;;  %v7582_v19 = vmul.f32 0.2, %v7468_v8  ;;  %v16268_v62 = vpop.f32.mrb[30].mxu1 }
 0x821   : > { %v11901_v13 = vpop.f32.mrb[236].mxu0  ;;  %8017 = vst.msk [vmem:[#allocation5 + $0x50] sm:$0x1] %vm5541_vm3, %v10936_v17  ;;  %v7681_v50 = vrot.slane %v7611_v40, 7  ;;  %v7766_v43 = vsel %vm708_vm1, 0.0, %v7684_v63  ;;  %vm7548_vm14 = vcmp.gt.f32.partialorder %v7460_v15, 0.0  ;;  %v7154_v47 = vadd.f32 %v16088_v51, %v16097_v10 }
 0x822   : > { %v11902_v27 = vpop.f32.mrb[237].mxu0  ;;  %v7580_v6 = vmul.f32 0.2, %v7460_v15  ;;  %v7475_v22 = vpop.f32.mrb[31].mxu1  ;;  %8013 = vst.msk [vmem:[#allocation5 + $0x40] sm:$0xf] %vm5538_vm2, %v10932_v48  ;;  %v10940_v34 = vpack.c.bf16 %v7766_v43, %v7766_v43  ;;  %v7614_v54 = vsel %vm7550_vm13, %v7468_v8, %v7582_v19  ;;  %v7159_v51 = vadd.f32 %v16090_v4, %v16097_v10 }
 0x823   : > { %v16270_v20 = vadd.f32 %v11902_v27, %v11901_v13  ;;  %v11904_v26 = vpop.f32.mrb[238].mxu0  ;;  %8014 = vst.msk [vmem:[#allocation5 + $0x44] sm:$0x1] %vm5541_vm3, %v10933_v37  ;;  %v7765_v59 = vsel %vm708_vm1, 0.0, %v7681_v50  ;;  %v7685_v41 = vrot.slane %v7614_v54, 7  ;;  %v7162_v31 = vadd.f32 %v16092_v53, %v16097_v10 }
 0x824   : > { %v11905_v28 = vpop.f32.mrb[239].mxu0  ;;  %v10937_v44 = vpack.c.bf16 %v7765_v59, %v7765_v59  ;;  %v7612_v30 = vsel %vm7548_vm14, %v7460_v15, %v7580_v6  ;;  %8021 = vst.msk [vmem:[#allocation5 + $0x60] sm:$0xf] %vm5538_vm2, %v10940_v34  ;;  %v16290_v21 = vcombine.low %v16281_v14, %v16262_v58  ;;  %v16294_v8 = vadd.f32 %v16103_v18, %v16097_v10  ;;  %v16303_v45 = vld [vmem:[#allocation5 + $0x34] sm:$0xf] }
 0x825   : > { %v16279_v12 = vadd.f32 %v11905_v28, %v11904_v26  ;;  %v7682_v56 = vrot.slane %v7612_v30, 7  ;;  %v16298_v15 = vadd.f32 %v16107_v16, %v16097_v10  ;;  %v7686_v4 = vsel %vm708_vm1, %v7684_v63, %v7685_v41  ;;  %v16319_v48 = vld [vmem:[#allocation5 + $0x30] sm:$0xf]  ;;  %v16363_v30 = vld [vmem:[#allocation5 + $0x24] sm:$0xf] }
 0x826   : > { %8018 = vst.msk [vmem:[#allocation5 + $0x54] sm:$0xf] %vm5538_vm2, %v10937_v44  ;;  %v7782_v53 = vsel %vm708_vm1, %v7685_v41, 0.0  ;;  %v10941_v17 = vpack.c.bf16 %v7686_v4, %v7686_v4  ;;  %9170 = vrot.lane.b32.xlu1 %v16290_v21, %s12991_s27  ;;  %v16309_v18 = vpop.f32.mrb[32].mxu1  ;;  %v16313_v16 = vadd.f32 %v16111_v36, %v16097_v10  ;;  %v16317_v23 = vadd.f32 %v16115_v55, %v16097_v10 }
 0x827   : > { %v10942_v39 = vpack.c.bf16 %v7782_v53, %v7782_v53  ;;  %v7683_v13 = vsel %vm708_vm1, %v7681_v50, %v7682_v56  ;;  %v7781_v46 = vsel %vm708_vm1, %v7682_v56, 0.0  ;;  %v16321_v37 = vpop.f32.mrb[33].mxu1  ;;  %v16325_v50 = vadd.f32 %v16123_v11, %v16097_v10 }
 0x828   : > { %v10938_v40 = vpack.c.bf16 %v7683_v13, %v7683_v13  ;;  %v10939_v27 = vpack.c.bf16 %v7781_v46, %v7781_v46  ;;  %8022 = vst.msk [vmem:[#allocation5 + $0x64] sm:$0xf] %vm5538_vm2, %v10941_v17  ;;  %v16331_v36 = vcombine.low %v16319_v48, %v16303_v45  ;;  %v7320_v55 = vadd.f32 %v16244_v24, %v7159_v51  ;;  %v16336_v43 = vpop.f32.mrb[34].mxu1 }
 0x829   : > { %v11907_v63 = vpop.f32.mrb[240].mxu0  ;;  %8023 = vst.msk [vmem:[#allocation5 + $0x68] sm:$0x1] %vm5541_vm3, %v10942_v39  ;;  %v7312_v26 = vadd.f32 %v16213_v29, %v16234_v1  ;;  %v16340_v11 = vadd.f32 %v16127_v25, %v16097_v10  ;;  %v7323_v34 = vadd.f32 %v16250_v42, %v7162_v31  ;;  %v7315_v24 = vadd.f32 %v16217_v49, %v7154_v47  ;;  %v16348_v59 = vpop.f32.mrb[35].mxu1 }
 0x82a   : > { %v11908_v19 = vpop.f32.mrb[241].mxu0  ;;  %17809 = vst [vmem:[#allocation30_spill] sm:$0xff] %v16331_v36  ;;  %8019 = vst.msk [vmem:[#allocation5 + $0x58] sm:$0xf] %vm5538_vm2, %v10938_v40  ;;  %v16352_v29 = vadd.f32 %v16135_v60, %v16097_v10  ;;  %v8364_v25 = vshrl.u32 %v16230_v35, 16  ;;  %9176 = vrot.lane.b32.xlu1 %v16331_v36, %s12991_s27  ;;  %v7481_v54 = vadd.f32 %v16258_v33, %v7320_v55  ;;  %v8367_v49 = vshll.u32 %v16230_v35, 16 }
 0x82b   : > { %v16342_v6 = vadd.f32 %v11908_v19, %v11907_v63  ;;  %v11910_v28 = vpop.f32.mrb[242].mxu0  ;;  %8020 = vst.msk [vmem:[#allocation5 + $0x5c] sm:$0x1] %vm5541_vm3, %v10939_v27  ;;  %v7473_v44 = vadd.f32 %v16264_v38, %v7312_v26  ;;  %v7484_v42 = vadd.f32 %v16268_v62, %v7323_v34  ;;  %v7476_v47 = vadd.f32 %v7475_v22, %v7315_v24  ;;  %v16365_v60 = vld [vmem:[#allocation5 + $0x28] sm:$0xf] }
 0x82c   : > { %v11911_v1 = vpop.f32.mrb[243].mxu0  ;;  %vm7553_vm15 = vcmp.gt.f32.partialorder %v7481_v54, 0.0  ;;  %v7585_v51 = vmul.f32 0.2, %v7481_v54  ;;  %v8377_v38 = vshrl.u32 %v16224_v32, 16  ;;  %v16370_v35 = vcombine.low %v16363_v30, %v16365_v60 }
 0x82d   : > { %v16359_v41 = vadd.f32 %v11911_v1, %v11910_v28  ;;  %vm7551_vm0 = vcmp.gt.f32.partialorder %v7473_v44, 0.0  ;;  %v7583_v31 = vmul.f32 0.2, %v7473_v44  ;;  %vm7554_vm4 = vcmp.gt.f32.partialorder %v7484_v42, 0.0 }
 0x82e   : > { %v7586_v56 = vmul.f32 0.2, %v7484_v42  ;;  %vm7552_vm5 = vcmp.gt.f32.partialorder %v7476_v47, 0.0  ;;  %v7584_v33 = vmul.f32 0.2, %v7476_v47  ;;  %v7617_v4 = vsel %vm7553_vm15, %v7481_v54, %v7585_v51  ;;  %17810 = vst [vmem:[#allocation6_spill] sm:$0xff] %v16370_v35  ;;  %9174 = vrot.lane.b32.xlu1 %v16370_v35, %s12991_s27 }
 0x82f   : > { %v7615_v53 = vsel %vm7551_vm0, %v7473_v44, %v7583_v31  ;;  %v16372_v62 = vpop.f32.mrb[36].mxu1  ;;  %v7690_v17 = vrot.slane %v7617_v4, 7  ;;  %v8366_v55 = vrot.slane %v8364_v25, 4  ;;  %v8369_v26 = vrot.slane %v8367_v49, 5  ;;  %v16389_v49 = vld [vmem:[#allocation5 + $0x20] sm:$0x1] }
 0x830   : > { %v7687_v39 = vrot.slane %v7615_v53, 7  ;;  %v7618_v13 = vsel %vm7554_vm4, %v7484_v42, %v7586_v56  ;;  %v7616_v46 = vsel %vm7552_vm5, %v7476_v47, %v7584_v33  ;;  %v16374_v63 = vpop.f32.mrb[37].mxu1  ;;  %v8373_v44 = vshll.u32 %v16224_v32, 16 }
 0x831   : > { %v11913_v22 = vpop.f32.mrb[244].mxu0  ;;  %v7691_v27 = vrot.slane %v7618_v13, 7  ;;  %v7688_v19 = vrot.slane %v7616_v46, 7  ;;  %v16378_v28 = vpop.f32.mrb[38].mxu1  ;;  %v7768_v1 = vsel %vm708_vm1, 0.0, %v7690_v17  ;;  %v8370_v46 = vor.u32 %v8369_v26, %v8366_v55 }
 0x832   : > { %v11914_v40 = vpop.f32.mrb[245].mxu0  ;;  %v7767_v54 = vsel %vm708_vm1, 0.0, %v7687_v39  ;;  %v16385_v42 = vpop.f32.mrb[39].mxu1  ;;  %v10946_v51 = vpack.c.bf16 %v7768_v1, %v7768_v1  ;;  %v16402_v1 = vld [vmem:[#allocation5 + $0x40] sm:$0xf]  ;;  %v8343_v55 = vshll.u32 %v16281_v14, 16 }
 0x833   : > { %v16380_v34 = vadd.f32 %v11914_v40, %v11913_v22  ;;  %v11916_v24 = vpop.f32.mrb[246].mxu0  ;;  %v10943_v31 = vpack.c.bf16 %v7767_v54, %v7767_v54  ;;  %v7692_v56 = vsel %vm708_vm1, %v7690_v17, %v7691_v27  ;;  %v7784_v25 = vsel %vm708_vm1, %v7691_v27, 0.0 }
 0x834   : > { %v11917_v47 = vpop.f32.mrb[247].mxu0  ;;  %v10947_v4 = vpack.c.bf16 %v7692_v56, %v7692_v56  ;;  %v10948_v53 = vpack.c.bf16 %v7784_v25, %v7784_v25  ;;  %v7689_v22 = vsel %vm708_vm1, %v7687_v39, %v7688_v19  ;;  %8027 = vst.msk [vmem:[#allocation5 + $0x78] sm:$0xf] %vm5538_vm2, %v10946_v51  ;;  %v7783_v32 = vsel %vm708_vm1, %v7688_v19, 0.0 }
 0x835   : > { %v16391_v33 = vadd.f32 %v11917_v47, %v11916_v24  ;;  %8024 = vst.msk [vmem:[#allocation5 + $0x6c] sm:$0xf] %vm5538_vm2, %v10943_v31  ;;  %v10944_v13 = vpack.c.bf16 %v7689_v22, %v7689_v22  ;;  %v8375_v40 = vrot.slane %v8373_v44, 5  ;;  %v10945_v17 = vpack.c.bf16 %v7783_v32, %v7783_v32 }
 0x836   : > { %8028 = vst.msk [vmem:[#allocation5 + $0x7c] sm:$0xf] %vm5538_vm2, %v10947_v4  ;;  %v8379_v27 = vrot.slane %v8377_v38, 4  ;;  %v8383_v24 = vshll.u32 %v16389_v49, 16  ;;  %v7336_v39 = vadd.f32 %v16342_v6, %v16313_v16  ;;  %v16406_v54 = vadd.f32 %v16139_v61, %v16097_v10  ;;  %v16411_v44 = vpop.f32.mrb[40].mxu1 }
 0x837   : > { %8029 = vst.msk [vmem:[#allocation5 + $0x80] sm:$0x1] %vm5541_vm3, %v10948_v53  ;;  %v8340_v19 = vshrl.u32 %v16281_v14, 16  ;;  %v8371_v26 = vrot.slane %v8370_v46, 4  ;;  %v8353_v38 = vshrl.u32 %v16262_v58, 16  ;;  %v16419_v51 = vpop.f32.mrb[41].mxu1  ;;  %v7328_v53 = vadd.f32 %v16270_v20, %v16294_v8 }
 0x838   : > { %8025 = vst.msk [vmem:[#allocation5 + $0x70] sm:$0xf] %vm5538_vm2, %v10944_v13  ;;  %v8380_v6 = vor.u32 %v8379_v27, %v8375_v40  ;;  %v7497_v10 = vadd.f32 %v16309_v18, %v7336_v39  ;;  %v16417_v61 = vld [vmem:[#allocation5 + $0x3c] sm:$0xf]  ;;  %v8385_v25 = vrot.slane %v8383_v24, 5  ;;  %v16429_v22 = vpop.f32.mrb[42].mxu1  ;;  %v7339_v24 = vadd.f32 %v16359_v41, %v16317_v23 }
 0x839   : > { %8026 = vst.msk [vmem:[#allocation5 + $0x74] sm:$0x1] %vm5541_vm3, %v10945_v17  ;;  %v11919_v16 = vpop.f32.mrb[248].mxu0  ;;  %v8376_v56 = vsel %vm13377_vm7, %v8371_v26, %v8375_v40  ;;  %v16425_v4 = vcombine.low %v16417_v61, %v16402_v1  ;;  %v16433_v17 = vpop.f32.mrb[43].mxu1  ;;  %v7489_v40 = vadd.f32 %v16321_v37, %v7328_v53  ;;  %v7331_v20 = vadd.f32 %v16279_v12, %v16298_v15 }
 0x83a   : > { %v11920_v31 = vpop.f32.mrb[249].mxu0  ;;  %v8381_v13 = vrot.slane %v8380_v6, 4  ;;  %vm7557_vm9 = vcmp.gt.f32.partialorder %v7497_v10, 0.0  ;;  %v7589_v46 = vmul.f32 0.2, %v7497_v10  ;;  %v8342_v8 = vrot.slane %v8340_v19, 4 }
 0x83b   : > { %17811 = vst [vmem:[#allocation9_spill] sm:$0xff] %v16425_v4  ;;  %v16431_v32 = vadd.f32 %v11920_v31, %v11919_v16  ;;  %v11922_v18 = vpop.f32.mrb[250].mxu0  ;;  %9178 = vrot.lane.b32.xlu0 %v16425_v4, %s12991_s27  ;;  %v16446_v6 = vld [vmem:[#allocation5 + $0x14] sm:$0x1]  ;;  %v8345_v31 = vrot.slane %v8343_v55, 5  ;;  %vm7555_vm10 = vcmp.gt.f32.partialorder %v7489_v40, 0.0  ;;  %v7500_v23 = vadd.f32 %v16336_v43, %v7339_v24 }
 0x83c   : > { %v11923_v27 = vpop.f32.mrb[251].mxu0  ;;  %v8386_v26 = vsel %vm13377_vm7, %v8381_v13, %v8385_v25  ;;  %v7621_v16 = vsel %vm7557_vm9, %v7497_v10, %v7589_v46  ;;  %v7587_v37 = vmul.f32 0.2, %v7489_v40  ;;  %v7492_v41 = vadd.f32 %v16348_v59, %v7331_v20 }
 0x83d   : > { %v16442_v39 = vadd.f32 %v11923_v27, %v11922_v18  ;;  %v16448_v47 = vcombine.low %v8376_v56, %v8386_v26  ;;  %v7696_v4 = vrot.slane %v7621_v16, 7  ;;  %v8346_v12 = vor.u32 %v8345_v31, %v8342_v8 }
 0x83e   : > { %v8349_v15 = vshll.u32 %v16262_v58, 16  ;;  %v7619_v10 = vsel %vm7555_vm10, %v7489_v40, %v7587_v37  ;;  %v8355_v25 = vrot.slane %v8353_v38, 4  ;;  %v8359_v55 = vshll.u32 %v16446_v6, 16 }
 0x83f   : > { %17812 = vst [vmem:[#allocation10_spill] sm:$0xff] %v16448_v47  ;;  %9027 = vrot.lane.b32.xlu1 %v16448_v47, %s12991_s27  ;;  %v7770_v19 = vsel %vm708_vm1, 0.0, %v7696_v4  ;;  %v7693_v53 = vrot.slane %v7619_v10, 7  ;;  %vm7558_vm11 = vcmp.gt.f32.partialorder %v7500_v23, 0.0  ;;  %v7590_v18 = vmul.f32 0.2, %v7500_v23 }
 0x840   : > { %v10952_v56 = vpack.c.bf16 %v7770_v19, %v7770_v19  ;;  %v8415_v43 = vshll.u32 %v16319_v48, 16  ;;  %vm7556_vm12 = vcmp.gt.f32.partialorder %v7492_v41, 0.0  ;;  %v7588_v59 = vmul.f32 0.2, %v7492_v41 }
 0x841   : > { %v11925_v13 = vpop.f32.mrb[252].mxu0  ;;  %v8351_v46 = vrot.slane %v8349_v15, 5  ;;  %v7769_v38 = vsel %vm708_vm1, 0.0, %v7693_v53  ;;  %v7622_v40 = vsel %vm7558_vm11, %v7500_v23, %v7590_v18  ;;  %v8347_v37 = vrot.slane %v8346_v12, 4  ;;  %v16469_v18 = vld [vmem:[#allocation5 + $0x4c] sm:$0xf] }
 0x842   : > { %v11926_v27 = vpop.f32.mrb[253].mxu0  ;;  %8033 = vst.msk [vmem:[#allocation5 + $0x90] sm:$0xf] %vm5538_vm2, %v10952_v56  ;;  %v10949_v26 = vpack.c.bf16 %v7769_v38, %v7769_v38  ;;  %v7697_v16 = vrot.slane %v7622_v40, 7  ;;  %v7620_v31 = vsel %vm7556_vm12, %v7492_v41, %v7588_v59  ;;  %v8361_v36 = vrot.slane %v8359_v55, 5 }
 0x843   : > { %v11928_v8 = vpop.f32.mrb[254].mxu0  ;;  %v7694_v10 = vrot.slane %v7620_v31, 7  ;;  %v8356_v47 = vor.u32 %v8355_v25, %v8351_v46  ;;  %v8756_v15 = vrot.slane %v16262_v58, 5  ;;  %v10715_v24 = vrot.slane %v16281_v14, 9  ;;  %v16475_v40 = vld [vmem:[#allocation5 + $0x48] sm:$0xf] }
 0x844   : > { %v11929_v19 = vpop.f32.mrb[255].mxu0  ;;  %8030 = vst.msk [vmem:[#allocation5 + $0x84] sm:$0xf] %vm5538_vm2, %v10949_v26  ;;  %v7698_v20 = vsel %vm708_vm1, %v7696_v4, %v7697_v16  ;;  %v7786_v56 = vsel %vm708_vm1, %v7697_v16, 0.0  ;;  %v16467_v23 = vadd.f32 %v11926_v27, %v11925_v13  ;;  %v8352_v38 = vsel %vm13377_vm7, %v8347_v37, %v8351_v46 }
 0x845   : > { %v10953_v41 = vpack.c.bf16 %v7698_v20, %v7698_v20  ;;  %v10954_v12 = vpack.c.bf16 %v7786_v56, %v7786_v56  ;;  %v7695_v59 = vsel %vm708_vm1, %v7693_v53, %v7694_v10  ;;  %v7785_v25 = vsel %vm708_vm1, %v7694_v10, 0.0 }
 0x846   : > { %v10950_v55 = vpack.c.bf16 %v7695_v59, %v7695_v59  ;;  %v10951_v58 = vpack.c.bf16 %v7785_v25, %v7785_v25  ;;  %v8357_v4 = vrot.slane %v8356_v47, 4  ;;  %v8757_v14 = vsel %vm13362_vm6, %v10715_v24, %v8756_v15  ;;  %v16524_v59 = vld [vmem:[#allocation5 + $0x38] sm:$0x1] }
 0x847   : > { %8034 = vst.msk [vmem:[#allocation5 + $0x94] sm:$0xf] %vm5538_vm2, %v10953_v41  ;;  %v8758_v13 = vrot.slane %v8756_v15, 4  ;;  %v8759_v53 = vrot.slane %v16446_v6, 5  ;;  %v16484_v27 = vcombine.low %v16475_v40, %v16469_v18  ;;  %v16492_v46 = vadd.f32 %v11929_v19, %v11928_v8 }
 0x848   : > { %8035 = vst.msk [vmem:[#allocation5 + $0x98] sm:$0x1] %vm5541_vm3, %v10954_v12  ;;  %8032 = vst.msk [vmem:[#allocation5 + $0x8c] sm:$0x1] %vm5541_vm3, %v10951_v58  ;;  %v8362_v47 = vsel %vm13377_vm7, %v8357_v4, %v8361_v36  ;;  %v7352_v24 = vadd.f32 %v16431_v32, %v16352_v29  ;;  %v7344_v6 = vadd.f32 %v16380_v34, %v16325_v50  ;;  %v17815_v34 = vshrl.u32 %v16319_v48, 16 }
 0x849   : > { %17813 = vst [vmem:[#allocation11_spill] sm:$0xff] %v16484_v27  ;;  %v16486_v20 = vpop.f32.mrb[0].mxu0  ;;  %8031 = vst.msk [vmem:[#allocation5 + $0x88] sm:$0xf] %vm5538_vm2, %v10950_v55  ;;  %v16498_v16 = vcombine.low %v8352_v38, %v8362_v47  ;;  %v8760_v31 = vsel %vm13362_vm6, %v8758_v13, %v8759_v53  ;;  %v7355_v37 = vadd.f32 %v16442_v39, %v16406_v54  ;;  %v8421_v39 = vshll.u32 %v16303_v45, 16 }
 0x84a   : > { %v11932_v26 = vpop.f32.mrb[1].mxu0  ;;  %v7347_v36 = vadd.f32 %v16391_v33, %v16340_v11  ;;  %v16508_v19 = vcombine.low %v8757_v14, %v8760_v31  ;;  %v7513_v29 = vadd.f32 %v16372_v62, %v7352_v24  ;;  %v7505_v50 = vadd.f32 %v16374_v63, %v7344_v6 }
 0x84b   : > { %17814 = vst [vmem:[#allocation13_spill] sm:$0xff] %v16498_v16  ;;  %v16506_v8 = vpop.f32.mrb[2].mxu0  ;;  %v8414_v32 = vrot.slane %v17815_v34, 4  ;;  %9025 = vrot.lane.b32.xlu1 %v16498_v16, %s12991_s27  ;;  %v7516_v54 = vadd.f32 %v16378_v28, %v7355_v37  ;;  %v8417_v33 = vrot.slane %v8415_v43, 5  ;;  %v8391_v41 = vshll.u32 %v16363_v30, 16 }
 0x84c   : > { %v16514_v10 = vpop.f32.mrb[3].mxu0  ;;  %v7508_v11 = vadd.f32 %v16385_v42, %v7347_v36  ;;  %9272 = vrot.lane.b32.xlu0 %v16508_v19, %s12991_s27  ;;  %vm7561_vm13 = vcmp.gt.f32.partialorder %v7513_v29, 0.0  ;;  %v7593_v62 = vmul.f32 0.2, %v7513_v29  ;;  %vm7559_vm14 = vcmp.gt.f32.partialorder %v7505_v50, 0.0 }
 0x84d   : > { %v7591_v63 = vmul.f32 0.2, %v7505_v50  ;;  %vm7562_vm15 = vcmp.gt.f32.partialorder %v7516_v54, 0.0  ;;  %v7594_v15 = vmul.f32 0.2, %v7516_v54  ;;  %v8418_v42 = vor.u32 %v8417_v33, %v8414_v32  ;;  %v16538_v33 = vpop.trf.xlu0 }
 0x84e   : > { %vm7560_vm0 = vcmp.gt.f32.partialorder %v7508_v11, 0.0  ;;  %v7592_v56 = vmul.f32 0.2, %v7508_v11  ;;  %v7625_v12 = vsel %vm7561_vm13, %v7513_v29, %v7593_v62  ;;  %v8423_v14 = vrot.slane %v8421_v39, 5 }
 0x84f   : > { %v7623_v28 = vsel %vm7559_vm14, %v7505_v50, %v7591_v63  ;;  %9180 = vrot.lane.b32.xlu1 %v16484_v27, %s12991_s27  ;;  %v7702_v43 = vrot.slane %v7625_v12, 7  ;;  %v7626_v55 = vsel %vm7562_vm15, %v7516_v54, %v7594_v15  ;;  %v17816_v13 = vshrl.u32 %v16303_v45, 16  ;;  %v16545_v12 = vld [vmem:[#allocation5 + $0x2c] sm:$0x1] }
 0x850   : > { %v7699_v25 = vrot.slane %v7623_v28, 7  ;;  %v7624_v58 = vsel %vm7560_vm0, %v7508_v11, %v7592_v56  ;;  %v7703_v38 = vrot.slane %v7626_v55, 7  ;;  %v8401_v47 = vshrl.u32 %v16365_v60, 16 }
 0x851   : > { %v7700_v4 = vrot.slane %v7624_v58, 7  ;;  %v8427_v53 = vrot.slane %v17816_v13, 4  ;;  %v7772_v24 = vsel %vm708_vm1, 0.0, %v7702_v43  ;;  %v8431_v31 = vshll.u32 %v16524_v59, 16 }
 0x852   : > { %v7771_v6 = vsel %vm708_vm1, 0.0, %v7699_v25  ;;  %v10958_v37 = vpack.c.bf16 %v7772_v24, %v7772_v24  ;;  %v7704_v29 = vsel %vm708_vm1, %v7702_v43, %v7703_v38  ;;  %v7788_v50 = vsel %vm708_vm1, %v7703_v38, 0.0 }
 0x853   : > { %v10955_v36 = vpack.c.bf16 %v7771_v6, %v7771_v6  ;;  %v10959_v34 = vpack.c.bf16 %v7704_v29, %v7704_v29  ;;  %v10960_v32 = vpack.c.bf16 %v7788_v50, %v7788_v50  ;;  %v7701_v54 = vsel %vm708_vm1, %v7699_v25, %v7700_v4  ;;  %v16561_v6 = vpop.trf.xlu0  ;;  %v16568_v29 = vld [vmem:[#allocation5 + $0x78] sm:$0xf] }
 0x854   : > { %v7787_v11 = vsel %vm708_vm1, %v7700_v4, 0.0  ;;  %8039 = vst.msk [vmem:[#allocation5 + $0xa8] sm:$0xf] %vm5538_vm2, %v10958_v37  ;;  %v10956_v39 = vpack.c.bf16 %v7701_v54, %v7701_v54  ;;  %v8419_v63 = vrot.slane %v8418_v42, 4  ;;  %v8428_v15 = vor.u32 %v8427_v53, %v8423_v14 }
 0x855   : > { %8036 = vst.msk [vmem:[#allocation5 + $0x9c] sm:$0xf] %vm5538_vm2, %v10955_v36  ;;  %v10957_v62 = vpack.c.bf16 %v7787_v11, %v7787_v11  ;;  %8040 = vst.msk [vmem:[#allocation5 + $0xac] sm:$0xf] %vm5538_vm2, %v10959_v34  ;;  %v11933_v56 = vadd.f32 %v11932_v26, %v16486_v20  ;;  %v17817_v28 = vshrl.u32 %v16363_v30, 16  ;;  %v8393_v25 = vrot.slane %v8391_v41, 5 }
 0x856   : > { %8041 = vst.msk [vmem:[#allocation5 + $0xb0] sm:$0x1] %vm5541_vm3, %v10960_v32  ;;  %v8429_v55 = vrot.slane %v8428_v15, 4  ;;  %v8433_v58 = vrot.slane %v8431_v31, 5  ;;  %v8397_v42 = vshll.u32 %v16365_v60, 16  ;;  %v8403_v38 = vrot.slane %v8401_v47, 4 }
 0x857   : > { %v8390_v43 = vrot.slane %v17817_v28, 4  ;;  %8037 = vst.msk [vmem:[#allocation5 + $0xa0] sm:$0xf] %vm5538_vm2, %v10956_v39  ;;  %v8424_v13 = vsel %vm13377_vm7, %v8419_v63, %v8423_v14  ;;  %v8407_v53 = vshll.u32 %v16545_v12, 16  ;;  %v16557_v41 = vld [vmem:[#allocation5 + $0x7c] sm:$0xf]  ;;  %v11936_v32 = vadd.f32 %v16514_v10, %v16506_v8 }
 0x858   : > { %8038 = vst.msk [vmem:[#allocation5 + $0xa4] sm:$0x1] %vm5541_vm3, %v10957_v62  ;;  %v8434_v20 = vsel %vm13377_vm7, %v8429_v55, %v8433_v58  ;;  %v8399_v26 = vrot.slane %v8397_v42, 5  ;;  %v12967_v47 = vld [vmem:[%s17642_s11] ss:$0 sm:$0xff]  ;;  %v16575_v34 = vcombine.low %v16568_v29, %v16557_v41  ;;  %v16598_v55 = vpop.trf.xlu0 }
 0x859   : > { %v8394_v4 = vor.u32 %v8393_v25, %v8390_v43  ;;  %v16559_v24 = vcombine.low %v8424_v13, %v8434_v20  ;;  %v7199_v31 = vadd.f32 %v12967_v47, %v16147_v57  ;;  %v7207_v14 = vadd.f32 %v12967_v47, %v16159_v52  ;;  %v16596_v25 = vld [vmem:[#allocation5 + $0x58] sm:$0xf] }
 0x85a   : > { %v8404_v36 = vor.u32 %v8403_v38, %v8399_v26  ;;  %v7210_v50 = vadd.f32 %v12967_v47, %v16163_v0  ;;  %17819 = vst [vmem:[#allocation15_spill] sm:$0xff] %v16575_v34  ;;  %v8409_v57 = vrot.slane %v8407_v53, 5  ;;  %v7202_v39 = vadd.f32 %v12967_v47, %v16151_v2  ;;  %9188 = vrot.lane.b32.xlu0 %v16575_v34, %s12991_s27  ;;  %v16603_v38 = vld [vmem:[#allocation5 + $0x54] sm:$0xf] }
 0x85b   : > { %17818 = vst [vmem:[#allocation14_spill] sm:$0xff] %v16559_v24  ;;  %v8395_v37 = vrot.slane %v8394_v4, 4  ;;  %9031 = vrot.lane.b32.xlu1 %v16559_v24, %s12991_s27  ;;  %v7368_v11 = vadd.f32 %v11933_v56, %v7207_v14  ;;  %v7360_v52 = vadd.f32 %v16467_v23, %v7199_v31 }
 0x85c   : > { %v8405_v54 = vrot.slane %v8404_v36, 4  ;;  %v7371_v0 = vadd.f32 %v11936_v32, %v7210_v50  ;;  %v7363_v4 = vadd.f32 %v16492_v46, %v7202_v39  ;;  %v8463_v36 = vshll.u32 %v16475_v40, 16  ;;  %v16615_v32 = vld [vmem:[#allocation5 + $0x70] sm:$0xf] }
 0x85d   : > { %v8400_v15 = vsel %vm13377_vm7, %v8395_v37, %v8399_v26  ;;  %v7529_v10 = vadd.f32 %v16411_v44, %v7368_v11  ;;  %v7521_v23 = vadd.f32 %v16419_v51, %v7360_v52  ;;  %v16609_v26 = vcombine.low %v16603_v38, %v16596_v25  ;;  %v16621_v52 = vpop.trf.xlu0 }
 0x85e   : > { %v8410_v8 = vsel %vm13377_vm7, %v8405_v54, %v8409_v57  ;;  %v7532_v43 = vadd.f32 %v16429_v22, %v7371_v0  ;;  %v8436_v22 = vshrl.u32 %v16417_v61, 16  ;;  %v7524_v14 = vadd.f32 %v16433_v17, %v7363_v4 }
 0x85f   : > { %v16593_v28 = vcombine.low %v8400_v15, %v8410_v8  ;;  %vm7565_vm4 = vcmp.gt.f32.partialorder %v7529_v10, 0.0  ;;  %v7597_v58 = vmul.f32 0.2, %v7529_v10  ;;  %vm7563_vm5 = vcmp.gt.f32.partialorder %v7521_v23, 0.0  ;;  %17821 = vst [vmem:[#allocation19_spill] sm:$0xff] %v16609_v26 }
 0x860   : > { %v7595_v42 = vmul.f32 0.2, %v7521_v23  ;;  %vm7566_vm9 = vcmp.gt.f32.partialorder %v7532_v43, 0.0  ;;  %v7598_v51 = vmul.f32 0.2, %v7532_v43  ;;  %v8460_v37 = vshrl.u32 %v16475_v40, 16 }
 0x861   : > { %17820 = vst [vmem:[#allocation16_spill] sm:$0xff] %v16593_v28  ;;  %9029 = vrot.lane.b32.xlu1 %v16593_v28, %s12991_s27  ;;  %v7629_v13 = vsel %vm7565_vm4, %v7529_v10, %v7597_v58  ;;  %v8473_v50 = vshrl.u32 %v16469_v18, 16  ;;  %vm7564_vm10 = vcmp.gt.f32.partialorder %v7524_v14, 0.0  ;;  %v7596_v11 = vmul.f32 0.2, %v7524_v14 }
 0x862   : > { %v7627_v20 = vsel %vm7563_vm5, %v7521_v23, %v7595_v42  ;;  %v7708_v53 = vrot.slane %v7629_v13, 7  ;;  %v7630_v31 = vsel %vm7566_vm9, %v7532_v43, %v7598_v51  ;;  %v8439_v15 = vshll.u32 %v16417_v61, 16  ;;  %v16626_v43 = vld [vmem:[#allocation5 + $0x6c] sm:$0xf]  ;;  %v8280_v58 = vld [vmem:[#allocation5 + $0x50] sm:$0x1] }
 0x863   : > { %v7705_v47 = vrot.slane %v7627_v20, 7  ;;  %v7709_v46 = vrot.slane %v7630_v31, 7  ;;  %v7628_v23 = vsel %vm7564_vm10, %v7524_v14, %v7596_v11  ;;  %v8449_v42 = vshrl.u32 %v16402_v1, 16  ;;  %v8284_v20 = vld [vmem:[#allocation5 + $0x60] sm:$0xf] }
 0x864   : > { %v7774_v54 = vsel %vm708_vm1, 0.0, %v7708_v53  ;;  %v7706_v4 = vrot.slane %v7628_v23, 7  ;;  %v16634_v13 = vcombine.low %v16626_v43, %v16615_v32  ;;  %v8462_v31 = vrot.slane %v8460_v37, 4  ;;  %v16644_v23 = vpop.trf.xlu0  ;;  %v8056_v28 = vld [vmem:[%s17643_s12 + $0x8] sm:$0x77] }
 0x865   : > { %v7773_v57 = vsel %vm708_vm1, 0.0, %v7705_v47  ;;  %9182 = vrot.lane.b32.xlu1 %v16609_v26, %s12991_s27  ;;  %v10964_v17 = vpack.c.bf16 %v7774_v54, %v7774_v54  ;;  %v7710_v40 = vsel %vm708_vm1, %v7708_v53, %v7709_v46  ;;  %v7790_v0 = vsel %vm708_vm1, %v7709_v46, 0.0  ;;  %v8285_v54 = vld [vmem:[#allocation5 + $0x64] sm:$0xf] }
 0x866   : > { %v10961_v39 = vpack.c.bf16 %v7773_v57, %v7773_v57  ;;  %v10965_v8 = vpack.c.bf16 %v7710_v40, %v7710_v40  ;;  %v10966_v10 = vpack.c.bf16 %v7790_v0, %v7790_v0  ;;  %17822 = vst [vmem:[#allocation7_spill] sm:$0xff] %v16634_v13  ;;  %v8484_v53 = vshrl.u32 %v16603_v38, 16  ;;  %9186 = vrot.lane.b32.xlu0 %v16634_v13, %s12991_s27  ;;  %v16866_v16 = vld [vmem:[#allocation5 + $0xa4] sm:$0x1] }
 0x867   : > { %8045 = vst.msk [vmem:[#allocation5 + $0xc0] sm:$0xf] %vm5538_vm2, %v10964_v17  ;;  %v8465_v14 = vrot.slane %v8463_v36, 5  ;;  %v8469_v46 = vshll.u32 %v16469_v18, 16  ;;  %v7707_v57 = vsel %vm708_vm1, %v7705_v47, %v7706_v4  ;;  %v7789_v11 = vsel %vm708_vm1, %v7706_v4, 0.0 }
 0x868   : > { %8042 = vst.msk [vmem:[#allocation5 + $0xb4] sm:$0xf] %vm5538_vm2, %v10961_v39  ;;  %8046 = vst.msk [vmem:[#allocation5 + $0xc4] sm:$0xf] %vm5538_vm2, %v10965_v8  ;;  %v8475_v17 = vrot.slane %v8473_v50, 4  ;;  %v8479_v39 = vshll.u32 %v8280_v58, 16  ;;  %v10962_v40 = vpack.c.bf16 %v7707_v57, %v7707_v57  ;;  %v10963_v0 = vpack.c.bf16 %v7789_v11, %v7789_v11 }
 0x869   : > { %8047 = vst.msk [vmem:[#allocation5 + $0xc8] sm:$0x1] %vm5541_vm3, %v10966_v10  ;;  %v8466_v8 = vor.u32 %v8465_v14, %v8462_v31  ;;  %v8471_v10 = vrot.slane %v8469_v46, 5  ;;  %v8487_v37 = vshll.u32 %v16603_v38, 16  ;;  %v8286_v36 = vld [vmem:[#allocation5 + $0x68] sm:$0x1] }
 0x86a   : > { %v8508_v18 = vshrl.u32 %v8284_v20, 16  ;;  %v8511_v63 = vshll.u32 %v8284_v20, 16  ;;  %v8517_v51 = vshll.u32 %v8285_v54, 16  ;;  %v8497_v47 = vshrl.u32 %v16596_v25, 16  ;;  %8043 = vst.msk [vmem:[#allocation5 + $0xb8] sm:$0xf] %vm5538_vm2, %v10962_v40 }
 0x86b   : > { %8044 = vst.msk [vmem:[#allocation5 + $0xbc] sm:$0x1] %vm5541_vm3, %v10963_v0  ;;  %v8467_v50 = vrot.slane %v8466_v8, 4  ;;  %v8476_v58 = vor.u32 %v8475_v17, %v8471_v10  ;;  %v8521_v4 = vshrl.u32 %v8285_v54, 16  ;;  %v8481_v57 = vrot.slane %v8479_v39, 5  ;;  %v16660_v8 = vpop.trf.xlu0 }
 0x86c   : > { %v8510_v31 = vrot.slane %v8508_v18, 4  ;;  %v8513_v14 = vrot.slane %v8511_v63, 5  ;;  %v8519_v46 = vrot.slane %v8517_v51, 5  ;;  %v16650_v11 = vld [vmem:[#allocation5 + $0x44] sm:$0x1]  ;;  %v8527_v56 = vshll.u32 %v8286_v36, 16 }
 0x86d   : > { %v8472_v62 = vsel %vm13377_vm7, %v8467_v50, %v8471_v10  ;;  %v8477_v20 = vrot.slane %v8476_v58, 4  ;;  %v8523_v2 = vrot.slane %v8521_v4, 4  ;;  %v8438_v40 = vrot.slane %v8436_v22, 4 }
 0x86e   : > { %v8514_v44 = vor.u32 %v8513_v14, %v8510_v31  ;;  %v8441_v0 = vrot.slane %v8439_v15, 5  ;;  %v8445_v17 = vshll.u32 %v16402_v1, 16  ;;  %v8451_v51 = vrot.slane %v8449_v42, 4 }
 0x86f   : > { %v8482_v54 = vsel %vm13377_vm7, %v8477_v20, %v8481_v57  ;;  %v8524_v63 = vor.u32 %v8523_v2, %v8519_v46  ;;  %v8455_v39 = vshll.u32 %v16650_v11, 16  ;;  %v8529_v15 = vrot.slane %v8527_v56, 5  ;;  %v16668_v57 = vld [vmem:[#allocation5 + $0x5c] sm:$0x1] }
 0x870   : > { %v16662_v10 = vcombine.low %v8472_v62, %v8482_v54  ;;  %v8515_v18 = vrot.slane %v8514_v44, 4  ;;  %v8442_v36 = vor.u32 %v8441_v0, %v8438_v40  ;;  %v8447_v50 = vrot.slane %v8445_v17, 5 }
 0x871   : > { %v8525_v22 = vrot.slane %v8524_v63, 4  ;;  %v8486_v4 = vrot.slane %v8484_v53, 4  ;;  %v8565_v31 = vshll.u32 %v16557_v41, 16  ;;  %v8489_v14 = vrot.slane %v8487_v37, 5 }
 0x872   : > { %17823 = vst [vmem:[#allocation22_spill] sm:$0xff] %v16662_v10  ;;  %9035 = vrot.lane.b32.xlu1 %v16662_v10, %s12991_s27  ;;  %v8443_v2 = vrot.slane %v8442_v36, 4  ;;  %v8452_v42 = vor.u32 %v8451_v51, %v8447_v50  ;;  %v8520_v62 = vsel %vm13377_vm7, %v8515_v18, %v8519_v46  ;;  %v8493_v20 = vshll.u32 %v16596_v25, 16  ;;  %v16680_v36 = vpop.trf.xlu0  ;;  %v12968_v18 = vld [vmem:[#allocation5 + $0x1c] sm:$0xf] }
 0x873   : > { %v8530_v44 = vsel %vm13377_vm7, %v8525_v22, %v8529_v15  ;;  %v8499_v56 = vrot.slane %v8497_v47, 4  ;;  %v8457_v0 = vrot.slane %v8455_v39, 5  ;;  %v8490_v17 = vor.u32 %v8489_v14, %v8486_v4 }
 0x874   : > { %v16675_v53 = vcombine.low %v8520_v62, %v8530_v44  ;;  %v8453_v40 = vrot.slane %v8452_v42, 4  ;;  %v8556_v54 = vshrl.u32 %v16568_v29, 16  ;;  %v8569_v63 = vshrl.u32 %v16557_v41, 16 }
 0x875   : > { %v8495_v51 = vrot.slane %v8493_v20, 5  ;;  %v8503_v37 = vshll.u32 %v16668_v57, 16  ;;  %v8559_v46 = vshll.u32 %v16568_v29, 16  ;;  %v8448_v47 = vsel %vm13377_vm7, %v8443_v2, %v8447_v50 }
 0x876   : > { %17824 = vst [vmem:[#allocation23_spill] sm:$0xff] %v16675_v53  ;;  %9039 = vrot.lane.b32.xlu0 %v16675_v53, %s12991_s27  ;;  %v8458_v39 = vsel %vm13377_vm7, %v8453_v40, %v8457_v0  ;;  %v8763_v22 = vrot.slane %v12968_v18, 5  ;;  %v8491_v42 = vrot.slane %v8490_v17, 4  ;;  %v8773_v62 = vrot.slane %v16545_v12, 5  ;;  %v16707_v15 = vpop.trf.xlu0  ;;  %v12969_v53 = vld [vmem:[#allocation5 + $0x18] sm:$0xf] }
 0x877   : > { %v16690_v4 = vcombine.low %v8448_v47, %v8458_v39  ;;  %v8500_v14 = vor.u32 %v8499_v56, %v8495_v51  ;;  %v16693_v44 = vrot.slane %v8565_v31, 5  ;;  %v8541_v20 = vshll.u32 %v16615_v32, 16 }
 0x878   : > { %v8545_v58 = vshrl.u32 %v16615_v32, 16  ;;  %v8571_v50 = vrot.slane %v8569_v63, 4  ;;  %v8505_v40 = vrot.slane %v8503_v37, 5  ;;  %v8765_v0 = vrot.slane %v8763_v22, 4 }
 0x879   : > { %17825 = vst [vmem:[#allocation18_spill] sm:$0xff] %v16690_v4  ;;  %9033 = vrot.lane.b32.xlu1 %v16690_v4, %s12991_s27  ;;  %v8501_v2 = vrot.slane %v8500_v14, 4  ;;  %v8558_v18 = vrot.slane %v8556_v54, 4  ;;  %v8561_v47 = vrot.slane %v8559_v46, 5  ;;  %v8532_v17 = vshrl.u32 %v16626_v43, 16 }
 0x87a   : > { %v8535_v56 = vshll.u32 %v16626_v43, 16  ;;  %v8496_v31 = vsel %vm13377_vm7, %v8491_v42, %v8495_v51  ;;  %v8766_v39 = vrot.slane %v16389_v49, 5  ;;  %v16709_v37 = vrot.slane %v8541_v20, 5  ;;  %v16713_v14 = vld [vmem:[#allocation5 + $0x80] sm:$0x1] }
 0x87b   : > { %v8506_v63 = vsel %vm13377_vm7, %v8501_v2, %v8505_v40  ;;  %v8547_v54 = vrot.slane %v8545_v58, 4  ;;  %v10716_v10 = vrot.slane %v12969_v53, 9  ;;  %v16717_v51 = vld [vmem:[#allocation5 + $0x84] sm:$0xf]  ;;  %v8572_v42 = vor.u32 %v8571_v50, %v16693_v44  ;;  %v16737_v58 = vpop.trf.xlu0 }
 0x87c   : > { %v16711_v46 = vcombine.low %v8496_v31, %v8506_v63  ;;  %v8767_v12 = vsel %vm13362_vm6, %v8765_v0, %v8766_v39  ;;  %v8534_v2 = vrot.slane %v8532_v17, 4  ;;  %v8537_v49 = vrot.slane %v8535_v56, 5  ;;  %v16731_v17 = vld [vmem:[#allocation5 + $0x74] sm:$0x1] }
 0x87d   : > { %v8562_v20 = vor.u32 %v8561_v47, %v8558_v18  ;;  %v8764_v53 = vsel %vm13362_vm6, %v10716_v10, %v8763_v22  ;;  %v8575_v31 = vshll.u32 %v16713_v14, 16  ;;  %v8580_v50 = vshrl.u32 %v16717_v51, 16  ;;  %v16734_v18 = vld [vmem:[#allocation5 + $0x88] sm:$0xf] }
 0x87e   : > { %17826 = vst [vmem:[#allocation24_spill] sm:$0xff] %v16711_v46  ;;  %9037 = vrot.lane.b32.xlu0 %v16711_v46, %s12991_s27  ;;  %v16728_v63 = vcombine.low %v8764_v53, %v8767_v12  ;;  %v8573_v47 = vrot.slane %v8572_v42, 4  ;;  %v8548_v39 = vor.u32 %v8547_v54, %v16709_v37  ;;  %v8583_v10 = vshll.u32 %v16717_v51, 16 }
 0x87f   : > { %v8563_v22 = vrot.slane %v8562_v20, 4  ;;  %v8538_v12 = vor.u32 %v8537_v49, %v8534_v2  ;;  %v17828_v53 = vrot.slane %v16365_v60, 5  ;;  %v17829_v40 = vrot.slane %v16363_v30, 9 }
 0x880   : > { %17827 = vst [vmem:[#allocation8_spill] sm:$0xff] %v16728_v63  ;;  %v8577_v0 = vrot.slane %v8575_v31, 5  ;;  %v8551_v42 = vshll.u32 %v16731_v17, 16  ;;  %v8582_v34 = vrot.slane %v8580_v50, 4  ;;  %v8589_v4 = vshll.u32 %v16734_v18, 16 }
 0x881   : > { %v8771_v56 = vsel %vm13362_vm6, %v17829_v40, %v17828_v53  ;;  %v17830_v54 = vmov %v17828_v53  ;;  %v16754_v20 = vcombine.low %v16717_v51, %v16734_v18  ;;  %v8593_v2 = vshrl.u32 %v16734_v18, 16 }
 0x882   : > { %9274 = vrot.lane.b32.xlu0 %v16728_v63, %s12991_s27  ;;  %v8772_v46 = vrot.slane %v17830_v54, 4  ;;  %v8578_v30 = vsel %vm13377_vm7, %v8573_v47, %v8577_v0  ;;  %v8549_v49 = vrot.slane %v8548_v39, 4  ;;  %v8568_v60 = vsel %vm13377_vm7, %v8563_v22, %v16693_v44  ;;  %v16776_v47 = vpop.trf.xlu0 }
 0x883   : > { %17831 = vst [vmem:[#allocation26_spill] sm:$0xff] %v16754_v20  ;;  %v8539_v50 = vrot.slane %v8538_v12, 4  ;;  %v8553_v53 = vrot.slane %v8551_v42, 5  ;;  %v17833_v54 = vrot.slane %v16303_v45, 5  ;;  %v17834_v13 = vrot.slane %v16319_v48, 9  ;;  %v16843_v42 = vpop.permute.xlu1 %9023 }
 0x884   : > { %v8774_v40 = vsel %vm13362_vm6, %v8772_v46, %v8773_v62  ;;  %v8585_v39 = vrot.slane %v8583_v10, 5  ;;  %v17837_v48 = vrot.slane %v16524_v59, 5  ;;  %v8595_v12 = vrot.slane %v8593_v2, 4 }
 0x885   : > { %v16766_v31 = vcombine.low %v8771_v56, %v8774_v40  ;;  %v8778_v0 = vsel %vm13362_vm6, %v17834_v13, %v17833_v54  ;;  %v17835_v62 = vmov %v17833_v54  ;;  %v16781_v56 = vrot.slane %v8589_v4, 5  ;;  %v16803_v40 = vld [vmem:[#allocation5 + $0x8c] sm:$0x1]  ;;  %v16807_v54 = vld [vmem:[#allocation5 + $0x94] sm:$0xf] }
 0x886   : > { %9190 = vrot.lane.b32.xlu0 %v16754_v20, %s12991_s27  ;;  %v8779_v46 = vrot.slane %v17835_v62, 4  ;;  %v16778_v20 = vcombine.low %v8568_v60, %v8578_v30  ;;  %v8554_v22 = vsel %vm13377_vm7, %v8549_v49, %v8553_v53  ;;  %v8787_v10 = vrot.slane %v16650_v11, 5 }
 0x887   : > { %17832 = vst [vmem:[#allocation12_spill] sm:$0xff] %v16766_v31  ;;  %v12527_v4 = vunpack.i.l.bf16 %v16207_v3  ;;  %v8544_v30 = vsel %vm13377_vm7, %v8539_v50, %v16709_v37  ;;  %v12535_v59 = vunpack.i.h.bf16 %v16538_v33  ;;  %v12532_v49 = vunpack.i.l.bf16 %v16538_v33  ;;  %v16815_v50 = vld [vmem:[#allocation5 + $0x9c] sm:$0xf] }
 0x888   : > { %17836 = vst [vmem:[#allocation28_spill] sm:$0xff] %v16778_v20  ;;  %v8781_v13 = vsel %vm13362_vm6, %v8779_v46, %v17837_v48  ;;  %v16801_v2 = vcombine.low %v8544_v30, %v8554_v22  ;;  %v8586_v60 = vor.u32 %v8585_v39, %v8582_v34  ;;  %v12540_v53 = vunpack.i.h.bf16 %v16561_v6  ;;  %v16826_v48 = vld [vmem:[#allocation5 + $0x90] sm:$0xf] }
 0x889   : > { %v16791_v45 = vcombine.low %v8778_v0, %v8781_v13  ;;  %v12537_v11 = vunpack.i.l.bf16 %v16561_v6  ;;  %v16809_v0 = vpop.trf.xlu0  ;;  %v12545_v37 = vunpack.i.h.bf16 %v16598_v55  ;;  %v8596_v33 = vor.u32 %v8595_v12, %v16781_v56 }
 0x88a   : > { %9043 = vrot.lane.b32.xlu0 %v16778_v20, %s12991_s27  ;;  %17838 = vst [vmem:[#allocation17_spill] sm:$0xff] %v16801_v2  ;;  %v17839_v62 = vrot.slane %v16402_v1, 5  ;;  %v17840_v34 = vrot.slane %v16417_v61, 9  ;;  %v12542_v22 = vunpack.i.l.bf16 %v16598_v55  ;;  %v8599_v13 = vshll.u32 %v16803_v40, 16  ;;  %v16834_v61 = vld [vmem:[#allocation5 + $0xa0] sm:$0xf] }
 0x88b   : > { %v16831_v12 = vcombine.low %v16826_v48, %v16807_v54  ;;  %v12550_v30 = vunpack.i.h.bf16 %v16621_v52  ;;  %v8587_v44 = vrot.slane %v8586_v60, 4  ;;  %v12547_v1 = vunpack.i.l.bf16 %v16621_v52 }
 0x88c   : > { %v8785_v6 = vsel %vm13362_vm6, %v17840_v34, %v17839_v62  ;;  %v17841_v46 = vmov %v17839_v62  ;;  %v8628_v55 = vshrl.u32 %v16815_v50, 16  ;;  %v8631_v34 = vshll.u32 %v16815_v50, 16 }
 0x88d   : > { %v8786_v39 = vrot.slane %v17841_v46, 4  ;;  %17842 = vst [vmem:[#allocation31_spill] sm:$0xff] %v16831_v12  ;;  %v12555_v60 = vunpack.i.h.bf16 %v16644_v23  ;;  %v12552_v20 = vunpack.i.l.bf16 %v16644_v23  ;;  %v8601_v24 = vrot.slane %v8599_v13, 5 }
 0x88e   : > { %9041 = vrot.lane.b32.xlu0 %v16801_v2, %s12991_s27  ;;  %v8597_v2 = vrot.slane %v8596_v33, 4  ;;  %v8641_v52 = vshrl.u32 %v16834_v61, 16  ;;  %v8232_v26 = vpack.c.bf16 %v12532_v49, %v12527_v4  ;;  %v17843_v23 = vunpack.i.h.bf16 %v16207_v3 }
 0x88f   : > { %v8788_v62 = vsel %vm13362_vm6, %v8786_v39, %v8787_v10  ;;  %v12560_v10 = vunpack.i.h.bf16 %v16660_v8  ;;  %v16851_v39 = vpop.trf.xlu0  ;;  %v16864_v13 = vcombine.low %v16815_v50, %v16834_v61  ;;  %v8630_v27 = vrot.slane %v8628_v55, 4 }
 0x890   : > { %v16841_v46 = vcombine.low %v8785_v6, %v8788_v62  ;;  %v8592_v6 = vsel %vm13377_vm7, %v8587_v44, %v16781_v56  ;;  %v12557_v62 = vunpack.i.l.bf16 %v16660_v8  ;;  %v8224_v33 = vpack.c.bf16 %v12535_v59, %v17843_v23  ;;  %11957 = vmatprep.subr.bf16.mxu0 %v8232_v26  ;;  %v16874_v23 = vpop.permute.xlu1 %9172 }
 0x891   : > { %v8633_v35 = vrot.slane %v8631_v34, 5  ;;  %v8637_v44 = vshll.u32 %v16834_v61, 16  ;;  %v8602_v8 = vsel %vm13377_vm7, %v8597_v2, %v8601_v24  ;;  %v12562_v56 = vunpack.i.l.bf16 %v16680_v36 }
 0x892   : > { %9276 = vrot.lane.b32.xlu0 %v16766_v31, %s12991_s27  ;;  %v8061_v3 = vcombine.high %v8056_v28, %v8056_v28  ;;  %v8643_v4 = vrot.slane %v8641_v52, 4  ;;  %11958 = vmatpush3.bf16.msra.mxu0 %v8224_v33  ;;  %v8233_v59 = vpack.c.bf16 %v12542_v22, %v12537_v11  ;;  %v8225_v49 = vpack.c.bf16 %v12545_v37, %v12540_v53  ;;  %v16906_v33 = vld [vmem:[#allocation5 + $0xb8] sm:$0xf] }
 0x893   : > { %v8647_v55 = vshll.u32 %v16866_v16, 16  ;;  %v17844_v34 = vrot.slane %v16596_v25, 5  ;;  %v17845_v31 = vrot.slane %v16603_v38, 9  ;;  %v8634_v26 = vor.u32 %v8633_v35, %v8630_v27  ;;  %v16887_v53 = vpop.trf.xlu0 }
 0x894   : > { %v16885_v63 = vrot.slane %v8637_v44, 5  ;;  %11959 = vmatprep.subr.bf16.mxu0 %v8233_v59  ;;  %v8234_v11 = vpack.c.bf16 %v12552_v20, %v12547_v1  ;;  %v16891_v37 = vcombine.low %v8592_v6, %v8602_v8  ;;  %v12565_v38 = vunpack.i.h.bf16 %v16680_v36  ;;  %v16900_v20 = vld [vmem:[#allocation5 + $0xb4] sm:$0xf] }
 0x895   : > { %v17846_v24 = vmov %v17844_v34  ;;  %v12570_v22 = vunpack.i.h.bf16 %v16707_v15  ;;  %v12567_v27 = vunpack.i.l.bf16 %v16707_v15  ;;  %v12606_v25 = vpack.i.bf16 %v8056_v28, %v8061_v3 }
 0x896   : > { %9192 = vrot.lane.b32.xlu0 %v16831_v12, %s12991_s27  ;;  %v8799_v12 = vsel %vm13362_vm6, %v17845_v31, %v17844_v34  ;;  %v8800_v2 = vrot.slane %v17846_v24, 4  ;;  %v17847_v31 = vrot.slane %v16668_v57, 5  ;;  %11960 = vmatpush3.bf16.msra.mxu0 %v8225_v49  ;;  %v8226_v52 = vpack.c.bf16 %v12555_v60, %v12550_v30 }
 0x897   : > { %v12575_v6 = vunpack.i.h.bf16 %v16737_v58  ;;  %v12572_v36 = vunpack.i.l.bf16 %v16737_v58  ;;  %11961 = vmatprep.subr.bf16.mxu0 %v8234_v11  ;;  %v8635_v57 = vrot.slane %v8634_v26, 4  ;;  %v8644_v44 = vor.u32 %v8643_v4, %v16885_v63  ;;  %v16926_v34 = vpop.trf.xlu0 }
 0x898   : > { %v8802_v35 = vsel %vm13362_vm6, %v8800_v2, %v17847_v31  ;;  %v8649_v8 = vrot.slane %v8647_v55, 5  ;;  %v8235_v59 = vpack.c.bf16 %v12562_v56, %v12557_v62  ;;  %v16909_v15 = vpop.permute.xlu1 %9170  ;;  %v8676_v28 = vshrl.u32 %v16900_v20, 16 }
 0x899   : > { %v16902_v1 = vcombine.low %v8799_v12, %v8802_v35  ;;  %v8679_v12 = vshll.u32 %v16900_v20, 16  ;;  %v17848_v30 = vrot.slane %v16615_v32, 5  ;;  %v17849_v58 = vrot.slane %v16626_v43, 9 }
 0x89a   : > { %9278 = vrot.lane.b32.xlu0 %v16791_v45, %s12991_s27  ;;  %v8689_v62 = vshrl.u32 %v16906_v33, 16  ;;  %v12577_v56 = vunpack.i.l.bf16 %v16776_v47  ;;  %11962 = vmatpush3.bf16.msra.mxu0 %v8226_v52  ;;  %v8227_v49 = vpack.c.bf16 %v12565_v38, %v12560_v10  ;;  %v8815_v55 = vrot.slane %v16731_v17, 5 }
 0x89b   : > { %v8813_v60 = vsel %vm13362_vm6, %v17849_v58, %v17848_v30  ;;  %v17850_v3 = vmov %v17848_v30  ;;  %v12582_v24 = vunpack.i.l.bf16 %v16809_v0  ;;  %11963 = vmatprep.subr.bf16.mxu0 %v8235_v59  ;;  %v8236_v43 = vpack.c.bf16 %v12572_v36, %v12567_v27 }
 0x89c   : > { %v8814_v4 = vrot.slane %v17850_v3, 4  ;;  %v8645_v2 = vrot.slane %v8644_v44, 4  ;;  %v12580_v26 = vunpack.i.h.bf16 %v16776_v47  ;;  %v8685_v32 = vshll.u32 %v16906_v33, 16  ;;  %v16947_v44 = vpop.permute.xlu1 %9176 }
 0x89d   : > { %v17851_v17 = vrot.slane %v16557_v41, 5  ;;  %v17852_v38 = vrot.slane %v16568_v29, 9  ;;  %v8822_v27 = vrot.slane %v16713_v14, 5  ;;  %v12585_v52 = vunpack.i.h.bf16 %v16809_v0  ;;  %v12601_v0 = vpop.trf.xlu0 }
 0x89e   : > { %9045 = vrot.lane.b32.xlu0 %v16891_v37, %s12991_s27  ;;  %v8816_v11 = vsel %vm13362_vm6, %v8814_v4, %v8815_v55  ;;  %11964 = vmatpush3.bf16.msra.mxu0 %v8227_v49  ;;  %v8228_v36 = vpack.c.bf16 %v12575_v6, %v12570_v22  ;;  %v12592_v59 = vunpack.i.l.bf16 %v16887_v53  ;;  %v8237_v30 = vpack.c.bf16 %v12582_v24, %v12577_v56  ;;  %v16962_v4 = vld [vmem:[#allocation5 + $0xbc] sm:$0x1] }
 0x89f   : > { %v16935_v10 = vcombine.low %v8813_v60, %v8816_v11  ;;  %v8820_v31 = vsel %vm13362_vm6, %v17852_v38, %v17851_v17  ;;  %v17853_v47 = vmov %v17851_v17  ;;  %11965 = vmatprep.subr.bf16.mxu0 %v8236_v43  ;;  %v8650_v41 = vsel %vm13377_vm7, %v8645_v2, %v8649_v8  ;;  %v12971_v11 = vld [vmem:[#allocation5 + $0x4] sm:$0xf]  ;;  %v12972_v38 = vld [vmem:[#allocation5 + $0x8] sm:$0x1] }
 0x8a0   : > { %v8821_v35 = vrot.slane %v17853_v47, 4  ;;  %v8687_v58 = vrot.slane %v8685_v32, 5  ;;  %v8691_v14 = vrot.slane %v8689_v62, 4  ;;  %v8640_v22 = vsel %vm13377_vm7, %v8635_v57, %v16885_v63  ;;  %v16969_v32 = vpop.permute.xlu1 %9174 }
 0x8a1   : > { %v8678_v6 = vrot.slane %v8676_v28, 4  ;;  %v8681_v3 = vrot.slane %v8679_v12, 5  ;;  %v12590_v56 = vunpack.i.h.bf16 %v16851_v39  ;;  %v12595_v8 = vunpack.i.h.bf16 %v16887_v53  ;;  %v12970_v12 = vld [vmem:[#allocation5] sm:$0xf] }
 0x8a2   : > { %9194 = vrot.lane.b32.xlu0 %v16864_v13, %s12991_s27  ;;  %12607 = vxpose.xlu1.b32.start.end [1/1] (short) %v12606_v25, 128  ;;  %v12587_v25 = vunpack.i.l.bf16 %v16851_v39  ;;  %v8823_v29 = vsel %vm13362_vm6, %v8821_v35, %v8822_v27  ;;  %v8229_v62 = vpack.c.bf16 %v12585_v52, %v12580_v26  ;;  %v16966_v49 = vcombine.low %v8640_v22, %v8650_v41 }
 0x8a3   : > { %v16955_v60 = vcombine.low %v8820_v31, %v8823_v29  ;;  %11966 = vmatpush3.bf16.msra.mxu0 %v8228_v36  ;;  %v12597_v55 = vunpack.i.l.bf16 %v16926_v34  ;;  %v12602_v24 = vunpack.i.l.bf16 %v12601_v0  ;;  %v8692_v2 = vor.u32 %v8691_v14, %v8687_v58 }
 0x8a4   : > { %11967 = vmatprep.subr.bf16.mxu0 %v8237_v30  ;;  %v8238_v43 = vpack.c.bf16 %v12592_v59, %v12587_v25  ;;  %v8682_v63 = vor.u32 %v8681_v3, %v8678_v6  ;;  %v8695_v39 = vshll.u32 %v16962_v4, 16  ;;  %v12600_v53 = vunpack.i.h.bf16 %v16926_v34 }
 0x8a5   : > { %v12605_v57 = vunpack.i.h.bf16 %v12601_v0  ;;  %v8230_v28 = vpack.c.bf16 %v12595_v8, %v12590_v56  ;;  %v10714_v26 = vrot.slane %v12970_v12, 9  ;;  %v8749_v17 = vrot.slane %v12971_v11, 5 }
 0x8a6   : > { %9280 = vrot.lane.b32.xlu0 %v16841_v46, %s12991_s27  ;;  %v8752_v31 = vrot.slane %v12972_v38, 5  ;;  %v16977_v47 = vcombine.low %v16900_v20, %v16906_v33  ;;  %v8239_v35 = vpack.c.bf16 %v12602_v24, %v12597_v55  ;;  %v8693_v27 = vrot.slane %v8692_v2, 4 }
 0x8a7   : > { %11968 = vmatpush3.bf16.msra.mxu0 %v8229_v62  ;;  %v8750_v52 = vsel %vm13362_vm6, %v10714_v26, %v8749_v17  ;;  %v8751_v34 = vrot.slane %v8749_v17, 4  ;;  %v8683_v36 = vrot.slane %v8682_v63, 4  ;;  %v8697_v25 = vrot.slane %v8695_v39, 5 }
 0x8a8   : > { %11969 = vmatprep.subr.bf16.mxu0 %v8238_v43  ;;  %v8231_v59 = vpack.c.bf16 %v12605_v57, %v12600_v53  ;;  %v10732_v0 = vcombine.low %v12970_v12, %v12971_v11  ;;  %v8826_v22 = vrot.slane %v16734_v18, 5  ;;  %v8833_v8 = vrot.slane %v16807_v54, 5  ;;  %v17012_v43 = vld [vmem:[#allocation5 + $0xc0] sm:$0xf]  ;;  %v17028_v12 = vld [vmem:[#allocation5 + $0xac] sm:$0xf] }
 0x8a9   : > { %v8753_v29 = vsel %vm13362_vm6, %v8751_v34, %v8752_v31  ;;  %v8698_v14 = vsel %vm13377_vm7, %v8693_v27, %v8697_v25  ;;  %v8688_v56 = vsel %vm13377_vm7, %v8683_v36, %v8687_v58  ;;  %v9208_v58 = vsel %vm2169_vm8, %v16508_v19, %v16874_v23 }
 0x8aa   : > { %9049 = vrot.lane.b32.xlu0 %v16966_v49, %s12991_s27  ;;  %v10764_v41 = vcombine.low %v8750_v52, %v8753_v29  ;;  %v16999_v62 = vcombine.low %v8688_v56, %v8698_v14  ;;  %v9057_v18 = vsel %vm2169_vm8, %v10732_v0, %v16843_v42  ;;  %v8835_v55 = vrot.slane %v8833_v8, 4  ;;  %v17015_v42 = vld [vmem:[#allocation5 + $0xc4] sm:$0xf] }
 0x8ab   : > { %11970 = vmatpush3.bf16.msra.mxu0 %v8230_v28  ;;  %v8829_v24 = vrot.slane %v16803_v40, 5  ;;  %v10725_v63 = vrot.slane %v16717_v51, 9  ;;  %v8604_v39 = vshrl.u32 %v16826_v48, 16  ;;  %v10726_v23 = vrot.slane %v16826_v48, 9 }
 0x8ac   : > { %11971 = vmatprep.subr.bf16.mxu0 %v8239_v35  ;;  %v9204_v6 = vsel %vm2169_vm8, %v10764_v41, %v16909_v15  ;;  %v8828_v15 = vrot.slane %v8826_v22, 4  ;;  %v8840_v53 = vrot.slane %v16834_v61, 5  ;;  %v8860_v57 = vshrl.u32 %v17012_v43, 16  ;;  %v17059_v41 = vld [vmem:[#allocation5 + $0xb0] sm:$0x1] }
 0x8ad   : > { %9461 = vmatprep.mubr.bf16.mxu0 %v9204_v6  ;;  %v8863_v51 = vshll.u32 %v17012_v43, 16  ;;  %v8869_v26 = vshll.u32 %v17015_v42, 16  ;;  %v8873_v11 = vshrl.u32 %v17015_v42, 16  ;;  %v8607_v38 = vshll.u32 %v16826_v48, 16  ;;  %v17854_v48 = vld [vmem:[#allocation8_spill] sm:$0xff] }
 0x8ae   : > { %9198 = vrot.lane.b32.xlu0 %v16977_v47, %s12991_s27  ;;  %v8830_v19 = vsel %vm13362_vm6, %v8828_v15, %v8829_v24  ;;  %v8617_v31 = vshrl.u32 %v16807_v54, 16  ;;  %v8827_v61 = vsel %vm13362_vm6, %v10725_v63, %v8826_v22  ;;  %v10727_v35 = vrot.slane %v16815_v50, 9  ;;  %v17063_v6 = vld [vmem:[#allocation5 + $0xc8] sm:$0x1] }
 0x8af   : > { %11972 = vmatpush3.bf16.msra.mxu0 %v8231_v59  ;;  %v17042_v27 = vcombine.low %v8827_v61, %v8830_v19  ;;  %v8834_v52 = vsel %vm13362_vm6, %v10726_v23, %v8833_v8  ;;  %v8843_v34 = vrot.slane %v16866_v16, 5  ;;  %v9212_v36 = vsel %vm2169_vm8, %v17854_v48, %v16969_v32  ;;  %v17855_v61 = vld [vmem:[#allocation12_spill] sm:$0xff] }
 0x8b0   : > { %v8841_v50 = vsel %vm13362_vm6, %v10727_v35, %v8840_v53  ;;  %v8842_v59 = vrot.slane %v8840_v53, 4  ;;  %v8847_v29 = vrot.slane %v17028_v12, 5  ;;  %v8862_v16 = vrot.slane %v8860_v57, 4  ;;  %v17077_v57 = vld [vmem:[#allocation5 + $0xa8] sm:$0xf] }
 0x8b1   : > { %v9028_v30 = vpop.permute.xlu1 %9027  ;;  %v8865_v14 = vrot.slane %v8863_v51, 5  ;;  %v17061_v0 = vrot.slane %v8869_v26, 5  ;;  %v8875_v22 = vrot.slane %v8873_v11, 4  ;;  %v8606_v56 = vrot.slane %v8604_v39, 4 }
 0x8b2   : > { %9284 = vrot.lane.b32.xlu0 %v16902_v1, %s12991_s27  ;;  %v16994_v3 = vsel %vm2169_vm8, %v16240_v7, %v9028_v30  ;;  %v17006_v7 = vld [vmem:[#allocation5 + $0x98] sm:$0x1]  ;;  %9462 = vmatmul.mubr.bf16.vlgmr.msra.gmra.mrb[4].mxu0 %v9057_v18  ;;  %v17057_v30 = vld [vmem:[#allocation5 + $0xd0] sm:$0xf]  ;;  %v8609_v8 = vrot.slane %v8607_v38, 5  ;;  %v8613_v18 = vshll.u32 %v16807_v54, 16  ;;  %v9216_v35 = vsel %vm2169_vm8, %v17855_v61, %v16947_v44 }
 0x8b3   : > { %9622 = vmatprep.mubr.bf16.mxu1 %v16994_v3  ;;  %9469 = vmatprep.mubr.bf16.mxu0 %v9208_v58  ;;  %v8836_v2 = vrot.slane %v17006_v7, 5  ;;  %v8903_v58 = vshll.u32 %v17057_v30, 16  ;;  %v8619_v24 = vrot.slane %v8617_v31, 4  ;;  %v8623_v39 = vshll.u32 %v17006_v7, 16 }
 0x8b4   : > { %v8610_v63 = vor.u32 %v8609_v8, %v8606_v56  ;;  %v8615_v19 = vrot.slane %v8613_v18, 5  ;;  %v8849_v23 = vrot.slane %v8847_v29, 4  ;;  %v8850_v54 = vrot.slane %v17059_v41, 5 }
 0x8b5   : > { %v8837_v40 = vsel %vm13362_vm6, %v8835_v55, %v8836_v2  ;;  %v8907_v55 = vshrl.u32 %v17057_v30, 16  ;;  %v8844_v2 = vsel %vm13362_vm6, %v8842_v59, %v8843_v34  ;;  %v8879_v53 = vshll.u32 %v17063_v6, 16 }
 0x8b6   : > { %9053 = vrot.lane.b32.xlu0 %v16999_v62, %s12991_s27  ;;  %v17052_v25 = vcombine.low %v8834_v52, %v8837_v40  ;;  %v8866_v40 = vor.u32 %v8865_v14, %v8862_v16  ;;  %v8611_v11 = vrot.slane %v8610_v63, 4  ;;  %v8905_v7 = vrot.slane %v8903_v58, 5 }
 0x8b7   : > { %v8909_v31 = vrot.slane %v8907_v55, 4  ;;  %v17092_v59 = vcombine.low %v17012_v43, %v17015_v42  ;;  %v17094_v16 = vcombine.low %v8841_v50, %v8844_v2  ;;  %v10728_v14 = vrot.slane %v17077_v57, 9 }
 0x8b8   : > { %v8616_v52 = vsel %vm13377_vm7, %v8611_v11, %v8615_v19  ;;  %v8881_v8 = vrot.slane %v8879_v53, 5 }
 0x8b9   : > { %v8848_v50 = vsel %vm13362_vm6, %v10728_v14, %v8847_v29  ;;  %v8910_v55 = vor.u32 %v8909_v31, %v8905_v7  ;;  %v8857_v29 = vrot.slane %v16962_v4, 5  ;;  %v17856_v4 = vld [vmem:[#allocation6_spill] sm:$0xff]  ;;  %v8891_v14 = vrot.slane %v17063_v6, 5 }
 0x8ba   : > { %9288 = vrot.lane.b32.xlu0 %v16935_v10, %s12991_s27 }
 0x8bd   : > { %v9026_v28 = vpop.permute.xlu1 %9025 }
 0x8be   : > { %v9061_v17 = vsel %vm2169_vm8, %v16290_v21, %v9026_v28  ;;  %9290 = vrot.lane.b32.xlu0 %v16955_v60, %s12991_s27  ;;  %v17047_v21 = vld [vmem:[#allocation5 + $0xcc] sm:$0xf]  ;;  %v8876_v28 = vor.u32 %v8875_v22, %v17061_v0  ;;  %v17097_v22 = vld [vmem:[#allocation5 + $0xd4] sm:$0x1] }
 0x8bf   : > { %9470 = vmatmul.mubr.bf16.gmra.mrb[8].mxu0 %v9061_v17  ;;  %v8894_v32 = vshrl.u32 %v17047_v21, 16  ;;  %v8897_v15 = vshll.u32 %v17047_v21, 16  ;;  %v8620_v17 = vor.u32 %v8619_v24, %v8615_v19  ;;  %v8913_v24 = vshll.u32 %v17097_v22, 16 }
 0x8c0   : > { %9477 = vmatprep.mubr.bf16.mxu0 %v9212_v36  ;;  %v8625_v36 = vrot.slane %v8623_v39, 5  ;;  %v8877_v44 = vrot.slane %v8876_v28, 4  ;;  %v9179_v28 = vpop.permute.xlu0 %9178 }
 0x8c1   : > { %v8896_v51 = vrot.slane %v8894_v32, 4  ;;  %v17080_v26 = vpop.permute.xlu1 %9180  ;;  %v8899_v38 = vrot.slane %v8897_v15, 5  ;;  %v8621_v34 = vrot.slane %v8620_v17, 4  ;;  %v8854_v32 = vrot.slane %v16906_v33, 5 }
 0x8c2   : > { %9292 = vrot.lane.b32.xlu0 %v17042_v27, %s12991_s27  ;;  %v8867_v15 = vrot.slane %v8866_v40, 4  ;;  %v8882_v33 = vsel %vm13377_vm7, %v8877_v44, %v8881_v8  ;;  %v8915_v40 = vrot.slane %v8913_v24, 5  ;;  %v8888_v17 = vrot.slane %v17015_v42, 5  ;;  %v17857_v44 = vld [vmem:[#allocation30_spill] sm:$0xff]  ;;  %v12973_v8 = vld [vmem:[#allocation5 + $0x4c] sm:$0xf] }
 0x8c3   : > { %v8626_v56 = vsel %vm13377_vm7, %v8621_v34, %v8625_v36  ;;  %v8900_v58 = vor.u32 %v8899_v38, %v8896_v51  ;;  %v8856_v19 = vrot.slane %v8854_v32, 4  ;;  %v10729_v51 = vrot.slane %v16900_v20, 9  ;;  %v12974_v24 = vld [vmem:[#allocation5 + $0x50] sm:$0x1] }
 0x8c4   : > { %v17108_v18 = vcombine.low %v8616_v52, %v8626_v56  ;;  %v8872_v39 = vsel %vm13377_vm7, %v8867_v15, %v17061_v0  ;;  %v9220_v42 = vsel %vm2169_vm8, %v16791_v45, %v9179_v28  ;;  %v8890_v34 = vrot.slane %v8888_v17, 4 }
 0x8c5   : > { %v17121_v53 = vcombine.low %v8872_v39, %v8882_v33  ;;  %v8858_v11 = vsel %vm13362_vm6, %v8856_v19, %v8857_v29  ;;  %v8855_v31 = vsel %vm13362_vm6, %v10729_v51, %v8854_v32  ;;  %v9224_v6 = vsel %vm2169_vm8, %v16841_v46, %v17080_v26  ;;  %v12975_v33 = vld [vmem:[#allocation5 + $0x48] sm:$0xf]  ;;  %v17859_v51 = vld [vmem:[#allocation11_spill] sm:$0xff] }
 0x8c6   : > { %9294 = vrot.lane.b32.xlu0 %v17052_v25, %s12991_s27  ;;  %v17142_v52 = vcombine.low %v8855_v31, %v8858_v11  ;;  %v8791_v15 = vrot.slane %v12973_v8, 5  ;;  %v10720_v19 = vrot.slane %v12975_v33, 9  ;;  %v8655_v31 = vshll.u32 %v17077_v57, 16 }
 0x8c7   : > { %9478 = vmatmul.mubr.bf16.gmra.mrb[12].mxu0 %v16994_v3  ;;  %v8851_v3 = vsel %vm13362_vm6, %v8849_v23, %v8850_v54  ;;  %v8901_v23 = vrot.slane %v8900_v58, 4  ;;  %v8911_v54 = vrot.slane %v8910_v55, 4 }
 0x8c8   : > { %9485 = vmatprep.mubr.bf16.mxu0 %v9216_v35  ;;  %v17111_v63 = vcombine.low %v8848_v50, %v8851_v3  ;;  %v8892_v3 = vsel %vm13362_vm6, %v8890_v34, %v8891_v14  ;;  %v8793_v58 = vrot.slane %v8791_v15, 4  ;;  %v8792_v26 = vsel %vm13362_vm6, %v10720_v19, %v8791_v15 }
 0x8c9   : > { %v8906_v35 = vsel %vm13377_vm7, %v8901_v23, %v8905_v7  ;;  %v8916_v20 = vsel %vm13377_vm7, %v8911_v54, %v8915_v40  ;;  %v10730_v7 = vrot.slane %v17012_v43, 9  ;;  %v17858_v54 = vld [vmem:[#allocation9_spill] sm:$0xff] }
 0x8ca   : > { %9296 = vrot.lane.b32.xlu0 %v17094_v16, %s12991_s27  ;;  %v10784_v36 = vcombine.low %v8906_v35, %v8916_v20  ;;  %v12976_v35 = vld [vmem:[#allocation5 + $0x60] sm:$0xf]  ;;  %v12977_v20 = vld [vmem:[#allocation5 + $0x64] sm:$0xf] }
 0x8cb   : > { %v8889_v56 = vsel %vm13362_vm6, %v10730_v7, %v8888_v17  ;;  %v8661_v17 = vshll.u32 %v17028_v12, 16  ;;  %v8657_v7 = vrot.slane %v8655_v31, 5  ;;  %v10722_v33 = vrot.slane %v12976_v35, 9 }
 0x8cc   : > { %v17161_v50 = vcombine.low %v8889_v56, %v8892_v3  ;;  %v8671_v56 = vshll.u32 %v17059_v41, 16 }
 0x8cd   : > { %v9032_v2 = vpop.permute.xlu1 %9031  ;;  %v8663_v34 = vrot.slane %v8661_v17, 5 }
 0x8ce   : > { %9298 = vrot.lane.b32.xlu0 %v17111_v63, %s12991_s27  ;;  %v17153_v32 = vsel %vm2169_vm8, %v17857_v44, %v9032_v2  ;;  %v8794_v2 = vrot.slane %v12974_v24, 5  ;;  %v8673_v15 = vrot.slane %v8671_v56, 5 }
 0x8d0   : > { %v8795_v29 = vsel %vm13362_vm6, %v8793_v58, %v8794_v2 }
 0x8d1   : > { %v17169_v23 = vcombine.low %v8792_v26, %v8795_v29 }
 0x8d2   : > { %9374 = vrot.lane.b32.xlu0 %v17121_v53, %s12991_s27 }
 0x8d3   : > { %v9030_v38 = vpop.permute.xlu1 %9029 }
 0x8d4   : > { %v17131_v0 = vsel %vm2169_vm8, %v17856_v4, %v9030_v38  ;;  %v8665_v38 = vshrl.u32 %v17028_v12, 16  ;;  %v8652_v4 = vshrl.u32 %v17077_v57, 16 }
 0x8d5   : > { %9486 = vmatmul.mubr.bf16.gmra.mrb[16].mxu0 %v17131_v0 }
 0x8d6   : > { %9493 = vmatprep.mubr.bf16.mxu0 %v9220_v42  ;;  %9300 = vrot.lane.b32.xlu0 %v17142_v52, %s12991_s27  ;;  %v17187_v42 = vcombine.low %v12976_v35, %v12977_v20  ;;  %v8654_v14 = vrot.slane %v8652_v4, 4 }
 0x8d7   : > { %v9183_v43 = vpop.permute.xlu1 %9182 }
 0x8d8   : > { %v9228_v28 = vsel %vm2169_vm8, %v17169_v23, %v9183_v43  ;;  %v8658_v44 = vor.u32 %v8657_v7, %v8654_v14 }
 0x8da   : > { %9376 = vrot.lane.b32.xlu0 %v10784_v36, %s12991_s27  ;;  %v8667_v36 = vrot.slane %v8665_v38, 4  ;;  %v8659_v8 = vrot.slane %v8658_v44, 4 }
 0x8dc   : > { %v8668_v3 = vor.u32 %v8667_v36, %v8663_v34  ;;  %v8664_v41 = vsel %vm13377_vm7, %v8659_v8, %v8663_v34  ;;  %v17220_v36 = vpop.permute.xlu0 %9272 }
 0x8dd   : > { %9494 = vmatmul.mubr.bf16.gmra.mrb[20].mxu0 %v17153_v32 }
 0x8de   : > { %9501 = vmatprep.mubr.bf16.mxu0 %v9224_v6  ;;  %9302 = vrot.lane.b32.xlu0 %v17161_v50, %s12991_s27  ;;  %v17196_v6 = vcombine.low %v17077_v57, %v17028_v12  ;;  %v8669_v43 = vrot.slane %v8668_v3, 4  ;;  %v12978_v57 = vld [vmem:[#allocation5 + $0x68] sm:$0x1] }
 0x8df   : > { %v8808_v2 = vrot.slane %v12978_v57, 5 }
 0x8e0   : > { %v8674_v58 = vsel %vm13377_vm7, %v8669_v43, %v8673_v15  ;;  %v17222_v43 = vpop.permute.xlu0 %9188 }
 0x8e1   : > { %v17206_v24 = vcombine.low %v8664_v41, %v8674_v58 }
 0x8e4   : > { %v9036_v55 = vpop.permute.xlu1 %9035 }
 0x8e5   : > { %v17180_v11 = vsel %vm2169_vm8, %v17859_v51, %v9036_v55  ;;  %v8805_v55 = vrot.slane %v12977_v20, 5 }
 0x8e7   : > { %v8807_v12 = vrot.slane %v8805_v55, 4  ;;  %v8806_v29 = vsel %vm13362_vm6, %v10722_v33, %v8805_v55 }
 0x8e9   : > { %v8809_v19 = vsel %vm13362_vm6, %v8807_v12, %v8808_v2  ;;  %v17224_v12 = vpop.permute.xlu0 %9186 }
 0x8ea   : > { %v17216_v9 = vcombine.low %v8806_v29, %v8809_v19  ;;  %v8057_v19 = vld [vmem:[%s17643_s12 + $0x10] sm:$0x7] }
 0x8eb   : > { %v9034_v39 = vpop.permute.xlu1 %9033 }
 0x8ec   : > { %v17173_v40 = vsel %vm2169_vm8, %v17858_v54, %v9034_v39 }
 0x8ed   : > { %9502 = vmatmul.mubr.bf16.gmra.mrb[24].mxu0 %v17173_v40 }
 0x8ee   : > { %9509 = vmatprep.mubr.bf16.mxu0 %v9228_v28 }
 0x8f5   : > { %9510 = vmatmul.mubr.bf16.gmra.mrb[28].mxu0 %v17180_v11 }
 0x8fc   : > { %9184 = vrot.lane.b32.xlu1 %v17187_v42, %s12991_s27 }
 0x900   : > { %9047 = vrot.lane.b32.xlu1 %v17108_v18, %s12991_s27 }
 0x904   : > { %9196 = vrot.lane.b32.xlu1 %v17196_v6, %s12991_s27 }
 0x908   : > { %9282 = vrot.lane.b32.xlu1 %v17169_v23, %s12991_s27 }
 0x90c   : > { %9051 = vrot.lane.b32.xlu1 %v17206_v24, %s12991_s27 }
 0x910   : > { %9200 = vrot.lane.b32.xlu1 %v17092_v59, %s12991_s27 }
 0x914   : > { %9286 = vrot.lane.b32.xlu1 %v17216_v9, %s12991_s27 }
 0x922   : > { %v12608_v26 = vpop.trf.xlu1 }
 0x923   : > { %v12612_v39 = vunpack.i.h.bf16 %v12608_v26  ;;  %v12609_v54 = vunpack.i.l.bf16 %v12608_v26 }
 0x926   : > { %v12613_v28 = vpop.trf.xlu1 }
 0x927   : > { %v12617_v51 = vunpack.i.h.bf16 %v12613_v28  ;;  %v12614_v17 = vunpack.i.l.bf16 %v12613_v28 }
 0x929   : > { %v8248_v38 = vpack.c.bf16 %v12614_v17, %v12609_v54  ;;  %v8240_v4 = vpack.c.bf16 %v12617_v51, %v12612_v39  ;;  %v17229_v54 = vpop.permute.xlu0 %9039 }
 0x92a   : > { %v12618_v31 = vpop.trf.xlu1 }
 0x92b   : > { %12069 = vmatprep.subr.bf16.mxu1 %v8248_v38  ;;  %v12622_v35 = vunpack.i.h.bf16 %v12618_v31  ;;  %v12619_v20 = vunpack.i.l.bf16 %v12618_v31 }
 0x92c   : > { %12070 = vmatpush3.bf16.msra.mxu1 %v8240_v4 }
 0x92d   : > { %v9038_v31 = vpop.permute.xlu0 %9037 }
 0x92e   : > { %v12623_v34 = vpop.trf.xlu1 }
 0x92f   : > { %v12627_v14 = vunpack.i.h.bf16 %v12623_v34  ;;  %v12624_v7 = vunpack.i.l.bf16 %v12623_v34 }
 0x931   : > { %v8249_v3 = vpack.c.bf16 %v12624_v7, %v12619_v20  ;;  %v8241_v44 = vpack.c.bf16 %v12627_v14, %v12622_v35 }
 0x932   : > { %v12628_v56 = vpop.trf.xlu1 }
 0x933   : > { %12071 = vmatprep.subr.bf16.mxu1 %v8249_v3  ;;  %v12632_v8 = vunpack.i.h.bf16 %v12628_v56  ;;  %v12629_v15 = vunpack.i.l.bf16 %v12628_v56 }
 0x934   : > { %12072 = vmatpush3.bf16.msra.mxu1 %v8241_v44 }
 0x936   : > { %v12633_v58 = vpop.trf.xlu1 }
 0x937   : > { %v12637_v55 = vunpack.i.h.bf16 %v12633_v58  ;;  %v12634_v41 = vunpack.i.l.bf16 %v12633_v58 }
 0x939   : > { %v8250_v57 = vpack.c.bf16 %v12634_v41, %v12629_v15  ;;  %v8242_v2 = vpack.c.bf16 %v12637_v55, %v12632_v8  ;;  %v9275_v8 = vpop.permute.xlu0 %9274 }
 0x93a   : > { %v12638_v33 = vpop.trf.xlu1 }
 0x93b   : > { %12073 = vmatprep.subr.bf16.mxu1 %v8250_v57  ;;  %v12642_v29 = vunpack.i.h.bf16 %v12638_v33  ;;  %v12639_v26 = vunpack.i.l.bf16 %v12638_v33 }
 0x93c   : > { %12074 = vmatpush3.bf16.msra.mxu1 %v8242_v2 }
 0x93d   : > { %8192 = vxpose.xlu1.b32.start.end [1/1] (short) (narrow) %v8057_v19, 64  ;;  %v9191_v2 = vpop.permute.xlu0 %9190 }
 0x93e   : > { %v12643_v39 = vpop.trf.xlu1 }
 0x93f   : > { %v12647_v28 = vunpack.i.h.bf16 %v12643_v39  ;;  %v12644_v51 = vunpack.i.l.bf16 %v12643_v39 }
 0x941   : > { %v8251_v17 = vpack.c.bf16 %v12644_v51, %v12639_v26  ;;  %v8243_v38 = vpack.c.bf16 %v12647_v28, %v12642_v29  ;;  %v9044_v51 = vpop.permute.xlu0 %9043 }
 0x942   : > { %v12648_v4 = vpop.trf.xlu1 }
 0x943   : > { %12075 = vmatprep.subr.bf16.mxu1 %v8251_v17  ;;  %v12652_v35 = vunpack.i.h.bf16 %v12648_v4  ;;  %v12649_v20 = vunpack.i.l.bf16 %v12648_v4 }
 0x944   : > { %12076 = vmatpush3.bf16.msra.mxu1 %v8243_v38 }
 0x946   : > { %v12653_v34 = vpop.trf.xlu1 }
 0x947   : > { %v12657_v14 = vunpack.i.h.bf16 %v12653_v34  ;;  %v12654_v7 = vunpack.i.l.bf16 %v12653_v34  ;;  %v9042_v34 = vpop.permute.xlu0 %9041 }
 0x949   : > { %v8252_v3 = vpack.c.bf16 %v12654_v7, %v12649_v20  ;;  %v8244_v44 = vpack.c.bf16 %v12657_v14, %v12652_v35 }
 0x94a   : > { %v12658_v56 = vpop.trf.xlu1 }
 0x94b   : > { %12077 = vmatprep.subr.bf16.mxu1 %v8252_v3  ;;  %v12662_v15 = vunpack.i.h.bf16 %v12658_v56  ;;  %v12659_v58 = vunpack.i.l.bf16 %v12658_v56 }
 0x94c   : > { %12078 = vmatpush3.bf16.msra.mxu1 %v8244_v44 }
 0x94e   : > { %v12663_v55 = vpop.trf.xlu1 }
 0x94f   : > { %v12667_v41 = vunpack.i.h.bf16 %v12663_v55  ;;  %v12664_v57 = vunpack.i.l.bf16 %v12663_v55  ;;  %v9277_v55 = vpop.permute.xlu0 %9276 }
 0x951   : > { %v8253_v33 = vpack.c.bf16 %v12664_v57, %v12659_v58  ;;  %v8245_v19 = vpack.c.bf16 %v12667_v41, %v12662_v15  ;;  %v17860_v41 = vld [vmem:[#allocation13_spill] sm:$0xff] }
 0x952   : > { %v12668_v29 = vpop.trf.xlu1  ;;  %v9306_v57 = vsel %vm2169_vm8, %v17860_v41, %v17220_v36 }
 0x953   : > { %12079 = vmatprep.subr.bf16.mxu1 %v8253_v33  ;;  %v12672_v26 = vunpack.i.h.bf16 %v12668_v29  ;;  %v12669_v39 = vunpack.i.l.bf16 %v12668_v29  ;;  %v9193_v33 = vpop.permute.xlu0 %9192 }
 0x954   : > { %12080 = vmatpush3.bf16.msra.mxu1 %v8245_v19  ;;  %v17861_v19 = vld [vmem:[#allocation10_spill] sm:$0xff] }
 0x955   : > { %v9310_v29 = vsel %vm2169_vm8, %v17861_v19, %v9275_v8  ;;  %v17863_v8 = vld [vmem:[#allocation16_spill] sm:$0xff] }
 0x956   : > { %v12673_v28 = vpop.trf.xlu1 }
 0x957   : > { %v12677_v17 = vunpack.i.h.bf16 %v12673_v28  ;;  %v12674_v38 = vunpack.i.l.bf16 %v12673_v28 }
 0x959   : > { %v8254_v4 = vpack.c.bf16 %v12674_v38, %v12669_v39  ;;  %v8246_v35 = vpack.c.bf16 %v12677_v17, %v12672_v26  ;;  %v9279_v39 = vpop.permute.xlu0 %9278  ;;  %v17862_v17 = vld [vmem:[#allocation19_spill] sm:$0xff] }
 0x95a   : > { %v12678_v20 = vpop.trf.xlu1  ;;  %v9085_v38 = vsel %vm2169_vm8, %v17862_v17, %v9038_v31  ;;  %v17869_v17 = vld [vmem:[#allocation26_spill] sm:$0xff] }
 0x95b   : > { %12081 = vmatprep.subr.bf16.mxu1 %v8254_v4  ;;  %v12682_v14 = vunpack.i.h.bf16 %v12678_v20  ;;  %v12679_v7 = vunpack.i.l.bf16 %v12678_v20  ;;  %v9314_v4 = vsel %vm2169_vm8, %v17863_v8, %v9277_v55  ;;  %v17864_v20 = vld [vmem:[#allocation14_spill] sm:$0xff] }
 0x95c   : > { %12082 = vmatpush3.bf16.msra.mxu1 %v8246_v35  ;;  %v9089_v35 = vsel %vm2169_vm8, %v17187_v42, %v17229_v54 }
 0x95d   : > { %v9046_v36 = vpop.permute.xlu0 %9045 }
 0x95e   : > { %v12683_v3 = vpop.trf.xlu1 }
 0x95f   : > { %v12687_v44 = vunpack.i.h.bf16 %v12683_v3  ;;  %v12684_v56 = vunpack.i.l.bf16 %v12683_v3 }
 0x961   : > { %v8255_v15 = vpack.c.bf16 %v12684_v56, %v12679_v7  ;;  %v8247_v58 = vpack.c.bf16 %v12687_v44, %v12682_v14  ;;  %v9195_v31 = vpop.permute.xlu0 %9194  ;;  %v9318_v14 = vsel %vm2169_vm8, %v17864_v20, %v9279_v39  ;;  %v17865_v7 = vld [vmem:[#allocation7_spill] sm:$0xff]  ;;  %v17868_v39 = vld [vmem:[#allocation22_spill] sm:$0xff] }
 0x962   : > { %v9093_v3 = vsel %vm2169_vm8, %v17865_v7, %v9042_v34 }
 0x963   : > { %12083 = vmatprep.subr.bf16.mxu1 %v8255_v15  ;;  %v17867_v15 = vld [vmem:[#allocation15_spill] sm:$0xff] }
 0x964   : > { %12084 = vmatpush3.bf16.msra.mxu1 %v8247_v58  ;;  %v9097_v58 = vsel %vm2169_vm8, %v17867_v15, %v9044_v51 }
 0x965   : > { %v9281_v42 = vpop.permute.xlu0 %9280 }
 0x967   : > { %9623 = vmatmul.mubr.bf16.vlgmr.msra.gmra.mrb[44].mxu1 %v9306_v57 }
 0x968   : > { %9630 = vmatprep.mubr.bf16.mxu1 %v17131_v0  ;;  %v9236_v0 = vsel %vm2169_vm8, %v17216_v9, %v17224_v12 }
 0x969   : > { %v9050_v56 = vpop.permute.xlu0 %9049 }
 0x96e   : > { %v9185_v26 = vpop.permute.xlu1 %9184 }
 0x96f   : > { %9631 = vmatmul.mubr.bf16.gmra.mrb[48].mxu1 %v9310_v29  ;;  %v9232_v28 = vsel %vm2169_vm8, %v16902_v1, %v9185_v26  ;;  %v9199_v29 = vpop.permute.xlu0 %9198 }
 0x970   : > { %9517 = vmatprep.mubr.bf16.mxu0 %v9232_v28  ;;  %9638 = vmatprep.mubr.bf16.mxu1 %v17153_v32  ;;  %v9240_v32 = vsel %vm2169_vm8, %v16935_v10, %v17222_v43  ;;  %v17866_v43 = vld [vmem:[#allocation18_spill] sm:$0xff] }
 0x971   : > { %9518 = vmatmul.mubr.bf16.gmra.mrb[32].mxu0 %v9085_v38  ;;  %v9322_v44 = vsel %vm2169_vm8, %v17866_v43, %v9281_v42 }
 0x972   : > { %9525 = vmatprep.mubr.bf16.mxu0 %v9236_v0  ;;  %v9048_v12 = vpop.permute.xlu1 %9047 }
 0x976   : > { %v9197_v54 = vpop.permute.xlu1 %9196 }
 0x977   : > { %9639 = vmatmul.mubr.bf16.gmra.mrb[52].mxu1 %v9314_v4  ;;  %v9285_v4 = vpop.permute.xlu0 %9284 }
 0x978   : > { %9646 = vmatprep.mubr.bf16.mxu1 %v17173_v40  ;;  %v9244_v40 = vsel %vm2169_vm8, %v16955_v60, %v9191_v2 }
 0x979   : > { %9526 = vmatmul.mubr.bf16.gmra.mrb[36].mxu0 %v9089_v35 }
 0x97a   : > { %9533 = vmatprep.mubr.bf16.mxu0 %v9240_v32  ;;  %v9283_v55 = vpop.permute.xlu1 %9282 }
 0x97b   : > { %v9326_v28 = vsel %vm2169_vm8, %v17868_v39, %v9283_v55  ;;  %v17872_v39 = vld [vmem:[#allocation23_spill] sm:$0xff] }
 0x97e   : > { %v9052_v51 = vpop.permute.xlu1 %9051 }
 0x97f   : > { %9647 = vmatmul.mubr.bf16.gmra.mrb[56].mxu1 %v9318_v14 }
 0x980   : > { %9654 = vmatprep.mubr.bf16.mxu1 %v17180_v11  ;;  %v9248_v11 = vsel %vm2169_vm8, %v17042_v27, %v9193_v33  ;;  %v9252_v33 = vsel %vm2169_vm8, %v17052_v25, %v9195_v31  ;;  %v9256_v31 = vsel %vm2169_vm8, %v17094_v16, %v9197_v54 }
 0x981   : > { %9534 = vmatmul.mubr.bf16.gmra.mrb[40].mxu0 %v9093_v3 }
 0x982   : > { %9541 = vmatprep.mubr.bf16.mxu0 %v9244_v40  ;;  %v9201_v7 = vpop.permute.xlu1 %9200  ;;  %v17870_v40 = vld [vmem:[#allocation24_spill] sm:$0xff] }
 0x983   : > { %v9330_v43 = vsel %vm2169_vm8, %v17870_v40, %v9285_v4  ;;  %v9113_v4 = vsel %vm2169_vm8, %v17196_v6, %v9052_v51  ;;  %v17874_v40 = vld [vmem:[#allocation28_spill] sm:$0xff] }
 0x985   : > { %v11973_v34 = vpop.f32.mrb[4].mxu0 }
 0x986   : > { %v11974_v41 = vpop.f32.mrb[5].mxu0  ;;  %v9287_v55 = vpop.permute.xlu1 %9286 }
 0x987   : > { %9655 = vmatmul.mubr.bf16.gmra.mrb[60].mxu1 %v9322_v44  ;;  %v17267_v2 = vadd.f32 %v11974_v41, %v11973_v34  ;;  %v11976_v57 = vpop.f32.mrb[6].mxu0 }
 0x988   : > { %9662 = vmatprep.mubr.bf16.mxu1 %v9085_v38  ;;  %v11977_v19 = vpop.f32.mrb[7].mxu0  ;;  %v9101_v38 = vsel %vm2169_vm8, %v17869_v17, %v9046_v36  ;;  %v17871_v36 = vld [vmem:[#allocation31_spill] sm:$0xff]  ;;  %v17873_v17 = vld [vmem:[#allocation17_spill] sm:$0xff] }
 0x989   : > { %9542 = vmatmul.mubr.bf16.gmra.mrb[44].mxu0 %v9097_v58  ;;  %v17269_v26 = vadd.f32 %v11977_v19, %v11976_v57  ;;  %v9054_v57 = vpop.permute.xlu0 %9053 }
 0x98a   : > { %9549 = vmatprep.mubr.bf16.mxu0 %v9248_v11  ;;  %v9117_v6 = vsel %vm2169_vm8, %v16977_v47, %v9054_v57 }
 0x98d   : > { %v9289_v54 = vpop.permute.xlu0 %9288 }
 0x98f   : > { %9663 = vmatmul.mubr.bf16.gmra.mrb[64].mxu1 %v9326_v28  ;;  %v9334_v28 = vsel %vm2169_vm8, %v17872_v39, %v9287_v55 }
 0x990   : > { %9670 = vmatprep.mubr.bf16.mxu1 %v9089_v35  ;;  %v9105_v35 = vsel %vm2169_vm8, %v17871_v36, %v9048_v12  ;;  %v9109_v12 = vsel %vm2169_vm8, %v16864_v13, %v9050_v56  ;;  %v9264_v56 = vsel %vm2169_vm8, %v17142_v52, %v9201_v7 }
 0x991   : > { %9550 = vmatmul.mubr.bf16.gmra.mrb[48].mxu0 %v9101_v38 }
 0x992   : > { %v11979_v0 = vpop.f32.mrb[8].mxu0  ;;  %9557 = vmatprep.mubr.bf16.mxu0 %v9252_v33  ;;  %v9338_v33 = vsel %vm2169_vm8, %v17873_v17, %v9289_v54 }
 0x993   : > { %v11980_v8 = vpop.f32.mrb[9].mxu0 }
 0x994   : > { %v17277_v32 = vadd.f32 %v11980_v8, %v11979_v0  ;;  %v11982_v20 = vpop.f32.mrb[10].mxu0 }
 0x995   : > { %v11983_v14 = vpop.f32.mrb[11].mxu0 }
 0x996   : > { %v17279_v42 = vadd.f32 %v11983_v14, %v11982_v20 }
 0x997   : > { %9671 = vmatmul.mubr.bf16.gmra.mrb[68].mxu1 %v9330_v43 }
 0x998   : > { %9678 = vmatprep.mubr.bf16.mxu1 %v9093_v3  ;;  %v9260_v3 = vsel %vm2169_vm8, %v17111_v63, %v9199_v29  ;;  %v9291_v29 = vpop.permute.xlu0 %9290 }
 0x999   : > { %9558 = vmatmul.mubr.bf16.gmra.mrb[52].mxu0 %v9105_v35  ;;  %v9342_v43 = vsel %vm2169_vm8, %v17874_v40, %v9291_v29 }
 0x99a   : > { %v11985_v44 = vpop.f32.mrb[12].mxu0  ;;  %9565 = vmatprep.mubr.bf16.mxu0 %v9256_v31 }
 0x99b   : > { %v11986_v15 = vpop.f32.mrb[13].mxu0 }
 0x99c   : > { %v17287_v11 = vadd.f32 %v11986_v15, %v11985_v44  ;;  %v11988_v34 = vpop.f32.mrb[14].mxu0  ;;  %v9293_v51 = vpop.permute.xlu0 %9292 }
 0x99d   : > { %v11989_v41 = vpop.f32.mrb[15].mxu0  ;;  %v9346_v55 = vsel %vm2169_vm8, %v16891_v37, %v9293_v51 }
 0x99e   : > { %v17289_v19 = vadd.f32 %v11989_v41, %v11988_v34 }
 0x99f   : > { %9679 = vmatmul.mubr.bf16.gmra.mrb[72].mxu1 %v9334_v28 }
 0x9a0   : > { %9686 = vmatprep.mubr.bf16.mxu1 %v9097_v58  ;;  %v9295_v34 = vpop.permute.xlu0 %9294 }
 0x9a1   : > { %9566 = vmatmul.mubr.bf16.gmra.mrb[56].mxu0 %v9109_v12 }
 0x9a2   : > { %9573 = vmatprep.mubr.bf16.mxu0 %v9260_v3 }
 0x9a4   : > { %v9297_v41 = vpop.permute.xlu0 %9296 }
 0x9a7   : > { %9687 = vmatmul.mubr.bf16.gmra.mrb[76].mxu1 %v9338_v33 }
 0x9a8   : > { %v11991_v0 = vpop.f32.mrb[16].mxu0  ;;  %9694 = vmatprep.mubr.bf16.mxu1 %v9101_v38  ;;  %v9299_v3 = vpop.permute.xlu0 %9298 }
 0x9a9   : > { %v11992_v8 = vpop.f32.mrb[17].mxu0  ;;  %9574 = vmatmul.mubr.bf16.gmra.mrb[60].mxu0 %v9113_v4 }
 0x9aa   : > { %v17301_v20 = vadd.f32 %v11992_v8, %v11991_v0  ;;  %v11994_v13 = vpop.f32.mrb[18].mxu0  ;;  %9581 = vmatprep.mubr.bf16.mxu0 %v9264_v56  ;;  %v9354_v0 = vsel %vm2169_vm8, %v16966_v49, %v9297_v41 }
 0x9ab   : > { %v11995_v58 = vpop.f32.mrb[19].mxu0 }
 0x9ac   : > { %v17305_v14 = vadd.f32 %v11995_v58, %v11994_v13 }
 0x9af   : > { %9695 = vmatmul.mubr.bf16.gmra.mrb[80].mxu1 %v9342_v43 }
 0x9b0   : > { %v11997_v36 = vpop.f32.mrb[20].mxu0  ;;  %9702 = vmatprep.mubr.bf16.mxu1 %v9105_v35  ;;  %v9350_v35 = vsel %vm2169_vm8, %v17108_v18, %v9295_v34  ;;  %v9375_v18 = vpop.permute.xlu0 %9374 }
 0x9b1   : > { %v11998_v31 = vpop.f32.mrb[21].mxu0  ;;  %9582 = vmatmul.mubr.bf16.gmra.mrb[64].mxu0 %v9117_v6 }
 0x9b2   : > { %v17311_v38 = vadd.f32 %v11998_v31, %v11997_v36  ;;  %v12000_v44 = vpop.f32.mrb[22].mxu0  ;;  %12431 = vmatprep.mubr.msk.bf16.mxu0 %vm2169_vm8, %v17854_v48  ;;  %v9358_v31 = vsel %vm2169_vm8, %v17206_v24, %v9299_v3 }
 0x9b3   : > { %v12001_v7 = vpop.f32.mrb[23].mxu0 }
 0x9b4   : > { %v17315_v15 = vadd.f32 %v12001_v7, %v12000_v44  ;;  %v9301_v49 = vpop.permute.xlu0 %9300  ;;  %v10783_v44 = vcombine.low %v17047_v21, %v17057_v30 }
 0x9b5   : > { %v9362_v24 = vsel %vm2169_vm8, %v16999_v62, %v9301_v49 }
 0x9b7   : > { %9703 = vmatmul.mubr.bf16.gmra.mrb[84].mxu1 %v9346_v55 }
 0x9b8   : > { %9710 = vmatprep.mubr.bf16.mxu1 %v9109_v12  ;;  %v9377_v55 = vpop.permute.xlu0 %9376 }
 0x9b9   : > { %v9384_v41 = vsel %vm2169_vm8, %v10783_v44, %v9377_v55 }
 0x9bd   : > { %v8208_v47 = vpop.trf.xlu1 }
 0x9bf   : > { %9711 = vmatmul.mubr.bf16.gmra.mrb[88].mxu1 %v9350_v35 }
 0x9c0   : > { %9718 = vmatprep.mubr.bf16.mxu1 %v9113_v4  ;;  %v12003_v57 = vpop.f32.mrb[24].mxu0 }
 0x9c1   : > { %v8209_v39 = vpop.trf.xlu1  ;;  %v12004_v28 = vpop.f32.mrb[25].mxu0 }
 0x9c2   : > { %v8256_v48 = vpack.c.bf16 %v8209_v39, %v8208_v47  ;;  %v17321_v54 = vadd.f32 %v12004_v28, %v12003_v57  ;;  %v12006_v17 = vpop.f32.mrb[26].mxu0 }
 0x9c3   : > { %v12007_v33 = vpop.f32.mrb[27].mxu0 }
 0x9c4   : > { %12423 = vmatprep.subr.bf16.mxu0 %v8256_v48  ;;  %v17323_v37 = vadd.f32 %v12007_v33, %v12006_v17 }
 0x9c5   : > { %12424 = vmatpush3.bf16.msra.mxu0 %v8256_v48  ;;  %v8210_v12 = vpop.trf.xlu1 }
 0x9c7   : > { %9719 = vmatmul.mubr.bf16.gmra.mrb[92].mxu1 %v9354_v0 }
 0x9c8   : > { %9726 = vmatprep.mubr.bf16.mxu1 %v9117_v6  ;;  %v12009_v8 = vpop.f32.mrb[28].mxu0  ;;  %v9380_v6 = vsel %vm2169_vm8, %v17092_v59, %v9375_v18  ;;  %v9303_v59 = vpop.permute.xlu0 %9302 }
 0x9c9   : > { %v8211_v4 = vpop.trf.xlu1  ;;  %v12010_v13 = vpop.f32.mrb[29].mxu0  ;;  %v9366_v57 = vsel %vm2169_vm8, %v17121_v53, %v9303_v59 }
 0x9ca   : > { %v8257_v56 = vpack.c.bf16 %v8211_v4, %v8210_v12  ;;  %v17327_v58 = vadd.f32 %v12010_v13, %v12009_v8  ;;  %v12012_v29 = vpop.f32.mrb[30].mxu0 }
 0x9cb   : > { %v12013_v40 = vpop.f32.mrb[31].mxu0 }
 0x9cc   : > { %v17329_v43 = vadd.f32 %v12013_v40, %v12012_v29  ;;  %12425 = vmatprep.subr.bf16.mxu0 %v8257_v56 }
 0x9cd   : > { %v8212_v36 = vpop.trf.xlu1  ;;  %12426 = vmatpush3.bf16.msra.mxu0 %v8257_v56 }
 0x9cf   : > { %9727 = vmatmul.mubr.bf16.gmra.mrb[96].mxu1 %v9358_v31 }
 0x9d0   : > { %9734 = vmatprep.mubr.bf16.mxu1 %v9380_v6 }
 0x9d1   : > { %v8213_v51 = vpop.trf.xlu1 }
 0x9d2   : > { %v8258_v7 = vpack.c.bf16 %v8213_v51, %v8212_v36 }
 0x9d4   : > { %12427 = vmatprep.subr.bf16.mxu0 %v8258_v7 }
 0x9d5   : > { %v8214_v34 = vpop.trf.xlu1  ;;  %12428 = vmatpush3.bf16.msra.mxu0 %v8258_v7 }
 0x9d7   : > { %9735 = vmatmul.mubr.bf16.gmra.mrb[100].mxu1 %v9362_v24 }
 0x9d8   : > { %9742 = vmatprep.mubr.bf16.mxu1 %v9384_v41 }
 0x9d9   : > { %v8215_v47 = vpop.trf.xlu1 }
 0x9da   : > { %v8259_v35 = vpack.c.bf16 %v8215_v47, %v8214_v34 }
 0x9dc   : > { %12429 = vmatprep.subr.bf16.mxu0 %v8259_v35 }
 0x9dd   : > { %12430 = vmatpush3.bf16.msra.mxu0 %v8259_v35 }
 0x9df   : > { %9743 = vmatmul.mubr.bf16.gmra.mrb[104].mxu1 %v9366_v57 }
 0x9e0   : > { %12432 = vmatmul.mubr.msk.bf16.vlgmr.msra.gmra.mrb[68].mxu0 %vm2169_vm8, %v17855_v61 }
 0x9e1   : > { %12435 = vmatprep.mubr.msk.bf16.mxu0 %vm2169_vm8, %v16791_v45  ;;  %v8922_v45 = vrot.slane %v17057_v30, 5 }
 0x9e8   : > { %12436 = vmatmul.mubr.msk.bf16.gmra.mrb[72].mxu0 %vm2169_vm8, %v16841_v46  ;;  %v10731_v46 = vrot.slane %v17047_v21, 9  ;;  %v17381_v21 = vld [vmem:[%s17644_s13] ss:$0 sm:$0xff] }
 0x9e9   : > { %12439 = vmatprep.mubr.msk.bf16.mxu0 %vm2169_vm8, %v17169_v23  ;;  %v9464_v61 = vadd.f32 %v17267_v2, %v17381_v21  ;;  %v9472_v39 = vadd.f32 %v17277_v32, %v17381_v21  ;;  %v9475_v33 = vadd.f32 %v17279_v42, %v17381_v21  ;;  %v9480_v29 = vadd.f32 %v17287_v11, %v17381_v21 }
 0x9ea   : > { %v9483_v6 = vadd.f32 %v17289_v19, %v17381_v21  ;;  %v9488_v35 = vadd.f32 %v17301_v20, %v17381_v21 }
 0x9f0   : > { %12440 = vmatmul.mubr.msk.bf16.gmra.mrb[76].mxu0 %vm2169_vm8, %v16902_v1  ;;  %v8924_v1 = vrot.slane %v8922_v45, 4 }
 0x9f1   : > { %12443 = vmatprep.mubr.msk.bf16.mxu0 %vm2169_vm8, %v17216_v9 }
 0x9f8   : > { %12444 = vmatmul.mubr.msk.bf16.gmra.mrb[80].mxu0 %vm2169_vm8, %v16935_v10  ;;  %v8925_v10 = vrot.slane %v17097_v22, 5 }
 0x9f9   : > { %12447 = vmatprep.mubr.msk.bf16.mxu0 %vm2169_vm8, %v16955_v60  ;;  %v8923_v60 = vsel %vm13362_vm6, %v10731_v46, %v8922_v45 }
 0x9fa   : > { %v8926_v62 = vsel %vm13362_vm6, %v8924_v1, %v8925_v10  ;;  %v9491_v1 = vadd.f32 %v17305_v14, %v17381_v21 }
 0xa00   : > { %12448 = vmatmul.mubr.msk.bf16.gmra.mrb[84].mxu0 %vm2169_vm8, %v17042_v27  ;;  %v10785_v27 = vcombine.low %v8923_v60, %v8926_v62 }
 0xa01   : > { %12451 = vmatprep.mubr.msk.bf16.mxu0 %vm2169_vm8, %v17052_v25 }
 0xa08   : > { %12452 = vmatmul.mubr.msk.bf16.gmra.mrb[88].mxu0 %vm2169_vm8, %v17094_v16 }
 0xa09   : > { %12455 = vmatprep.mubr.msk.bf16.mxu0 %vm2169_vm8, %v17111_v63  ;;  %v9467_v63 = vadd.f32 %v17269_v26, %v17381_v21 }
 0xa10   : > { %12456 = vmatmul.mubr.msk.bf16.gmra.mrb[92].mxu0 %vm2169_vm8, %v17142_v52 }
 0xa11   : > { %12459 = vmatprep.mubr.msk.bf16.mxu0 %vm2169_vm8, %v17161_v50 }
 0xa18   : > { %12460 = vmatmul.mubr.msk.bf16.gmra.mrb[96].mxu0 %vm2169_vm8, %v10785_v27 }
 0xa3a   : > { %v12085_v25 = vpop.f32.mrb[44].mxu1 }
 0xa3b   : > { %v12086_v30 = vpop.f32.mrb[45].mxu1 }
 0xa3c   : > { %v12087_v16 = vadd.f32 %v12086_v30, %v12085_v25  ;;  %v12088_v22 = vpop.f32.mrb[46].mxu1 }
 0xa3d   : > { %v12089_v5 = vpop.f32.mrb[47].mxu1 }
 0xa3e   : > { %v12090_v53 = vadd.f32 %v12089_v5, %v12088_v22  ;;  %v17387_v52 = vadd.f32 %v12087_v16, %v9464_v61  ;;  %v9496_v22 = vadd.f32 %v17311_v38, %v17381_v21 }
 0xa40   : > { %v17389_v50 = vadd.f32 %v12090_v53, %v9467_v63 }
 0xa42   : > { %v12091_v23 = vpop.f32.mrb[48].mxu1 }
 0xa43   : > { %v12092_v9 = vpop.f32.mrb[49].mxu1 }
 0xa44   : > { %v12093_v28 = vadd.f32 %v12092_v9, %v12091_v23  ;;  %v12015_v3 = vpop.f32.mrb[32].mxu0  ;;  %v12094_v48 = vpop.f32.mrb[50].mxu1  ;;  %v9499_v9 = vadd.f32 %v17315_v15, %v17381_v21 }
 0xa45   : > { %v12016_v2 = vpop.f32.mrb[33].mxu0  ;;  %v12095_v17 = vpop.f32.mrb[51].mxu1 }
 0xa46   : > { %v17395_v12 = vadd.f32 %v12016_v2, %v12015_v3  ;;  %v12096_v26 = vadd.f32 %v12095_v17, %v12094_v48  ;;  %v12018_v0 = vpop.f32.mrb[34].mxu0  ;;  %v17397_v18 = vadd.f32 %v12093_v28, %v9472_v39 }
 0xa47   : > { %v12019_v8 = vpop.f32.mrb[35].mxu0 }
 0xa48   : > { %v17399_v4 = vadd.f32 %v12019_v8, %v12018_v0  ;;  %v17401_v13 = vadd.f32 %v12096_v26, %v9475_v33  ;;  %v9504_v0 = vadd.f32 %v17321_v54, %v17381_v21 }
 0xa4a   : > { %v12097_v32 = vpop.f32.mrb[52].mxu1 }
 0xa4b   : > { %v12098_v56 = vpop.f32.mrb[53].mxu1 }
 0xa4c   : > { %v12099_v40 = vadd.f32 %v12098_v56, %v12097_v32  ;;  %v12021_v36 = vpop.f32.mrb[36].mxu0  ;;  %v12100_v31 = vpop.f32.mrb[54].mxu1 }
 0xa4d   : > { %v12022_v42 = vpop.f32.mrb[37].mxu0  ;;  %v12101_v49 = vpop.f32.mrb[55].mxu1 }
 0xa4e   : > { %v17407_v51 = vadd.f32 %v12022_v42, %v12021_v36  ;;  %v12102_v44 = vadd.f32 %v12101_v49, %v12100_v31  ;;  %v12024_v7 = vpop.f32.mrb[38].mxu0  ;;  %v17409_v55 = vadd.f32 %v12099_v40, %v9480_v29  ;;  %v9507_v40 = vadd.f32 %v17323_v37, %v17381_v21 }
 0xa4f   : > { %v12025_v34 = vpop.f32.mrb[39].mxu0 }
 0xa50   : > { %v17411_v41 = vadd.f32 %v12025_v34, %v12024_v7  ;;  %v17413_v24 = vadd.f32 %v12102_v44, %v9483_v6 }
 0xa52   : > { %v12103_v11 = vpop.f32.mrb[56].mxu1 }
 0xa53   : > { %v12104_v47 = vpop.f32.mrb[57].mxu1 }
 0xa54   : > { %v12105_v59 = vadd.f32 %v12104_v47, %v12103_v11  ;;  %v12027_v57 = vpop.f32.mrb[40].mxu0  ;;  %v12106_v45 = vpop.f32.mrb[58].mxu1  ;;  %v9512_v11 = vadd.f32 %v17327_v58, %v17381_v21 }
 0xa55   : > { %v12028_v19 = vpop.f32.mrb[41].mxu0  ;;  %v12107_v46 = vpop.f32.mrb[59].mxu1 }
 0xa56   : > { %v17419_v10 = vadd.f32 %v12028_v19, %v12027_v57  ;;  %v12108_v60 = vadd.f32 %v12107_v46, %v12106_v45  ;;  %v12030_v62 = vpop.f32.mrb[42].mxu0  ;;  %v17421_v27 = vadd.f32 %v12105_v59, %v9488_v35  ;;  %v9515_v45 = vadd.f32 %v17329_v43, %v17381_v21 }
 0xa57   : > { %v12031_v25 = vpop.f32.mrb[43].mxu0 }
 0xa58   : > { %v17423_v30 = vadd.f32 %v12031_v25, %v12030_v62  ;;  %v17425_v61 = vadd.f32 %v12108_v60, %v9491_v1 }
 0xa5a   : > { %v12109_v20 = vpop.f32.mrb[60].mxu1 }
 0xa5b   : > { %v12110_v16 = vpop.f32.mrb[61].mxu1 }
 0xa5c   : > { %v12111_v5 = vadd.f32 %v12110_v16, %v12109_v20  ;;  %v12033_v63 = vpop.f32.mrb[44].mxu0  ;;  %v12112_v53 = vpop.f32.mrb[62].mxu1 }
 0xa5d   : > { %v12034_v14 = vpop.f32.mrb[45].mxu0  ;;  %v12113_v23 = vpop.f32.mrb[63].mxu1 }
 0xa5e   : > { %v17431_v39 = vadd.f32 %v12034_v14, %v12033_v63  ;;  %v12114_v28 = vadd.f32 %v12113_v23, %v12112_v53  ;;  %v12036_v3 = vpop.f32.mrb[46].mxu0  ;;  %v17433_v48 = vadd.f32 %v12111_v5, %v9496_v22  ;;  %v9520_v22 = vadd.f32 %v17395_v12, %v17381_v21 }
 0xa5f   : > { %v12037_v2 = vpop.f32.mrb[47].mxu0  ;;  %v9523_v23 = vadd.f32 %v17399_v4, %v17381_v21 }
 0xa60   : > { %v17435_v17 = vadd.f32 %v12037_v2, %v12036_v3  ;;  %v17437_v33 = vadd.f32 %v12114_v28, %v9499_v9 }
 0xa62   : > { %v12115_v38 = vpop.f32.mrb[64].mxu1 }
 0xa63   : > { %v12116_v26 = vpop.f32.mrb[65].mxu1 }
 0xa64   : > { %v12117_v8 = vadd.f32 %v12116_v26, %v12115_v38  ;;  %v12039_v32 = vpop.f32.mrb[48].mxu0  ;;  %v12118_v56 = vpop.f32.mrb[66].mxu1 }
 0xa65   : > { %v12040_v15 = vpop.f32.mrb[49].mxu0  ;;  %v12119_v29 = vpop.f32.mrb[67].mxu1 }
 0xa66   : > { %v17443_v36 = vadd.f32 %v12040_v15, %v12039_v32  ;;  %v12120_v31 = vadd.f32 %v12119_v29, %v12118_v56  ;;  %v12042_v42 = vpop.f32.mrb[50].mxu0  ;;  %v17445_v49 = vadd.f32 %v12117_v8, %v9504_v0  ;;  %v9528_v32 = vadd.f32 %v17407_v51, %v17381_v21 }
 0xa67   : > { %v12043_v6 = vpop.f32.mrb[51].mxu0 }
 0xa68   : > { %v17447_v44 = vadd.f32 %v12043_v6, %v12042_v42  ;;  %v17449_v7 = vadd.f32 %v12120_v31, %v9507_v40  ;;  %v9531_v31 = vadd.f32 %v17411_v41, %v17381_v21 }
 0xa6a   : > { %v12121_v54 = vpop.f32.mrb[68].mxu1 }
 0xa6b   : > { %v12122_v34 = vpop.f32.mrb[69].mxu1 }
 0xa6c   : > { %v12123_v47 = vadd.f32 %v12122_v34, %v12121_v54  ;;  %v12045_v35 = vpop.f32.mrb[52].mxu0  ;;  %v12124_v59 = vpop.f32.mrb[70].mxu1 }
 0xa6d   : > { %v12046_v37 = vpop.f32.mrb[53].mxu0  ;;  %v12125_v57 = vpop.f32.mrb[71].mxu1 }
 0xa6e   : > { %v17455_v19 = vadd.f32 %v12046_v37, %v12045_v35  ;;  %v12126_v46 = vadd.f32 %v12125_v57, %v12124_v59  ;;  %v12048_v1 = vpop.f32.mrb[54].mxu0  ;;  %v17457_v60 = vadd.f32 %v12123_v47, %v9512_v11  ;;  %v9536_v37 = vadd.f32 %v17419_v10, %v17381_v21 }
 0xa6f   : > { %v12049_v62 = vpop.f32.mrb[55].mxu0 }
 0xa70   : > { %v17459_v25 = vadd.f32 %v12049_v62, %v12048_v1  ;;  %v17461_v20 = vadd.f32 %v12126_v46, %v9515_v45  ;;  %v9539_v62 = vadd.f32 %v17423_v30, %v17381_v21  ;;  %v9547_v30 = vadd.f32 %v17435_v17, %v17381_v21 }
 0xa72   : > { %v12127_v58 = vpop.f32.mrb[72].mxu1 }
 0xa73   : > { %v12128_v16 = vpop.f32.mrb[73].mxu1 }
 0xa74   : > { %v12129_v5 = vadd.f32 %v12128_v16, %v12127_v58  ;;  %v12051_v63 = vpop.f32.mrb[56].mxu0  ;;  %v12130_v53 = vpop.f32.mrb[74].mxu1 }
 0xa75   : > { %v12052_v43 = vpop.f32.mrb[57].mxu0  ;;  %v12131_v14 = vpop.f32.mrb[75].mxu1 }
 0xa76   : > { %v17467_v9 = vadd.f32 %v12052_v43, %v12051_v63  ;;  %v12132_v28 = vadd.f32 %v12131_v14, %v12130_v53  ;;  %v12054_v3 = vpop.f32.mrb[58].mxu0  ;;  %v17469_v2 = vadd.f32 %v12129_v5, %v9520_v22 }
 0xa77   : > { %v12055_v38 = vpop.f32.mrb[59].mxu0 }
 0xa78   : > { %v17471_v26 = vadd.f32 %v12055_v38, %v12054_v3  ;;  %v17473_v0 = vadd.f32 %v12132_v28, %v9523_v23  ;;  %v9544_v23 = vadd.f32 %v17431_v39, %v17381_v21  ;;  %v9555_v39 = vadd.f32 %v17447_v44, %v17381_v21 }
 0xa7a   : > { %v12133_v12 = vpop.f32.mrb[76].mxu1 }
 0xa7b   : > { %v12134_v8 = vpop.f32.mrb[77].mxu1 }
 0xa7c   : > { %v12135_v56 = vadd.f32 %v12134_v8, %v12133_v12  ;;  %v12057_v15 = vpop.f32.mrb[60].mxu0  ;;  %v12136_v29 = vpop.f32.mrb[78].mxu1 }
 0xa7d   : > { %v12058_v4 = vpop.f32.mrb[61].mxu0  ;;  %v12137_v40 = vpop.f32.mrb[79].mxu1 }
 0xa7e   : > { %v17479_v42 = vadd.f32 %v12058_v4, %v12057_v15  ;;  %v12138_v6 = vadd.f32 %v12137_v40, %v12136_v29  ;;  %v12060_v54 = vpop.f32.mrb[62].mxu0  ;;  %v17481_v34 = vadd.f32 %v12135_v56, %v9528_v32  ;;  %v9552_v29 = vadd.f32 %v17443_v36, %v17381_v21 }
 0xa7f   : > { %v12061_v11 = vpop.f32.mrb[63].mxu0  ;;  %v9563_v36 = vadd.f32 %v17459_v25, %v17381_v21 }
 0xa80   : > { %v17483_v47 = vadd.f32 %v12061_v11, %v12060_v54  ;;  %v17485_v35 = vadd.f32 %v12138_v6, %v9531_v31 }
 0xa82   : > { %v12139_v51 = vpop.f32.mrb[80].mxu1 }
 0xa83   : > { %v12140_v59 = vpop.f32.mrb[81].mxu1 }
 0xa84   : > { %v12141_v57 = vadd.f32 %v12140_v59, %v12139_v51  ;;  %v12063_v45 = vpop.f32.mrb[64].mxu0  ;;  %v12142_v46 = vpop.f32.mrb[82].mxu1  ;;  %v9560_v59 = vadd.f32 %v17455_v19, %v17381_v21  ;;  %v9571_v19 = vadd.f32 %v17471_v26, %v17381_v21 }
 0xa85   : > { %v12064_v41 = vpop.f32.mrb[65].mxu0  ;;  %v12143_v1 = vpop.f32.mrb[83].mxu1 }
 0xa86   : > { %v17491_v58 = vadd.f32 %v12064_v41, %v12063_v45  ;;  %v12144_v16 = vadd.f32 %v12143_v1, %v12142_v46  ;;  %v12066_v22 = vpop.f32.mrb[66].mxu0  ;;  %v17493_v5 = vadd.f32 %v12141_v57, %v9536_v37 }
 0xa87   : > { %v12067_v63 = vpop.f32.mrb[67].mxu0 }
 0xa88   : > { %v17495_v53 = vadd.f32 %v12067_v63, %v12066_v22  ;;  %v17497_v43 = vadd.f32 %v12144_v16, %v9539_v62  ;;  %v9568_v16 = vadd.f32 %v17467_v9, %v17381_v21  ;;  %v9579_v9 = vadd.f32 %v17483_v47, %v17381_v21 }
 0xa8a   : > { %v12145_v10 = vpop.f32.mrb[84].mxu1 }
 0xa8b   : > { %v12146_v14 = vpop.f32.mrb[85].mxu1 }
 0xa8c   : > { %v12147_v28 = vadd.f32 %v12146_v14, %v12145_v10  ;;  %v12148_v3 = vpop.f32.mrb[86].mxu1 }
 0xa8d   : > { %v12149_v38 = vpop.f32.mrb[87].mxu1 }
 0xa8e   : > { %v12150_v12 = vadd.f32 %v12149_v38, %v12148_v3  ;;  %v17503_v8 = vadd.f32 %v12147_v28, %v9544_v23  ;;  %v9576_v38 = vadd.f32 %v17479_v42, %v17381_v21  ;;  %v9584_v42 = vadd.f32 %v17491_v58, %v17381_v21 }
 0xa90   : > { %v17505_v32 = vadd.f32 %v12150_v12, %v9547_v30 }
 0xa92   : > { %v12151_v56 = vpop.f32.mrb[88].mxu1 }
 0xa93   : > { %v12152_v15 = vpop.f32.mrb[89].mxu1 }
 0xa94   : > { %v12153_v4 = vadd.f32 %v12152_v15, %v12151_v56  ;;  %v12154_v40 = vpop.f32.mrb[90].mxu1 }
 0xa95   : > { %v12155_v31 = vpop.f32.mrb[91].mxu1 }
 0xa96   : > { %v12156_v6 = vadd.f32 %v12155_v31, %v12154_v40  ;;  %v17511_v54 = vadd.f32 %v12153_v4, %v9552_v29 }
 0xa98   : > { %v17513_v17 = vadd.f32 %v12156_v6, %v9555_v39 }
 0xa9a   : > { %v12157_v11 = vpop.f32.mrb[92].mxu1 }
 0xa9b   : > { %v12158_v51 = vpop.f32.mrb[93].mxu1 }
 0xa9c   : > { %v12159_v37 = vadd.f32 %v12158_v51, %v12157_v11  ;;  %v12160_v57 = vpop.f32.mrb[94].mxu1 }
 0xa9d   : > { %v12161_v45 = vpop.f32.mrb[95].mxu1 }
 0xa9e   : > { %v12162_v46 = vadd.f32 %v12161_v45, %v12160_v57  ;;  %v17519_v41 = vadd.f32 %v12159_v37, %v9560_v59  ;;  %v9587_v57 = vadd.f32 %v17495_v53, %v17381_v21 }
 0xaa0   : > { %v17521_v44 = vadd.f32 %v12162_v46, %v9563_v36 }
 0xaa2   : > { %v12163_v1 = vpop.f32.mrb[96].mxu1 }
 0xaa3   : > { %v12164_v62 = vpop.f32.mrb[97].mxu1 }
 0xaa4   : > { %v12165_v22 = vadd.f32 %v12164_v62, %v12163_v1  ;;  %v12166_v63 = vpop.f32.mrb[98].mxu1 }
 0xaa5   : > { %v12167_v10 = vpop.f32.mrb[99].mxu1 }
 0xaa6   : > { %v12168_v14 = vadd.f32 %v12167_v10, %v12166_v63  ;;  %v17527_v23 = vadd.f32 %v12165_v22, %v9568_v16 }
 0xaa8   : > { %v17529_v25 = vadd.f32 %v12168_v14, %v9571_v19 }
 0xaaa   : > { %v12169_v28 = vpop.f32.mrb[100].mxu1 }
 0xaab   : > { %v12170_v3 = vpop.f32.mrb[101].mxu1 }
 0xaac   : > { %v12171_v30 = vadd.f32 %v12170_v3, %v12169_v28  ;;  %v12172_v12 = vpop.f32.mrb[102].mxu1 }
 0xaad   : > { %v12173_v56 = vpop.f32.mrb[103].mxu1 }
 0xaae   : > { %v12174_v15 = vadd.f32 %v12173_v56, %v12172_v12  ;;  %v17535_v29 = vadd.f32 %v12171_v30, %v9576_v38 }
 0xab0   : > { %v17537_v26 = vadd.f32 %v12174_v15, %v9579_v9 }
 0xab2   : > { %v12175_v4 = vpop.f32.mrb[104].mxu1 }
 0xab3   : > { %v12176_v40 = vpop.f32.mrb[105].mxu1  ;;  %v12433_v31 = vpop.f32.mrb[68].mxu0 }
 0xab4   : > { %v12177_v39 = vadd.f32 %v12176_v40, %v12175_v4  ;;  %v9794_v6 = vadd.f32 %v12433_v31, %v17397_v18  ;;  %v12178_v11 = vpop.f32.mrb[106].mxu1  ;;  %v9785_v51 = vpop.f32.mrb[69].mxu0 }
 0xab5   : > { %v9786_v59 = vadd.f32 %v9785_v51, %v17387_v52  ;;  %v12179_v37 = vpop.f32.mrb[107].mxu1  ;;  %v12434_v47 = vpop.f32.mrb[70].mxu0 }
 0xab6   : > { %v12180_v45 = vadd.f32 %v12179_v37, %v12178_v11  ;;  %v9797_v36 = vadd.f32 %v12434_v47, %v17401_v13  ;;  %v9788_v46 = vpop.f32.mrb[71].mxu0  ;;  %v17547_v62 = vadd.f32 %v12177_v39, %v9584_v42  ;;  %v9946_v53 = vmul.f32 0.2, %v9794_v6 }
 0xab7   : > { %vm9912_vm1 = vcmp.gt.f32.partialorder %v9786_v59, 0.0  ;;  %v9944_v1 = vmul.f32 0.2, %v9786_v59  ;;  %v9789_v18 = vadd.f32 %v9788_v46, %v17389_v50  ;;  %vm9914_vm7 = vcmp.gt.f32.partialorder %v9794_v6, 0.0 }
 0xab8   : > { %v17549_v16 = vadd.f32 %v12180_v45, %v9587_v57  ;;  %v9947_v3 = vmul.f32 0.2, %v9797_v36  ;;  %v9978_v38 = vsel %vm9914_vm7, %v9794_v6, %v9946_v53  ;;  %vm9915_vm8 = vcmp.gt.f32.partialorder %v9797_v36, 0.0 }
 0xab9   : > { %v9945_v58 = vmul.f32 0.2, %v9789_v18  ;;  %v9976_v22 = vsel %vm9912_vm1, %v9786_v59, %v9944_v1  ;;  %vm9913_vm6 = vcmp.gt.f32.partialorder %v9789_v18, 0.0 }
 0xaba   : > { %10008 = vxpose.xlu0.b32.start [1/16] (narrow) %v9976_v22, 8  ;;  %v9979_v15 = vsel %vm9915_vm8, %v9797_v36, %v9947_v3 }
 0xabb   : > { %v12437_v52 = vpop.f32.mrb[72].mxu0  ;;  %v9977_v19 = vsel %vm9913_vm6, %v9789_v18, %v9945_v58 }
 0xabc   : > { %v9810_v63 = vadd.f32 %v12437_v52, %v17421_v27  ;;  %v9801_v21 = vpop.f32.mrb[73].mxu0 }
 0xabd   : > { %v9802_v13 = vadd.f32 %v9801_v21, %v17409_v55  ;;  %v12438_v10 = vpop.f32.mrb[74].mxu0 }
 0xabe   : > { %v9813_v50 = vadd.f32 %v12438_v10, %v17425_v61  ;;  %v9804_v14 = vpop.f32.mrb[75].mxu0  ;;  %10009 = vxpose.xlu0.b32.cont [2/16] (narrow) %v9977_v19, 8  ;;  %vm9918_vm11 = vcmp.gt.f32.partialorder %v9810_v63, 0.0 }
 0xabf   : > { %v9805_v28 = vadd.f32 %v9804_v14, %v17413_v24  ;;  %v9948_v56 = vmul.f32 0.2, %v9802_v13  ;;  %vm9916_vm2 = vcmp.gt.f32.partialorder %v9802_v13, 0.0 }
 0xac0   : > { %v9951_v37 = vmul.f32 0.2, %v9813_v50  ;;  %vm9919_vm12 = vcmp.gt.f32.partialorder %v9813_v50, 0.0 }
 0xac1   : > { %v9949_v40 = vmul.f32 0.2, %v9805_v28  ;;  %v9980_v31 = vsel %vm9916_vm2, %v9802_v13, %v9948_v56  ;;  %vm9917_vm3 = vcmp.gt.f32.partialorder %v9805_v28, 0.0 }
 0xac2   : > { %10010 = vxpose.xlu0.b32.cont [3/16] (narrow) %v9978_v38, 8  ;;  %v9983_v1 = vsel %vm9919_vm12, %v9813_v50, %v9951_v37 }
 0xac3   : > { %v12441_v30 = vpop.f32.mrb[76].mxu0 }
 0xac4   : > { %v17556_v27 = vadd.f32 %v12441_v30, %v17445_v49  ;;  %v9817_v12 = vpop.f32.mrb[77].mxu0 }
 0xac5   : > { %v9818_v55 = vadd.f32 %v9817_v12, %v17433_v48  ;;  %v12442_v9 = vpop.f32.mrb[78].mxu0  ;;  %v9950_v48 = vmul.f32 0.2, %v9810_v63 }
 0xac6   : > { %v17560_v61 = vadd.f32 %v12442_v9, %v17449_v7  ;;  %v9820_v4 = vpop.f32.mrb[79].mxu0  ;;  %10011 = vxpose.xlu0.b32.cont [4/16] (narrow) %v9979_v15, 8  ;;  %v9981_v7 = vsel %vm9917_vm3, %v9805_v28, %v9949_v40  ;;  %vm9922_vm4 = vcmp.gt.f32.partialorder %v17556_v27, 0.0 }
 0xac7   : > { %v9821_v24 = vadd.f32 %v9820_v4, %v17437_v33  ;;  %v9982_v47 = vsel %vm9918_vm11, %v9810_v63, %v9950_v48  ;;  %v9952_v45 = vmul.f32 0.2, %v9818_v55  ;;  %vm9920_vm13 = vcmp.gt.f32.partialorder %v9818_v55, 0.0 }
 0xac8   : > { %vm9923_vm9 = vcmp.gt.f32.partialorder %v17560_v61, 0.0 }
 0xac9   : > { %v9953_v22 = vmul.f32 0.2, %v9821_v24  ;;  %v9984_v21 = vsel %vm9920_vm13, %v9818_v55, %v9952_v45  ;;  %vm9921_vm15 = vcmp.gt.f32.partialorder %v9821_v24, 0.0 }
 0xaca   : > { %10012 = vxpose.xlu0.b32.cont [5/16] (narrow) %v9980_v31, 8 }
 0xacb   : > { %v12445_v49 = vpop.f32.mrb[80].mxu0  ;;  %v9985_v50 = vsel %vm9921_vm15, %v9821_v24, %v9953_v22 }
 0xacc   : > { %v17564_v39 = vadd.f32 %v12445_v49, %v17469_v2  ;;  %v9833_v6 = vpop.f32.mrb[81].mxu0 }
 0xacd   : > { %v17567_v11 = vadd.f32 %v9833_v6, %v17457_v60  ;;  %v12446_v51 = vpop.f32.mrb[82].mxu0 }
 0xace   : > { %v17570_v42 = vadd.f32 %v12446_v51, %v17473_v0  ;;  %v9836_v33 = vpop.f32.mrb[83].mxu0  ;;  %10013 = vxpose.xlu0.b32.cont [6/16] (narrow) %v9981_v7, 8  ;;  %vm9926_vm2 = vcmp.gt.f32.partialorder %v17564_v39, 0.0 }
 0xacf   : > { %v17573_v59 = vadd.f32 %v9836_v33, %v17461_v20  ;;  %vm9924_vm1 = vcmp.gt.f32.partialorder %v17567_v11, 0.0 }
 0xad0   : > { %vm9927_vm11 = vcmp.gt.f32.partialorder %v17570_v42, 0.0 }
 0xad1   : > { %v9957_v31 = vmul.f32 0.2, %v17573_v59  ;;  %vm9925_vm7 = vcmp.gt.f32.partialorder %v17573_v59, 0.0 }
 0xad2   : > { %10014 = vxpose.xlu0.b32.cont [7/16] (narrow) %v9982_v47, 8 }
 0xad3   : > { %v12449_v2 = vpop.f32.mrb[84].mxu0  ;;  %v9989_v47 = vsel %vm9925_vm7, %v17573_v59, %v9957_v31 }
 0xad4   : > { %v9858_v57 = vadd.f32 %v12449_v2, %v17493_v5  ;;  %v9849_v60 = vpop.f32.mrb[85].mxu0  ;;  %v9954_v5 = vmul.f32 0.2, %v17556_v27 }
 0xad5   : > { %v9850_v36 = vadd.f32 %v9849_v60, %v17481_v34  ;;  %v12450_v46 = vpop.f32.mrb[86].mxu0 }
 0xad6   : > { %v9861_v0 = vadd.f32 %v12450_v46, %v17497_v43  ;;  %v9852_v18 = vpop.f32.mrb[87].mxu0  ;;  %10015 = vxpose.xlu0.b32.cont [8/16] (narrow) %v9983_v1, 8  ;;  %v9962_v13 = vmul.f32 0.2, %v9858_v57  ;;  %vm9930_vm5 = vcmp.gt.f32.partialorder %v9858_v57, 0.0  ;;  %v9986_v30 = vsel %vm9922_vm4, %v17556_v27, %v9954_v5 }
 0xad7   : > { %v9960_v20 = vmul.f32 0.2, %v9850_v36  ;;  %v9853_v58 = vadd.f32 %v9852_v18, %v17485_v35  ;;  %vm9928_vm14 = vcmp.gt.f32.partialorder %v9850_v36, 0.0 }
 0xad8   : > { %v9963_v38 = vmul.f32 0.2, %v9861_v0  ;;  %vm9931_vm10 = vcmp.gt.f32.partialorder %v9861_v0, 0.0 }
 0xad9   : > { %v9961_v52 = vmul.f32 0.2, %v9853_v58  ;;  %v9992_v63 = vsel %vm9928_vm14, %v9850_v36, %v9960_v20  ;;  %vm9929_vm0 = vcmp.gt.f32.partialorder %v9853_v58, 0.0 }
 0xada   : > { %10040 = vxpose.xlu1.b32.start [1/16] (narrow) %v9992_v63, 8  ;;  %10016 = vxpose.xlu0.b32.cont [9/16] (narrow) %v9984_v21, 8  ;;  %v9995_v24 = vsel %vm9931_vm10, %v9861_v0, %v9963_v38 }
 0xadb   : > { %v12453_v34 = vpop.f32.mrb[88].mxu0  ;;  %v9993_v19 = vsel %vm9929_vm0, %v9853_v58, %v9961_v52 }
 0xadc   : > { %v17581_v53 = vadd.f32 %v12453_v34, %v17511_v54  ;;  %v9865_v43 = vpop.f32.mrb[89].mxu0  ;;  %v9955_v54 = vmul.f32 0.2, %v17560_v61 }
 0xadd   : > { %v9866_v10 = vadd.f32 %v9865_v43, %v17503_v8  ;;  %v12454_v35 = vpop.f32.mrb[90].mxu0  ;;  %v9994_v8 = vsel %vm9930_vm5, %v9858_v57, %v9962_v13  ;;  %v9959_v57 = vmul.f32 0.2, %v17570_v42 }
 0xade   : > { %v17586_v14 = vadd.f32 %v12454_v35, %v17513_v17  ;;  %v9868_v28 = vpop.f32.mrb[91].mxu0  ;;  %10041 = vxpose.xlu1.b32.cont [2/16] (narrow) %v9993_v19, 8  ;;  %10017 = vxpose.xlu0.b32.cont [10/16] (narrow) %v9985_v50, 8  ;;  %v9987_v55 = vsel %vm9923_vm9, %v17560_v61, %v9955_v54  ;;  %v9966_v7 = vmul.f32 0.2, %v17581_v53  ;;  %vm9934_vm3 = vcmp.gt.f32.partialorder %v17581_v53, 0.0 }
 0xadf   : > { %v9869_v3 = vadd.f32 %v9868_v28, %v17505_v32  ;;  %v9956_v32 = vmul.f32 0.2, %v17567_v11  ;;  %v9964_v9 = vmul.f32 0.2, %v9866_v10  ;;  %vm9932_vm6 = vcmp.gt.f32.partialorder %v9866_v10, 0.0 }
 0xae0   : > { %v9967_v60 = vmul.f32 0.2, %v17586_v14  ;;  %vm9935_vm12 = vcmp.gt.f32.partialorder %v17586_v14, 0.0  ;;  %v9991_v36 = vsel %vm9927_vm11, %v17570_v42, %v9959_v57 }
 0xae1   : > { %v9965_v61 = vmul.f32 0.2, %v9869_v3  ;;  %v9996_v49 = vsel %vm9932_vm6, %v9866_v10, %v9964_v9  ;;  %v9988_v6 = vsel %vm9924_vm1, %v17567_v11, %v9956_v32  ;;  %vm9933_vm8 = vcmp.gt.f32.partialorder %v9869_v3, 0.0 }
 0xae2   : > { %10042 = vxpose.xlu1.b32.cont [3/16] (narrow) %v9994_v8, 8  ;;  %10018 = vxpose.xlu0.b32.cont [11/16] (narrow) %v9986_v30, 8  ;;  %v9999_v59 = vsel %vm9935_vm12, %v17586_v14, %v9967_v60 }
 0xae3   : > { %v12457_v12 = vpop.f32.mrb[92].mxu0  ;;  %v9997_v37 = vsel %vm9933_vm8, %v9869_v3, %v9965_v61 }
 0xae4   : > { %v17593_v17 = vadd.f32 %v12457_v12, %v17527_v23  ;;  %v9881_v56 = vpop.f32.mrb[93].mxu0 }
 0xae5   : > { %v9882_v15 = vadd.f32 %v9881_v56, %v17519_v41  ;;  %v12458_v4 = vpop.f32.mrb[94].mxu0 }
 0xae6   : > { %v9893_v27 = vadd.f32 %v12458_v4, %v17529_v25  ;;  %v9884_v40 = vpop.f32.mrb[95].mxu0  ;;  %10043 = vxpose.xlu1.b32.cont [4/16] (narrow) %v9995_v24, 8  ;;  %10019 = vxpose.xlu0.b32.cont [12/16] (narrow) %v9987_v55, 8  ;;  %v9958_v25 = vmul.f32 0.2, %v17564_v39  ;;  %vm9938_vm15 = vcmp.gt.f32.partialorder %v17593_v17, 0.0 }
 0xae7   : > { %v9885_v23 = vadd.f32 %v9884_v40, %v17521_v44  ;;  %vm9936_vm13 = vcmp.gt.f32.partialorder %v9882_v15, 0.0 }
 0xae8   : > { %v9990_v45 = vsel %vm9926_vm2, %v17564_v39, %v9958_v25  ;;  %v9970_v39 = vmul.f32 0.2, %v17593_v17  ;;  %v9971_v0 = vmul.f32 0.2, %v9893_v27  ;;  %vm9939_vm0 = vcmp.gt.f32.partialorder %v9893_v27, 0.0 }
 0xae9   : > { %vm9937_vm14 = vcmp.gt.f32.partialorder %v9885_v23, 0.0 }
 0xaea   : > { %10044 = vxpose.xlu1.b32.cont [5/16] (narrow) %v9996_v49, 8  ;;  %10020 = vxpose.xlu0.b32.cont [13/16] (narrow) %v9988_v6, 8  ;;  %v10002_v18 = vsel %vm9938_vm15, %v17593_v17, %v9970_v39  ;;  %v10003_v42 = vsel %vm9939_vm0, %v9893_v27, %v9971_v0 }
 0xaeb   : > { %v12461_v41 = vpop.f32.mrb[96].mxu0 }
 0xaec   : > { %v9906_v48 = vadd.f32 %v12461_v41, %v17547_v62  ;;  %v9897_v51 = vpop.f32.mrb[97].mxu0 }
 0xaed   : > { %v9898_v44 = vadd.f32 %v9897_v51, %v17535_v29  ;;  %v12462_v33 = vpop.f32.mrb[98].mxu0  ;;  %v9998_v29 = vsel %vm9934_vm3, %v17581_v53, %v9966_v7 }
 0xaee   : > { %v9909_v11 = vadd.f32 %v12462_v33, %v17549_v16  ;;  %10045 = vxpose.xlu1.b32.cont [6/16] (narrow) %v9997_v37, 8  ;;  %v9900_v2 = vpop.f32.mrb[99].mxu0  ;;  %10021 = vxpose.xlu0.b32.cont [14/16] (narrow) %v9989_v47, 8  ;;  %v9968_v16 = vmul.f32 0.2, %v9882_v15  ;;  %vm9942_vm9 = vcmp.gt.f32.partialorder %v9906_v48, 0.0 }
 0xaef   : > { %v9901_v62 = vadd.f32 %v9900_v2, %v17537_v26  ;;  %v9969_v26 = vmul.f32 0.2, %v9885_v23  ;;  %v9972_v20 = vmul.f32 0.2, %v9898_v44  ;;  %vm9940_vm4 = vcmp.gt.f32.partialorder %v9898_v44, 0.0 }
 0xaf0   : > { %v10000_v46 = vsel %vm9936_vm13, %v9882_v15, %v9968_v16  ;;  %v9974_v52 = vmul.f32 0.2, %v9906_v48  ;;  %v9975_v21 = vmul.f32 0.2, %v9909_v11  ;;  %vm9943_vm10 = vcmp.gt.f32.partialorder %v9909_v11, 0.0 }
 0xaf1   : > { %v10001_v1 = vsel %vm9937_vm14, %v9885_v23, %v9969_v26  ;;  %v9973_v58 = vmul.f32 0.2, %v9901_v62  ;;  %v10004_v22 = vsel %vm9940_vm4, %v9898_v44, %v9972_v20  ;;  %vm9941_vm5 = vcmp.gt.f32.partialorder %v9901_v62, 0.0 }
 0xaf2   : > { %10046 = vxpose.xlu1.b32.cont [7/16] (narrow) %v9998_v29, 8  ;;  %10022 = vxpose.xlu0.b32.cont [15/16] (narrow) %v9990_v45, 8  ;;  %v10006_v34 = vsel %vm9942_vm9, %v9906_v48, %v9974_v52  ;;  %v10007_v5 = vsel %vm9943_vm10, %v9909_v11, %v9975_v21 }
 0xaf3   : > { %v10005_v63 = vsel %vm9941_vm5, %v9901_v62, %v9973_v58 }
 0xaf6   : > { %10047 = vxpose.xlu1.b32.cont [8/16] (narrow) %v9999_v59, 8  ;;  %10023 = vxpose.xlu0.b32.end [16/16] (narrow) %v9991_v36, 8 }
 0xafa   : > { %10048 = vxpose.xlu1.b32.cont [9/16] (narrow) %v10000_v46, 8 }
 0xafe   : > { %10049 = vxpose.xlu1.b32.cont [10/16] (narrow) %v10001_v1, 8 }
 0xb02   : > { %10050 = vxpose.xlu1.b32.cont [11/16] (narrow) %v10002_v18, 8 }
 0xb06   : > { %10051 = vxpose.xlu1.b32.cont [12/16] (narrow) %v10003_v42, 8 }
 0xb0a   : > { %10052 = vxpose.xlu1.b32.cont [13/16] (narrow) %v10004_v22, 8 }
 0xb0e   : > { %10053 = vxpose.xlu1.b32.cont [14/16] (narrow) %v10005_v63, 8 }
 0xb12   : > { %10054 = vxpose.xlu1.b32.cont [15/16] (narrow) %v10006_v34, 8 }
 0xb16   : > { %10055 = vxpose.xlu1.b32.end [16/16] (narrow) %v10007_v5, 8 }
 0xb3a   : > { %v10024_v53 = vpop.trf.xlu0 }
 0xb5a   : > { %v10056_v43 = vpop.trf.xlu1 }
 0xb5b   : > { %v10074_v13 = vcombine.low %v10024_v53, %v10056_v43 }
 0xb5d   : > { %10076 = vst [vmem:[%s467_s23] sm:$0x77] %v10074_v13 }
 0xb5e PF: > { %s24_s29 = sadd.s32 1, %s12985_s29  }
 0xb5f   : > { %p21_p4 = scmp.ge.s32.totalorder %s24_s29, 4  }
 0xb61   :  { %23 = sbr.rel (!%p21_p4) target bundleno = 1 (0x1), region = 114 }

</bundles_post_ra>
